<compile_context>
chip_gen: v7x
topology: tpu7x:2x2x1
jax: 0.10.0
libtpu: 0.0.40
codegen_flags: <defaults>
</compile_context>

<pallas_src>
import functools

import jax
import jax.numpy as jnp
from jax.experimental import pallas as pl
from jax.experimental.pallas import tpu as pltpu


# ---------------------------------------------------------------------------
# Fused conv stack kernel (conv1 + ReLU -> conv2 + ReLU -> maxpool -> conv3 + ReLU)
# ---------------------------------------------------------------------------
def _accum_taps_dot(src_ref, w_ref, h, w, cin, cout):
    """3x3 'same' conv as 9 shifted MXU matmuls.

    src_ref: (1, h+2, w+2, cin) zero-padded VMEM ref, w_ref: (9, cin, cout).
    Returns f32 (h*w, cout) with rows in (y, x) order."""
    acc = jnp.zeros((h * w, cout), jnp.float32)
    for k in range(9):
        dy, dx = k // 3, k % 3
        tap = src_ref[:, dy:dy + h, dx:dx + w, :].reshape(h * w, cin)
        acc = acc + jnp.dot(tap, w_ref[k], preferred_element_type=jnp.float32)
    return acc


def _accum_taps_bcast(src_ref, w_ref, h, w, cout):
    """Cin == 1 specialization: broadcast multiply-accumulate on the VPU."""
    acc = jnp.zeros((1, h, w, cout), jnp.float32)
    for k in range(9):
        dy, dx = k // 3, k % 3
        tap = src_ref[:, dy:dy + h, dx:dx + w, :]           # (1, h, w, 1)
        acc = acc + tap * w_ref[k].reshape(1, 1, 1, cout)
    return acc


def _fused_conv_kernel(x_ref, w1_ref, b1_ref, w2_ref, b2_ref, w3_ref, b3_ref,
                       o_ref,
                       x0p_ref, a1p_ref, hp_ref, a2pp_ref,
                       *, H, W, Cin):
    Hq, Wq = H // 2, W // 2

    # Stage this image into a zero-padded VMEM buffer (padding done in-kernel).
    x0p_ref[...] = jnp.zeros_like(x0p_ref)
    x0p_ref[:, 1:H + 1, 1:W + 1, :] = x_ref[...]

    # conv1 (Cin -> 32) + bias + ReLU.   (Dropout2d(0.4) is identity at inference.)
    if Cin == 1:
        a1 = _accum_taps_bcast(x0p_ref, w1_ref, H, W, 32)               # (1,H,W,32)
    else:
        a1 = _accum_taps_dot(x0p_ref, w1_ref, H, W, Cin, 32).reshape(1, H, W, 32)
    a1 = jnp.maximum(a1 + b1_ref[...].reshape(1, 1, 1, 32), 0.0)
    a1p_ref[...] = jnp.zeros_like(a1p_ref)
    a1p_ref[:, 1:H + 1, 1:W + 1, :] = a1

    # conv2 (32 -> 64) + bias + ReLU.
    a2 = _accum_taps_dot(a1p_ref, w2_ref, H, W, 32, 64)                 # (H*W, 64)
    a2 = jnp.maximum(a2 + b2_ref[...], 0.0)

    # Fused 2x2 / stride-2 max pool (Dropout2d(0.5) identity).
    # Row index of a2 is h*W + x; split h = 2i + j (major-dim split only).
    a2 = a2.reshape(1, Hq, 2, W, 64)
    hp_ref[...] = jnp.maximum(a2[:, :, 0, :, :], a2[:, :, 1, :, :])     # (1, Hq, W, 64)
    pooled = jnp.maximum(hp_ref[:, :, pl.ds(0, Wq, 2), :],
                         hp_ref[:, :, pl.ds(1, Wq, 2), :])              # (1, Hq, Wq, 64)
    a2pp_ref[...] = jnp.zeros_like(a2pp_ref)
    a2pp_ref[:, 1:Hq + 1, 1:Wq + 1, :] = pooled

    # conv3 (64 -> 128) + bias + ReLU (Dropout2d(0.6) identity).
    a3 = _accum_taps_dot(a2pp_ref, w3_ref, Hq, Wq, 64, 128)             # (Hq*Wq, 128)
    a3 = jnp.maximum(a3 + b3_ref[...], 0.0)
    o_ref[...] = a3.astype(o_ref.dtype)       # bf16, rows = (h, w), lanes = channels


def fused_convs(x_nhwc, kp):
    """x: (N, H, W, Cin) f32 -> (N*(H//2)*(W//2), 128) bf16 in NHWC flatten order."""
    N, H, W, Cin = x_nhwc.shape
    assert H % 2 == 0 and W % 2 == 0
    Hq, Wq = H // 2, W // 2
    kernel = functools.partial(_fused_conv_kernel, H=H, W=W, Cin=Cin)
    return pl.pallas_call(
        kernel,
        out_shape=jax.ShapeDtypeStruct((N * Hq * Wq, 128), jnp.bfloat16),
        grid=(N,),
        in_specs=[
            pl.BlockSpec((1, H, W, Cin), lambda n: (n, 0, 0, 0)),
            pl.BlockSpec((9, Cin, 32), lambda n: (0, 0, 0)),
            pl.BlockSpec((1, 32), lambda n: (0, 0)),
            pl.BlockSpec((9, 32, 64), lambda n: (0, 0, 0)),
            pl.BlockSpec((1, 64), lambda n: (0, 0)),
            pl.BlockSpec((9, 64, 128), lambda n: (0, 0, 0)),
            pl.BlockSpec((1, 128), lambda n: (0, 0)),
        ],
        out_specs=pl.BlockSpec((Hq * Wq, 128), lambda n: (n, 0)),
        scratch_shapes=[
            pltpu.VMEM((1, H + 2, W + 2, Cin), jnp.float32),   # padded input
            pltpu.VMEM((1, H + 2, W + 2, 32), jnp.float32),    # padded conv1 out
            pltpu.VMEM((1, Hq, W, 64), jnp.float32),           # H-pooled conv2 out
            pltpu.VMEM((1, Hq + 2, Wq + 2, 64), jnp.float32),  # padded pooled conv2
        ],
        compiler_params=pltpu.CompilerParams(
            dimension_semantics=("parallel",)),
    )(x_nhwc, kp["w1"], kp["b1"], kp["w2"], kp["b2"], kp["w3"], kp["b3"])


# ---------------------------------------------------------------------------
# FC1: tiled, pipelined matmul + bias + ReLU (bf16 in, f32 accumulate)
# ---------------------------------------------------------------------------
def _fc1_kernel(a_ref, w_ref, b_ref, o_ref, acc_ref):
    @pl.when(pl.program_id(1) == 0)
    def _():
        acc_ref[...] = jnp.zeros_like(acc_ref)

    acc_ref[...] += jnp.dot(a_ref[...], w_ref[...],
                            preferred_element_type=jnp.float32)

    @pl.when(pl.program_id(1) == pl.num_programs(1) - 1)
    def _():
        o_ref[...] = jnp.maximum(acc_ref[...] + b_ref[...], 0.0).astype(o_ref.dtype)


def _largest_tile(dim, candidates):
    for c in candidates:
        if dim % c == 0:
            return c
    return dim


def fc1_relu(a, w, b):
    """a: (M, K) bf16, w: (K, N) bf16, b: (1, N) f32 -> relu(a @ w + b) f32."""
    M, K = a.shape
    K2, N = w.shape
    assert K == K2
    tk = _largest_tile(K, (2048, 1024, 512, 256, 128))
    tn = _largest_tile(N, (256, 128))
    grid = (N // tn, K // tk)
    return pl.pallas_call(
        _fc1_kernel,
        out_shape=jax.ShapeDtypeStruct((M, N), jnp.float32),
        grid=grid,
        in_specs=[
            pl.BlockSpec((M, tk), lambda j, k: (0, k)),
            pl.BlockSpec((tk, tn), lambda j, k: (k, j)),
            pl.BlockSpec((1, tn), lambda j, k: (0, j)),
        ],
        out_specs=pl.BlockSpec((M, tn), lambda j, k: (0, j)),
        scratch_shapes=[pltpu.VMEM((M, tn), jnp.float32)],
        compiler_params=pltpu.CompilerParams(
            dimension_semantics=("parallel", "arbitrary")),
    )(a, w, b)


# ---------------------------------------------------------------------------
# FC2: small single-block matmul + bias with a lane-dense (128-padded) output
# ---------------------------------------------------------------------------
def _fc2_kernel(a_ref, w_ref, b_ref, o_ref):
    o_ref[...] = (jnp.dot(a_ref[...], w_ref[...], preferred_element_type=jnp.float32)
                  + b_ref[...]).astype(o_ref.dtype)


def fc2(a, w, b):
    M, K = a.shape
    K2, N = w.shape
    assert K == K2
    return pl.pallas_call(
        _fc2_kernel,
        out_shape=jax.ShapeDtypeStruct((M, N), jnp.float32),
        grid=(1,),
        in_specs=[
            pl.BlockSpec((M, K), lambda i: (0, 0)),
            pl.BlockSpec((K, N), lambda i: (0, 0)),
            pl.BlockSpec((1, N), lambda i: (0, 0)),
        ],
        out_specs=pl.BlockSpec((M, N), lambda i: (0, 0)),
        compiler_params=pltpu.CompilerParams(
            dimension_semantics=("arbitrary",)),
    )(a, w, b)


# ---------------------------------------------------------------------------
# Parameters: PyTorch-equivalent init + one-time repack into kernel layout
# ---------------------------------------------------------------------------
def init_params(key, input_shape=(1, 16, 16), num_classes=10):
    cin, H, W = input_shape
    fc_in = 128 * (H // 2) * (W // 2)
    ks = jax.random.split(key, 10)
    s = 0.05
    return {
        "w1": s * jax.random.normal(ks[0], (3, 3, cin, 32), jnp.float32),   # HWIO
        "b1": s * jax.random.normal(ks[1], (32,), jnp.float32),
        "w2": s * jax.random.normal(ks[2], (3, 3, 32, 64), jnp.float32),
        "b2": s * jax.random.normal(ks[3], (64,), jnp.float32),
        "w3": s * jax.random.normal(ks[4], (3, 3, 64, 128), jnp.float32),
        "b3": s * jax.random.normal(ks[5], (128,), jnp.float32),
        # w4 rows are in PyTorch flatten order (c, h, w); permuted in prepare_params.
        "w4": s * jax.random.normal(ks[6], (fc_in, 512), jnp.float32),
        "b4": s * jax.random.normal(ks[7], (512,), jnp.float32),
        "w5": s * jax.random.normal(ks[8], (512, num_classes), jnp.float32),
        "b5": s * jax.random.normal(ks[9], (num_classes,), jnp.float32),
    }


def prepare_params(params, input_shape=(1, 16, 16), num_classes=10):
    """One-time repack (off the critical path):
       - conv weights (3,3,Cin,Cout) -> (9,Cin,Cout); biases -> (1,C)
       - w4 rows permuted from PyTorch (c,h,w) flatten order to NHWC (h,w,c)
         flatten order and cast to bf16 (halves HBM traffic of the dominant op)
       - w5/b5 zero-padded to a 128-lane-multiple output width."""
    cin, H, W = input_shape
    Hq, Wq = H // 2, W // 2
    C3 = 128
    w4 = params["w4"]
    assert w4.shape[0] == C3 * Hq * Wq
    w4_hwc = (w4.reshape(C3, Hq, Wq, -1)
                .transpose(1, 2, 0, 3)
                .reshape(C3 * Hq * Wq, -1)).astype(jnp.bfloat16)
    nc = num_classes
    ncp = ((nc + 127) // 128) * 128
    w5p = jnp.zeros((512, ncp), jnp.float32).at[:, :nc].set(params["w5"])
    b5p = jnp.zeros((1, ncp), jnp.float32).at[:, :nc].set(params["b5"])
    return {
        "w1": params["w1"].reshape(9, cin, 32),
        "b1": params["b1"].reshape(1, 32),
        "w2": params["w2"].reshape(9, 32, 64),
        "b2": params["b2"].reshape(1, 64),
        "w3": params["w3"].reshape(9, 64, 128),
        "b3": params["b3"].reshape(1, 128),
        "w4": w4_hwc,
        "b4": params["b4"].reshape(1, 512),
        "w5p": w5p,
        "b5p": b5p,
    }


# ---------------------------------------------------------------------------
# Forward
# ---------------------------------------------------------------------------
def cnn_classify_forward(kparams, x_nchw, num_classes):
    """x: (N, Cin, H, W) f32 -> logits (N, num_classes) f32."""
    N = x_nchw.shape[0]
    x_nhwc = jnp.transpose(x_nchw, (0, 2, 3, 1)).astype(jnp.float32)   # layout only
    conv_out = fused_convs(x_nhwc, kparams)            # (N*Hq*Wq, 128) bf16
    a = conv_out.reshape(N, -1)                        # contiguous (h,w,c) flatten == w4 row order
    h = fc1_relu(a, kparams["w4"], kparams["b4"])      # (N, 512) f32
    logits_p = fc2(h, kparams["w5p"], kparams["b5p"])  # (N, 128) f32, lane-dense
    return logits_p[:, :num_classes]


if __name__ == "__main__":
    key = jax.random.PRNGKey(0)
    k_par, k_inp = jax.random.split(key)

    input_shape = (1, 16, 16)     # (Cin, H, W), small demo size
    num_classes = 10
    batch = 2

    params = init_params(k_par, input_shape=input_shape, num_classes=num_classes)
    kparams = prepare_params(params, input_shape=input_shape, num_classes=num_classes)
    x = jax.random.normal(k_inp, (batch,) + input_shape, jnp.float32)

    fwd = jax.jit(functools.partial(cnn_classify_forward, num_classes=num_classes))
    logits = fwd(kparams, x)
    jax.block_until_ready(logits)

    assert logits.shape == (batch, num_classes), logits.shape
    assert bool(jnp.all(jnp.isfinite(logits)))
    print("KERNEL_OK")
</pallas_src>

<mosaic_0001>
module attributes {stable_mosaic.version = 11 : i64} {
  func.func @_fc1_kernel(%arg0: i32, %arg1: i32, %arg2: memref<2x2048xbf16, #tpu.memory_space<vmem>>, %arg3: memref<2048x256xbf16, #tpu.memory_space<vmem>>, %arg4: memref<1x256xf32, #tpu.memory_space<vmem>>, %arg5: memref<2x256xf32, #tpu.memory_space<vmem>>, %arg6: memref<2x256xf32, #tpu.memory_space<vmem>>) attributes {dimension_semantics = [#tpu.dimension_semantics<parallel>, #tpu.dimension_semantics<arbitrary>], iteration_bounds = array<i64: 2, 4>, scalar_prefetch = 0 : i64, scratch_operands = 1 : i64, tpu.core_type = #tpu.core_type<tc>, window_params = [{transform_indices = @transform_0, window_bounds = array<i64: 2, 2048>}, {transform_indices = @transform_1, window_bounds = array<i64: 2048, 256>}, {transform_indices = @transform_2, window_bounds = array<i64: 1, 256>}, {transform_indices = @transform_3, window_bounds = array<i64: 2, 256>}]} {
    %c0_i32 = arith.constant 0 : i32
    %0 = arith.cmpi eq, %arg1, %c0_i32 : i32
    %1 = arith.extui %0 : i1 to i32
    %c0_i32_0 = arith.constant 0 : i32
    %2 = arith.cmpi ne, %1, %c0_i32_0 : i32
    scf.if %2 {
      %cst_9 = arith.constant 0.000000e+00 : f32
      %12 = vector.broadcast %cst_9 : f32 to vector<2x256xf32>
      %c0_10 = arith.constant 0 : index
      %c0_11 = arith.constant 0 : index
      %13 = vector.load %arg6[%c0_10, %c0_11] : memref<2x256xf32, #tpu.memory_space<vmem>>, vector<2x256xf32>
      tpu.vector_store %arg6[%c0_10, %c0_11], %12 {strides = array<i32>} : memref<2x256xf32, #tpu.memory_space<vmem>>, vector<2x256xf32>,
    } else {
    }
    %c0 = arith.constant 0 : index
    %c0_1 = arith.constant 0 : index
    %3 = vector.load %arg6[%c0, %c0_1] : memref<2x256xf32, #tpu.memory_space<vmem>>, vector<2x256xf32>
    %c0_2 = arith.constant 0 : index
    %c0_3 = arith.constant 0 : index
    %4 = vector.load %arg2[%c0_2, %c0_3] : memref<2x2048xbf16, #tpu.memory_space<vmem>>, vector<2x2048xbf16>
    %c0_4 = arith.constant 0 : index
    %c0_5 = arith.constant 0 : index
    %5 = vector.load %arg3[%c0_4, %c0_5] : memref<2048x256xbf16, #tpu.memory_space<vmem>>, vector<2048x256xbf16>
    %cst = arith.constant dense<0.000000e+00> : vector<2x256xf32>
    %6 = tpu.matmul %4, %5, %cst {dimension_numbers = #tpu.dot_dimension_numbers<[1], [0], [0], [1], [0, 0, 1, 1], [], []>} : vector<2x2048xbf16>, vector<2048x256xbf16>, vector<2x256xf32> -> vector<2x256xf32>
    %7 = arith.addf %3, %6 : vector<2x256xf32>
    %c0_6 = arith.constant 0 : index
    %c0_7 = arith.constant 0 : index
    %8 = vector.load %arg6[%c0_6, %c0_7] : memref<2x256xf32, #tpu.memory_space<vmem>>, vector<2x256xf32>
    tpu.vector_store %arg6[%c0_6, %c0_7], %7 {strides = array<i32>} : memref<2x256xf32, #tpu.memory_space<vmem>>, vector<2x256xf32>,
    %c3_i32 = arith.constant 3 : i32
    %9 = arith.cmpi eq, %arg1, %c3_i32 : i32
    %10 = arith.extui %9 : i1 to i32
    %c0_i32_8 = arith.constant 0 : i32
    %11 = arith.cmpi ne, %10, %c0_i32_8 : i32
    scf.if %11 {
      %c0_9 = arith.constant 0 : index
      %c0_10 = arith.constant 0 : index
      %12 = vector.load %arg6[%c0_9, %c0_10] : memref<2x256xf32, #tpu.memory_space<vmem>>, vector<2x256xf32>
      %c0_11 = arith.constant 0 : index
      %c0_12 = arith.constant 0 : index
      %13 = vector.load %arg4[%c0_11, %c0_12] : memref<1x256xf32, #tpu.memory_space<vmem>>, vector<1x256xf32>
      %14 = vector.broadcast %13 : vector<1x256xf32> to vector<2x256xf32>
      %15 = arith.addf %12, %14 : vector<2x256xf32>
      %cst_13 = arith.constant 0.000000e+00 : f32
      %16 = vector.broadcast %cst_13 : f32 to vector<2x256xf32>
      %17 = arith.maximumf %15, %16 : vector<2x256xf32>
      %c0_14 = arith.constant 0 : index
      %c0_15 = arith.constant 0 : index
      %18 = vector.load %arg5[%c0_14, %c0_15] : memref<2x256xf32, #tpu.memory_space<vmem>>, vector<2x256xf32>
      tpu.vector_store %arg5[%c0_14, %c0_15], %17 {strides = array<i32>} : memref<2x256xf32, #tpu.memory_space<vmem>>, vector<2x256xf32>,
    } else {
    }
    return
  }
  func.func @transform_0(%arg0: i32, %arg1: i32) -> (i32, i32) {
    %c0_i32 = arith.constant 0 : i32
    %c0_i32_0 = arith.constant 0 : i32
    return %c0_i32, %arg1 : i32, i32
  }
  func.func @transform_1(%arg0: i32, %arg1: i32) -> (i32, i32) {
    %c0_i32 = arith.constant 0 : i32
    return %arg1, %arg0 : i32, i32
  }
  func.func @transform_2(%arg0: i32, %arg1: i32) -> (i32, i32) {
    %c0_i32 = arith.constant 0 : i32
    %c0_i32_0 = arith.constant 0 : i32
    return %c0_i32, %arg0 : i32, i32
  }
  func.func @transform_3(%arg0: i32, %arg1: i32) -> (i32, i32) {
    %c0_i32 = arith.constant 0 : i32
    %c0_i32_0 = arith.constant 0 : i32
    return %c0_i32, %arg0 : i32, i32
  }
}

module attributes {stable_mosaic.version = 11 : i64} {
  func.func @_fused_conv_kernel(%arg0: i32, %arg1: memref<1x16x16x1xf32, #tpu.memory_space<vmem>>, %arg2: memref<9x1x32xf32, #tpu.memory_space<vmem>>, %arg3: memref<1x32xf32, #tpu.memory_space<vmem>>, %arg4: memref<9x32x64xf32, #tpu.memory_space<vmem>>, %arg5: memref<1x64xf32, #tpu.memory_space<vmem>>, %arg6: memref<9x64x128xf32, #tpu.memory_space<vmem>>, %arg7: memref<1x128xf32, #tpu.memory_space<vmem>>, %arg8: memref<64x128xbf16, #tpu.memory_space<vmem>>, %arg9: memref<1x18x18x1xf32, #tpu.memory_space<vmem>>, %arg10: memref<1x18x18x32xf32, #tpu.memory_space<vmem>>, %arg11: memref<1x8x16x64xf32, #tpu.memory_space<vmem>>, %arg12: memref<1x10x10x64xf32, #tpu.memory_space<vmem>>) attributes {dimension_semantics = [#tpu.dimension_semantics<parallel>], iteration_bounds = array<i64: 2>, scalar_prefetch = 0 : i64, scratch_operands = 4 : i64, tpu.core_type = #tpu.core_type<tc>, window_params = [{transform_indices = @transform_0, window_bounds = array<i64: 1, 16, 16, 1>}, {pipeline_mode = #tpu.pipeline_mode<synchronous>, transform_indices = @transform_1, window_bounds = array<i64: 9, 1, 32>}, {pipeline_mode = #tpu.pipeline_mode<synchronous>, transform_indices = @transform_2, window_bounds = array<i64: 1, 32>}, {pipeline_mode = #tpu.pipeline_mode<synchronous>, transform_indices = @transform_3, window_bounds = array<i64: 9, 32, 64>}, {pipeline_mode = #tpu.pipeline_mode<synchronous>, transform_indices = @transform_4, window_bounds = array<i64: 1, 64>}, {pipeline_mode = #tpu.pipeline_mode<synchronous>, transform_indices = @transform_5, window_bounds = array<i64: 9, 64, 128>}, {pipeline_mode = #tpu.pipeline_mode<synchronous>, transform_indices = @transform_6, window_bounds = array<i64: 1, 128>}, {transform_indices = @transform_7, window_bounds = array<i64: 64, 128>}]} {
    %cst = arith.constant 0.000000e+00 : f32
    %0 = vector.broadcast %cst : f32 to vector<1x18x18x1xf32>
    %c0 = arith.constant 0 : index
    %c0_0 = arith.constant 0 : index
    %c0_1 = arith.constant 0 : index
    %c0_2 = arith.constant 0 : index
    %1 = vector.load %arg9[%c0, %c0_0, %c0_1, %c0_2] : memref<1x18x18x1xf32, #tpu.memory_space<vmem>>, vector<1x18x18x1xf32>
    tpu.vector_store %arg9[%c0, %c0_0, %c0_1, %c0_2], %0 {strides = array<i32>} : memref<1x18x18x1xf32, #tpu.memory_space<vmem>>, vector<1x18x18x1xf32>,
    %c0_3 = arith.constant 0 : index
    %c0_4 = arith.constant 0 : index
    %c0_5 = arith.constant 0 : index
    %c0_6 = arith.constant 0 : index
    %2 = vector.load %arg1[%c0_3, %c0_4, %c0_5, %c0_6] : memref<1x16x16x1xf32, #tpu.memory_space<vmem>>, vector<1x16x16x1xf32>
    %c0_7 = arith.constant 0 : index
    %c1 = arith.constant 1 : index
    %c1_8 = arith.constant 1 : index
    %c0_9 = arith.constant 0 : index
    %3 = vector.load %arg9[%c0_7, %c1, %c1_8, %c0_9] : memref<1x18x18x1xf32, #tpu.memory_space<vmem>>, vector<1x16x16x1xf32>
    tpu.vector_store %arg9[%c0_7, %c1, %c1_8, %c0_9], %2 {strides = array<i32>} : memref<1x18x18x1xf32, #tpu.memory_space<vmem>>, vector<1x16x16x1xf32>,
    %cst_10 = arith.constant 0.000000e+00 : f32
    %4 = vector.broadcast %cst_10 : f32 to vector<1x16x16x32xf32>
    %c0_11 = arith.constant 0 : index
    %c0_12 = arith.constant 0 : index
    %c0_13 = arith.constant 0 : index
    %c0_14 = arith.constant 0 : index
    %5 = vector.load %arg9[%c0_11, %c0_12, %c0_13, %c0_14] : memref<1x18x18x1xf32, #tpu.memory_space<vmem>>, vector<1x16x16x1xf32>
    %c0_15 = arith.constant 0 : index
    %c0_16 = arith.constant 0 : index
    %c0_17 = arith.constant 0 : index
    %6 = vector.load %arg2[%c0_15, %c0_16, %c0_17] : memref<9x1x32xf32, #tpu.memory_space<vmem>>, vector<1x1x32xf32>
    %7 = vector.shape_cast %6 : vector<1x1x32xf32> to vector<1x32xf32>
    %8 = vector.shape_cast %7 : vector<1x32xf32> to vector<1x1x1x32xf32>
    %9 = vector.broadcast %5 : vector<1x16x16x1xf32> to vector<1x16x16x32xf32>
    %10 = vector.broadcast %8 : vector<1x1x1x32xf32> to vector<1x16x16x32xf32>
    %11 = arith.mulf %9, %10 : vector<1x16x16x32xf32>
    %12 = arith.addf %4, %11 : vector<1x16x16x32xf32>
    %c0_18 = arith.constant 0 : index
    %c0_19 = arith.constant 0 : index
    %c1_20 = arith.constant 1 : index
    %c0_21 = arith.constant 0 : index
    %13 = vector.load %arg9[%c0_18, %c0_19, %c1_20, %c0_21] : memref<1x18x18x1xf32, #tpu.memory_space<vmem>>, vector<1x16x16x1xf32>
    %c1_22 = arith.constant 1 : index
    %c0_23 = arith.constant 0 : index
    %c0_24 = arith.constant 0 : index
    %14 = vector.load %arg2[%c1_22, %c0_23, %c0_24] : memref<9x1x32xf32, #tpu.memory_space<vmem>>, vector<1x1x32xf32>
    %15 = vector.shape_cast %14 : vector<1x1x32xf32> to vector<1x32xf32>
    %16 = vector.shape_cast %15 : vector<1x32xf32> to vector<1x1x1x32xf32>
    %17 = vector.broadcast %13 : vector<1x16x16x1xf32> to vector<1x16x16x32xf32>
    %18 = vector.broadcast %16 : vector<1x1x1x32xf32> to vector<1x16x16x32xf32>
    %19 = arith.mulf %17, %18 : vector<1x16x16x32xf32>
    %20 = arith.addf %12, %19 : vector<1x16x16x32xf32>
    %c0_25 = arith.constant 0 : index
    %c0_26 = arith.constant 0 : index
    %c2 = arith.constant 2 : index
    %c0_27 = arith.constant 0 : index
    %21 = vector.load %arg9[%c0_25, %c0_26, %c2, %c0_27] : memref<1x18x18x1xf32, #tpu.memory_space<vmem>>, vector<1x16x16x1xf32>
    %c2_28 = arith.constant 2 : index
    %c0_29 = arith.constant 0 : index
    %c0_30 = arith.constant 0 : index
    %22 = vector.load %arg2[%c2_28, %c0_29, %c0_30] : memref<9x1x32xf32, #tpu.memory_space<vmem>>, vector<1x1x32xf32>
    %23 = vector.shape_cast %22 : vector<1x1x32xf32> to vector<1x32xf32>
    %24 = vector.shape_cast %23 : vector<1x32xf32> to vector<1x1x1x32xf32>
    %25 = vector.broadcast %21 : vector<1x16x16x1xf32> to vector<1x16x16x32xf32>
    %26 = vector.broadcast %24 : vector<1x1x1x32xf32> to vector<1x16x16x32xf32>
    %27 = arith.mulf %25, %26 : vector<1x16x16x32xf32>
    %28 = arith.addf %20, %27 : vector<1x16x16x32xf32>
    %c0_31 = arith.constant 0 : index
    %c1_32 = arith.constant 1 : index
    %c0_33 = arith.constant 0 : index
    %c0_34 = arith.constant 0 : index
    %29 = vector.load %arg9[%c0_31, %c1_32, %c0_33, %c0_34] : memref<1x18x18x1xf32, #tpu.memory_space<vmem>>, vector<1x16x16x1xf32>
    %c3 = arith.constant 3 : index
    %c0_35 = arith.constant 0 : index
    %c0_36 = arith.constant 0 : index
    %30 = vector.load %arg2[%c3, %c0_35, %c0_36] : memref<9x1x32xf32, #tpu.memory_space<vmem>>, vector<1x1x32xf32>
    %31 = vector.shape_cast %30 : vector<1x1x32xf32> to vector<1x32xf32>
    %32 = vector.shape_cast %31 : vector<1x32xf32> to vector<1x1x1x32xf32>
    %33 = vector.broadcast %29 : vector<1x16x16x1xf32> to vector<1x16x16x32xf32>
    %34 = vector.broadcast %32 : vector<1x1x1x32xf32> to vector<1x16x16x32xf32>
    %35 = arith.mulf %33, %34 : vector<1x16x16x32xf32>
    %36 = arith.addf %28, %35 : vector<1x16x16x32xf32>
    %c0_37 = arith.constant 0 : index
    %c1_38 = arith.constant 1 : index
    %c1_39 = arith.constant 1 : index
    %c0_40 = arith.constant 0 : index
    %37 = vector.load %arg9[%c0_37, %c1_38, %c1_39, %c0_40] : memref<1x18x18x1xf32, #tpu.memory_space<vmem>>, vector<1x16x16x1xf32>
    %c4 = arith.constant 4 : index
    %c0_41 = arith.constant 0 : index
    %c0_42 = arith.constant 0 : index
    %38 = vector.load %arg2[%c4, %c0_41, %c0_42] : memref<9x1x32xf32, #tpu.memory_space<vmem>>, vector<1x1x32xf32>
    %39 = vector.shape_cast %38 : vector<1x1x32xf32> to vector<1x32xf32>
    %40 = vector.shape_cast %39 : vector<1x32xf32> to vector<1x1x1x32xf32>
    %41 = vector.broadcast %37 : vector<1x16x16x1xf32> to vector<1x16x16x32xf32>
    %42 = vector.broadcast %40 : vector<1x1x1x32xf32> to vector<1x16x16x32xf32>
    %43 = arith.mulf %41, %42 : vector<1x16x16x32xf32>
    %44 = arith.addf %36, %43 : vector<1x16x16x32xf32>
    %c0_43 = arith.constant 0 : index
    %c1_44 = arith.constant 1 : index
    %c2_45 = arith.constant 2 : index
    %c0_46 = arith.constant 0 : index
    %45 = vector.load %arg9[%c0_43, %c1_44, %c2_45, %c0_46] : memref<1x18x18x1xf32, #tpu.memory_space<vmem>>, vector<1x16x16x1xf32>
    %c5 = arith.constant 5 : index
    %c0_47 = arith.constant 0 : index
    %c0_48 = arith.constant 0 : index
    %46 = vector.load %arg2[%c5, %c0_47, %c0_48] : memref<9x1x32xf32, #tpu.memory_space<vmem>>, vector<1x1x32xf32>
    %47 = vector.shape_cast %46 : vector<1x1x32xf32> to vector<1x32xf32>
    %48 = vector.shape_cast %47 : vector<1x32xf32> to vector<1x1x1x32xf32>
    %49 = vector.broadcast %45 : vector<1x16x16x1xf32> to vector<1x16x16x32xf32>
    %50 = vector.broadcast %48 : vector<1x1x1x32xf32> to vector<1x16x16x32xf32>
    %51 = arith.mulf %49, %50 : vector<1x16x16x32xf32>
    %52 = arith.addf %44, %51 : vector<1x16x16x32xf32>
    %c0_49 = arith.constant 0 : index
    %c2_50 = arith.constant 2 : index
    %c0_51 = arith.constant 0 : index
    %c0_52 = arith.constant 0 : index
    %53 = vector.load %arg9[%c0_49, %c2_50, %c0_51, %c0_52] : memref<1x18x18x1xf32, #tpu.memory_space<vmem>>, vector<1x16x16x1xf32>
    %c6 = arith.constant 6 : index
    %c0_53 = arith.constant 0 : index
    %c0_54 = arith.constant 0 : index
    %54 = vector.load %arg2[%c6, %c0_53, %c0_54] : memref<9x1x32xf32, #tpu.memory_space<vmem>>, vector<1x1x32xf32>
    %55 = vector.shape_cast %54 : vector<1x1x32xf32> to vector<1x32xf32>
    %56 = vector.shape_cast %55 : vector<1x32xf32> to vector<1x1x1x32xf32>
    %57 = vector.broadcast %53 : vector<1x16x16x1xf32> to vector<1x16x16x32xf32>
    %58 = vector.broadcast %56 : vector<1x1x1x32xf32> to vector<1x16x16x32xf32>
    %59 = arith.mulf %57, %58 : vector<1x16x16x32xf32>
    %60 = arith.addf %52, %59 : vector<1x16x16x32xf32>
    %c0_55 = arith.constant 0 : index
    %c2_56 = arith.constant 2 : index
    %c1_57 = arith.constant 1 : index
    %c0_58 = arith.constant 0 : index
    %61 = vector.load %arg9[%c0_55, %c2_56, %c1_57, %c0_58] : memref<1x18x18x1xf32, #tpu.memory_space<vmem>>, vector<1x16x16x1xf32>
    %c7 = arith.constant 7 : index
    %c0_59 = arith.constant 0 : index
    %c0_60 = arith.constant 0 : index
    %62 = vector.load %arg2[%c7, %c0_59, %c0_60] : memref<9x1x32xf32, #tpu.memory_space<vmem>>, vector<1x1x32xf32>
    %63 = vector.shape_cast %62 : vector<1x1x32xf32> to vector<1x32xf32>
    %64 = vector.shape_cast %63 : vector<1x32xf32> to vector<1x1x1x32xf32>
    %65 = vector.broadcast %61 : vector<1x16x16x1xf32> to vector<1x16x16x32xf32>
    %66 = vector.broadcast %64 : vector<1x1x1x32xf32> to vector<1x16x16x32xf32>
    %67 = arith.mulf %65, %66 : vector<1x16x16x32xf32>
    %68 = arith.addf %60, %67 : vector<1x16x16x32xf32>
    %c0_61 = arith.constant 0 : index
    %c2_62 = arith.constant 2 : index
    %c2_63 = arith.constant 2 : index
    %c0_64 = arith.constant 0 : index
    %69 = vector.load %arg9[%c0_61, %c2_62, %c2_63, %c0_64] : memref<1x18x18x1xf32, #tpu.memory_space<vmem>>, vector<1x16x16x1xf32>
    %c8 = arith.constant 8 : index
    %c0_65 = arith.constant 0 : index
    %c0_66 = arith.constant 0 : index
    %70 = vector.load %arg2[%c8, %c0_65, %c0_66] : memref<9x1x32xf32, #tpu.memory_space<vmem>>, vector<1x1x32xf32>
    %71 = vector.shape_cast %70 : vector<1x1x32xf32> to vector<1x32xf32>
    %72 = vector.shape_cast %71 : vector<1x32xf32> to vector<1x1x1x32xf32>
    %73 = vector.broadcast %69 : vector<1x16x16x1xf32> to vector<1x16x16x32xf32>
    %74 = vector.broadcast %72 : vector<1x1x1x32xf32> to vector<1x16x16x32xf32>
    %75 = arith.mulf %73, %74 : vector<1x16x16x32xf32>
    %76 = arith.addf %68, %75 : vector<1x16x16x32xf32>
    %c0_67 = arith.constant 0 : index
    %c0_68 = arith.constant 0 : index
    %77 = vector.load %arg3[%c0_67, %c0_68] : memref<1x32xf32, #tpu.memory_space<vmem>>, vector<1x32xf32>
    %78 = vector.shape_cast %77 : vector<1x32xf32> to vector<1x1x1x32xf32>
    %79 = vector.broadcast %78 : vector<1x1x1x32xf32> to vector<1x16x16x32xf32>
    %80 = arith.addf %76, %79 : vector<1x16x16x32xf32>
    %cst_69 = arith.constant 0.000000e+00 : f32
    %81 = vector.broadcast %cst_69 : f32 to vector<1x16x16x32xf32>
    %82 = arith.maximumf %80, %81 : vector<1x16x16x32xf32>
    %cst_70 = arith.constant 0.000000e+00 : f32
    %83 = vector.broadcast %cst_70 : f32 to vector<1x18x18x32xf32>
    %c0_71 = arith.constant 0 : index
    %c0_72 = arith.constant 0 : index
    %c0_73 = arith.constant 0 : index
    %c0_74 = arith.constant 0 : index
    %84 = vector.load %arg10[%c0_71, %c0_72, %c0_73, %c0_74] : memref<1x18x18x32xf32, #tpu.memory_space<vmem>>, vector<1x18x18x32xf32>
    tpu.vector_store %arg10[%c0_71, %c0_72, %c0_73, %c0_74], %83 {strides = array<i32>} : memref<1x18x18x32xf32, #tpu.memory_space<vmem>>, vector<1x18x18x32xf32>,
    %c0_75 = arith.constant 0 : index
    %c1_76 = arith.constant 1 : index
    %c1_77 = arith.constant 1 : index
    %c0_78 = arith.constant 0 : index
    %85 = vector.load %arg10[%c0_75, %c1_76, %c1_77, %c0_78] : memref<1x18x18x32xf32, #tpu.memory_space<vmem>>, vector<1x16x16x32xf32>
    tpu.vector_store %arg10[%c0_75, %c1_76, %c1_77, %c0_78], %82 {strides = array<i32>} : memref<1x18x18x32xf32, #tpu.memory_space<vmem>>, vector<1x16x16x32xf32>,
    %cst_79 = arith.constant 0.000000e+00 : f32
    %86 = vector.broadcast %cst_79 : f32 to vector<256x64xf32>
    %c0_80 = arith.constant 0 : index
    %c0_81 = arith.constant 0 : index
    %c0_82 = arith.constant 0 : index
    %c0_83 = arith.constant 0 : index
    %87 = vector.load %arg10[%c0_80, %c0_81, %c0_82, %c0_83] : memref<1x18x18x32xf32, #tpu.memory_space<vmem>>, vector<1x16x16x32xf32>
    %88 = vector.shape_cast %87 : vector<1x16x16x32xf32> to vector<256x32xf32>
    %c0_84 = arith.constant 0 : index
    %c0_85 = arith.constant 0 : index
    %c0_86 = arith.constant 0 : index
    %89 = vector.load %arg4[%c0_84, %c0_85, %c0_86] : memref<9x32x64xf32, #tpu.memory_space<vmem>>, vector<1x32x64xf32>
    %90 = vector.shape_cast %89 : vector<1x32x64xf32> to vector<32x64xf32>
    %cst_87 = arith.constant dense<0.000000e+00> : vector<256x64xf32>
    %91 = tpu.matmul %88, %90, %cst_87 {dimension_numbers = #tpu.dot_dimension_numbers<[1], [0], [0], [1], [0, 0, 1, 1], [], []>} : vector<256x32xf32>, vector<32x64xf32>, vector<256x64xf32> -> vector<256x64xf32>
    %92 = arith.addf %86, %91 : vector<256x64xf32>
    %c0_88 = arith.constant 0 : index
    %c0_89 = arith.constant 0 : index
    %c1_90 = arith.constant 1 : index
    %c0_91 = arith.constant 0 : index
    %93 = vector.load %arg10[%c0_88, %c0_89, %c1_90, %c0_91] : memref<1x18x18x32xf32, #tpu.memory_space<vmem>>, vector<1x16x16x32xf32>
    %94 = vector.shape_cast %93 : vector<1x16x16x32xf32> to vector<256x32xf32>
    %c1_92 = arith.constant 1 : index
    %c0_93 = arith.constant 0 : index
    %c0_94 = arith.constant 0 : index
    %95 = vector.load %arg4[%c1_92, %c0_93, %c0_94] : memref<9x32x64xf32, #tpu.memory_space<vmem>>, vector<1x32x64xf32>
    %96 = vector.shape_cast %95 : vector<1x32x64xf32> to vector<32x64xf32>
    %cst_95 = arith.constant dense<0.000000e+00> : vector<256x64xf32>
    %97 = tpu.matmul %94, %96, %cst_95 {dimension_numbers = #tpu.dot_dimension_numbers<[1], [0], [0], [1], [0, 0, 1, 1], [], []>} : vector<256x32xf32>, vector<32x64xf32>, vector<256x64xf32> -> vector<256x64xf32>
    %98 = arith.addf %92, %97 : vector<256x64xf32>
    %c0_96 = arith.constant 0 : index
    %c0_97 = arith.constant 0 : index
    %c2_98 = arith.constant 2 : index
    %c0_99 = arith.constant 0 : index
    %99 = vector.load %arg10[%c0_96, %c0_97, %c2_98, %c0_99] : memref<1x18x18x32xf32, #tpu.memory_space<vmem>>, vector<1x16x16x32xf32>
    %100 = vector.shape_cast %99 : vector<1x16x16x32xf32> to vector<256x32xf32>
    %c2_100 = arith.constant 2 : index
    %c0_101 = arith.constant 0 : index
    %c0_102 = arith.constant 0 : index
    %101 = vector.load %arg4[%c2_100, %c0_101, %c0_102] : memref<9x32x64xf32, #tpu.memory_space<vmem>>, vector<1x32x64xf32>
    %102 = vector.shape_cast %101 : vector<1x32x64xf32> to vector<32x64xf32>
    %cst_103 = arith.constant dense<0.000000e+00> : vector<256x64xf32>
    %103 = tpu.matmul %100, %102, %cst_103 {dimension_numbers = #tpu.dot_dimension_numbers<[1], [0], [0], [1], [0, 0, 1, 1], [], []>} : vector<256x32xf32>, vector<32x64xf32>, vector<256x64xf32> -> vector<256x64xf32>
    %104 = arith.addf %98, %103 : vector<256x64xf32>
    %c0_104 = arith.constant 0 : index
    %c1_105 = arith.constant 1 : index
    %c0_106 = arith.constant 0 : index
    %c0_107 = arith.constant 0 : index
    %105 = vector.load %arg10[%c0_104, %c1_105, %c0_106, %c0_107] : memref<1x18x18x32xf32, #tpu.memory_space<vmem>>, vector<1x16x16x32xf32>
    %106 = vector.shape_cast %105 : vector<1x16x16x32xf32> to vector<256x32xf32>
    %c3_108 = arith.constant 3 : index
    %c0_109 = arith.constant 0 : index
    %c0_110 = arith.constant 0 : index
    %107 = vector.load %arg4[%c3_108, %c0_109, %c0_110] : memref<9x32x64xf32, #tpu.memory_space<vmem>>, vector<1x32x64xf32>
    %108 = vector.shape_cast %107 : vector<1x32x64xf32> to vector<32x64xf32>
    %cst_111 = arith.constant dense<0.000000e+00> : vector<256x64xf32>
    %109 = tpu.matmul %106, %108, %cst_111 {dimension_numbers = #tpu.dot_dimension_numbers<[1], [0], [0], [1], [0, 0, 1, 1], [], []>} : vector<256x32xf32>, vector<32x64xf32>, vector<256x64xf32> -> vector<256x64xf32>
    %110 = arith.addf %104, %109 : vector<256x64xf32>
    %c0_112 = arith.constant 0 : index
    %c1_113 = arith.constant 1 : index
    %c1_114 = arith.constant 1 : index
    %c0_115 = arith.constant 0 : index
    %111 = vector.load %arg10[%c0_112, %c1_113, %c1_114, %c0_115] : memref<1x18x18x32xf32, #tpu.memory_space<vmem>>, vector<1x16x16x32xf32>
    %112 = vector.shape_cast %111 : vector<1x16x16x32xf32> to vector<256x32xf32>
    %c4_116 = arith.constant 4 : index
    %c0_117 = arith.constant 0 : index
    %c0_118 = arith.constant 0 : index
    %113 = vector.load %arg4[%c4_116, %c0_117, %c0_118] : memref<9x32x64xf32, #tpu.memory_space<vmem>>, vector<1x32x64xf32>
    %114 = vector.shape_cast %113 : vector<1x32x64xf32> to vector<32x64xf32>
    %cst_119 = arith.constant dense<0.000000e+00> : vector<256x64xf32>
    %115 = tpu.matmul %112, %114, %cst_119 {dimension_numbers = #tpu.dot_dimension_numbers<[1], [0], [0], [1], [0, 0, 1, 1], [], []>} : vector<256x32xf32>, vector<32x64xf32>, vector<256x64xf32> -> vector<256x64xf32>
    %116 = arith.addf %110, %115 : vector<256x64xf32>
    %c0_120 = arith.constant 0 : index
    %c1_121 = arith.constant 1 : index
    %c2_122 = arith.constant 2 : index
    %c0_123 = arith.constant 0 : index
    %117 = vector.load %arg10[%c0_120, %c1_121, %c2_122, %c0_123] : memref<1x18x18x32xf32, #tpu.memory_space<vmem>>, vector<1x16x16x32xf32>
    %118 = vector.shape_cast %117 : vector<1x16x16x32xf32> to vector<256x32xf32>
    %c5_124 = arith.constant 5 : index
    %c0_125 = arith.constant 0 : index
    %c0_126 = arith.constant 0 : index
    %119 = vector.load %arg4[%c5_124, %c0_125, %c0_126] : memref<9x32x64xf32, #tpu.memory_space<vmem>>, vector<1x32x64xf32>
    %120 = vector.shape_cast %119 : vector<1x32x64xf32> to vector<32x64xf32>
    %cst_127 = arith.constant dense<0.000000e+00> : vector<256x64xf32>
    %121 = tpu.matmul %118, %120, %cst_127 {dimension_numbers = #tpu.dot_dimension_numbers<[1], [0], [0], [1], [0, 0, 1, 1], [], []>} : vector<256x32xf32>, vector<32x64xf32>, vector<256x64xf32> -> vector<256x64xf32>
    %122 = arith.addf %116, %121 : vector<256x64xf32>
    %c0_128 = arith.constant 0 : index
    %c2_129 = arith.constant 2 : index
    %c0_130 = arith.constant 0 : index
    %c0_131 = arith.constant 0 : index
    %123 = vector.load %arg10[%c0_128, %c2_129, %c0_130, %c0_131] : memref<1x18x18x32xf32, #tpu.memory_space<vmem>>, vector<1x16x16x32xf32>
    %124 = vector.shape_cast %123 : vector<1x16x16x32xf32> to vector<256x32xf32>
    %c6_132 = arith.constant 6 : index
    %c0_133 = arith.constant 0 : index
    %c0_134 = arith.constant 0 : index
    %125 = vector.load %arg4[%c6_132, %c0_133, %c0_134] : memref<9x32x64xf32, #tpu.memory_space<vmem>>, vector<1x32x64xf32>
    %126 = vector.shape_cast %125 : vector<1x32x64xf32> to vector<32x64xf32>
    %cst_135 = arith.constant dense<0.000000e+00> : vector<256x64xf32>
    %127 = tpu.matmul %124, %126, %cst_135 {dimension_numbers = #tpu.dot_dimension_numbers<[1], [0], [0], [1], [0, 0, 1, 1], [], []>} : vector<256x32xf32>, vector<32x64xf32>, vector<256x64xf32> -> vector<256x64xf32>
    %128 = arith.addf %122, %127 : vector<256x64xf32>
    %c0_136 = arith.constant 0 : index
    %c2_137 = arith.constant 2 : index
    %c1_138 = arith.constant 1 : index
    %c0_139 = arith.constant 0 : index
    %129 = vector.load %arg10[%c0_136, %c2_137, %c1_138, %c0_139] : memref<1x18x18x32xf32, #tpu.memory_space<vmem>>, vector<1x16x16x32xf32>
    %130 = vector.shape_cast %129 : vector<1x16x16x32xf32> to vector<256x32xf32>
    %c7_140 = arith.constant 7 : index
    %c0_141 = arith.constant 0 : index
    %c0_142 = arith.constant 0 : index
    %131 = vector.load %arg4[%c7_140, %c0_141, %c0_142] : memref<9x32x64xf32, #tpu.memory_space<vmem>>, vector<1x32x64xf32>
    %132 = vector.shape_cast %131 : vector<1x32x64xf32> to vector<32x64xf32>
    %cst_143 = arith.constant dense<0.000000e+00> : vector<256x64xf32>
    %133 = tpu.matmul %130, %132, %cst_143 {dimension_numbers = #tpu.dot_dimension_numbers<[1], [0], [0], [1], [0, 0, 1, 1], [], []>} : vector<256x32xf32>, vector<32x64xf32>, vector<256x64xf32> -> vector<256x64xf32>
    %134 = arith.addf %128, %133 : vector<256x64xf32>
    %c0_144 = arith.constant 0 : index
    %c2_145 = arith.constant 2 : index
    %c2_146 = arith.constant 2 : index
    %c0_147 = arith.constant 0 : index
    %135 = vector.load %arg10[%c0_144, %c2_145, %c2_146, %c0_147] : memref<1x18x18x32xf32, #tpu.memory_space<vmem>>, vector<1x16x16x32xf32>
    %136 = vector.shape_cast %135 : vector<1x16x16x32xf32> to vector<256x32xf32>
    %c8_148 = arith.constant 8 : index
    %c0_149 = arith.constant 0 : index
    %c0_150 = arith.constant 0 : index
    %137 = vector.load %arg4[%c8_148, %c0_149, %c0_150] : memref<9x32x64xf32, #tpu.memory_space<vmem>>, vector<1x32x64xf32>
    %138 = vector.shape_cast %137 : vector<1x32x64xf32> to vector<32x64xf32>
    %cst_151 = arith.constant dense<0.000000e+00> : vector<256x64xf32>
    %139 = tpu.matmul %136, %138, %cst_151 {dimension_numbers = #tpu.dot_dimension_numbers<[1], [0], [0], [1], [0, 0, 1, 1], [], []>} : vector<256x32xf32>, vector<32x64xf32>, vector<256x64xf32> -> vector<256x64xf32>
    %140 = arith.addf %134, %139 : vector<256x64xf32>
    %c0_152 = arith.constant 0 : index
    %c0_153 = arith.constant 0 : index
    %141 = vector.load %arg5[%c0_152, %c0_153] : memref<1x64xf32, #tpu.memory_space<vmem>>, vector<1x64xf32>
    %142 = vector.broadcast %141 : vector<1x64xf32> to vector<256x64xf32>
    %143 = arith.addf %140, %142 : vector<256x64xf32>
    %cst_154 = arith.constant 0.000000e+00 : f32
    %144 = vector.broadcast %cst_154 : f32 to vector<256x64xf32>
    %145 = arith.maximumf %143, %144 : vector<256x64xf32>
    %146 = vector.shape_cast %145 : vector<256x64xf32> to vector<1x8x2x16x64xf32>
    %147 = vector.extract_strided_slice %146 {offsets = [0, 0, 0, 0, 0], sizes = [1, 8, 1, 16, 64], strides = [1, 1, 1, 1, 1]} : vector<1x8x2x16x64xf32> to vector<1x8x1x16x64xf32>
    %148 = vector.shape_cast %147 : vector<1x8x1x16x64xf32> to vector<1x8x16x64xf32>
    %149 = vector.extract_strided_slice %146 {offsets = [0, 0, 1, 0, 0], sizes = [1, 8, 1, 16, 64], strides = [1, 1, 1, 1, 1]} : vector<1x8x2x16x64xf32> to vector<1x8x1x16x64xf32>
    %150 = vector.shape_cast %149 : vector<1x8x1x16x64xf32> to vector<1x8x16x64xf32>
    %151 = arith.maximumf %148, %150 : vector<1x8x16x64xf32>
    %c0_155 = arith.constant 0 : index
    %c0_156 = arith.constant 0 : index
    %c0_157 = arith.constant 0 : index
    %c0_158 = arith.constant 0 : index
    %152 = vector.load %arg11[%c0_155, %c0_156, %c0_157, %c0_158] : memref<1x8x16x64xf32, #tpu.memory_space<vmem>>, vector<1x8x16x64xf32>
    tpu.vector_store %arg11[%c0_155, %c0_156, %c0_157, %c0_158], %151 {strides = array<i32>} : memref<1x8x16x64xf32, #tpu.memory_space<vmem>>, vector<1x8x16x64xf32>,
    %c0_159 = arith.constant 0 : index
    %c0_160 = arith.constant 0 : index
    %c0_161 = arith.constant 0 : index
    %c0_162 = arith.constant 0 : index
    %153 = tpu.strided_load %arg11[%c0_159, %c0_160, %c0_161, %c0_162] {strides = array<i32: 1, 1, 2, 1>} : memref<1x8x16x64xf32, #tpu.memory_space<vmem>>, vector<1x8x8x64xf32>
    %c0_163 = arith.constant 0 : index
    %c0_164 = arith.constant 0 : index
    %c1_165 = arith.constant 1 : index
    %c0_166 = arith.constant 0 : index
    %154 = tpu.strided_load %arg11[%c0_163, %c0_164, %c1_165, %c0_166] {strides = array<i32: 1, 1, 2, 1>} : memref<1x8x16x64xf32, #tpu.memory_space<vmem>>, vector<1x8x8x64xf32>
    %155 = arith.maximumf %153, %154 : vector<1x8x8x64xf32>
    %cst_167 = arith.constant 0.000000e+00 : f32
    %156 = vector.broadcast %cst_167 : f32 to vector<1x10x10x64xf32>
    %c0_168 = arith.constant 0 : index
    %c0_169 = arith.constant 0 : index
    %c0_170 = arith.constant 0 : index
    %c0_171 = arith.constant 0 : index
    %157 = vector.load %arg12[%c0_168, %c0_169, %c0_170, %c0_171] : memref<1x10x10x64xf32, #tpu.memory_space<vmem>>, vector<1x10x10x64xf32>
    tpu.vector_store %arg12[%c0_168, %c0_169, %c0_170, %c0_171], %156 {strides = array<i32>} : memref<1x10x10x64xf32, #tpu.memory_space<vmem>>, vector<1x10x10x64xf32>,
    %c0_172 = arith.constant 0 : index
    %c1_173 = arith.constant 1 : index
    %c1_174 = arith.constant 1 : index
    %c0_175 = arith.constant 0 : index
    %158 = vector.load %arg12[%c0_172, %c1_173, %c1_174, %c0_175] : memref<1x10x10x64xf32, #tpu.memory_space<vmem>>, vector<1x8x8x64xf32>
    tpu.vector_store %arg12[%c0_172, %c1_173, %c1_174, %c0_175], %155 {strides = array<i32>} : memref<1x10x10x64xf32, #tpu.memory_space<vmem>>, vector<1x8x8x64xf32>,
    %cst_176 = arith.constant 0.000000e+00 : f32
    %159 = vector.broadcast %cst_176 : f32 to vector<64x128xf32>
    %c0_177 = arith.constant 0 : index
    %c0_178 = arith.constant 0 : index
    %c0_179 = arith.constant 0 : index
    %c0_180 = arith.constant 0 : index
    %160 = vector.load %arg12[%c0_177, %c0_178, %c0_179, %c0_180] : memref<1x10x10x64xf32, #tpu.memory_space<vmem>>, vector<1x8x8x64xf32>
    %161 = vector.shape_cast %160 : vector<1x8x8x64xf32> to vector<64x64xf32>
    %c0_181 = arith.constant 0 : index
    %c0_182 = arith.constant 0 : index
    %c0_183 = arith.constant 0 : index
    %162 = vector.load %arg6[%c0_181, %c0_182, %c0_183] : memref<9x64x128xf32, #tpu.memory_space<vmem>>, vector<1x64x128xf32>
    %163 = vector.shape_cast %162 : vector<1x64x128xf32> to vector<64x128xf32>
    %cst_184 = arith.constant dense<0.000000e+00> : vector<64x128xf32>
    %164 = tpu.matmul %161, %163, %cst_184 {dimension_numbers = #tpu.dot_dimension_numbers<[1], [0], [0], [1], [0, 0, 1, 1], [], []>} : vector<64x64xf32>, vector<64x128xf32>, vector<64x128xf32> -> vector<64x128xf32>
    %165 = arith.addf %159, %164 : vector<64x128xf32>
    %c0_185 = arith.constant 0 : index
    %c0_186 = arith.constant 0 : index
    %c1_187 = arith.constant 1 : index
    %c0_188 = arith.constant 0 : index
    %166 = vector.load %arg12[%c0_185, %c0_186, %c1_187, %c0_188] : memref<1x10x10x64xf32, #tpu.memory_space<vmem>>, vector<1x8x8x64xf32>
    %167 = vector.shape_cast %166 : vector<1x8x8x64xf32> to vector<64x64xf32>
    %c1_189 = arith.constant 1 : index
    %c0_190 = arith.constant 0 : index
    %c0_191 = arith.constant 0 : index
    %168 = vector.load %arg6[%c1_189, %c0_190, %c0_191] : memref<9x64x128xf32, #tpu.memory_space<vmem>>, vector<1x64x128xf32>
    %169 = vector.shape_cast %168 : vector<1x64x128xf32> to vector<64x128xf32>
    %cst_192 = arith.constant dense<0.000000e+00> : vector<64x128xf32>
    %170 = tpu.matmul %167, %169, %cst_192 {dimension_numbers = #tpu.dot_dimension_numbers<[1], [0], [0], [1], [0, 0, 1, 1], [], []>} : vector<64x64xf32>, vector<64x128xf32>, vector<64x128xf32> -> vector<64x128xf32>
    %171 = arith.addf %165, %170 : vector<64x128xf32>
    %c0_193 = arith.constant 0 : index
    %c0_194 = arith.constant 0 : index
    %c2_195 = arith.constant 2 : index
    %c0_196 = arith.constant 0 : index
    %172 = vector.load %arg12[%c0_193, %c0_194, %c2_195, %c0_196] : memref<1x10x10x64xf32, #tpu.memory_space<vmem>>, vector<1x8x8x64xf32>
    %173 = vector.shape_cast %172 : vector<1x8x8x64xf32> to vector<64x64xf32>
    %c2_197 = arith.constant 2 : index
    %c0_198 = arith.constant 0 : index
    %c0_199 = arith.constant 0 : index
    %174 = vector.load %arg6[%c2_197, %c0_198, %c0_199] : memref<9x64x128xf32, #tpu.memory_space<vmem>>, vector<1x64x128xf32>
    %175 = vector.shape_cast %174 : vector<1x64x128xf32> to vector<64x128xf32>
    %cst_200 = arith.constant dense<0.000000e+00> : vector<64x128xf32>
    %176 = tpu.matmul %173, %175, %cst_200 {dimension_numbers = #tpu.dot_dimension_numbers<[1], [0], [0], [1], [0, 0, 1, 1], [], []>} : vector<64x64xf32>, vector<64x128xf32>, vector<64x128xf32> -> vector<64x128xf32>
    %177 = arith.addf %171, %176 : vector<64x128xf32>
    %c0_201 = arith.constant 0 : index
    %c1_202 = arith.constant 1 : index
    %c0_203 = arith.constant 0 : index
    %c0_204 = arith.constant 0 : index
    %178 = vector.load %arg12[%c0_201, %c1_202, %c0_203, %c0_204] : memref<1x10x10x64xf32, #tpu.memory_space<vmem>>, vector<1x8x8x64xf32>
    %179 = vector.shape_cast %178 : vector<1x8x8x64xf32> to vector<64x64xf32>
    %c3_205 = arith.constant 3 : index
    %c0_206 = arith.constant 0 : index
    %c0_207 = arith.constant 0 : index
    %180 = vector.load %arg6[%c3_205, %c0_206, %c0_207] : memref<9x64x128xf32, #tpu.memory_space<vmem>>, vector<1x64x128xf32>
    %181 = vector.shape_cast %180 : vector<1x64x128xf32> to vector<64x128xf32>
    %cst_208 = arith.constant dense<0.000000e+00> : vector<64x128xf32>
    %182 = tpu.matmul %179, %181, %cst_208 {dimension_numbers = #tpu.dot_dimension_numbers<[1], [0], [0], [1], [0, 0, 1, 1], [], []>} : vector<64x64xf32>, vector<64x128xf32>, vector<64x128xf32> -> vector<64x128xf32>
    %183 = arith.addf %177, %182 : vector<64x128xf32>
    %c0_209 = arith.constant 0 : index
    %c1_210 = arith.constant 1 : index
    %c1_211 = arith.constant 1 : index
    %c0_212 = arith.constant 0 : index
    %184 = vector.load %arg12[%c0_209, %c1_210, %c1_211, %c0_212] : memref<1x10x10x64xf32, #tpu.memory_space<vmem>>, vector<1x8x8x64xf32>
    %185 = vector.shape_cast %184 : vector<1x8x8x64xf32> to vector<64x64xf32>
    %c4_213 = arith.constant 4 : index
    %c0_214 = arith.constant 0 : index
    %c0_215 = arith.constant 0 : index
    %186 = vector.load %arg6[%c4_213, %c0_214, %c0_215] : memref<9x64x128xf32, #tpu.memory_space<vmem>>, vector<1x64x128xf32>
    %187 = vector.shape_cast %186 : vector<1x64x128xf32> to vector<64x128xf32>
    %cst_216 = arith.constant dense<0.000000e+00> : vector<64x128xf32>
    %188 = tpu.matmul %185, %187, %cst_216 {dimension_numbers = #tpu.dot_dimension_numbers<[1], [0], [0], [1], [0, 0, 1, 1], [], []>} : vector<64x64xf32>, vector<64x128xf32>, vector<64x128xf32> -> vector<64x128xf32>
    %189 = arith.addf %183, %188 : vector<64x128xf32>
    %c0_217 = arith.constant 0 : index
    %c1_218 = arith.constant 1 : index
    %c2_219 = arith.constant 2 : index
    %c0_220 = arith.constant 0 : index
    %190 = vector.load %arg12[%c0_217, %c1_218, %c2_219, %c0_220] : memref<1x10x10x64xf32, #tpu.memory_space<vmem>>, vector<1x8x8x64xf32>
    %191 = vector.shape_cast %190 : vector<1x8x8x64xf32> to vector<64x64xf32>
    %c5_221 = arith.constant 5 : index
    %c0_222 = arith.constant 0 : index
    %c0_223 = arith.constant 0 : index
    %192 = vector.load %arg6[%c5_221, %c0_222, %c0_223] : memref<9x64x128xf32, #tpu.memory_space<vmem>>, vector<1x64x128xf32>
    %193 = vector.shape_cast %192 : vector<1x64x128xf32> to vector<64x128xf32>
    %cst_224 = arith.constant dense<0.000000e+00> : vector<64x128xf32>
    %194 = tpu.matmul %191, %193, %cst_224 {dimension_numbers = #tpu.dot_dimension_numbers<[1], [0], [0], [1], [0, 0, 1, 1], [], []>} : vector<64x64xf32>, vector<64x128xf32>, vector<64x128xf32> -> vector<64x128xf32>
    %195 = arith.addf %189, %194 : vector<64x128xf32>
    %c0_225 = arith.constant 0 : index
    %c2_226 = arith.constant 2 : index
    %c0_227 = arith.constant 0 : index
    %c0_228 = arith.constant 0 : index
    %196 = vector.load %arg12[%c0_225, %c2_226, %c0_227, %c0_228] : memref<1x10x10x64xf32, #tpu.memory_space<vmem>>, vector<1x8x8x64xf32>
    %197 = vector.shape_cast %196 : vector<1x8x8x64xf32> to vector<64x64xf32>
    %c6_229 = arith.constant 6 : index
    %c0_230 = arith.constant 0 : index
    %c0_231 = arith.constant 0 : index
    %198 = vector.load %arg6[%c6_229, %c0_230, %c0_231] : memref<9x64x128xf32, #tpu.memory_space<vmem>>, vector<1x64x128xf32>
    %199 = vector.shape_cast %198 : vector<1x64x128xf32> to vector<64x128xf32>
    %cst_232 = arith.constant dense<0.000000e+00> : vector<64x128xf32>
    %200 = tpu.matmul %197, %199, %cst_232 {dimension_numbers = #tpu.dot_dimension_numbers<[1], [0], [0], [1], [0, 0, 1, 1], [], []>} : vector<64x64xf32>, vector<64x128xf32>, vector<64x128xf32> -> vector<64x128xf32>
    %201 = arith.addf %195, %200 : vector<64x128xf32>
    %c0_233 = arith.constant 0 : index
    %c2_234 = arith.constant 2 : index
    %c1_235 = arith.constant 1 : index
    %c0_236 = arith.constant 0 : index
    %202 = vector.load %arg12[%c0_233, %c2_234, %c1_235, %c0_236] : memref<1x10x10x64xf32, #tpu.memory_space<vmem>>, vector<1x8x8x64xf32>
    %203 = vector.shape_cast %202 : vector<1x8x8x64xf32> to vector<64x64xf32>
    %c7_237 = arith.constant 7 : index
    %c0_238 = arith.constant 0 : index
    %c0_239 = arith.constant 0 : index
    %204 = vector.load %arg6[%c7_237, %c0_238, %c0_239] : memref<9x64x128xf32, #tpu.memory_space<vmem>>, vector<1x64x128xf32>
    %205 = vector.shape_cast %204 : vector<1x64x128xf32> to vector<64x128xf32>
    %cst_240 = arith.constant dense<0.000000e+00> : vector<64x128xf32>
    %206 = tpu.matmul %203, %205, %cst_240 {dimension_numbers = #tpu.dot_dimension_numbers<[1], [0], [0], [1], [0, 0, 1, 1], [], []>} : vector<64x64xf32>, vector<64x128xf32>, vector<64x128xf32> -> vector<64x128xf32>
    %207 = arith.addf %201, %206 : vector<64x128xf32>
    %c0_241 = arith.constant 0 : index
    %c2_242 = arith.constant 2 : index
    %c2_243 = arith.constant 2 : index
    %c0_244 = arith.constant 0 : index
    %208 = vector.load %arg12[%c0_241, %c2_242, %c2_243, %c0_244] : memref<1x10x10x64xf32, #tpu.memory_space<vmem>>, vector<1x8x8x64xf32>
    %209 = vector.shape_cast %208 : vector<1x8x8x64xf32> to vector<64x64xf32>
    %c8_245 = arith.constant 8 : index
    %c0_246 = arith.constant 0 : index
    %c0_247 = arith.constant 0 : index
    %210 = vector.load %arg6[%c8_245, %c0_246, %c0_247] : memref<9x64x128xf32, #tpu.memory_space<vmem>>, vector<1x64x128xf32>
    %211 = vector.shape_cast %210 : vector<1x64x128xf32> to vector<64x128xf32>
    %cst_248 = arith.constant dense<0.000000e+00> : vector<64x128xf32>
    %212 = tpu.matmul %209, %211, %cst_248 {dimension_numbers = #tpu.dot_dimension_numbers<[1], [0], [0], [1], [0, 0, 1, 1], [], []>} : vector<64x64xf32>, vector<64x128xf32>, vector<64x128xf32> -> vector<64x128xf32>
    %213 = arith.addf %207, %212 : vector<64x128xf32>
    %c0_249 = arith.constant 0 : index
    %c0_250 = arith.constant 0 : index
    %214 = vector.load %arg7[%c0_249, %c0_250] : memref<1x128xf32, #tpu.memory_space<vmem>>, vector<1x128xf32>
    %215 = vector.broadcast %214 : vector<1x128xf32> to vector<64x128xf32>
    %216 = arith.addf %213, %215 : vector<64x128xf32>
    %cst_251 = arith.constant 0.000000e+00 : f32
    %217 = vector.broadcast %cst_251 : f32 to vector<64x128xf32>
    %218 = arith.maximumf %216, %217 : vector<64x128xf32>
    %219 = arith.truncf %218 : vector<64x128xf32> to vector<64x128xbf16>
    %c0_252 = arith.constant 0 : index
    %c0_253 = arith.constant 0 : index
    %220 = vector.load %arg8[%c0_252, %c0_253] : memref<64x128xbf16, #tpu.memory_space<vmem>>, vector<64x128xbf16>
    tpu.vector_store %arg8[%c0_252, %c0_253], %219 {strides = array<i32>} : memref<64x128xbf16, #tpu.memory_space<vmem>>, vector<64x128xbf16>,
    return
  }
  func.func @transform_0(%arg0: i32) -> (i32, i32, i32, i32) {
    %c0_i32 = arith.constant 0 : i32
    %c0_i32_0 = arith.constant 0 : i32
    %c0_i32_1 = arith.constant 0 : i32
    %c0_i32_2 = arith.constant 0 : i32
    return %arg0, %c0_i32, %c0_i32_0, %c0_i32_1 : i32, i32, i32, i32
  }
  func.func @transform_1(%arg0: i32) -> (i32, i32, i32) {
    %c0_i32 = arith.constant 0 : i32
    %c0_i32_0 = arith.constant 0 : i32
    %c0_i32_1 = arith.constant 0 : i32
    %c0_i32_2 = arith.constant 0 : i32
    return %c0_i32, %c0_i32_0, %c0_i32_1 : i32, i32, i32
  }
  func.func @transform_2(%arg0: i32) -> (i32, i32) {
    %c0_i32 = arith.constant 0 : i32
    %c0_i32_0 = arith.constant 0 : i32
    %c0_i32_1 = arith.constant 0 : i32
    return %c0_i32, %c0_i32_0 : i32, i32
  }
  func.func @transform_3(%arg0: i32) -> (i32, i32, i32) {
    %c0_i32 = arith.constant 0 : i32
    %c0_i32_0 = arith.constant 0 : i32
    %c0_i32_1 = arith.constant 0 : i32
    %c0_i32_2 = arith.constant 0 : i32
    return %c0_i32, %c0_i32_0, %c0_i32_1 : i32, i32, i32
  }
  func.func @transform_4(%arg0: i32) -> (i32, i32) {
    %c0_i32 = arith.constant 0 : i32
    %c0_i32_0 = arith.constant 0 : i32
    %c0_i32_1 = arith.constant 0 : i32
    return %c0_i32, %c0_i32_0 : i32, i32
  }
  func.func @transform_5(%arg0: i32) -> (i32, i32, i32) {
    %c0_i32 = arith.constant 0 : i32
    %c0_i32_0 = arith.constant 0 : i32
    %c0_i32_1 = arith.constant 0 : i32
    %c0_i32_2 = arith.constant 0 : i32
    return %c0_i32, %c0_i32_0, %c0_i32_1 : i32, i32, i32
  }
  func.func @transform_6(%arg0: i32) -> (i32, i32) {
    %c0_i32 = arith.constant 0 : i32
    %c0_i32_0 = arith.constant 0 : i32
    %c0_i32_1 = arith.constant 0 : i32
    return %c0_i32, %c0_i32_0 : i32, i32
  }
  func.func @transform_7(%arg0: i32) -> (i32, i32) {
    %c0_i32 = arith.constant 0 : i32
    %c0_i32_0 = arith.constant 0 : i32
    return %arg0, %c0_i32 : i32, i32
  }
}

module attributes {stable_mosaic.version = 11 : i64} {
  func.func @_fc2_kernel(%arg0: i32, %arg1: memref<2x512xf32, #tpu.memory_space<vmem>>, %arg2: memref<512x128xf32, #tpu.memory_space<vmem>>, %arg3: memref<1x128xf32, #tpu.memory_space<vmem>>, %arg4: memref<2x128xf32, #tpu.memory_space<vmem>>) attributes {dimension_semantics = [#tpu.dimension_semantics<arbitrary>], iteration_bounds = array<i64: 1>, scalar_prefetch = 0 : i64, scratch_operands = 0 : i64, tpu.core_type = #tpu.core_type<tc>, window_params = [{pipeline_mode = #tpu.pipeline_mode<synchronous>, transform_indices = @transform_0, window_bounds = array<i64: 2, 512>}, {pipeline_mode = #tpu.pipeline_mode<synchronous>, transform_indices = @transform_1, window_bounds = array<i64: 512, 128>}, {pipeline_mode = #tpu.pipeline_mode<synchronous>, transform_indices = @transform_2, window_bounds = array<i64: 1, 128>}, {pipeline_mode = #tpu.pipeline_mode<synchronous>, transform_indices = @transform_3, window_bounds = array<i64: 2, 128>}]} {
    %c0 = arith.constant 0 : index
    %c0_0 = arith.constant 0 : index
    %0 = vector.load %arg1[%c0, %c0_0] : memref<2x512xf32, #tpu.memory_space<vmem>>, vector<2x512xf32>
    %c0_1 = arith.constant 0 : index
    %c0_2 = arith.constant 0 : index
    %1 = vector.load %arg2[%c0_1, %c0_2] : memref<512x128xf32, #tpu.memory_space<vmem>>, vector<512x128xf32>
    %cst = arith.constant dense<0.000000e+00> : vector<2x128xf32>
    %2 = tpu.matmul %0, %1, %cst {dimension_numbers = #tpu.dot_dimension_numbers<[1], [0], [0], [1], [0, 0, 1, 1], [], []>} : vector<2x512xf32>, vector<512x128xf32>, vector<2x128xf32> -> vector<2x128xf32>
    %c0_3 = arith.constant 0 : index
    %c0_4 = arith.constant 0 : index
    %3 = vector.load %arg3[%c0_3, %c0_4] : memref<1x128xf32, #tpu.memory_space<vmem>>, vector<1x128xf32>
    %4 = vector.broadcast %3 : vector<1x128xf32> to vector<2x128xf32>
    %5 = arith.addf %2, %4 : vector<2x128xf32>
    %c0_5 = arith.constant 0 : index
    %c0_6 = arith.constant 0 : index
    %6 = vector.load %arg4[%c0_5, %c0_6] : memref<2x128xf32, #tpu.memory_space<vmem>>, vector<2x128xf32>
    tpu.vector_store %arg4[%c0_5, %c0_6], %5 {strides = array<i32>} : memref<2x128xf32, #tpu.memory_space<vmem>>, vector<2x128xf32>,
    return
  }
  func.func @transform_0(%arg0: i32) -> (i32, i32) {
    %c0_i32 = arith.constant 0 : i32
    %c0_i32_0 = arith.constant 0 : i32
    %c0_i32_1 = arith.constant 0 : i32
    return %c0_i32, %c0_i32_0 : i32, i32
  }
  func.func @transform_1(%arg0: i32) -> (i32, i32) {
    %c0_i32 = arith.constant 0 : i32
    %c0_i32_0 = arith.constant 0 : i32
    %c0_i32_1 = arith.constant 0 : i32
    return %c0_i32, %c0_i32_0 : i32, i32
  }
  func.func @transform_2(%arg0: i32) -> (i32, i32) {
    %c0_i32 = arith.constant 0 : i32
    %c0_i32_0 = arith.constant 0 : i32
    %c0_i32_1 = arith.constant 0 : i32
    return %c0_i32, %c0_i32_0 : i32, i32
  }
  func.func @transform_3(%arg0: i32) -> (i32, i32) {
    %c0_i32 = arith.constant 0 : i32
    %c0_i32_0 = arith.constant 0 : i32
    %c0_i32_1 = arith.constant 0 : i32
    return %c0_i32, %c0_i32_0 : i32, i32
  }
}

</mosaic_0001>

<bundles_post_ra>
// kernel: cnn_classify_forward.5
= control target key start
LH: loop header
LB: loop body
LE: loop exit
PB: predicated region body
PF: predicated region fallthrough
CT: control target
= control target key end

     0   :  { %v426_v47 = vmov 1983009808   ;;  %v92_v49 = vlaneseq  ;;  %s658_s0 = inlined_call_operand.vmem [shape: f32[2,512], index: 0, kind: input, shape index: {}]   ;;  %s659_s1 = inlined_call_operand.vmem [shape: f32[512,128], index: 1, kind: input, shape index: {}]   ;;  %s660_s2 = inlined_call_operand.vmem [shape: f32[1,128], index: 2, kind: input, shape index: {}]   ;;  %s661_s3 = inlined_call_operand.hbm [shape: f32[2,128], index: 3, kind: output, shape index: {}]  }
   0x1   :  { %v32_v0 = vld [vmem:[%s659_s1 + $0x80] sm:$0xff]  ;;  %v33_v1 = vld [vmem:[%s659_s1 + $0x88] sm:$0xff]  ;;  %v34_v11 = vld [vmem:[%s659_s1 + $0x90] sm:$0xff]  ;;  %v90_v48 = vunpack.c.l.s4 %v426_v47 }
   0x2   :  { %v16_v2 = vld [vmem:[%s659_s1] sm:$0xff]  ;;  %v335_v3 = vpack.c.bf16 %v33_v1, %v32_v0  ;;  %v17_v4 = vld [vmem:[%s659_s1 + $0x8] sm:$0xff]  ;;  %v35_v13 = vld [vmem:[%s659_s1 + $0x98] sm:$0xff]  ;;  %v93_v0 = vshrl.u32 %v92_v49, 7 }
   0x3   :  { %v64_v5 = vld [vmem:[%s659_s1 + $0x180] sm:$0xff]  ;;  %v65_v6 = vld [vmem:[%s659_s1 + $0x188] sm:$0xff]  ;;  %v337_v7 = vpack.c.bf16 %v17_v4, %v16_v2  ;;  %v18_v14 = vld [vmem:[%s659_s1 + $0x10] sm:$0xff]  ;;  %v339_v16 = vpack.c.bf16 %v35_v13, %v34_v11  ;;  %v91_v63 = vunpack.c.0.s8 %v90_v48 }
   0x4   :  { %v367_v8 = vpack.c.bf16 %v65_v6, %v64_v5  ;;  %v48_v9 = vld [vmem:[%s659_s1 + $0x100] sm:$0xff]  ;;  %v49_v10 = vld [vmem:[%s659_s1 + $0x108] sm:$0xff]  ;;  %336 = vmatprep.subr.bf16.mxu0 %v335_v3  ;;  %v19_v15 = vld [vmem:[%s659_s1 + $0x18] sm:$0xff] }
   0x5   :  { %v369_v12 = vpack.c.bf16 %v49_v10, %v48_v9  ;;  %338 = vmatpush3.bf16.msra.mxu0 %v337_v7  ;;  %v341_v17 = vpack.c.bf16 %v19_v15, %v18_v14  ;;  %v66_v18 = vld [vmem:[%s659_s1 + $0x190] sm:$0xff]  ;;  %v67_v19 = vld [vmem:[%s659_s1 + $0x198] sm:$0xff]  ;;  %v36_v23 = vld [vmem:[%s659_s1 + $0xa0] sm:$0xff]  ;;  %v94_v13 = vsub.s32 %v91_v63, %v93_v0 }
   0x6   :  { %368 = vmatprep.subr.bf16.mxu1 %v367_v8  ;;  %v50_v20 = vld [vmem:[%s659_s1 + $0x110] sm:$0xff]  ;;  %v371_v21 = vpack.c.bf16 %v67_v19, %v66_v18  ;;  %v51_v22 = vld [vmem:[%s659_s1 + $0x118] sm:$0xff]  ;;  %v37_v24 = vld [vmem:[%s659_s1 + $0xa8] sm:$0xff]  ;;  %340 = vmatprep.subr.bf16.mxu0 %v339_v16 }
   0x7   :  { %370 = vmatpush3.bf16.msra.mxu1 %v369_v12  ;;  %v373_v25 = vpack.c.bf16 %v51_v22, %v50_v20  ;;  %v343_v26 = vpack.c.bf16 %v37_v24, %v36_v23  ;;  %v20_v27 = vld [vmem:[%s659_s1 + $0x20] sm:$0xff]  ;;  %v21_v28 = vld [vmem:[%s659_s1 + $0x28] sm:$0xff]  ;;  %v38_v35 = vld [vmem:[%s659_s1 + $0xb0] sm:$0xff] }
   0x8   :  { %v68_v29 = vld [vmem:[%s659_s1 + $0x1a0] sm:$0xff]  ;;  %372 = vmatprep.subr.bf16.mxu1 %v371_v21  ;;  %v69_v30 = vld [vmem:[%s659_s1 + $0x1a8] sm:$0xff]  ;;  %v345_v33 = vpack.c.bf16 %v21_v28, %v20_v27  ;;  %v39_v36 = vld [vmem:[%s659_s1 + $0xb8] sm:$0xff] }
   0x9   :  { %v52_v31 = vld [vmem:[%s659_s1 + $0x120] sm:$0xff]  ;;  %v53_v32 = vld [vmem:[%s659_s1 + $0x128] sm:$0xff]  ;;  %342 = vmatpush3.bf16.msra.mxu0 %v341_v17  ;;  %v375_v34 = vpack.c.bf16 %v69_v30, %v68_v29  ;;  %v22_v37 = vld [vmem:[%s659_s1 + $0x30] sm:$0xff]  ;;  %v347_v39 = vpack.c.bf16 %v39_v36, %v38_v35 }
   0xa   :  { %344 = vmatprep.subr.bf16.mxu0 %v343_v26  ;;  %v377_v38 = vpack.c.bf16 %v53_v32, %v52_v31  ;;  %v23_v40 = vld [vmem:[%s659_s1 + $0x38] sm:$0xff]  ;;  %v70_v41 = vld [vmem:[%s659_s1 + $0x1b0] sm:$0xff]  ;;  %v40_v46 = vld [vmem:[%s659_s1 + $0xc0] sm:$0xff] }
   0xb   :  { %374 = vmatpush3.bf16.msra.mxu1 %v373_v25  ;;  %v71_v42 = vld [vmem:[%s659_s1 + $0x1b8] sm:$0xff]  ;;  %v54_v44 = vld [vmem:[%s659_s1 + $0x130] sm:$0xff]  ;;  %v41_v50 = vld [vmem:[%s659_s1 + $0xc8] sm:$0xff]  ;;  %v349_v51 = vpack.c.bf16 %v23_v40, %v22_v37 }
   0xc   :  { %376 = vmatprep.subr.bf16.mxu1 %v375_v34  ;;  %v379_v43 = vpack.c.bf16 %v71_v42, %v70_v41  ;;  %v55_v45 = vld [vmem:[%s659_s1 + $0x138] sm:$0xff]  ;;  %v72_v52 = vld [vmem:[%s659_s1 + $0x1c0] sm:$0xff]  ;;  %v73_v53 = vld [vmem:[%s659_s1 + $0x1c8] sm:$0xff]  ;;  %v351_v55 = vpack.c.bf16 %v41_v50, %v40_v46 }
   0xd   :  { %346 = vmatpush3.bf16.msra.mxu0 %v345_v33  ;;  %v381_v54 = vpack.c.bf16 %v55_v45, %v54_v44  ;;  %v24_v56 = vld [vmem:[%s659_s1 + $0x40] sm:$0xff]  ;;  %v25_v57 = vld [vmem:[%s659_s1 + $0x48] sm:$0xff]  ;;  %v383_v59 = vpack.c.bf16 %v73_v53, %v72_v52  ;;  %v42_v61 = vld [vmem:[%s659_s1 + $0xd0] sm:$0xff] }
   0xe   :  { %348 = vmatprep.subr.bf16.mxu0 %v347_v39  ;;  %v56_v58 = vld [vmem:[%s659_s1 + $0x140] sm:$0xff]  ;;  %v57_v60 = vld [vmem:[%s659_s1 + $0x148] sm:$0xff]  ;;  %v43_v62 = vld [vmem:[%s659_s1 + $0xd8] sm:$0xff]  ;;  %v353_v3 = vpack.c.bf16 %v25_v57, %v24_v56 }
   0xf   :  { %378 = vmatpush3.bf16.msra.mxu1 %v377_v38  ;;  %v74_v1 = vld [vmem:[%s659_s1 + $0x1d0] sm:$0xff]  ;;  %v75_v2 = vld [vmem:[%s659_s1 + $0x1d8] sm:$0xff]  ;;  %v385_v4 = vpack.c.bf16 %v57_v60, %v56_v58  ;;  %v355_v5 = vpack.c.bf16 %v43_v62, %v42_v61  ;;  %v44_v11 = vld [vmem:[%s659_s1 + $0xe0] sm:$0xff] }
  0x10   :  { %380 = vmatprep.subr.bf16.mxu1 %v379_v43  ;;  %v26_v6 = vld [vmem:[%s659_s1 + $0x50] sm:$0xff]  ;;  %v27_v7 = vld [vmem:[%s659_s1 + $0x58] sm:$0xff]  ;;  %v387_v9 = vpack.c.bf16 %v75_v2, %v74_v1  ;;  %v45_v12 = vld [vmem:[%s659_s1 + $0xe8] sm:$0xff] }
  0x11   :  { %350 = vmatpush3.bf16.msra.mxu0 %v349_v51  ;;  %v58_v8 = vld [vmem:[%s659_s1 + $0x150] sm:$0xff]  ;;  %v59_v10 = vld [vmem:[%s659_s1 + $0x158] sm:$0xff]  ;;  %v76_v14 = vld [vmem:[%s659_s1 + $0x1e0] sm:$0xff]  ;;  %v357_v16 = vpack.c.bf16 %v27_v7, %v26_v6  ;;  %v359_v20 = vpack.c.bf16 %v45_v12, %v44_v11 }
  0x12   :  { %352 = vmatprep.subr.bf16.mxu0 %v351_v55  ;;  %v77_v15 = vld [vmem:[%s659_s1 + $0x1e8] sm:$0xff]  ;;  %v28_v17 = vld [vmem:[%s659_s1 + $0x60] sm:$0xff]  ;;  %v389_v19 = vpack.c.bf16 %v59_v10, %v58_v8 }
  0x13   :  { %382 = vmatpush3.bf16.msra.mxu1 %v381_v54  ;;  %v29_v18 = vld [vmem:[%s659_s1 + $0x68] sm:$0xff]  ;;  %v60_v21 = vld [vmem:[%s659_s1 + $0x160] sm:$0xff] }
  0x14   :  { %384 = vmatprep.subr.bf16.mxu1 %v383_v59  ;;  %v15_v22 = vld [vmem:[%s658_s0] sm:$0xff] }
  0x15   :  { %354 = vmatpush3.bf16.msra.mxu0 %v353_v3 }
  0x16   :  { %356 = vmatprep.subr.bf16.mxu0 %v355_v5 }
  0x17   :  { %386 = vmatpush3.bf16.msra.mxu1 %v385_v4 }
  0x18   :  { %8 = vsyncpa [#allocation3], 0  ;;  %388 = vmatprep.subr.bf16.mxu1 %v387_v9  ;;  %v391_v23 = vpack.c.bf16 %v77_v15, %v76_v14  ;;  %v61_v24 = vld [vmem:[%s659_s1 + $0x168] sm:$0xff]  ;;  %v46_v25 = vld [vmem:[%s659_s1 + $0xf0] sm:$0xff]  ;;  %v95_v27 = vrot.slane %v15_v22, %v94_v13  ;;  %v88_v28 = vcombine.high %v15_v22, %v15_v22  ;;  %v361_v31 = vpack.c.bf16 %v29_v18, %v28_v17 }
  0x19   :  { %v47_v26 = vld [vmem:[%s659_s1 + $0xf8] sm:$0xff]  ;;  %v78_v29 = vld [vmem:[%s659_s1 + $0x1f0] sm:$0xff]  ;;  %358 = vmatpush3.bf16.msra.mxu0 %v357_v16  ;;  %v393_v34 = vpack.c.bf16 %v61_v24, %v60_v21  ;;  %v264_v45 = vld [vmem:[%s660_s2] ss:$0 sm:$0xff] }
  0x1a   :  { %v79_v30 = vld [vmem:[%s659_s1 + $0x1f8] sm:$0xff]  ;;  %v103_v32 = vcombine.high %v95_v27, %v95_v27  ;;  %v102_v33 = vrot.slane %v88_v28, %v94_v13  ;;  %360 = vmatprep.subr.bf16.mxu0 %v359_v20  ;;  %v363_v35 = vpack.c.bf16 %v47_v26, %v46_v25  ;;  %v30_v36 = vld [vmem:[%s659_s1 + $0x70] sm:$0xff] }
  0x1b   :  { %390 = vmatpush3.bf16.msra.mxu1 %v389_v19  ;;  %v31_v37 = vld [vmem:[%s659_s1 + $0x78] sm:$0xff]  ;;  %v395_v38 = vpack.c.bf16 %v79_v30, %v78_v29  ;;  %v62_v39 = vld [vmem:[%s659_s1 + $0x170] sm:$0xff] }
  0x1c   :  { %392 = vmatprep.subr.bf16.mxu1 %v391_v23  ;;  %v63_v40 = vld [vmem:[%s659_s1 + $0x178] sm:$0xff]  ;;  %173 = vmatprep.mubr.f32.mxu0 %v103_v32  ;;  %v104_v41 = vcombine.high %v102_v33, %v102_v33  ;;  %v365_v42 = vpack.c.bf16 %v31_v37, %v30_v36  ;;  %s427_s1 = smov [#allocation2]  }
  0x1d   :  { %362 = vmatpush3.bf16.msra.mxu0 %v361_v31  ;;  %v397_v43 = vpack.c.bf16 %v63_v40, %v62_v39  ;;  %s256_s8 = sshll.u32 %s427_s1, 4  ;;  %s257_s8 = int_to_ptr.vmem [resolvable:$true] %s256_s8 }
  0x1e   :  { %243 = vmatprep.mubr.f32.mxu1 %v104_v41  ;;  %364 = vmatprep.subr.bf16.mxu0 %v363_v35  ;;  %s402_s9 = scalar_lea.vmem %s257_s8, 32  ;;  %p407_p1 = scmp.lt.s32.totalorder %s257_s8, %s257_s8 }
  0x1f   :  { %394 = vmatpush3.bf16.msra.mxu1 %v393_v34  ;;  %p403_p0 = scmp.ne.s32.totalorder %s257_s8, %s402_s9  ;;  %p408_p2 = scmp.lt.s32.totalorder %s402_s9, %s402_s9 }
  0x20   :  { %396 = vmatprep.subr.bf16.mxu1 %v395_v38 }
  0x21   :  { %366 = vmatpush3.bf16.msra.mxu0 %v365_v42  ;;  %p409_p3 = por %p408_p2, %p407_p1 }
  0x23   :  { %398 = vmatpush3.bf16.msra.mxu1 %v397_v43  ;;  %p410_p4 = pnand %p409_p3, %p403_p0 }
  0x24   :  { %174 = vmatmul.mubr.f32.vlgmr.msra.gmra.mrb[0].mxu0 %v95_v27 }
  0x26   :  { %244 = vmatmul.mubr.f32.vlgmr.msra.gmra.mrb[0].mxu1 %v102_v33 }
  0xf7   :  { %v297_v44 = vpop.f32.mrb[0].mxu0 }
  0xf8   :  { %v298_v46 = vpop.f32.mrb[1].mxu0 }
  0xf9   :  { %v332_v47 = vpop.f32.mrb[0].mxu1  ;;  %v299_v48 = vadd.f32 %v298_v46, %v297_v44 }
  0xfa   :  { %v333_v49 = vpop.f32.mrb[1].mxu1 }
  0xfb   :  { %v334_v50 = vadd.f32 %v333_v49, %v332_v47  ;;  %v176_v51 = vadd.f32 %v299_v48, %v264_v45 }
  0xfd   :  { %v246_v52 = vadd.f32 %v334_v50, %v176_v51 }
  0xff   :  { %249 = vst [vmem:[#allocation2] sm:$0x3] %v246_v52 }
 0x100   :  { %413 = shalt.err (!%p410_p4)
}
 0x101   :  { %s414_s11 = scalar_lea.hbm %s661_s3, 32 }
 0x102   :  { %p415_p5 = scmp.ne.s32.totalorder %s661_s3, %s414_s11  ;;  %p418_p6 = scmp.lt.u32.totalorder %s414_s11, %s661_s3 }
 0x104   :  { %p420_p7 = pnand %p418_p6, %p415_p5 }
 0x106   :  { %423 = shalt.err (!%p420_p7)
}
 0x107   :  { %259 = dma.vmem_to_hbm [thread:$0]  %s257_s8, 32, %s661_s3, [#allocation3]  }
 0x108   :  { %424 = dma.done.wait [#allocation3], 32  }
 0x109   :  { %425 = vsyncadd [#allocation3], 4294967264 }
 0x10a   :  { %263 = vsyncpa [#allocation3], 1 }

// kernel: cnn_classify_forward.4
= control target key start
LH: loop header
LB: loop body
LE: loop exit
PB: predicated region body
PF: predicated region fallthrough
CT: control target
= control target key end

     0   :  { %s3989_s0 = inlined_call_operand.vmem [shape: bf16[2,8192], index: 0, kind: input, shape index: {}]   ;;  %s3990_s1 = inlined_call_operand.hbm [shape: bf16[8192,512], index: 1, kind: input, shape index: {}]   ;;  %s3991_s2 = inlined_call_operand.hbm [shape: f32[1,512], index: 2, kind: input, shape index: {}]   ;;  %s3992_s3 = inlined_call_operand.vmem [shape: f32[2,512], index: 3, kind: output, shape index: {}]  }
   0x1   :  { %3998 = sst [smem:[#allocation10_spill]] %s3990_s1 }
   0x2   :  { %8 = vsyncpa [#allocation4], 0 }
   0x3   :  { %10 = vsyncpa [#allocation4 + $0x1], 0 }
   0x4   :  { %11 = vsyncpa [#allocation6], 0 }
   0x5   :  { %13 = vsyncpa [#allocation6 + $0x1], 0  ;;  %s3393_s12 = smov 0   ;;  %s3395_s13 = smov 0  }
   0x6   :  { %s3397_s14 = smov 0   ;;  %s3399_s15 = smov 0  }
   0x7   :  { %s3401_s16 = smov 0   ;;  %s3403_s17 = smov 0  }
   0x8   :  { %s3405_s18 = smov 0   ;;  %s3407_s19 = smov 0  }
   0x9   :  { %s3409_s20 = smov 0   ;;  %s3411_s21 = smov 0  }
   0xa   :  { %s3413_s22 = smov 0  }
   0xb LB: > { %s28_s23 = sadd.s32 1, %s3355_s20  ;;  %s66_s24 = sadd.s32 1, %s3343_s17  ;;  %s3363_s22 = sphi %s3413_s22, %s19_s22   ;;  %s3359_s21 = sphi %s3411_s21, %s4024_s21   ;;  %s3355_s20 = sphi %s3409_s20, %s4023_s20   ;;  %s3351_s19 = sphi %s3407_s19, %s4022_s19   ;;  %s3347_s18 = sphi %s3405_s18, %s4021_s18   ;;  %s3343_s17 = sphi %s3403_s17, %s4020_s17   ;;  %s3339_s16 = sphi %s3401_s16, %s4019_s16   ;;  %s3335_s15 = sphi %s3399_s15, %s4018_s15   ;;  %s3331_s14 = sphi %s3397_s14, %s4017_s14   ;;  %s3327_s13 = sphi %s3395_s13, %s4016_s13   ;;  %s3323_s12 = sphi %s3393_s12, %s4015_s12  }
   0xc   : > { %p3450_p0 = scmp.ge.s32.totalorder %s28_s23, 4  ;;  %p73_p1 = scmp.ne.s32.totalorder %s3343_s17, %s3339_s16 }
   0xd   : > { %p3994_p2 = scmp.eq.s32.totalorder %s3363_s22, 0  ;;  %p3993_p4 = scmp.lt.s32.totalorder %s3363_s22, 8 }
   0xe   : > { %s4026_s23 = smov (%p3450_p0, %s28_s23), 0  ;;  %s163_s27 = sand.u32 1, %s3343_s17  }
   0xf   : > { %p75_p3 = por %p3994_p2, %p73_p1  ;;  %s61_s26 = ssub.s32 %s3355_s20, %s4026_s23 }
  0x10   : > { %s2415_s28 = sshll.u32 %s163_s27, 11  ;;  %s2417_s29 = sshll.u32 %s3359_s21, 1 }
  0x11   : > { %s2689_s30 = sshll.u32 %s3355_s20, 10  ;;  %s167_s4 = scalar_lea.vmem [#allocation3], %s2415_s28 }
  0x12   : > { %s177_s5 = sshll.u32 %s167_s4, 4  ;;  %s174_s6 = sadd.s32 %s2689_s30, %s2417_s29  ;;  %s3469_s5 = int_to_ptr.vmem [resolvable:$true] %s177_s5 }
  0x13   : > { %s2419_s7 = sshll.u32 %s174_s6, 6  ;;  %p3473_p5 = pnand %p3993_p4, %p75_p3 }
  0x14   : > { %s4001_s1 = sld [smem:[#allocation10_spill]]  ;;  %s3483_s28 = scalar_lea.sflag [#allocation4], %s163_s27 }
  0x15   : > { %p3211_p8 = pneg %p3473_p5 }
  0x1a   : > { %s3480_s11 = scalar_lea.hbm %s4001_s1, %s2419_s7  ;;  %s3214_s6 = scalar_lea.hbm %s4001_s1, 262144 }
  0x1b   : > { %s3209_s29 = scalar_lea.hbm %s3480_s11, 32768  ;;  %p3215_p11 = scmp.lt.u32.totalorder %s3480_s11, %s4001_s1 }
  0x1c   : > { %p3210_p7 = scmp.ne.s32.totalorder %s3480_s11, %s3209_s29  ;;  %p3216_p12 = scmp.lt.u32.totalorder %s3214_s6, %s3209_s29 }
  0x1d   : > { %p3218_p1 = scmp.lt.u32.totalorder %s3209_s29, %s3480_s11 }
  0x1e   : > { %p3212_p9 = pnand %p3211_p8, %p3210_p7  ;;  %p3217_p13 = por %p3216_p12, %p3215_p11 }
  0x20   : > { %p3213_p10 = pneg %p3212_p9  ;;  %p3219_p3 = por %p3218_p1, %p3217_p13 }
  0x22   : > { %p3220_p4 = pnand %p3219_p3, %p3213_p10 }
  0x24   : > { %3223 = shalt.err (!%p3220_p4)
}
  0x25   : > { %s3224_s27 = scalar_lea.vmem %s3469_s5, 32768  ;;  %s3365_s10 = smov [#allocation3]  }
  0x26   : > { %p3225_p7 = scmp.ne.s32.totalorder %s3469_s5, %s3224_s27  ;;  %s3229_s30 = sshll.u32 %s3365_s10, 4  ;;  %s3230_s30 = int_to_ptr.vmem [resolvable:$false] %s3229_s30 }
  0x27   : > { %s3231_s4 = scalar_lea.vmem %s3230_s30, 65536  ;;  %p3232_p6 = scmp.lt.s32.totalorder %s3469_s5, %s3230_s30 }
  0x28   : > { %p3227_p9 = pnand %p3225_p7, %p3211_p8  ;;  %p3233_p11 = scmp.lt.s32.totalorder %s3231_s4, %s3224_s27 }
  0x2a   : > { %p3228_p2 = pneg %p3227_p9  ;;  %p3234_p12 = por %p3233_p11, %p3232_p6 }
  0x2c   : > { %p3235_p13 = pnand %p3234_p12, %p3228_p2 }
  0x2e   : > { %3238 = shalt.err (!%p3235_p13)
}
  0x2f   : > { %s3366_s29 = smov 256   ;;  %s3367_s6 = smov 128  }
  0x30   : > { %s3368_s7 = smov 8   ;;  %p204_p2 = scmp.lt.s32.totalorder %s3363_s22, 9 }
  0x31   : > { %2724 = dma.hbm_to_vmem [thread:$0]  (!%p3473_p5), %s3480_s11, 32768, %s3469_s5, %s3483_s28, %s3366_s29, %s3367_s6, %s3368_s7  }
  0x32   : > { %p4002_p4 = scmp.ge.s32.totalorder %s3363_s22, 1  ;;  %s2411_s27 = sadd.s32 4294967295, %s3363_s22  }
  0x33   : > { %s31_s10 = sadd.s32 1, %s3359_s21  ;;  %p79_p8 = scmp.ne.s32.totalorder %s3339_s16, %s3335_s15 }
  0x34   : > { %p3514_p6 = pnand %p4002_p4, %p204_p2  ;;  %s4028_s10 = smov (!%p3450_p0, %s31_s10), %s3359_s21 }
  0x35   : > { %p3525_p10 = scmp.eq.s32.totalorder %s2411_s27, 0  ;;  %p33_p5 = scmp.ge.s32.totalorder %s4028_s10, 2 }
  0x36   : > { %s92_s5 = sadd.s32 1, %s3331_s14  ;;  %p99_p3 = scmp.ne.s32.totalorder %s3331_s14, %s3327_s13 }
  0x37   : > { %p3532_p1 = por %p3525_p10, %p79_p8  ;;  %s4030_s10 = smov (%p33_p5, %s4028_s10), 0 }
  0x38   : > { %4006 = sst [smem:[#allocation9_spill]] %s4030_s10  ;;  %p4007_p0 = scmp.eq.s32.totalorder %s3363_s22, 0 }
  0x39   : > { %s4005_s11 = scalar_select %p3532_p1, 1, 0 }
  0x3a   : > { %p3542_p7 = por %p99_p3, %p4007_p0  ;;  %p105_p9 = scmp.ne.s32.totalorder %s3327_s13, %s3323_s12 }
  0x3b   : > { %s62_s25 = ssub.s32 %s3359_s21, %s4030_s10  ;;  %s187_s28 = sand.u32 1, %s3331_s14  }
  0x3c   : > { %s63_s30 = sor.u32 %s62_s25, %s61_s26  ;;  %p90_p11 = scmp.eq.s32.totalorder %s62_s25, 0 }
  0x3d   : > { %p64_p12 = scmp.eq.s32.totalorder %s63_s30, 0  ;;  %p3556_p13 = por %p105_p9, %p3525_p10 }
  0x3e   : > { %s3561_s29 = scalar_select %p90_p11, %s3331_s14, %s92_s5  }
  0x3f   : > { %s4009_s4 = scalar_select %p3556_p13, 1, 0 }
  0x40   : > { %s3566_s6 = scalar_select %p64_p12, %s3343_s17, %s66_s24  }
  0x41   : > { %s2420_s7 = sshll.u32 %s187_s28, 1  ;;  %s2690_s27 = sshll.u32 %s3359_s21, 5 }
  0x42   : > { %s3572_s10 = scalar_lea.hbm %s3991_s2, %s2690_s27  ;;  %s191_s26 = scalar_lea.vmem [#allocation5], %s2420_s7 }
  0x43   : > { %s199_s8 = sshll.u32 %s191_s26, 4  ;;  %p4010_p2 = scmp.lt.s32.totalorder %s3363_s22, 8  ;;  %s3574_s8 = int_to_ptr.vmem [resolvable:$true] %s199_s8 }
  0x44   : > { %s188_s5 = scalar_lea.sflag [#allocation6], %s187_s28  ;;  %s3239_s1 = scalar_lea.hbm %s3572_s10, 32 }
  0x45   : > { %p3580_p4 = pnand %p4010_p2, %p3542_p7  ;;  %p3240_p8 = scmp.ne.s32.totalorder %s3572_s10, %s3239_s1 }
  0x46   : > { %s3244_s15 = scalar_lea.hbm %s3991_s2, 64  ;;  %p3245_p0 = scmp.lt.u32.totalorder %s3572_s10, %s3991_s2 }
  0x47   : > { %p3241_p10 = pneg %p3580_p4  ;;  %p3246_p7 = scmp.lt.u32.totalorder %s3244_s15, %s3239_s1 }
  0x48   : > { %p3248_p11 = scmp.lt.u32.totalorder %s3239_s1, %s3572_s10 }
  0x49   : > { %p3242_p5 = pnand %p3241_p10, %p3240_p8  ;;  %p3247_p9 = por %p3246_p7, %p3245_p0 }
  0x4b   : > { %p3243_p3 = pneg %p3242_p5  ;;  %p3249_p12 = por %p3248_p11, %p3247_p9 }
  0x4d   : > { %p3250_p2 = pnand %p3249_p12, %p3243_p3 }
  0x4f   : > { %3253 = shalt.err (!%p3250_p2)
}
  0x50   : > { %s3254_s28 = scalar_lea.vmem %s3574_s8, 32  ;;  %s3369_s12 = smov [#allocation5]  }
  0x51   : > { %p3255_p8 = scmp.ne.s32.totalorder %s3574_s8, %s3254_s28  ;;  %s3259_s26 = sshll.u32 %s3369_s12, 4  ;;  %s3260_s26 = int_to_ptr.vmem [resolvable:$false] %s3259_s26 }
  0x52   : > { %s3261_s25 = scalar_lea.vmem %s3260_s26, 64  ;;  %p3262_p1 = scmp.lt.s32.totalorder %s3574_s8, %s3260_s26 }
  0x53   : > { %p3257_p5 = pnand %p3255_p8, %p3241_p10  ;;  %p3263_p0 = scmp.lt.s32.totalorder %s3261_s25, %s3254_s28 }
  0x55   : > { %p3258_p13 = pneg %p3257_p5  ;;  %p3264_p7 = por %p3263_p0, %p3262_p1 }
  0x57   : > { %p3265_p9 = pnand %p3264_p7, %p3258_p13 }
  0x59   : > { %3268 = shalt.err (!%p3265_p9)
}
  0x5a   : > { %2727 = dma.hbm_to_vmem [thread:$0]  (!%p3580_p4), %s3572_s10, 32, %s3574_s8, %s188_s5  }
  0x5b   : > { %208 = sbr.rel (%p3514_p6) target bundleno = 607 (0x25f), region = 32  ;;  %s210_s1 = sand.u32 (!%p3514_p6), 1, %s3339_s16  }
  0x5c   : > { %s2424_s30 = sshll.u32 (!%p3514_p6), %s210_s1, 11  ;;  %s211_s15 = scalar_lea.sflag (!%p3514_p6), [#allocation4], %s210_s1 }
  0x5d   : > { %s3612_s7 = scalar_lea.vmem (!%p3514_p6), [#allocation3], %s2424_s30  ;;  %p4012_p10 = scmp.ne.s32.totalorder (!%p3514_p6), %s4005_s11, 0 }
  0x62   : > { %3314 = dma.done.wait (%p4012_p10), %s211_s15, 32768  }
  0x63   : > { %3316 = vsyncadd (%p4012_p10), %s211_s15, 4294934528  ;;  %s219_s24 = sand.u32 1, %s3327_s13   ;;  %p4013_p6 = scmp.ne.s32.totalorder %s4009_s4, 0 }
  0x64   : > { %s3619_s27 = sshll.u32 %s219_s24, 1  ;;  %s220_s9 = scalar_lea.sflag [#allocation6], %s219_s24 }
  0x65   : > { %s223_s10 = scalar_lea.vmem [#allocation5], %s3619_s27 }
  0x66   : > { %3318 = dma.done.wait (%p4013_p6), %s220_s9, 32  }
  0x67   : > { %3320 = vsyncadd (%p4013_p6), %s220_s9, 4294967264  ;;  %s2426_s8 = sshll.u32 %s3347_s18, 4  ;;  %s2427_s5 = sshll.u32 %s3351_s19, 1 }
  0x68   : > { %p256_p1 = scmp.lt.s32.totalorder %s2426_s8, 63  ;;  %p264_p13 = scmp.lt.s32.totalorder %s2427_s5, 3 }
  0x69   : > { %p2429_p4 = scmp.ne.s32.totalorder %s3347_s18, 0 }
  0x6a   : > { %s4032_s8 = smov (!%p256_p1, %s2426_s8), 63  ;;  %s4034_s5 = smov (!%p264_p13, %s2427_s5), 3 }
  0x6b   : > { %s3631_s12 = scalar_lea.vmem %s3989_s0, %s4032_s8  ;;  %s2428_s26 = sshll.u32 %s4034_s5, 1  ;;  %v3370_v0 = vmov (!%p2429_p4), 0.0  }
  0x6c   : > { %s3636_s30 = scalar_lea.vmem %s3992_s3, %s2428_s26  ;;  %272 = sbr.rel (%p2429_p4) target bundleno = 115 (0x73), region = 44  ;;  %273 = vst [vmem:[#allocation2] sm:$0xf] (!%p2429_p4), %v3370_v0 }
  0x73 PF: > { %v2823_v1 = vld [vmem:[%s3612_s7 + $0x4] ss:$8 sps:$4 sm:$0xff]   ;;  %v2827_v3 = vld [vmem:[%s3612_s7] ss:$8 sps:$4 sm:$0xff]   ;;  %v2829_v5 = vld [vmem:[%s3612_s7 + $0x14] ss:$8 sps:$4 sm:$0xff]   ;;  %v539_v39 = vlaneseq }
  0x74   : > { %v2825_v2 = vld [vmem:[%s3612_s7 + $0x404] ss:$8 sps:$4 sm:$0xff]   ;;  %1929 = vmatprep.subr.bf16.mxu1 %v2823_v1  ;;  %v2828_v4 = vld [vmem:[%s3612_s7 + $0x400] ss:$8 sps:$4 sm:$0xff]   ;;  %v2831_v6 = vld [vmem:[%s3612_s7 + $0x414] ss:$8 sps:$4 sm:$0xff]  }
  0x75   : > { %2093 = vmatprep.subr.bf16.mxu0 %v2825_v2  ;;  %1930 = vmatpush1.bf16.msra.mxu1 %v2827_v3  ;;  %v2833_v7 = vld [vmem:[%s3612_s7 + $0x10] ss:$8 sps:$4 sm:$0xff]   ;;  %v2835_v9 = vld [vmem:[%s3612_s7 + $0x24] ss:$8 sps:$4 sm:$0xff]   ;;  %v2839_v11 = vld [vmem:[%s3612_s7 + $0x20] ss:$8 sps:$4 sm:$0xff]  }
  0x76   : > { %2094 = vmatpush1.bf16.msra.mxu0 %v2828_v4  ;;  %1931 = vmatprep.subr.bf16.mxu1 %v2829_v5  ;;  %v2834_v8 = vld [vmem:[%s3612_s7 + $0x410] ss:$8 sps:$4 sm:$0xff]   ;;  %v2837_v10 = vld [vmem:[%s3612_s7 + $0x424] ss:$8 sps:$4 sm:$0xff]   ;;  %v2840_v12 = vld [vmem:[%s3612_s7 + $0x420] ss:$8 sps:$4 sm:$0xff]  }
  0x77   : > { %2095 = vmatprep.subr.bf16.mxu0 %v2831_v6  ;;  %v2841_v13 = vld [vmem:[%s3612_s7 + $0x34] ss:$8 sps:$4 sm:$0xff]   ;;  %v2845_v15 = vld [vmem:[%s3612_s7 + $0x30] ss:$8 sps:$4 sm:$0xff]   ;;  %v2847_v17 = vld [vmem:[%s3612_s7 + $0x44] ss:$8 sps:$4 sm:$0xff]  }
  0x78   : > { %v2843_v14 = vld [vmem:[%s3612_s7 + $0x434] ss:$8 sps:$4 sm:$0xff]   ;;  %v2846_v16 = vld [vmem:[%s3612_s7 + $0x430] ss:$8 sps:$4 sm:$0xff]   ;;  %v2849_v18 = vld [vmem:[%s3612_s7 + $0x444] ss:$8 sps:$4 sm:$0xff]  }
  0x79   : > { %1932 = vmatpush1.bf16.msra.mxu1 %v2833_v7  ;;  %v2851_v19 = vld [vmem:[%s3612_s7 + $0x40] ss:$8 sps:$4 sm:$0xff]   ;;  %v2853_v21 = vld [vmem:[%s3612_s7 + $0x54] ss:$8 sps:$4 sm:$0xff]   ;;  %v2857_v23 = vld [vmem:[%s3612_s7 + $0x50] ss:$8 sps:$4 sm:$0xff]  }
  0x7a   : > { %2096 = vmatpush1.bf16.msra.mxu0 %v2834_v8  ;;  %1933 = vmatprep.subr.bf16.mxu1 %v2835_v9  ;;  %v2852_v20 = vld [vmem:[%s3612_s7 + $0x440] ss:$8 sps:$4 sm:$0xff]   ;;  %v2855_v22 = vld [vmem:[%s3612_s7 + $0x454] ss:$8 sps:$4 sm:$0xff]   ;;  %v2858_v24 = vld [vmem:[%s3612_s7 + $0x450] ss:$8 sps:$4 sm:$0xff]  }
  0x7b   : > { %2097 = vmatprep.subr.bf16.mxu0 %v2837_v10  ;;  %v2859_v25 = vld [vmem:[%s3612_s7 + $0x64] ss:$8 sps:$4 sm:$0xff]   ;;  %v2863_v27 = vld [vmem:[%s3612_s7 + $0x60] ss:$8 sps:$4 sm:$0xff]   ;;  %v2865_v29 = vld [vmem:[%s3612_s7 + $0x74] ss:$8 sps:$4 sm:$0xff]  }
  0x7c   : > { %v2861_v26 = vld [vmem:[%s3612_s7 + $0x464] ss:$8 sps:$4 sm:$0xff]   ;;  %v2864_v28 = vld [vmem:[%s3612_s7 + $0x460] ss:$8 sps:$4 sm:$0xff]   ;;  %v2867_v30 = vld [vmem:[%s3612_s7 + $0x474] ss:$8 sps:$4 sm:$0xff]  }
  0x7d   : > { %1934 = vmatpush1.bf16.msra.mxu1 %v2839_v11  ;;  %v2869_v31 = vld [vmem:[%s3612_s7 + $0x70] ss:$8 sps:$4 sm:$0xff]   ;;  %v2871_v33 = vld [vmem:[%s3612_s7 + $0x84] ss:$8 sps:$4 sm:$0xff]   ;;  %v2875_v35 = vld [vmem:[%s3612_s7 + $0x80] ss:$8 sps:$4 sm:$0xff]  }
  0x7e   : > { %2098 = vmatpush1.bf16.msra.mxu0 %v2840_v12  ;;  %1935 = vmatprep.subr.bf16.mxu1 %v2841_v13  ;;  %v2870_v32 = vld [vmem:[%s3612_s7 + $0x470] ss:$8 sps:$4 sm:$0xff]   ;;  %v2873_v34 = vld [vmem:[%s3612_s7 + $0x484] ss:$8 sps:$4 sm:$0xff]   ;;  %v2876_v36 = vld [vmem:[%s3612_s7 + $0x480] ss:$8 sps:$4 sm:$0xff]  }
  0x7f   : > { %2099 = vmatprep.subr.bf16.mxu0 %v2843_v14  ;;  %v3371_v37 = vmov 1966171168   ;;  %v2877_v40 = vld [vmem:[%s3612_s7 + $0x94] ss:$8 sps:$4 sm:$0xff]   ;;  %v2881_v42 = vld [vmem:[%s3612_s7 + $0x90] ss:$8 sps:$4 sm:$0xff]  }
  0x80   : > { %v537_v38 = vunpack.c.l.s4 %v3371_v37  ;;  %v2879_v41 = vld [vmem:[%s3612_s7 + $0x494] ss:$8 sps:$4 sm:$0xff]   ;;  %v3678_v44 = vshrl.u32 %v539_v39, 7  ;;  %v2882_v45 = vld [vmem:[%s3612_s7 + $0x490] ss:$8 sps:$4 sm:$0xff]   ;;  %v276_v57 = vld [vmem:[%s3631_s12 + $0x8] sm:$0xff] }
  0x81   : > { %1936 = vmatpush1.bf16.msra.mxu1 %v2845_v15  ;;  %v2883_v46 = vld [vmem:[%s3612_s7 + $0xa4] ss:$8 sps:$4 sm:$0xff]   ;;  %v2887_v48 = vld [vmem:[%s3612_s7 + $0xa0] ss:$8 sps:$4 sm:$0xff]   ;;  %v2889_v51 = vld [vmem:[%s3612_s7 + $0xb4] ss:$8 sps:$4 sm:$0xff]   ;;  %v584_v14 = vcombine.high %v276_v57, %v276_v57 }
  0x82   : > { %2100 = vmatpush1.bf16.msra.mxu0 %v2846_v16  ;;  %1937 = vmatprep.subr.bf16.mxu1 %v2847_v17  ;;  %v538_v43 = vunpack.c.0.s8 %v537_v38  ;;  %v2885_v47 = vld [vmem:[%s3612_s7 + $0x4a4] ss:$8 sps:$4 sm:$0xff]   ;;  %v2888_v49 = vld [vmem:[%s3612_s7 + $0x4a0] ss:$8 sps:$4 sm:$0xff]   ;;  %v2891_v52 = vld [vmem:[%s3612_s7 + $0x4b4] ss:$8 sps:$4 sm:$0xff]  }
  0x83   : > { %2101 = vmatprep.subr.bf16.mxu0 %v2849_v18  ;;  %v275_v53 = vld [vmem:[%s3631_s12] sm:$0xff]  ;;  %v2893_v54 = vld [vmem:[%s3612_s7 + $0xb0] ss:$8 sps:$4 sm:$0xff]   ;;  %v2895_v58 = vld [vmem:[%s3612_s7 + $0xc4] ss:$8 sps:$4 sm:$0xff]   ;;  %p2686_p3 = scmp.ne.s32.totalorder %s3347_s18, 3 }
  0x84   : > { %v3686_v50 = vsub.s32 %v538_v43, %v3678_v44  ;;  %v2894_v56 = vld [vmem:[%s3612_s7 + $0x4b0] ss:$8 sps:$4 sm:$0xff]   ;;  %v2897_v59 = vld [vmem:[%s3612_s7 + $0x4c4] ss:$8 sps:$4 sm:$0xff]   ;;  %v2899_v0 = vld [vmem:[%s3612_s7 + $0xc0] ss:$8 sps:$4 sm:$0xff]   ;;  %v535_v13 = vcombine.high %v275_v53, %v275_v53 }
  0x85   : > { %1938 = vmatpush1.bf16.msra.mxu1 %v2851_v19  ;;  %v2900_v1 = vld [vmem:[%s3612_s7 + $0x4c0] ss:$8 sps:$4 sm:$0xff]   ;;  %v2901_v2 = vld [vmem:[%s3612_s7 + $0xd4] ss:$8 sps:$4 sm:$0xff]   ;;  %v2905_v5 = vld [vmem:[%s3612_s7 + $0xd0] ss:$8 sps:$4 sm:$0xff]  }
  0x86   : > { %2102 = vmatpush1.bf16.msra.mxu0 %v2852_v20  ;;  %1939 = vmatprep.subr.bf16.mxu1 %v2853_v21  ;;  %v542_v55 = vrot.slane %v275_v53, %v3686_v50  ;;  %v591_v61 = vrot.slane %v276_v57, %v3686_v50  ;;  %v2903_v3 = vld [vmem:[%s3612_s7 + $0x4d4] ss:$8 sps:$4 sm:$0xff]   ;;  %v2906_v6 = vld [vmem:[%s3612_s7 + $0x4d0] ss:$8 sps:$4 sm:$0xff]   ;;  %v2907_v7 = vld [vmem:[%s3612_s7 + $0xe4] ss:$8 sps:$4 sm:$0xff]   ;;  %v549_v19 = vrot.slane %v535_v13, %v3686_v50 }
  0x87   : > { %2103 = vmatprep.subr.bf16.mxu0 %v2855_v22  ;;  %v2909_v8 = vld [vmem:[%s3612_s7 + $0x4e4] ss:$8 sps:$4 sm:$0xff]   ;;  %v2911_v9 = vld [vmem:[%s3612_s7 + $0xe0] ss:$8 sps:$4 sm:$0xff]   ;;  %v2913_v11 = vld [vmem:[%s3612_s7 + $0xf4] ss:$8 sps:$4 sm:$0xff]   ;;  %v598_v20 = vrot.slane %v584_v14, %v3686_v50 }
  0x88   : > { %v550_v60 = vcombine.high %v542_v55, %v542_v55  ;;  %v599_v63 = vcombine.high %v591_v61, %v591_v61  ;;  %v2912_v10 = vld [vmem:[%s3612_s7 + $0x4e0] ss:$8 sps:$4 sm:$0xff]   ;;  %v2915_v12 = vld [vmem:[%s3612_s7 + $0x4f4] ss:$8 sps:$4 sm:$0xff]   ;;  %v2917_v15 = vld [vmem:[%s3612_s7 + $0xf0] ss:$8 sps:$4 sm:$0xff]   ;;  %v3722_v21 = vrot.slane %v542_v55, %v3686_v50  ;;  %v3725_v22 = vrot.slane %v591_v61, %v3686_v50 }
  0x89   : > { %1940 = vmatpush1.bf16.msra.mxu1 %v2857_v23  ;;  %v2918_v16 = vld [vmem:[%s3612_s7 + $0x4f0] ss:$8 sps:$4 sm:$0xff]   ;;  %v2922_v17 = vld [vmem:[%s3612_s7 + $0x104] ss:$8 sps:$4 sm:$0xff]   ;;  %v551_v23 = vcombine.high %v549_v19, %v549_v19  ;;  %v2933_v39 = vld [vmem:[%s3612_s7 + $0x120] ss:$8 sps:$4 sm:$0xff]  }
  0x8a   : > { %2104 = vmatpush1.bf16.msra.mxu0 %v2858_v24  ;;  %1941 = vmatprep.subr.bf16.mxu1 %v2859_v25  ;;  %v3699_v62 = vrot.slane %v550_v60, %v3686_v50  ;;  %v621_v4 = vrot.slane %v599_v63, %v3686_v50  ;;  %v2926_v18 = vld [vmem:[%s3612_s7 + $0x504] ss:$8 sps:$4 sm:$0xff]   ;;  %v600_v24 = vcombine.high %v598_v20, %v598_v20  ;;  %v2920_v25 = vld [vmem:[%s3612_s7 + $0x100] ss:$8 sps:$4 sm:$0xff]   ;;  %v2939_v43 = vld [vmem:[%s3612_s7 + $0x130] ss:$8 sps:$4 sm:$0xff]  }
  0x8b   : > { %2105 = vmatprep.subr.bf16.mxu0 %v2861_v26  ;;  %v2924_v26 = vld [vmem:[%s3612_s7 + $0x500] ss:$8 sps:$4 sm:$0xff]   ;;  %v2935_v37 = vld [vmem:[%s3612_s7 + $0x124] ss:$8 sps:$4 sm:$0xff]   ;;  %v2954_v53 = vld [vmem:[%s3612_s7 + $0x550] ss:$8 sps:$4 sm:$0xff]  }
  0x8c   : > { %1961 = vmatprep.mubr.bf16.mxu1 %v3699_v62  ;;  %2125 = vmatprep.mubr.bf16.mxu0 %v621_v4  ;;  %v2938_v38 = vld [vmem:[%s3612_s7 + $0x524] ss:$8 sps:$4 sm:$0xff]   ;;  %v2960_v57 = vld [vmem:[%s3612_s7 + $0x560] ss:$8 sps:$4 sm:$0xff]   ;;  %v2963_v60 = vld [vmem:[%s3612_s7 + $0x170] ss:$8 sps:$4 sm:$0xff]  }
  0x8d   : > { %1942 = vmatpush1.bf16.msra.mxu1 %v2863_v27  ;;  %v2929_v27 = vld [vmem:[%s3612_s7 + $0x114] ss:$8 sps:$4 sm:$0xff]   ;;  %v2962_v55 = vld [vmem:[%s3612_s7 + $0x564] ss:$8 sps:$4 sm:$0xff]   ;;  %v2966_v61 = vld [vmem:[%s3612_s7 + $0x570] ss:$8 sps:$4 sm:$0xff]  }
  0x8e   : > { %2106 = vmatpush1.bf16.msra.mxu0 %v2864_v28  ;;  %1943 = vmatprep.subr.bf16.mxu1 %v2865_v29  ;;  %v2932_v28 = vld [vmem:[%s3612_s7 + $0x514] ss:$8 sps:$4 sm:$0xff]   ;;  %v3732_v29 = vrot.slane %v551_v23, %v3686_v50  ;;  %v2974_v63 = vld [vmem:[%s3612_s7 + $0x584] ss:$8 sps:$4 sm:$0xff]   ;;  %v2990_v13 = vld [vmem:[%s3612_s7 + $0x5b0] ss:$8 sps:$4 sm:$0xff]  }
  0x8f   : > { %2107 = vmatprep.subr.bf16.mxu0 %v2867_v30  ;;  %v3735_v30 = vrot.slane %v600_v24, %v3686_v50  ;;  %v2995_v14 = vld [vmem:[%s3612_s7 + $0x1c4] ss:$8 sps:$4 sm:$0xff]   ;;  %v3002_v23 = vld [vmem:[%s3612_s7 + $0x5d0] ss:$8 sps:$4 sm:$0xff]  }
  0x90   : > { %v3007_v24 = vld [vmem:[%s3612_s7 + $0x1e4] ss:$8 sps:$4 sm:$0xff]  }
  0x91   : > { %1944 = vmatpush1.bf16.msra.mxu1 %v2869_v31  ;;  %v3738_v31 = vrot.slane %v549_v19, %v3686_v50  ;;  %v3004_v19 = vld [vmem:[%s3612_s7 + $0x5d4] ss:$8 sps:$4 sm:$0xff]  }
  0x92   : > { %2108 = vmatpush1.bf16.msra.mxu0 %v2870_v32  ;;  %1945 = vmatprep.subr.bf16.mxu1 %v2871_v33  ;;  %v582_v32 = vcombine.high %v3699_v62, %v3699_v62  ;;  %v631_v33 = vcombine.high %v621_v4, %v621_v4  ;;  %v2971_v62 = vld [vmem:[%s3612_s7 + $0x184] ss:$8 sps:$4 sm:$0xff]   ;;  %v2975_v4 = vld [vmem:[%s3612_s7 + $0x190] ss:$8 sps:$4 sm:$0xff]  }
  0x93   : > { %2109 = vmatprep.subr.bf16.mxu0 %v2873_v34  ;;  %v3743_v34 = vrot.slane %v598_v20, %v3686_v50  ;;  %v2953_v50 = vld [vmem:[%s3612_s7 + $0x154] ss:$8 sps:$4 sm:$0xff]   ;;  %v2999_v20 = vld [vmem:[%s3612_s7 + $0x1d0] ss:$8 sps:$4 sm:$0xff]  }
  0x95   : > { %1946 = vmatpush1.bf16.msra.mxu1 %v2875_v35  ;;  %v2927_v35 = vld [vmem:[%s3612_s7 + $0x110] ss:$8 sps:$4 sm:$0xff]  }
  0x96   : > { %2110 = vmatpush1.bf16.msra.mxu0 %v2876_v36  ;;  %1947 = vmatprep.subr.bf16.mxu1 %v2877_v40  ;;  %v2930_v36 = vld [vmem:[%s3612_s7 + $0x510] ss:$8 sps:$4 sm:$0xff]   ;;  %v2936_v40 = vld [vmem:[%s3612_s7 + $0x520] ss:$8 sps:$4 sm:$0xff]  }
  0x97   : > { %2111 = vmatprep.subr.bf16.mxu0 %v2879_v41  ;;  %v2941_v41 = vld [vmem:[%s3612_s7 + $0x134] ss:$8 sps:$4 sm:$0xff]  }
  0x99   : > { %1948 = vmatpush1.bf16.msra.mxu1 %v2881_v42  ;;  %v2944_v42 = vld [vmem:[%s3612_s7 + $0x534] ss:$8 sps:$4 sm:$0xff]  }
  0x9a   : > { %2112 = vmatpush1.bf16.msra.mxu0 %v2882_v45  ;;  %1949 = vmatprep.subr.bf16.mxu1 %v2883_v46  ;;  %v2942_v45 = vld [vmem:[%s3612_s7 + $0x530] ss:$8 sps:$4 sm:$0xff]   ;;  %v2947_v46 = vld [vmem:[%s3612_s7 + $0x144] ss:$8 sps:$4 sm:$0xff]  }
  0x9b   : > { %2113 = vmatprep.subr.bf16.mxu0 %v2885_v47  ;;  %v2950_v47 = vld [vmem:[%s3612_s7 + $0x544] ss:$8 sps:$4 sm:$0xff]  }
  0x9d   : > { %1950 = vmatpush1.bf16.msra.mxu1 %v2887_v48  ;;  %v2945_v48 = vld [vmem:[%s3612_s7 + $0x140] ss:$8 sps:$4 sm:$0xff]  }
  0x9e   : > { %2114 = vmatpush1.bf16.msra.mxu0 %v2888_v49  ;;  %1951 = vmatprep.subr.bf16.mxu1 %v2889_v51  ;;  %v2948_v49 = vld [vmem:[%s3612_s7 + $0x540] ss:$8 sps:$4 sm:$0xff]   ;;  %v2956_v51 = vld [vmem:[%s3612_s7 + $0x554] ss:$8 sps:$4 sm:$0xff]  }
  0x9f   : > { %2115 = vmatprep.subr.bf16.mxu0 %v2891_v52  ;;  %v2951_v52 = vld [vmem:[%s3612_s7 + $0x150] ss:$8 sps:$4 sm:$0xff]  }
  0xa1   : > { %1952 = vmatpush1.bf16.msra.mxu1 %v2893_v54  ;;  %v2959_v54 = vld [vmem:[%s3612_s7 + $0x164] ss:$8 sps:$4 sm:$0xff]  }
  0xa2   : > { %2116 = vmatpush1.bf16.msra.mxu0 %v2894_v56  ;;  %1953 = vmatprep.subr.bf16.mxu1 %v2895_v58  ;;  %v2957_v56 = vld [vmem:[%s3612_s7 + $0x160] ss:$8 sps:$4 sm:$0xff]   ;;  %v2965_v58 = vld [vmem:[%s3612_s7 + $0x174] ss:$8 sps:$4 sm:$0xff]  }
  0xa3   : > { %2117 = vmatprep.subr.bf16.mxu0 %v2897_v59  ;;  %v2968_v59 = vld [vmem:[%s3612_s7 + $0x574] ss:$8 sps:$4 sm:$0xff]  }
  0xa5   : > { %1954 = vmatpush1.bf16.msra.mxu1 %v2899_v0  ;;  %v2969_v0 = vld [vmem:[%s3612_s7 + $0x180] ss:$8 sps:$4 sm:$0xff]  }
  0xa6   : > { %2118 = vmatpush1.bf16.msra.mxu0 %v2900_v1  ;;  %1955 = vmatprep.subr.bf16.mxu1 %v2901_v2  ;;  %v2972_v1 = vld [vmem:[%s3612_s7 + $0x580] ss:$8 sps:$4 sm:$0xff]   ;;  %v2977_v2 = vld [vmem:[%s3612_s7 + $0x194] ss:$8 sps:$4 sm:$0xff]  }
  0xa7   : > { %2119 = vmatprep.subr.bf16.mxu0 %v2903_v3  ;;  %v2980_v3 = vld [vmem:[%s3612_s7 + $0x594] ss:$8 sps:$4 sm:$0xff]  }
  0xa9   : > { %1956 = vmatpush1.bf16.msra.mxu1 %v2905_v5  ;;  %v2978_v5 = vld [vmem:[%s3612_s7 + $0x590] ss:$8 sps:$4 sm:$0xff]  }
  0xaa   : > { %2120 = vmatpush1.bf16.msra.mxu0 %v2906_v6  ;;  %1957 = vmatprep.subr.bf16.mxu1 %v2907_v7  ;;  %v2983_v6 = vld [vmem:[%s3612_s7 + $0x1a4] ss:$8 sps:$4 sm:$0xff]  }
  0xab   : > { %2121 = vmatprep.subr.bf16.mxu0 %v2909_v8  ;;  %v2986_v7 = vld [vmem:[%s3612_s7 + $0x5a4] ss:$8 sps:$4 sm:$0xff]   ;;  %v2981_v8 = vld [vmem:[%s3612_s7 + $0x1a0] ss:$8 sps:$4 sm:$0xff]  }
  0xad   : > { %1958 = vmatpush1.bf16.msra.mxu1 %v2911_v9  ;;  %v2984_v9 = vld [vmem:[%s3612_s7 + $0x5a0] ss:$8 sps:$4 sm:$0xff]  }
  0xae   : > { %2122 = vmatpush1.bf16.msra.mxu0 %v2912_v10  ;;  %1959 = vmatprep.subr.bf16.mxu1 %v2913_v11  ;;  %v2989_v10 = vld [vmem:[%s3612_s7 + $0x1b4] ss:$8 sps:$4 sm:$0xff]  }
  0xaf   : > { %2123 = vmatprep.subr.bf16.mxu0 %v2915_v12  ;;  %v2992_v11 = vld [vmem:[%s3612_s7 + $0x5b4] ss:$8 sps:$4 sm:$0xff]   ;;  %v2987_v12 = vld [vmem:[%s3612_s7 + $0x1b0] ss:$8 sps:$4 sm:$0xff]  }
  0xb1   : > { %1960 = vmatpush1.bf16.msra.mxu1 %v2917_v15  ;;  %v2998_v15 = vld [vmem:[%s3612_s7 + $0x5c4] ss:$8 sps:$4 sm:$0xff]  }
  0xb2   : > { %2124 = vmatpush1.bf16.msra.mxu0 %v2918_v16  ;;  %1970 = vmatprep.subr.bf16.mxu1 %v2922_v17  ;;  %v2993_v16 = vld [vmem:[%s3612_s7 + $0x1c0] ss:$8 sps:$4 sm:$0xff]  }
  0xb3   : > { %2134 = vmatprep.subr.bf16.mxu0 %v2926_v18  ;;  %v2996_v17 = vld [vmem:[%s3612_s7 + $0x5c0] ss:$8 sps:$4 sm:$0xff]   ;;  %v3001_v18 = vld [vmem:[%s3612_s7 + $0x1d4] ss:$8 sps:$4 sm:$0xff]  }
  0xb4   : > { %1962 = vmatmul.mubr.bf16.vlgmr.msra.gmra.mrb[0].mxu1 %v3722_v21 }
  0xb5   : > { %2126 = vmatmul.mubr.bf16.vlgmr.msra.gmra.mrb[0].mxu0 %v3725_v22  ;;  %1971 = vmatpush1.bf16.msra.mxu1 %v2920_v25  ;;  %v3010_v25 = vld [vmem:[%s3612_s7 + $0x5e4] ss:$8 sps:$4 sm:$0xff]  }
  0xb6   : > { %2135 = vmatpush1.bf16.msra.mxu0 %v2924_v26  ;;  %1972 = vmatprep.subr.bf16.mxu1 %v2929_v27  ;;  %v3005_v26 = vld [vmem:[%s3612_s7 + $0x1e0] ss:$8 sps:$4 sm:$0xff]  }
  0xb7   : > { %2136 = vmatprep.subr.bf16.mxu0 %v2932_v28  ;;  %2002 = vmatprep.mubr.bf16.mxu1 %v582_v32  ;;  %v3008_v27 = vld [vmem:[%s3612_s7 + $0x5e0] ss:$8 sps:$4 sm:$0xff]   ;;  %v3013_v28 = vld [vmem:[%s3612_s7 + $0x1f4] ss:$8 sps:$4 sm:$0xff]  }
  0xb8   : > { %2166 = vmatprep.mubr.bf16.mxu0 %v631_v33  ;;  %v3016_v32 = vld [vmem:[%s3612_s7 + $0x5f4] ss:$8 sps:$4 sm:$0xff]   ;;  %v3011_v33 = vld [vmem:[%s3612_s7 + $0x1f0] ss:$8 sps:$4 sm:$0xff]  }
  0xb9   : > { %1973 = vmatpush1.bf16.msra.mxu1 %v2927_v35  ;;  %v3014_v35 = vld [vmem:[%s3612_s7 + $0x5f0] ss:$8 sps:$4 sm:$0xff]  }
  0xba   : > { %2137 = vmatpush1.bf16.msra.mxu0 %v2930_v36  ;;  %1974 = vmatprep.subr.bf16.mxu1 %v2935_v37  ;;  %v3019_v36 = vld [vmem:[%s3612_s7 + $0x204] ss:$8 sps:$4 sm:$0xff]  }
  0xbb   : > { %2138 = vmatprep.subr.bf16.mxu0 %v2938_v38  ;;  %v3022_v37 = vld [vmem:[%s3612_s7 + $0x604] ss:$8 sps:$4 sm:$0xff]   ;;  %v580_v38 = vcombine.high %v3722_v21, %v3722_v21  ;;  %v3023_v21 = vld [vmem:[%s3612_s7 + $0x210] ss:$8 sps:$4 sm:$0xff]  }
  0xbd   : > { %1975 = vmatpush1.bf16.msra.mxu1 %v2933_v39  ;;  %v629_v39 = vcombine.high %v3725_v22, %v3725_v22  ;;  %v3026_v22 = vld [vmem:[%s3612_s7 + $0x610] ss:$8 sps:$4 sm:$0xff]  }
  0xbe   : > { %2139 = vmatpush1.bf16.msra.mxu0 %v2936_v40  ;;  %1976 = vmatprep.subr.bf16.mxu1 %v2941_v41  ;;  %v3017_v40 = vld [vmem:[%s3612_s7 + $0x200] ss:$8 sps:$4 sm:$0xff]  }
  0xbf   : > { %2140 = vmatprep.subr.bf16.mxu0 %v2944_v42  ;;  %v3020_v41 = vld [vmem:[%s3612_s7 + $0x600] ss:$8 sps:$4 sm:$0xff]   ;;  %v3025_v42 = vld [vmem:[%s3612_s7 + $0x214] ss:$8 sps:$4 sm:$0xff]  }
  0xc1   : > { %1977 = vmatpush1.bf16.msra.mxu1 %v2939_v43  ;;  %v3028_v43 = vld [vmem:[%s3612_s7 + $0x614] ss:$8 sps:$4 sm:$0xff]  }
  0xc2   : > { %2141 = vmatpush1.bf16.msra.mxu0 %v2942_v45  ;;  %1978 = vmatprep.subr.bf16.mxu1 %v2947_v46  ;;  %v3031_v45 = vld [vmem:[%s3612_s7 + $0x224] ss:$8 sps:$4 sm:$0xff]  }
  0xc3   : > { %2142 = vmatprep.subr.bf16.mxu0 %v2950_v47  ;;  %v3034_v46 = vld [vmem:[%s3612_s7 + $0x624] ss:$8 sps:$4 sm:$0xff]   ;;  %v3029_v47 = vld [vmem:[%s3612_s7 + $0x220] ss:$8 sps:$4 sm:$0xff]  }
  0xc5   : > { %1979 = vmatpush1.bf16.msra.mxu1 %v2945_v48  ;;  %v3032_v48 = vld [vmem:[%s3612_s7 + $0x620] ss:$8 sps:$4 sm:$0xff]  }
  0xc6   : > { %2143 = vmatpush1.bf16.msra.mxu0 %v2948_v49  ;;  %1980 = vmatprep.subr.bf16.mxu1 %v2953_v50  ;;  %v3037_v49 = vld [vmem:[%s3612_s7 + $0x234] ss:$8 sps:$4 sm:$0xff]  }
  0xc7   : > { %2144 = vmatprep.subr.bf16.mxu0 %v2956_v51  ;;  %v3040_v50 = vld [vmem:[%s3612_s7 + $0x634] ss:$8 sps:$4 sm:$0xff]   ;;  %v3035_v51 = vld [vmem:[%s3612_s7 + $0x230] ss:$8 sps:$4 sm:$0xff]  }
  0xc9   : > { %1981 = vmatpush1.bf16.msra.mxu1 %v2951_v52  ;;  %v3038_v52 = vld [vmem:[%s3612_s7 + $0x630] ss:$8 sps:$4 sm:$0xff]  }
  0xca   : > { %2145 = vmatpush1.bf16.msra.mxu0 %v2954_v53  ;;  %1982 = vmatprep.subr.bf16.mxu1 %v2959_v54  ;;  %v3043_v53 = vld [vmem:[%s3612_s7 + $0x244] ss:$8 sps:$4 sm:$0xff]  }
  0xcb   : > { %2146 = vmatprep.subr.bf16.mxu0 %v2962_v55  ;;  %v3046_v54 = vld [vmem:[%s3612_s7 + $0x644] ss:$8 sps:$4 sm:$0xff]   ;;  %v3041_v55 = vld [vmem:[%s3612_s7 + $0x240] ss:$8 sps:$4 sm:$0xff]  }
  0xcd   : > { %1983 = vmatpush1.bf16.msra.mxu1 %v2957_v56  ;;  %v3044_v56 = vld [vmem:[%s3612_s7 + $0x640] ss:$8 sps:$4 sm:$0xff]  }
  0xce   : > { %2147 = vmatpush1.bf16.msra.mxu0 %v2960_v57  ;;  %1984 = vmatprep.subr.bf16.mxu1 %v2965_v58  ;;  %v3049_v57 = vld [vmem:[%s3612_s7 + $0x254] ss:$8 sps:$4 sm:$0xff]  }
  0xcf   : > { %2148 = vmatprep.subr.bf16.mxu0 %v2968_v59  ;;  %v3052_v58 = vld [vmem:[%s3612_s7 + $0x654] ss:$8 sps:$4 sm:$0xff]   ;;  %v3047_v59 = vld [vmem:[%s3612_s7 + $0x250] ss:$8 sps:$4 sm:$0xff]  }
  0xd1   : > { %1985 = vmatpush1.bf16.msra.mxu1 %v2963_v60  ;;  %v3050_v60 = vld [vmem:[%s3612_s7 + $0x650] ss:$8 sps:$4 sm:$0xff]  }
  0xd2   : > { %2149 = vmatpush1.bf16.msra.mxu0 %v2966_v61  ;;  %1986 = vmatprep.subr.bf16.mxu1 %v2971_v62  ;;  %v3055_v61 = vld [vmem:[%s3612_s7 + $0x264] ss:$8 sps:$4 sm:$0xff]  }
  0xd3   : > { %2150 = vmatprep.subr.bf16.mxu0 %v2974_v63  ;;  %v3058_v62 = vld [vmem:[%s3612_s7 + $0x664] ss:$8 sps:$4 sm:$0xff]   ;;  %v3053_v63 = vld [vmem:[%s3612_s7 + $0x260] ss:$8 sps:$4 sm:$0xff]  }
  0xd5   : > { %1987 = vmatpush1.bf16.msra.mxu1 %v2969_v0  ;;  %v3056_v0 = vld [vmem:[%s3612_s7 + $0x660] ss:$8 sps:$4 sm:$0xff]  }
  0xd6   : > { %2151 = vmatpush1.bf16.msra.mxu0 %v2972_v1  ;;  %1988 = vmatprep.subr.bf16.mxu1 %v2977_v2  ;;  %v3061_v1 = vld [vmem:[%s3612_s7 + $0x274] ss:$8 sps:$4 sm:$0xff]  }
  0xd7   : > { %2152 = vmatprep.subr.bf16.mxu0 %v2980_v3  ;;  %v3064_v2 = vld [vmem:[%s3612_s7 + $0x674] ss:$8 sps:$4 sm:$0xff]   ;;  %v3059_v3 = vld [vmem:[%s3612_s7 + $0x270] ss:$8 sps:$4 sm:$0xff]  }
  0xd9   : > { %1989 = vmatpush1.bf16.msra.mxu1 %v2975_v4  ;;  %v3062_v4 = vld [vmem:[%s3612_s7 + $0x670] ss:$8 sps:$4 sm:$0xff]  }
  0xda   : > { %2153 = vmatpush1.bf16.msra.mxu0 %v2978_v5  ;;  %1990 = vmatprep.subr.bf16.mxu1 %v2983_v6  ;;  %v3067_v5 = vld [vmem:[%s3612_s7 + $0x284] ss:$8 sps:$4 sm:$0xff]  }
  0xdb   : > { %2154 = vmatprep.subr.bf16.mxu0 %v2986_v7  ;;  %v3070_v6 = vld [vmem:[%s3612_s7 + $0x684] ss:$8 sps:$4 sm:$0xff]   ;;  %v3065_v7 = vld [vmem:[%s3612_s7 + $0x280] ss:$8 sps:$4 sm:$0xff]  }
  0xdd   : > { %1991 = vmatpush1.bf16.msra.mxu1 %v2981_v8  ;;  %v3068_v8 = vld [vmem:[%s3612_s7 + $0x680] ss:$8 sps:$4 sm:$0xff]  }
  0xde   : > { %2155 = vmatpush1.bf16.msra.mxu0 %v2984_v9  ;;  %1992 = vmatprep.subr.bf16.mxu1 %v2989_v10  ;;  %v3073_v9 = vld [vmem:[%s3612_s7 + $0x294] ss:$8 sps:$4 sm:$0xff]  }
  0xdf   : > { %2156 = vmatprep.subr.bf16.mxu0 %v2992_v11  ;;  %v3076_v10 = vld [vmem:[%s3612_s7 + $0x694] ss:$8 sps:$4 sm:$0xff]   ;;  %v3071_v11 = vld [vmem:[%s3612_s7 + $0x290] ss:$8 sps:$4 sm:$0xff]  }
  0xe1   : > { %1993 = vmatpush1.bf16.msra.mxu1 %v2987_v12  ;;  %v3074_v12 = vld [vmem:[%s3612_s7 + $0x690] ss:$8 sps:$4 sm:$0xff]  }
  0xe2   : > { %2157 = vmatpush1.bf16.msra.mxu0 %v2990_v13  ;;  %1994 = vmatprep.subr.bf16.mxu1 %v2995_v14  ;;  %v3079_v13 = vld [vmem:[%s3612_s7 + $0x2a4] ss:$8 sps:$4 sm:$0xff]  }
  0xe3   : > { %2158 = vmatprep.subr.bf16.mxu0 %v2998_v15  ;;  %v3082_v14 = vld [vmem:[%s3612_s7 + $0x6a4] ss:$8 sps:$4 sm:$0xff]   ;;  %v3077_v15 = vld [vmem:[%s3612_s7 + $0x2a0] ss:$8 sps:$4 sm:$0xff]  }
  0xe5   : > { %1995 = vmatpush1.bf16.msra.mxu1 %v2993_v16  ;;  %v3080_v16 = vld [vmem:[%s3612_s7 + $0x6a0] ss:$8 sps:$4 sm:$0xff]  }
  0xe6   : > { %2159 = vmatpush1.bf16.msra.mxu0 %v2996_v17  ;;  %1996 = vmatprep.subr.bf16.mxu1 %v3001_v18  ;;  %v3085_v17 = vld [vmem:[%s3612_s7 + $0x2b4] ss:$8 sps:$4 sm:$0xff]  }
  0xe7   : > { %2160 = vmatprep.subr.bf16.mxu0 %v3004_v19  ;;  %v3088_v18 = vld [vmem:[%s3612_s7 + $0x6b4] ss:$8 sps:$4 sm:$0xff]   ;;  %v3083_v19 = vld [vmem:[%s3612_s7 + $0x2b0] ss:$8 sps:$4 sm:$0xff]  }
  0xe9   : > { %1997 = vmatpush1.bf16.msra.mxu1 %v2999_v20  ;;  %v3086_v20 = vld [vmem:[%s3612_s7 + $0x6b0] ss:$8 sps:$4 sm:$0xff]  }
  0xea   : > { %2161 = vmatpush1.bf16.msra.mxu0 %v3002_v23  ;;  %1998 = vmatprep.subr.bf16.mxu1 %v3007_v24  ;;  %v3091_v23 = vld [vmem:[%s3612_s7 + $0x2c4] ss:$8 sps:$4 sm:$0xff]  }
  0xeb   : > { %2162 = vmatprep.subr.bf16.mxu0 %v3010_v25  ;;  %v3094_v24 = vld [vmem:[%s3612_s7 + $0x6c4] ss:$8 sps:$4 sm:$0xff]   ;;  %v3089_v25 = vld [vmem:[%s3612_s7 + $0x2c0] ss:$8 sps:$4 sm:$0xff]  }
  0xed   : > { %1999 = vmatpush1.bf16.msra.mxu1 %v3005_v26  ;;  %v3092_v26 = vld [vmem:[%s3612_s7 + $0x6c0] ss:$8 sps:$4 sm:$0xff]  }
  0xee   : > { %2163 = vmatpush1.bf16.msra.mxu0 %v3008_v27  ;;  %2000 = vmatprep.subr.bf16.mxu1 %v3013_v28  ;;  %v3097_v27 = vld [vmem:[%s3612_s7 + $0x2d4] ss:$8 sps:$4 sm:$0xff]  }
  0xef   : > { %2164 = vmatprep.subr.bf16.mxu0 %v3016_v32  ;;  %v3100_v28 = vld [vmem:[%s3612_s7 + $0x6d4] ss:$8 sps:$4 sm:$0xff]   ;;  %v3095_v32 = vld [vmem:[%s3612_s7 + $0x2d0] ss:$8 sps:$4 sm:$0xff]  }
  0xf1   : > { %2001 = vmatpush1.bf16.msra.mxu1 %v3011_v33  ;;  %v3098_v33 = vld [vmem:[%s3612_s7 + $0x6d0] ss:$8 sps:$4 sm:$0xff]  }
  0xf2   : > { %2165 = vmatpush1.bf16.msra.mxu0 %v3014_v35  ;;  %2011 = vmatprep.subr.bf16.mxu1 %v3019_v36  ;;  %v3103_v35 = vld [vmem:[%s3612_s7 + $0x2e4] ss:$8 sps:$4 sm:$0xff]  }
  0xf3   : > { %2175 = vmatprep.subr.bf16.mxu0 %v3022_v37  ;;  %v3106_v36 = vld [vmem:[%s3612_s7 + $0x6e4] ss:$8 sps:$4 sm:$0xff]   ;;  %v3101_v37 = vld [vmem:[%s3612_s7 + $0x2e0] ss:$8 sps:$4 sm:$0xff]  }
  0xf4   : > { %2003 = vmatmul.mubr.bf16.vlgmr.msra.gmra.mrb[0].mxu1 %v580_v38  ;;  %v3104_v38 = vld [vmem:[%s3612_s7 + $0x6e0] ss:$8 sps:$4 sm:$0xff]  }
  0xf5   : > { %2167 = vmatmul.mubr.bf16.vlgmr.msra.gmra.mrb[0].mxu0 %v629_v39  ;;  %2012 = vmatpush1.bf16.msra.mxu1 %v3017_v40  ;;  %v3109_v39 = vld [vmem:[%s3612_s7 + $0x2f4] ss:$8 sps:$4 sm:$0xff]  }
  0xf6   : > { %2176 = vmatpush1.bf16.msra.mxu0 %v3020_v41  ;;  %2013 = vmatprep.subr.bf16.mxu1 %v3025_v42  ;;  %v3112_v40 = vld [vmem:[%s3612_s7 + $0x6f4] ss:$8 sps:$4 sm:$0xff]   ;;  %v3107_v41 = vld [vmem:[%s3612_s7 + $0x2f0] ss:$8 sps:$4 sm:$0xff]  }
  0xf7   : > { %2177 = vmatprep.subr.bf16.mxu0 %v3028_v43  ;;  %2043 = vmatprep.mubr.bf16.mxu1 %v3732_v29  ;;  %v3110_v42 = vld [vmem:[%s3612_s7 + $0x6f0] ss:$8 sps:$4 sm:$0xff]   ;;  %v3115_v43 = vld [vmem:[%s3612_s7 + $0x304] ss:$8 sps:$4 sm:$0xff]  }
  0xf8   : > { %2207 = vmatprep.mubr.bf16.mxu0 %v3735_v30 }
  0xf9   : > { %2014 = vmatpush1.bf16.msra.mxu1 %v3023_v21  ;;  %v3118_v21 = vld [vmem:[%s3612_s7 + $0x704] ss:$8 sps:$4 sm:$0xff]  }
  0xfa   : > { %2178 = vmatpush1.bf16.msra.mxu0 %v3026_v22  ;;  %2015 = vmatprep.subr.bf16.mxu1 %v3031_v45  ;;  %v3113_v22 = vld [vmem:[%s3612_s7 + $0x300] ss:$8 sps:$4 sm:$0xff]  }
  0xfb   : > { %2179 = vmatprep.subr.bf16.mxu0 %v3034_v46  ;;  %v3116_v45 = vld [vmem:[%s3612_s7 + $0x700] ss:$8 sps:$4 sm:$0xff]   ;;  %v3121_v46 = vld [vmem:[%s3612_s7 + $0x314] ss:$8 sps:$4 sm:$0xff]  }
  0xfd   : > { %2016 = vmatpush1.bf16.msra.mxu1 %v3029_v47  ;;  %v3124_v47 = vld [vmem:[%s3612_s7 + $0x714] ss:$8 sps:$4 sm:$0xff]  }
  0xfe   : > { %2180 = vmatpush1.bf16.msra.mxu0 %v3032_v48  ;;  %2017 = vmatprep.subr.bf16.mxu1 %v3037_v49  ;;  %v583_v48 = vcombine.high %v3732_v29, %v3732_v29  ;;  %v632_v49 = vcombine.high %v3735_v30, %v3735_v30  ;;  %v3127_v29 = vld [vmem:[%s3612_s7 + $0x324] ss:$8 sps:$4 sm:$0xff]   ;;  %v3125_v30 = vld [vmem:[%s3612_s7 + $0x320] ss:$8 sps:$4 sm:$0xff]  }
  0xff   : > { %2181 = vmatprep.subr.bf16.mxu0 %v3040_v50  ;;  %v3119_v50 = vld [vmem:[%s3612_s7 + $0x310] ss:$8 sps:$4 sm:$0xff]  }
 0x101   : > { %2018 = vmatpush1.bf16.msra.mxu1 %v3035_v51  ;;  %v3122_v51 = vld [vmem:[%s3612_s7 + $0x710] ss:$8 sps:$4 sm:$0xff]  }
 0x102   : > { %2182 = vmatpush1.bf16.msra.mxu0 %v3038_v52  ;;  %2019 = vmatprep.subr.bf16.mxu1 %v3043_v53  ;;  %v3130_v52 = vld [vmem:[%s3612_s7 + $0x724] ss:$8 sps:$4 sm:$0xff]   ;;  %v3128_v53 = vld [vmem:[%s3612_s7 + $0x720] ss:$8 sps:$4 sm:$0xff]  }
 0x103   : > { %2183 = vmatprep.subr.bf16.mxu0 %v3046_v54  ;;  %v3133_v54 = vld [vmem:[%s3612_s7 + $0x334] ss:$8 sps:$4 sm:$0xff]  }
 0x105   : > { %2020 = vmatpush1.bf16.msra.mxu1 %v3041_v55  ;;  %v3136_v55 = vld [vmem:[%s3612_s7 + $0x734] ss:$8 sps:$4 sm:$0xff]  }
 0x106   : > { %2184 = vmatpush1.bf16.msra.mxu0 %v3044_v56  ;;  %2021 = vmatprep.subr.bf16.mxu1 %v3049_v57  ;;  %v3131_v56 = vld [vmem:[%s3612_s7 + $0x330] ss:$8 sps:$4 sm:$0xff]  }
 0x107   : > { %2185 = vmatprep.subr.bf16.mxu0 %v3052_v58  ;;  %v3134_v57 = vld [vmem:[%s3612_s7 + $0x730] ss:$8 sps:$4 sm:$0xff]   ;;  %v3139_v58 = vld [vmem:[%s3612_s7 + $0x344] ss:$8 sps:$4 sm:$0xff]  }
 0x109   : > { %2022 = vmatpush1.bf16.msra.mxu1 %v3047_v59  ;;  %v3142_v59 = vld [vmem:[%s3612_s7 + $0x744] ss:$8 sps:$4 sm:$0xff]  }
 0x10a   : > { %2186 = vmatpush1.bf16.msra.mxu0 %v3050_v60  ;;  %2023 = vmatprep.subr.bf16.mxu1 %v3055_v61  ;;  %v3137_v60 = vld [vmem:[%s3612_s7 + $0x340] ss:$8 sps:$4 sm:$0xff]  }
 0x10b   : > { %2187 = vmatprep.subr.bf16.mxu0 %v3058_v62  ;;  %v3140_v61 = vld [vmem:[%s3612_s7 + $0x740] ss:$8 sps:$4 sm:$0xff]   ;;  %v3145_v62 = vld [vmem:[%s3612_s7 + $0x354] ss:$8 sps:$4 sm:$0xff]  }
 0x10d   : > { %2024 = vmatpush1.bf16.msra.mxu1 %v3053_v63  ;;  %v3148_v63 = vld [vmem:[%s3612_s7 + $0x754] ss:$8 sps:$4 sm:$0xff]  }
 0x10e   : > { %2188 = vmatpush1.bf16.msra.mxu0 %v3056_v0  ;;  %2025 = vmatprep.subr.bf16.mxu1 %v3061_v1  ;;  %v3143_v0 = vld [vmem:[%s3612_s7 + $0x350] ss:$8 sps:$4 sm:$0xff]  }
 0x10f   : > { %2189 = vmatprep.subr.bf16.mxu0 %v3064_v2  ;;  %v3146_v1 = vld [vmem:[%s3612_s7 + $0x750] ss:$8 sps:$4 sm:$0xff]   ;;  %v3151_v2 = vld [vmem:[%s3612_s7 + $0x364] ss:$8 sps:$4 sm:$0xff]  }
 0x111   : > { %2026 = vmatpush1.bf16.msra.mxu1 %v3059_v3  ;;  %v3154_v3 = vld [vmem:[%s3612_s7 + $0x764] ss:$8 sps:$4 sm:$0xff]  }
 0x112   : > { %2190 = vmatpush1.bf16.msra.mxu0 %v3062_v4  ;;  %2027 = vmatprep.subr.bf16.mxu1 %v3067_v5  ;;  %v3149_v4 = vld [vmem:[%s3612_s7 + $0x360] ss:$8 sps:$4 sm:$0xff]  }
 0x113   : > { %2191 = vmatprep.subr.bf16.mxu0 %v3070_v6  ;;  %v3152_v5 = vld [vmem:[%s3612_s7 + $0x760] ss:$8 sps:$4 sm:$0xff]   ;;  %v3157_v6 = vld [vmem:[%s3612_s7 + $0x374] ss:$8 sps:$4 sm:$0xff]  }
 0x115   : > { %2028 = vmatpush1.bf16.msra.mxu1 %v3065_v7  ;;  %v3160_v7 = vld [vmem:[%s3612_s7 + $0x774] ss:$8 sps:$4 sm:$0xff]  }
 0x116   : > { %2192 = vmatpush1.bf16.msra.mxu0 %v3068_v8  ;;  %2029 = vmatprep.subr.bf16.mxu1 %v3073_v9  ;;  %v3155_v8 = vld [vmem:[%s3612_s7 + $0x370] ss:$8 sps:$4 sm:$0xff]  }
 0x117   : > { %2193 = vmatprep.subr.bf16.mxu0 %v3076_v10  ;;  %v3158_v9 = vld [vmem:[%s3612_s7 + $0x770] ss:$8 sps:$4 sm:$0xff]   ;;  %v3163_v10 = vld [vmem:[%s3612_s7 + $0x384] ss:$8 sps:$4 sm:$0xff]  }
 0x119   : > { %2030 = vmatpush1.bf16.msra.mxu1 %v3071_v11  ;;  %v3166_v11 = vld [vmem:[%s3612_s7 + $0x784] ss:$8 sps:$4 sm:$0xff]  }
 0x11a   : > { %2194 = vmatpush1.bf16.msra.mxu0 %v3074_v12  ;;  %2031 = vmatprep.subr.bf16.mxu1 %v3079_v13  ;;  %v3161_v12 = vld [vmem:[%s3612_s7 + $0x380] ss:$8 sps:$4 sm:$0xff]  }
 0x11b   : > { %2195 = vmatprep.subr.bf16.mxu0 %v3082_v14  ;;  %v3164_v13 = vld [vmem:[%s3612_s7 + $0x780] ss:$8 sps:$4 sm:$0xff]   ;;  %v3169_v14 = vld [vmem:[%s3612_s7 + $0x394] ss:$8 sps:$4 sm:$0xff]  }
 0x11d   : > { %2032 = vmatpush1.bf16.msra.mxu1 %v3077_v15  ;;  %v3172_v15 = vld [vmem:[%s3612_s7 + $0x794] ss:$8 sps:$4 sm:$0xff]  }
 0x11e   : > { %2196 = vmatpush1.bf16.msra.mxu0 %v3080_v16  ;;  %2033 = vmatprep.subr.bf16.mxu1 %v3085_v17  ;;  %v3167_v16 = vld [vmem:[%s3612_s7 + $0x390] ss:$8 sps:$4 sm:$0xff]  }
 0x11f   : > { %2197 = vmatprep.subr.bf16.mxu0 %v3088_v18  ;;  %v3170_v17 = vld [vmem:[%s3612_s7 + $0x790] ss:$8 sps:$4 sm:$0xff]   ;;  %v3175_v18 = vld [vmem:[%s3612_s7 + $0x3a4] ss:$8 sps:$4 sm:$0xff]  }
 0x121   : > { %2034 = vmatpush1.bf16.msra.mxu1 %v3083_v19  ;;  %v3178_v19 = vld [vmem:[%s3612_s7 + $0x7a4] ss:$8 sps:$4 sm:$0xff]  }
 0x122   : > { %2198 = vmatpush1.bf16.msra.mxu0 %v3086_v20  ;;  %2035 = vmatprep.subr.bf16.mxu1 %v3091_v23  ;;  %v3173_v20 = vld [vmem:[%s3612_s7 + $0x3a0] ss:$8 sps:$4 sm:$0xff]  }
 0x123   : > { %2199 = vmatprep.subr.bf16.mxu0 %v3094_v24  ;;  %v3176_v23 = vld [vmem:[%s3612_s7 + $0x7a0] ss:$8 sps:$4 sm:$0xff]   ;;  %v3181_v24 = vld [vmem:[%s3612_s7 + $0x3b4] ss:$8 sps:$4 sm:$0xff]  }
 0x125   : > { %2036 = vmatpush1.bf16.msra.mxu1 %v3089_v25  ;;  %v3184_v25 = vld [vmem:[%s3612_s7 + $0x7b4] ss:$8 sps:$4 sm:$0xff]  }
 0x126   : > { %2200 = vmatpush1.bf16.msra.mxu0 %v3092_v26  ;;  %2037 = vmatprep.subr.bf16.mxu1 %v3097_v27  ;;  %v3179_v26 = vld [vmem:[%s3612_s7 + $0x3b0] ss:$8 sps:$4 sm:$0xff]  }
 0x127   : > { %2201 = vmatprep.subr.bf16.mxu0 %v3100_v28  ;;  %v3182_v27 = vld [vmem:[%s3612_s7 + $0x7b0] ss:$8 sps:$4 sm:$0xff]   ;;  %v3187_v28 = vld [vmem:[%s3612_s7 + $0x3c4] ss:$8 sps:$4 sm:$0xff]  }
 0x129   : > { %2038 = vmatpush1.bf16.msra.mxu1 %v3095_v32  ;;  %v3190_v32 = vld [vmem:[%s3612_s7 + $0x7c4] ss:$8 sps:$4 sm:$0xff]  }
 0x12a   : > { %2202 = vmatpush1.bf16.msra.mxu0 %v3098_v33  ;;  %2039 = vmatprep.subr.bf16.mxu1 %v3103_v35  ;;  %v3185_v33 = vld [vmem:[%s3612_s7 + $0x3c0] ss:$8 sps:$4 sm:$0xff]  }
 0x12b   : > { %2203 = vmatprep.subr.bf16.mxu0 %v3106_v36  ;;  %v3188_v35 = vld [vmem:[%s3612_s7 + $0x7c0] ss:$8 sps:$4 sm:$0xff]   ;;  %v3193_v36 = vld [vmem:[%s3612_s7 + $0x3d4] ss:$8 sps:$4 sm:$0xff]  }
 0x12d   : > { %2040 = vmatpush1.bf16.msra.mxu1 %v3101_v37  ;;  %v3196_v37 = vld [vmem:[%s3612_s7 + $0x7d4] ss:$8 sps:$4 sm:$0xff]  }
 0x12e   : > { %2204 = vmatpush1.bf16.msra.mxu0 %v3104_v38  ;;  %2041 = vmatprep.subr.bf16.mxu1 %v3109_v39  ;;  %v3191_v38 = vld [vmem:[%s3612_s7 + $0x3d0] ss:$8 sps:$4 sm:$0xff]  }
 0x12f   : > { %2205 = vmatprep.subr.bf16.mxu0 %v3112_v40  ;;  %v3194_v39 = vld [vmem:[%s3612_s7 + $0x7d0] ss:$8 sps:$4 sm:$0xff]   ;;  %v3199_v40 = vld [vmem:[%s3612_s7 + $0x3e4] ss:$8 sps:$4 sm:$0xff]  }
 0x131   : > { %2042 = vmatpush1.bf16.msra.mxu1 %v3107_v41  ;;  %v3202_v41 = vld [vmem:[%s3612_s7 + $0x7e4] ss:$8 sps:$4 sm:$0xff]  }
 0x132   : > { %2206 = vmatpush1.bf16.msra.mxu0 %v3110_v42  ;;  %2052 = vmatprep.subr.bf16.mxu1 %v3115_v43  ;;  %v3197_v42 = vld [vmem:[%s3612_s7 + $0x3e0] ss:$8 sps:$4 sm:$0xff]  }
 0x133   : > { %2216 = vmatprep.subr.bf16.mxu0 %v3118_v21  ;;  %v3200_v43 = vld [vmem:[%s3612_s7 + $0x7e0] ss:$8 sps:$4 sm:$0xff]   ;;  %v3205_v21 = vld [vmem:[%s3612_s7 + $0x3f4] ss:$8 sps:$4 sm:$0xff]  }
 0x134   : > { %2044 = vmatmul.mubr.bf16.vlgmr.msra.gmra.mrb[0].mxu1 %v3738_v31 }
 0x135   : > { %2208 = vmatmul.mubr.bf16.vlgmr.msra.gmra.mrb[0].mxu0 %v3743_v34  ;;  %2053 = vmatpush1.bf16.msra.mxu1 %v3113_v22  ;;  %v3208_v22 = vld [vmem:[%s3612_s7 + $0x7f4] ss:$8 sps:$4 sm:$0xff]  }
 0x136   : > { %2217 = vmatpush1.bf16.msra.mxu0 %v3116_v45  ;;  %2054 = vmatprep.subr.bf16.mxu1 %v3121_v46  ;;  %v3203_v45 = vld [vmem:[%s3612_s7 + $0x3f0] ss:$8 sps:$4 sm:$0xff]  }
 0x137   : > { %2218 = vmatprep.subr.bf16.mxu0 %v3124_v47  ;;  %2084 = vmatprep.mubr.bf16.mxu1 %v583_v48  ;;  %v3206_v46 = vld [vmem:[%s3612_s7 + $0x7f0] ss:$8 sps:$4 sm:$0xff]   ;;  %v581_v47 = vcombine.high %v3738_v31, %v3738_v31  ;;  %v630_v48 = vcombine.high %v3743_v34, %v3743_v34 }
 0x138   : > { %2248 = vmatprep.mubr.bf16.mxu0 %v632_v49  ;;  %v3372_v49 = vmov 1983009808  }
 0x139   : > { %2055 = vmatpush1.bf16.msra.mxu1 %v3119_v50  ;;  %v2261_v50 = vunpack.c.l.s4 %v3372_v49 }
 0x13a   : > { %2219 = vmatpush1.bf16.msra.mxu0 %v3122_v51  ;;  %2056 = vmatprep.subr.bf16.mxu1 %v3127_v29 }
 0x13b   : > { %2220 = vmatprep.subr.bf16.mxu0 %v3130_v52  ;;  %v2262_v51 = vunpack.c.0.s8 %v2261_v50 }
 0x13d   : > { %2057 = vmatpush1.bf16.msra.mxu1 %v3125_v30 }
 0x13e   : > { %2221 = vmatpush1.bf16.msra.mxu0 %v3128_v53  ;;  %2058 = vmatprep.subr.bf16.mxu1 %v3133_v54 }
 0x13f   : > { %2222 = vmatprep.subr.bf16.mxu0 %v3136_v55 }
 0x141   : > { %2059 = vmatpush1.bf16.msra.mxu1 %v3131_v56  ;;  %v2265_v56 = vsub.s32 %v2262_v51, %v3678_v44 }
 0x142   : > { %2223 = vmatpush1.bf16.msra.mxu0 %v3134_v57  ;;  %2060 = vmatprep.subr.bf16.mxu1 %v3139_v58 }
 0x143   : > { %2224 = vmatprep.subr.bf16.mxu0 %v3142_v59 }
 0x145   : > { %2061 = vmatpush1.bf16.msra.mxu1 %v3137_v60  ;;  %v274_v60 = vld [vmem:[#allocation2] sm:$0xf] }
 0x146   : > { %2225 = vmatpush1.bf16.msra.mxu0 %v3140_v61  ;;  %2062 = vmatprep.subr.bf16.mxu1 %v3145_v62 }
 0x147   : > { %2226 = vmatprep.subr.bf16.mxu0 %v3148_v63  ;;  %v2275_v63 = vld [vmem:[%s223_s10] sm:$0x3] (!%p2686_p3) }
 0x149   : > { %2063 = vmatpush1.bf16.msra.mxu1 %v3143_v0  ;;  %v2279_v0 = vsub.s32 (!%p2686_p3), 0, %v3678_v44 }
 0x14a   : > { %2227 = vmatpush1.bf16.msra.mxu0 %v3146_v1  ;;  %2064 = vmatprep.subr.bf16.mxu1 %v3151_v2  ;;  %v2283_v1 = vsub.s32 (!%p2686_p3), 1, %v3678_v44 }
 0x14b   : > { %2228 = vmatprep.subr.bf16.mxu0 %v3154_v3  ;;  %v2280_v2 = vrot.slane (!%p2686_p3), %v2275_v63, %v2279_v0 }
 0x14c   : > { %v2284_v3 = vrot.slane (!%p2686_p3), %v2275_v63, %v2283_v1 }
 0x14d   : > { %2065 = vmatpush1.bf16.msra.mxu1 %v3149_v4 }
 0x14e   : > { %2229 = vmatpush1.bf16.msra.mxu0 %v3152_v5  ;;  %2066 = vmatprep.subr.bf16.mxu1 %v3157_v6  ;;  %v2285_v4 = vcombine.low (!%p2686_p3), %v2280_v2, %v2284_v3 }
 0x14f   : > { %2230 = vmatprep.subr.bf16.mxu0 %v3160_v7 }
 0x150   : > { %v2292_v6 = vrot.slane (!%p2686_p3), %v2285_v4, %v2265_v56 }
 0x151   : > { %2067 = vmatpush1.bf16.msra.mxu1 %v3155_v8 }
 0x152   : > { %2231 = vmatpush1.bf16.msra.mxu0 %v3158_v9  ;;  %2068 = vmatprep.subr.bf16.mxu1 %v3163_v10 }
 0x153   : > { %2232 = vmatprep.subr.bf16.mxu0 %v3166_v11 }
 0x155   : > { %2069 = vmatpush1.bf16.msra.mxu1 %v3161_v12 }
 0x156   : > { %2233 = vmatpush1.bf16.msra.mxu0 %v3164_v13  ;;  %2070 = vmatprep.subr.bf16.mxu1 %v3169_v14 }
 0x157   : > { %2234 = vmatprep.subr.bf16.mxu0 %v3172_v15 }
 0x159   : > { %2071 = vmatpush1.bf16.msra.mxu1 %v3167_v16 }
 0x15a   : > { %2235 = vmatpush1.bf16.msra.mxu0 %v3170_v17  ;;  %2072 = vmatprep.subr.bf16.mxu1 %v3175_v18 }
 0x15b   : > { %2236 = vmatprep.subr.bf16.mxu0 %v3178_v19 }
 0x15d   : > { %2073 = vmatpush1.bf16.msra.mxu1 %v3173_v20 }
 0x15e   : > { %2237 = vmatpush1.bf16.msra.mxu0 %v3176_v23  ;;  %2074 = vmatprep.subr.bf16.mxu1 %v3181_v24 }
 0x15f   : > { %2238 = vmatprep.subr.bf16.mxu0 %v3184_v25 }
 0x161   : > { %2075 = vmatpush1.bf16.msra.mxu1 %v3179_v26 }
 0x162   : > { %2239 = vmatpush1.bf16.msra.mxu0 %v3182_v27  ;;  %2076 = vmatprep.subr.bf16.mxu1 %v3187_v28 }
 0x163   : > { %2240 = vmatprep.subr.bf16.mxu0 %v3190_v32 }
 0x165   : > { %2077 = vmatpush1.bf16.msra.mxu1 %v3185_v33 }
 0x166   : > { %2241 = vmatpush1.bf16.msra.mxu0 %v3188_v35  ;;  %2078 = vmatprep.subr.bf16.mxu1 %v3193_v36 }
 0x167   : > { %2242 = vmatprep.subr.bf16.mxu0 %v3196_v37 }
 0x169   : > { %2079 = vmatpush1.bf16.msra.mxu1 %v3191_v38 }
 0x16a   : > { %2243 = vmatpush1.bf16.msra.mxu0 %v3194_v39  ;;  %2080 = vmatprep.subr.bf16.mxu1 %v3199_v40 }
 0x16b   : > { %2244 = vmatprep.subr.bf16.mxu0 %v3202_v41 }
 0x16d   : > { %2081 = vmatpush1.bf16.msra.mxu1 %v3197_v42 }
 0x16e   : > { %2245 = vmatpush1.bf16.msra.mxu0 %v3200_v43  ;;  %2082 = vmatprep.subr.bf16.mxu1 %v3205_v21 }
 0x16f   : > { %2246 = vmatprep.subr.bf16.mxu0 %v3208_v22 }
 0x171   : > { %2083 = vmatpush1.bf16.msra.mxu1 %v3203_v45 }
 0x172   : > { %2247 = vmatpush1.bf16.msra.mxu0 %v3206_v46 }
 0x174   : > { %2085 = vmatmul.mubr.bf16.vlgmr.msra.gmra.mrb[0].mxu1 %v581_v47 }
 0x175   : > { %2249 = vmatmul.mubr.bf16.vlgmr.msra.gmra.mrb[0].mxu0 %v630_v48 }
 0x247   : > { %v2086_v29 = vpop.f32.mrb[0].mxu1 }
 0x248   : > { %v2250_v52 = vpop.f32.mrb[0].mxu0  ;;  %v2088_v53 = vpop.f32.mrb[1].mxu1 }
 0x249   : > { %v2691_v30 = vadd.f32 %v2250_v52, %v2086_v29  ;;  %v2252_v54 = vpop.f32.mrb[1].mxu0  ;;  %v2090_v57 = vpop.f32.mrb[2].mxu1 }
 0x24a   : > { %v2692_v55 = vadd.f32 %v2252_v54, %v2088_v53  ;;  %v2254_v31 = vpop.f32.mrb[2].mxu0  ;;  %v2091_v58 = vpop.f32.mrb[3].mxu1 }
 0x24b   : > { %v2255_v59 = vpop.f32.mrb[3].mxu0 }
 0x24c   : > { %v2259_v34 = vcombine.low %v2691_v30, %v2692_v55  ;;  %2273 = sbr.rel (%p2686_p3) target bundleno = 607 (0x25f), region = 48 }
 0x24e   : > { %v2266_v61 = vrot.slane %v2259_v34, %v2265_v56 }
 0x250   : > { %v2268_v62 = vadd.f32 %v2266_v61, %v274_v60 }
 0x252   : > { %2269 = vst [vmem:[#allocation2] sm:$0xf] %v2268_v62 }
 0x259   : > { %v2274_v5 = vld [vmem:[#allocation2] sm:$0xf] }
 0x25a   : > { %v2294_v7 = vadd.f32 %v2292_v6, %v2274_v5 }
 0x25c   : > { %v2295_v8 = vmax.f32 %v2294_v7, 0.0 }
 0x25e   : > { %2296 = vst [vmem:[%s3636_s30] sm:$0xf] %v2295_v8 }
 0x25f PF: > { %s19_s22 = sadd.s32 1, %s3363_s22   ;;  %s4014_s4 = sld [smem:[#allocation9_spill]] }
 0x260   : > { %p16_p11 = scmp.ge.s32.totalorder %s19_s22, 10   ;;  %s4015_s12 = smov %s3327_s13 }
 0x261   : > { %s4016_s13 = smov %s3331_s14  ;;  %s4017_s14 = smov %s3561_s29 }
 0x262   : > { %s4018_s15 = smov %s3339_s16  ;;  %s4019_s16 = smov %s3343_s17 }
 0x263   : > { %s4020_s17 = smov %s3566_s6  ;;  %s4021_s18 = smov %s3355_s20 }
 0x264   : > { %s4022_s19 = smov %s3359_s21  ;;  %s4023_s20 = smov %s4026_s23 }
 0x265   : > { %s4024_s21 = smov %s4014_s4  ;;  %18 = sbr.rel (!%p16_p11) target bundleno = 11 (0xb), region = 96 }
 0x26c   :  { %2319 = vsyncpa [#allocation4], 1 }
 0x26d   :  { %2321 = vsyncpa [#allocation4 + $0x1], 1 }
 0x26e   :  { %2322 = vsyncpa [#allocation6], 1 }
 0x26f   :  { %2324 = vsyncpa [#allocation6 + $0x1], 1 }

// kernel: cnn_classify_forward.3
= control target key start
LH: loop header
LB: loop body
LE: loop exit
PB: predicated region body
PF: predicated region fallthrough
CT: control target
= control target key end

     0   :  { %12 = vsyncpa [#allocation7], 0  ;;  %s13542_s0 = inlined_call_operand.vmem [shape: f32[2,16,16,1], index: 0, kind: input, shape index: {}]   ;;  %s13543_s1 = inlined_call_operand.hbm [shape: f32[9,1,32], index: 1, kind: input, shape index: {}]   ;;  %s13544_s2 = inlined_call_operand.hbm [shape: f32[1,32], index: 2, kind: input, shape index: {}]   ;;  %s13545_s3 = inlined_call_operand.hbm [shape: f32[9,32,64], index: 3, kind: input, shape index: {}]   ;;  %s13546_s4 = inlined_call_operand.hbm [shape: f32[1,64], index: 4, kind: input, shape index: {}]   ;;  %s13547_s5 = inlined_call_operand.hbm [shape: f32[9,64,128], index: 5, kind: input, shape index: {}]   ;;  %s13548_s6 = inlined_call_operand.hbm [shape: f32[1,128], index: 6, kind: input, shape index: {}]   ;;  %s13549_s7 = inlined_call_operand.vmem [shape: bf16[128,128], index: 7, kind: output, shape index: {}]  }
   0x1   :  { %13 = vsyncpa [#allocation9], 0 }
   0x2   :  { %14 = vsyncpa [#allocation12], 0 }
   0x3   :  { %15 = vsyncpa [#allocation15], 0  ;;  %s10727_s24 = smov 0  }
   0x4 LB: > { %s10675_s25 = smov [#allocation8]   ;;  %s10733_s27 = sadd.s32 4294967295, %s10673_s24   ;;  %s10673_s24 = sphi %s10727_s24, %s21_s24  }
   0x5   : > { %s230_s26 = sshll.u32 %s10675_s25, 4  ;;  %p8189_p0 = scmp.ge.s32.totalorder %s10673_s24, 1  ;;  %s10738_s26 = int_to_ptr.vmem [resolvable:$true] %s230_s26 }
   0x6   : > { %p204_p1 = scmp.lt.s32.totalorder %s10673_s24, 3  ;;  %p13550_p2 = scmp.eq.s32.totalorder %s10733_s27, 0 }
   0x7   : > { %s10676_s29 = smov [#allocation11]   ;;  %s10677_s8 = smov [#allocation6]  }
   0x8   : > { %p10740_p3 = pnand %p8189_p0, %p204_p1  ;;  %s254_s30 = sshll.u32 %s10676_s29, 4  ;;  %s10746_s30 = int_to_ptr.vmem [resolvable:$true] %s254_s30 }
   0x9   : > { %s216_s9 = sshll.u32 %s10677_s8, 4  ;;  %s10678_s11 = smov [#allocation10]   ;;  %s10754_s9 = int_to_ptr.vmem [resolvable:$true] %s216_s9 }
   0xa   : > { %s13570_s28 = scalar_select %p10740_p3, 1, 0 }
   0xb   : > { %p10410_p4 = pneg %p10740_p3  ;;  %s10756_s12 = sshll.u32 %s10678_s11, 4  ;;  %s241_s12 = int_to_ptr.vmem [resolvable:$true] %s10756_s12 }
   0xc   : > { %s10483_s15 = scalar_lea.hbm %s13544_s2, 16 }
   0xd   : > { %p10750_p5 = pnand %p13550_p2, %p10410_p4  ;;  %p10484_p6 = scmp.ne.s32.totalorder %s13544_s2, %s10483_s15 }
   0xe   : > { %p10490_p10 = scmp.lt.u32.totalorder %s10483_s15, %s13544_s2 }
   0xf   : > { %p10766_p7 = pneg %p10750_p5 }
  0x11   : > { %p10486_p8 = pnand %p10766_p7, %p10484_p6 }
  0x13   : > { %p10487_p9 = pneg %p10486_p8 }
  0x15   : > { %p10492_p11 = pnand %p10490_p10, %p10487_p9 }
  0x17   : > { %10495 = shalt.err (!%p10492_p11)
}
  0x18   : > { %s10496_s21 = scalar_lea.vmem %s10738_s26, 16  ;;  %s10503_s22 = scalar_lea.vmem %s10738_s26, 32 }
  0x19   : > { %p10497_p12 = scmp.ne.s32.totalorder %s10738_s26, %s10496_s21  ;;  %p10504_p1 = scmp.lt.s32.totalorder %s10738_s26, %s10738_s26 }
  0x1a   : > { %p10505_p4 = scmp.lt.s32.totalorder %s10503_s22, %s10496_s21 }
  0x1b   : > { %p10499_p13 = pnand %p10497_p12, %p10766_p7 }
  0x1c   : > { %p10506_p6 = por %p10505_p4, %p10504_p1 }
  0x1d   : > { %p10500_p0 = pneg %p10499_p13 }
  0x1f   : > { %p10507_p8 = pnand %p10506_p6, %p10500_p0 }
  0x21   : > { %10510 = shalt.err (!%p10507_p8)
}
  0x22   : > { %10416 = dma.hbm_to_vmem [thread:$0]  (!%p10750_p5), %s13544_s2, 16, %s10738_s26, [#allocation9]  }
  0x23   : > { %s10511_s11 = scalar_lea.hbm %s13546_s4, 16 }
  0x24   : > { %p10512_p9 = scmp.ne.s32.totalorder %s13546_s4, %s10511_s11  ;;  %p10518_p12 = scmp.lt.u32.totalorder %s10511_s11, %s13546_s4 }
  0x26   : > { %p10514_p10 = pnand %p10512_p9, %p10766_p7 }
  0x28   : > { %p10515_p11 = pneg %p10514_p10 }
  0x2a   : > { %p10520_p13 = pnand %p10518_p12, %p10515_p11 }
  0x2c   : > { %10523 = shalt.err (!%p10520_p13)
}
  0x2d   : > { %s10524_s26 = scalar_lea.vmem %s10746_s30, 16  ;;  %s10531_s17 = scalar_lea.vmem %s10746_s30, 32 }
  0x2e   : > { %p10525_p0 = scmp.ne.s32.totalorder %s10746_s30, %s10524_s26  ;;  %p10532_p6 = scmp.lt.s32.totalorder %s10746_s30, %s10746_s30 }
  0x2f   : > { %p10533_p8 = scmp.lt.s32.totalorder %s10531_s17, %s10524_s26 }
  0x30   : > { %p10527_p1 = pnand %p10525_p0, %p10766_p7 }
  0x31   : > { %p10534_p9 = por %p10533_p8, %p10532_p6 }
  0x32   : > { %p10528_p4 = pneg %p10527_p1 }
  0x34   : > { %p10535_p10 = pnand %p10534_p9, %p10528_p4 }
  0x36   : > { %10538 = shalt.err (!%p10535_p10)
}
  0x37   : > { %10422 = dma.hbm_to_vmem [thread:$0]  (!%p10750_p5), %s13546_s4, 16, %s10746_s30, [#allocation12]  }
  0x38   : > { %s10539_s23 = scalar_lea.hbm %s13543_s1, 144 }
  0x39   : > { %p10540_p11 = scmp.ne.s32.totalorder %s13543_s1, %s10539_s23  ;;  %p10546_p0 = scmp.lt.u32.totalorder %s10539_s23, %s13543_s1 }
  0x3b   : > { %p10542_p12 = pnand %p10540_p11, %p10766_p7 }
  0x3d   : > { %p10543_p13 = pneg %p10542_p12 }
  0x3f   : > { %p10548_p1 = pnand %p10546_p0, %p10543_p13 }
  0x41   : > { %10551 = shalt.err (!%p10548_p1)
}
  0x42   : > { %s10552_s30 = scalar_lea.vmem %s10754_s9, 144  ;;  %s10559_s13 = scalar_lea.vmem %s10754_s9, 160 }
  0x43   : > { %p10553_p4 = scmp.ne.s32.totalorder %s10754_s9, %s10552_s30  ;;  %p10560_p9 = scmp.lt.s32.totalorder %s10754_s9, %s10754_s9 }
  0x44   : > { %p10561_p10 = scmp.lt.s32.totalorder %s10559_s13, %s10552_s30 }
  0x45   : > { %p10555_p6 = pnand %p10553_p4, %p10766_p7 }
  0x46   : > { %p10562_p11 = por %p10561_p10, %p10560_p9 }
  0x47   : > { %p10556_p8 = pneg %p10555_p6 }
  0x49   : > { %p10563_p12 = pnand %p10562_p11, %p10556_p8 }
  0x4b   : > { %10566 = shalt.err (!%p10563_p12)
}
  0x4c   : > { %s10679_s14 = smov 16   ;;  %s10680_s15 = smov 1  }
  0x4d   : > { %10413 = dma.hbm_to_vmem [thread:$0]  (!%p10750_p5), %s13543_s1, 144, %s10754_s9, [#allocation7], %s10679_s14, %s10679_s14, %s10680_s15  }
  0x4e   : > { %s10567_s20 = scalar_lea.hbm %s13545_s3, 4608 }
  0x4f   : > { %p10568_p13 = scmp.ne.s32.totalorder %s13545_s3, %s10567_s20  ;;  %p10574_p4 = scmp.lt.u32.totalorder %s10567_s20, %s13545_s3 }
  0x51   : > { %p10570_p0 = pnand %p10568_p13, %p10766_p7 }
  0x53   : > { %p10571_p1 = pneg %p10570_p0 }
  0x55   : > { %p10576_p6 = pnand %p10574_p4, %p10571_p1 }
  0x57   : > { %10579 = shalt.err (!%p10576_p6)
}
  0x58   : > { %s10580_s29 = scalar_lea.vmem %s241_s12, 4608  ;;  %p10588_p11 = scmp.lt.s32.totalorder %s241_s12, %s241_s12 }
  0x59   : > { %p10581_p8 = scmp.ne.s32.totalorder %s241_s12, %s10580_s29  ;;  %p10589_p12 = scmp.lt.s32.totalorder %s10580_s29, %s10580_s29 }
  0x5b   : > { %p10583_p9 = pnand %p10581_p8, %p10766_p7  ;;  %p10590_p2 = por %p10589_p12, %p10588_p11 }
  0x5d   : > { %p10584_p10 = pneg %p10583_p9 }
  0x5f   : > { %p10591_p3 = pnand %p10590_p2, %p10584_p10 }
  0x61   : > { %10594 = shalt.err (!%p10591_p3)
}
  0x62   : > { %s10681_s9 = smov 128   ;;  %s10682_s8 = smov 8  }
  0x63   : > { %10419 = dma.hbm_to_vmem [thread:$0]  (!%p10750_p5), %s13545_s3, 4608, %s241_s12, [#allocation9], %s10681_s9, %s10681_s9, %s10682_s8  }
  0x64   : > { %s10683_s13 = smov [#allocation13]   ;;  %s10684_s15 = smov [#allocation14]  }
  0x65   : > { %s264_s14 = sshll.u32 %s10683_s13, 4  ;;  %s278_s16 = sshll.u32 %s10684_s15, 4  ;;  %s265_s14 = int_to_ptr.vmem [resolvable:$true] %s264_s14  ;;  %s279_s16 = int_to_ptr.vmem [resolvable:$true] %s278_s16 }
  0x66   : > { %s10595_s19 = scalar_lea.hbm %s13547_s5, 9216 }
  0x67   : > { %p10596_p2 = scmp.ne.s32.totalorder %s13547_s5, %s10595_s19  ;;  %p10602_p0 = scmp.lt.u32.totalorder %s10595_s19, %s13547_s5 }
  0x69   : > { %p10598_p3 = pnand %p10596_p2, %p10766_p7 }
  0x6b   : > { %p10599_p13 = pneg %p10598_p3 }
  0x6d   : > { %p10604_p1 = pnand %p10602_p0, %p10599_p13 }
  0x6f   : > { %10607 = shalt.err (!%p10604_p1)
}
  0x70   : > { %s10608_s12 = scalar_lea.vmem %s265_s14, 9216  ;;  %p10616_p9 = scmp.lt.s32.totalorder %s265_s14, %s265_s14 }
  0x71   : > { %p10609_p4 = scmp.ne.s32.totalorder %s265_s14, %s10608_s12  ;;  %p10617_p10 = scmp.lt.s32.totalorder %s10608_s12, %s10608_s12 }
  0x73   : > { %p10611_p6 = pnand %p10609_p4, %p10766_p7  ;;  %p10618_p11 = por %p10617_p10, %p10616_p9 }
  0x75   : > { %p10612_p8 = pneg %p10611_p6 }
  0x77   : > { %p10619_p12 = pnand %p10618_p11, %p10612_p8 }
  0x79   : > { %10622 = shalt.err (!%p10619_p12)
}
  0x7a   : > { %10425 = dma.hbm_to_vmem [thread:$0]  (!%p10750_p5), %s13547_s5, 9216, %s265_s14, [#allocation12], %s10681_s9, %s10681_s9, %s10682_s8  }
  0x7b   : > { %s10623_s13 = scalar_lea.hbm %s13548_s6, 16 }
  0x7c   : > { %p10624_p2 = scmp.ne.s32.totalorder %s13548_s6, %s10623_s13  ;;  %p10630_p0 = scmp.lt.u32.totalorder %s10623_s13, %s13548_s6 }
  0x7e   : > { %p10626_p3 = pnand %p10624_p2, %p10766_p7 }
  0x80   : > { %p10627_p13 = pneg %p10626_p3 }
  0x82   : > { %p10632_p1 = pnand %p10630_p0, %p10627_p13 }
  0x84   : > { %10635 = shalt.err (!%p10632_p1)
}
  0x85   : > { %s10636_s20 = scalar_lea.vmem %s279_s16, 16  ;;  %s10643_s9 = scalar_lea.vmem %s279_s16, 32 }
  0x86   : > { %p10637_p4 = scmp.ne.s32.totalorder %s279_s16, %s10636_s20  ;;  %p10644_p9 = scmp.lt.s32.totalorder %s279_s16, %s279_s16 }
  0x87   : > { %p10645_p10 = scmp.lt.s32.totalorder %s10643_s9, %s10636_s20 }
  0x88   : > { %p10639_p6 = pnand %p10637_p4, %p10766_p7 }
  0x89   : > { %p10646_p11 = por %p10645_p10, %p10644_p9 }
  0x8a   : > { %p10640_p8 = pneg %p10639_p6 }
  0x8c   : > { %p10647_p12 = pnand %p10646_p11, %p10640_p8 }
  0x8e   : > { %10650 = shalt.err (!%p10647_p12)
}
  0x8f   : > { %10428 = dma.hbm_to_vmem [thread:$0]  (!%p10750_p5), %s13548_s6, 16, %s279_s16, [#allocation15]  }
  0x90   : > { %p13573_p2 = scmp.ne.s32.totalorder %s13570_s28, 0 }
  0x92   : > { %299 = sbr.rel (%p13573_p2) target bundleno = 1753 (0x6d9), region = 48 }
  0x99   : > { %p13574_p3 = scmp.eq.s32.totalorder %s10733_s27, 0 }
  0x9b   : > { %10656 = dma.done.wait (%p13574_p3), [#allocation7], 144   ;;  %p13575_p7 = pmov %p13574_p3 }
  0x9c   : > { %p13576_p13 = pmov %p13574_p3 }
  0x9d   : > { %10658 = vsyncadd (%p13575_p7), [#allocation7], 4294967152 }
  0x9e   : > { %10660 = dma.done.wait (%p13576_p13), [#allocation9], 4624   ;;  %p13577_p0 = pmov %p13574_p3 }
  0xa0   : > { %10662 = vsyncadd (%p13577_p0), [#allocation9], 4294962672  ;;  %p13578_p1 = pmov %p13577_p0 }
  0xa1   : > { %p13579_p5 = pmov %p13577_p0 }
  0xa2   : > { %10664 = dma.done.wait (%p13578_p1), [#allocation12], 9232  }
  0xa3   : > { %10666 = vsyncadd (%p13579_p5), [#allocation12], 4294958064  ;;  %p13580_p4 = pmov %p13577_p0 }
  0xa4   : > { %p13581_p6 = pmov %p13577_p0 }
  0xa5   : > { %10668 = dma.done.wait (%p13580_p4), [#allocation15], 16  }
  0xa6   : > { %10670 = vsyncadd (%p13581_p6), [#allocation15], 4294967280  ;;  %vm362_vm0 = vcmask 7168   ;;  %p351_p8 = scmp.lt.s32.totalorder %s10733_s27, 1  ;;  %v10685_v0 = vmov 0   ;;  %v13552_v1 = vmov 0.0  }
  0xa7   : > { %10461 = vset.pattern.permute.xlu0 %v10685_v0  ;;  %363 = vst.msk [vmem:[#allocation2] sm:$0xff] %vm362_vm0, %v13552_v1  ;;  %364 = vst.msk [vmem:[#allocation2 + $0x8] sm:$0xff] %vm362_vm0, %v13552_v1  ;;  %10462 = vset.pattern.permute.xlu1 %v10685_v0  ;;  %vm365_vm1 = vcmask 1024   ;;  %vm2930_vm2 = vcmask 261120   ;;  %vm2933_vm3 = vcmask 254976   ;;  %vm6552_vm4 = vcmask 523264  }
  0xa8   : > { %367 = vst.msk [vmem:[#allocation2 + $0x18] sm:$0xff] %vm362_vm0, %v13552_v1  ;;  %368 = vst.msk [vmem:[#allocation2 + $0x20] sm:$0xff] %vm362_vm0, %v13552_v1  ;;  %s352_s28 = scalar_select %p351_p8, %s10733_s27, 1  ;;  %vm6609_vm5 = vcmask 517120  }
  0xa9   : > { %370 = vst.msk [vmem:[#allocation2 + $0x30] sm:$0xff] %vm362_vm0, %v13552_v1  ;;  %371 = vst.msk [vmem:[#allocation2 + $0x38] sm:$0xff] %vm362_vm0, %v13552_v1  ;;  %s8206_s22 = sshll.u32 %s10733_s27, 3 }
  0xaa   : > { %373 = vst.msk [vmem:[#allocation2 + $0x48] sm:$0xff] %vm362_vm0, %v13552_v1  ;;  %374 = vst.msk [vmem:[#allocation2 + $0x50] sm:$0xff] %vm362_vm0, %v13552_v1  ;;  %s8590_s10 = sshll.u32 %s352_s28, 8  ;;  %p357_p9 = scmp.lt.s32.totalorder %s8206_s22, 15 }
  0xab   : > { %376 = vst.msk [vmem:[#allocation2 + $0x60] sm:$0xff] %vm362_vm0, %v13552_v1  ;;  %377 = vst.msk [vmem:[#allocation2 + $0x68] sm:$0xff] %vm362_vm0, %v13552_v1  ;;  %s11024_s21 = scalar_lea.vmem %s13542_s0, %s8590_s10 }
  0xac   : > { %379 = vst.msk [vmem:[#allocation2 + $0x78] sm:$0xff] %vm362_vm0, %v13552_v1  ;;  %380 = vst.msk [vmem:[#allocation2 + $0x80] sm:$0xff] %vm362_vm0, %v13552_v1  ;;  %v418_v2 = vld [vmem:[%s11024_s21] sm:$0xff]  ;;  %v420_v3 = vld [vmem:[%s11024_s21 + $0x10] sm:$0xff]  ;;  %s13646_s22 = smov (!%p357_p9, %s8206_s22), 15 }
  0xad   : > { %382 = vst.msk [vmem:[#allocation2 + $0x90] sm:$0xff] %vm362_vm0, %v13552_v1  ;;  %383 = vst.msk [vmem:[#allocation2 + $0x98] sm:$0xff] %vm362_vm0, %v13552_v1  ;;  %v419_v4 = vld [vmem:[%s11024_s21 + $0x8] sm:$0xff]  ;;  %v422_v7 = vld [vmem:[%s11024_s21 + $0x20] sm:$0xff]  ;;  %s8207_s23 = sshll.u32 %s13646_s22, 2 }
  0xae   : > { %385 = vst.msk [vmem:[#allocation2 + $0xa8] sm:$0xff] %vm362_vm0, %v13552_v1  ;;  %386 = vst.msk [vmem:[#allocation2 + $0xb0] sm:$0xff] %vm362_vm0, %v13552_v1  ;;  %v483_v5 = vld [vmem:[#allocation2] sm:$0xff]  ;;  %v484_v6 = vld [vmem:[#allocation2 + $0x8] sm:$0xff]  ;;  %s360_s29 = scalar_lea.vmem %s13549_s7, %s8207_s23 }
  0xaf   : > { %388 = vst.msk [vmem:[#allocation2 + $0xc0] sm:$0xff] %vm362_vm0, %v13552_v1  ;;  %389 = vst.msk [vmem:[#allocation2 + $0xc8] sm:$0xff] %vm362_vm0, %v13552_v1  ;;  %518 = vperm.xlu0 %10461, %v483_v5   ;;  %v421_v8 = vld [vmem:[%s11024_s21 + $0x18] sm:$0xff]  ;;  %v424_v9 = vld [vmem:[%s11024_s21 + $0x30] sm:$0xff] }
  0xb0   : > { %391 = vst.msk [vmem:[#allocation2 + $0xd8] sm:$0xff] %vm362_vm0, %v13552_v1  ;;  %392 = vst.msk [vmem:[#allocation2 + $0xe0] sm:$0xff] %vm362_vm0, %v13552_v1  ;;  %v423_v10 = vld [vmem:[%s11024_s21 + $0x28] sm:$0xff]  ;;  %v426_v11 = vld [vmem:[%s11024_s21 + $0x40] sm:$0xff] }
  0xb1   : > { %394 = vst.msk [vmem:[#allocation2 + $0xf0] sm:$0xff] %vm362_vm0, %v13552_v1  ;;  %395 = vst.msk [vmem:[#allocation2 + $0xf8] sm:$0xff] %vm362_vm0, %v13552_v1  ;;  %v425_v12 = vld [vmem:[%s11024_s21 + $0x38] sm:$0xff]  ;;  %v428_v13 = vld [vmem:[%s11024_s21 + $0x50] sm:$0xff] }
  0xb2   : > { %397 = vst.msk [vmem:[#allocation2 + $0x108] sm:$0xff] %vm362_vm0, %v13552_v1  ;;  %398 = vst.msk [vmem:[#allocation2 + $0x110] sm:$0xff] %vm362_vm0, %v13552_v1  ;;  %v427_v14 = vld [vmem:[%s11024_s21 + $0x48] sm:$0xff]  ;;  %v430_v15 = vld [vmem:[%s11024_s21 + $0x60] sm:$0xff] }
  0xb3   : > { %400 = vst.msk [vmem:[#allocation2 + $0x120] sm:$0xff] %vm362_vm0, %v13552_v1  ;;  %401 = vst.msk [vmem:[#allocation2 + $0x128] sm:$0xff] %vm362_vm0, %v13552_v1  ;;  %v429_v16 = vld [vmem:[%s11024_s21 + $0x58] sm:$0xff]  ;;  %v432_v17 = vld [vmem:[%s11024_s21 + $0x70] sm:$0xff]  ;;  %523 = vperm.xlu0 %10461, %v484_v6  }
  0xb4   : > { %403 = vst.msk [vmem:[#allocation2 + $0x138] sm:$0xff] %vm362_vm0, %v13552_v1  ;;  %404 = vst.msk [vmem:[#allocation2 + $0x140] sm:$0xff] %vm362_vm0, %v13552_v1  ;;  %v431_v18 = vld [vmem:[%s11024_s21 + $0x68] sm:$0xff]  ;;  %v434_v19 = vld [vmem:[%s11024_s21 + $0x80] sm:$0xff] }
  0xb5   : > { %406 = vst.msk [vmem:[#allocation2 + $0x150] sm:$0xff] %vm362_vm0, %v13552_v1  ;;  %407 = vst.msk [vmem:[#allocation2 + $0x158] sm:$0xff] %vm362_vm0, %v13552_v1  ;;  %v433_v20 = vld [vmem:[%s11024_s21 + $0x78] sm:$0xff]  ;;  %v436_v21 = vld [vmem:[%s11024_s21 + $0x90] sm:$0xff] }
  0xb6   : > { %409 = vst.msk [vmem:[#allocation2 + $0x168] sm:$0xff] %vm362_vm0, %v13552_v1  ;;  %410 = vst.msk [vmem:[#allocation2 + $0x170] sm:$0xff] %vm362_vm0, %v13552_v1  ;;  %v435_v22 = vld [vmem:[%s11024_s21 + $0x88] sm:$0xff]  ;;  %v438_v23 = vld [vmem:[%s11024_s21 + $0xa0] sm:$0xff] }
  0xb7   : > { %412 = vst.msk [vmem:[#allocation2 + $0x180] sm:$0xff] %vm362_vm0, %v13552_v1  ;;  %413 = vst.msk [vmem:[#allocation2 + $0x188] sm:$0xff] %vm362_vm0, %v13552_v1  ;;  %v437_v24 = vld [vmem:[%s11024_s21 + $0x98] sm:$0xff]  ;;  %v440_v25 = vld [vmem:[%s11024_s21 + $0xb0] sm:$0xff] }
  0xb8   : > { %415 = vst.msk [vmem:[#allocation2 + $0x198] sm:$0xff] %vm362_vm0, %v13552_v1  ;;  %416 = vst.msk [vmem:[#allocation2 + $0x1a0] sm:$0xff] %vm362_vm0, %v13552_v1  ;;  %v439_v28 = vld [vmem:[%s11024_s21 + $0xa8] sm:$0xff]  ;;  %v442_v29 = vld [vmem:[%s11024_s21 + $0xc0] sm:$0xff] }
  0xb9   : > { %369 = vst.msk [vmem:[#allocation2 + $0x28] sm:$0x3] %vm365_vm1, %v13552_v1  ;;  %366 = vst.msk [vmem:[#allocation2 + $0x10] sm:$0x3] %vm365_vm1, %v13552_v1  ;;  %v441_v34 = vld [vmem:[%s11024_s21 + $0xb8] sm:$0xff]  ;;  %v444_v35 = vld [vmem:[%s11024_s21 + $0xd0] sm:$0xff] }
  0xba   : > { %372 = vst.msk [vmem:[#allocation2 + $0x40] sm:$0x3] %vm365_vm1, %v13552_v1  ;;  %375 = vst.msk [vmem:[#allocation2 + $0x58] sm:$0x3] %vm365_vm1, %v13552_v1  ;;  %v443_v36 = vld [vmem:[%s11024_s21 + $0xc8] sm:$0xff]  ;;  %v446_v37 = vld [vmem:[%s11024_s21 + $0xe0] sm:$0xff] }
  0xbb   : > { %378 = vst.msk [vmem:[#allocation2 + $0x70] sm:$0x3] %vm365_vm1, %v13552_v1  ;;  %381 = vst.msk [vmem:[#allocation2 + $0x88] sm:$0x3] %vm365_vm1, %v13552_v1  ;;  %v445_v39 = vld [vmem:[%s11024_s21 + $0xd8] sm:$0xff]  ;;  %v746_v63 = vld [vmem:[#allocation2 + $0x1] sm:$0xff] }
  0xbc   : > { %384 = vst.msk [vmem:[#allocation2 + $0xa0] sm:$0x3] %vm365_vm1, %v13552_v1  ;;  %387 = vst.msk [vmem:[#allocation2 + $0xb8] sm:$0x3] %vm365_vm1, %v13552_v1 }
  0xbd   : > { %390 = vst.msk [vmem:[#allocation2 + $0xd0] sm:$0x3] %vm365_vm1, %v13552_v1  ;;  %393 = vst.msk [vmem:[#allocation2 + $0xe8] sm:$0x3] %vm365_vm1, %v13552_v1 }
  0xbe   : > { %396 = vst.msk [vmem:[#allocation2 + $0x100] sm:$0x3] %vm365_vm1, %v13552_v1  ;;  %399 = vst.msk [vmem:[#allocation2 + $0x118] sm:$0x3] %vm365_vm1, %v13552_v1 }
  0xbf   : > { %402 = vst.msk [vmem:[#allocation2 + $0x130] sm:$0x3] %vm365_vm1, %v13552_v1  ;;  %405 = vst.msk [vmem:[#allocation2 + $0x148] sm:$0x3] %vm365_vm1, %v13552_v1 }
  0xc0   : > { %408 = vst.msk [vmem:[#allocation2 + $0x160] sm:$0x3] %vm365_vm1, %v13552_v1  ;;  %411 = vst.msk [vmem:[#allocation2 + $0x178] sm:$0x3] %vm365_vm1, %v13552_v1  ;;  %v747_v62 = vld [vmem:[#allocation2 + $0x9] sm:$0xff] }
  0xc1   : > { %414 = vst.msk [vmem:[#allocation2 + $0x190] sm:$0x3] %vm365_vm1, %v13552_v1  ;;  %417 = vst.msk [vmem:[#allocation2 + $0x1a8] sm:$0x3] %vm365_vm1, %v13552_v1  ;;  %v1011_v0 = vld [vmem:[#allocation2 + $0xa] sm:$0xff] }
  0xc2   : > { %451 = vst.msk [vmem:[#allocation2 + $0x19] sm:$0xff] %vm362_vm0, %v418_v2  ;;  %453 = vst.msk [vmem:[#allocation2 + $0x31] sm:$0xff] %vm362_vm0, %v420_v3  ;;  %v1010_v2 = vld [vmem:[#allocation2 + $0x2] sm:$0xff] }
  0xc3   : > { %452 = vst.msk [vmem:[#allocation2 + $0x21] sm:$0xff] %vm362_vm0, %v419_v4  ;;  %455 = vst.msk [vmem:[#allocation2 + $0x49] sm:$0xff] %vm362_vm0, %v422_v7 }
  0xc4   : > { %454 = vst.msk [vmem:[#allocation2 + $0x39] sm:$0xff] %vm362_vm0, %v421_v8  ;;  %457 = vst.msk [vmem:[#allocation2 + $0x61] sm:$0xff] %vm362_vm0, %v424_v9 }
  0xc5   : > { %456 = vst.msk [vmem:[#allocation2 + $0x51] sm:$0xff] %vm362_vm0, %v423_v10  ;;  %459 = vst.msk [vmem:[#allocation2 + $0x79] sm:$0xff] %vm362_vm0, %v426_v11 }
  0xc6   : > { %458 = vst.msk [vmem:[#allocation2 + $0x69] sm:$0xff] %vm362_vm0, %v425_v12  ;;  %461 = vst.msk [vmem:[#allocation2 + $0x91] sm:$0xff] %vm362_vm0, %v428_v13 }
  0xc7   : > { %460 = vst.msk [vmem:[#allocation2 + $0x81] sm:$0xff] %vm362_vm0, %v427_v14  ;;  %463 = vst.msk [vmem:[#allocation2 + $0xa9] sm:$0xff] %vm362_vm0, %v430_v15 }
  0xc8   : > { %462 = vst.msk [vmem:[#allocation2 + $0x99] sm:$0xff] %vm362_vm0, %v429_v16  ;;  %465 = vst.msk [vmem:[#allocation2 + $0xc1] sm:$0xff] %vm362_vm0, %v432_v17 }
  0xc9   : > { %464 = vst.msk [vmem:[#allocation2 + $0xb1] sm:$0xff] %vm362_vm0, %v431_v18  ;;  %467 = vst.msk [vmem:[#allocation2 + $0xd9] sm:$0xff] %vm362_vm0, %v434_v19  ;;  %v11067_v26 = vld [vmem:[#allocation2 + $0x18] sm:$0xff]  ;;  %v11069_v27 = vld [vmem:[#allocation2 + $0x30] sm:$0xff] }
  0xca   : > { %466 = vst.msk [vmem:[#allocation2 + $0xc9] sm:$0xff] %vm362_vm0, %v433_v20  ;;  %469 = vst.msk [vmem:[#allocation2 + $0xf1] sm:$0xff] %vm362_vm0, %v436_v21  ;;  %528 = vperm.xlu1 %10462, %v11067_v26   ;;  %538 = vperm.xlu0 %10461, %v11069_v27   ;;  %v11078_v30 = vld [vmem:[#allocation2 + $0x20] sm:$0xff]  ;;  %v11082_v31 = vld [vmem:[#allocation2 + $0x48] sm:$0xff] }
  0xcb   : > { %468 = vst.msk [vmem:[#allocation2 + $0xe1] sm:$0xff] %vm362_vm0, %v435_v22  ;;  %471 = vst.msk [vmem:[#allocation2 + $0x109] sm:$0xff] %vm362_vm0, %v438_v23  ;;  %v11086_v32 = vld [vmem:[#allocation2 + $0x38] sm:$0xff]  ;;  %v11088_v33 = vld [vmem:[#allocation2 + $0x60] sm:$0xff] }
  0xcc   : > { %470 = vst.msk [vmem:[#allocation2 + $0xf9] sm:$0xff] %vm362_vm0, %v437_v24  ;;  %473 = vst.msk [vmem:[#allocation2 + $0x121] sm:$0xff] %vm362_vm0, %v440_v25  ;;  %v11099_v38 = vld [vmem:[#allocation2 + $0x50] sm:$0xff]  ;;  %v11103_v40 = vld [vmem:[#allocation2 + $0x78] sm:$0xff] }
  0xcd   : > { %472 = vst.msk [vmem:[#allocation2 + $0x111] sm:$0xff] %vm362_vm0, %v439_v28  ;;  %475 = vst.msk [vmem:[#allocation2 + $0x139] sm:$0xff] %vm362_vm0, %v442_v29  ;;  %v11108_v41 = vld [vmem:[#allocation2 + $0x68] sm:$0xff]  ;;  %v11110_v42 = vld [vmem:[#allocation2 + $0x90] sm:$0xff] }
  0xce   : > { %533 = vperm.xlu1 %10462, %v11078_v30   ;;  %548 = vperm.xlu0 %10461, %v11082_v31   ;;  %474 = vst.msk [vmem:[#allocation2 + $0x129] sm:$0xff] %vm362_vm0, %v441_v34  ;;  %477 = vst.msk [vmem:[#allocation2 + $0x151] sm:$0xff] %vm362_vm0, %v444_v35  ;;  %v11114_v43 = vld [vmem:[#allocation2 + $0x80] sm:$0xff]  ;;  %v11116_v44 = vld [vmem:[#allocation2 + $0xa8] sm:$0xff] }
  0xcf   : > { %476 = vst.msk [vmem:[#allocation2 + $0x141] sm:$0xff] %vm362_vm0, %v443_v36  ;;  %479 = vst.msk [vmem:[#allocation2 + $0x169] sm:$0xff] %vm362_vm0, %v446_v37  ;;  %v11120_v45 = vld [vmem:[#allocation2 + $0x98] sm:$0xff]  ;;  %v499_v46 = vld [vmem:[#allocation2 + $0xc0] sm:$0xff] }
  0xd0   : > { %478 = vst.msk [vmem:[#allocation2 + $0x159] sm:$0xff] %vm362_vm0, %v445_v39  ;;  %v11123_v47 = vld [vmem:[#allocation2 + $0xb0] sm:$0xff]  ;;  %v501_v48 = vld [vmem:[#allocation2 + $0xd8] sm:$0xff]  ;;  %v749_v4 = vld [vmem:[#allocation2 + $0x21] sm:$0xff] }
  0xd1   : > { %v500_v49 = vld [vmem:[#allocation2 + $0xc8] sm:$0xff]  ;;  %v503_v50 = vld [vmem:[#allocation2 + $0xf0] sm:$0xff]  ;;  %v748_v3 = vld [vmem:[#allocation2 + $0x19] sm:$0xff]  ;;  %2935 = vst.msk [vmem:[#allocation3 + $0x18] sm:$0xff] %vm2930_vm2, %v13552_v1 }
  0xd2   : > { %543 = vperm.xlu1 %10462, %v11086_v32   ;;  %558 = vperm.xlu0 %10461, %v11088_v33   ;;  %v502_v51 = vld [vmem:[#allocation2 + $0xe0] sm:$0xff]  ;;  %v505_v52 = vld [vmem:[#allocation2 + $0x108] sm:$0xff]  ;;  %v750_v7 = vld [vmem:[#allocation2 + $0x31] sm:$0xff]  ;;  %2936 = vst.msk [vmem:[#allocation3 + $0x20] sm:$0xff] %vm2930_vm2, %v13552_v1 }
  0xd3   : > { %v504_v53 = vld [vmem:[#allocation2 + $0xf8] sm:$0xff]  ;;  %v507_v54 = vld [vmem:[#allocation2 + $0x120] sm:$0xff]  ;;  %v11136_v11 = vld [vmem:[#allocation2 + $0x49] sm:$0xff]  ;;  %2931 = vst.msk [vmem:[#allocation3] sm:$0xff] %vm2930_vm2, %v13552_v1 }
  0xd4   : > { %v506_v55 = vld [vmem:[#allocation2 + $0x110] sm:$0xff]  ;;  %v509_v56 = vld [vmem:[#allocation2 + $0x138] sm:$0xff]  ;;  %v1013_v6 = vld [vmem:[#allocation2 + $0x22] sm:$0xff]  ;;  %2932 = vst.msk [vmem:[#allocation3 + $0x8] sm:$0xff] %vm2930_vm2, %v13552_v1 }
  0xd5   : > { %v508_v57 = vld [vmem:[#allocation2 + $0x128] sm:$0xff]  ;;  %v511_v58 = vld [vmem:[#allocation2 + $0x150] sm:$0xff]  ;;  %v1012_v5 = vld [vmem:[#allocation2 + $0x1a] sm:$0xff]  ;;  %2938 = vst.msk [vmem:[#allocation3 + $0x30] sm:$0xff] %vm2930_vm2, %v13552_v1 }
  0xd6   : > { %553 = vperm.xlu1 %10462, %v11099_v38   ;;  %568 = vperm.xlu0 %10461, %v11103_v40   ;;  %v510_v59 = vld [vmem:[#allocation2 + $0x140] sm:$0xff]  ;;  %v513_v60 = vld [vmem:[#allocation2 + $0x168] sm:$0xff]  ;;  %v1014_v9 = vld [vmem:[#allocation2 + $0x32] sm:$0xff]  ;;  %2939 = vst.msk [vmem:[#allocation3 + $0x38] sm:$0xff] %vm2930_vm2, %v13552_v1 }
  0xd7   : > { %v512_v61 = vld [vmem:[#allocation2 + $0x158] sm:$0xff]  ;;  %v11147_v14 = vld [vmem:[#allocation2 + $0x4a] sm:$0xff]  ;;  %2941 = vst.msk [vmem:[#allocation3 + $0x48] sm:$0xff] %vm2930_vm2, %v13552_v1  ;;  %2942 = vst.msk [vmem:[#allocation3 + $0x50] sm:$0xff] %vm2930_vm2, %v13552_v1 }
  0xd8   : > { %v751_v8 = vld [vmem:[#allocation2 + $0x39] sm:$0xff]  ;;  %v11140_v12 = vld [vmem:[#allocation2 + $0x51] sm:$0xff]  ;;  %2944 = vst.msk [vmem:[#allocation3 + $0x60] sm:$0xff] %vm2930_vm2, %v13552_v1  ;;  %2945 = vst.msk [vmem:[#allocation3 + $0x68] sm:$0xff] %vm2930_vm2, %v13552_v1 }
  0xd9   : > { %v11130_v10 = vld [vmem:[#allocation2 + $0x3a] sm:$0xff]  ;;  %2947 = vst.msk [vmem:[#allocation3 + $0x78] sm:$0xff] %vm2930_vm2, %v13552_v1  ;;  %2948 = vst.msk [vmem:[#allocation3 + $0x80] sm:$0xff] %vm2930_vm2, %v13552_v1  ;;  %v11230_v18 = vld [vmem:[#allocation2 + $0x52] sm:$0xff] }
  0xda   : > { %563 = vperm.xlu1 %10462, %v11108_v41   ;;  %578 = vperm.xlu0 %10461, %v11110_v42   ;;  %2950 = vst.msk [vmem:[#allocation3 + $0x90] sm:$0xff] %vm2930_vm2, %v13552_v1  ;;  %2951 = vst.msk [vmem:[#allocation3 + $0x98] sm:$0xff] %vm2930_vm2, %v13552_v1  ;;  %v3088_v19 = vld [vmem:[#allocation10 + $0x20] sm:$0xff]  ;;  %v3089_v20 = vld [vmem:[#allocation10 + $0x28] sm:$0xff] }
  0xdb   : > { %2953 = vst.msk [vmem:[#allocation3 + $0xa8] sm:$0xff] %vm2930_vm2, %v13552_v1  ;;  %2954 = vst.msk [vmem:[#allocation3 + $0xb0] sm:$0xff] %vm2930_vm2, %v13552_v1  ;;  %v9846_v21 = vpack.c.bf16 %v3089_v20, %v3088_v19  ;;  %v3090_v24 = vld [vmem:[#allocation10 + $0x30] sm:$0xff]  ;;  %v3091_v25 = vld [vmem:[#allocation10 + $0x38] sm:$0xff] }
  0xdc   : > { %2956 = vst.msk [vmem:[#allocation3 + $0xc0] sm:$0xff] %vm2930_vm2, %v13552_v1  ;;  %2957 = vst.msk [vmem:[#allocation3 + $0xc8] sm:$0xff] %vm2930_vm2, %v13552_v1  ;;  %v754_v29 = vld [vmem:[#allocation2 + $0x61] sm:$0xff] }
  0xdd   : > { %2959 = vst.msk [vmem:[#allocation3 + $0xd8] sm:$0xff] %vm2930_vm2, %v13552_v1  ;;  %2960 = vst.msk [vmem:[#allocation3 + $0xe0] sm:$0xff] %vm2930_vm2, %v13552_v1  ;;  %9847 = vmatprep.subr.bf16.mxu1 %v9846_v21  ;;  %v4159_v39 = vld [vmem:[#allocation10 + $0x70] sm:$0xff] }
  0xde   : > { %573 = vperm.xlu1 %10462, %v11114_v43   ;;  %588 = vperm.xlu0 %10461, %v11116_v44   ;;  %2962 = vst.msk [vmem:[#allocation3 + $0xf0] sm:$0xff] %vm2930_vm2, %v13552_v1  ;;  %2963 = vst.msk [vmem:[#allocation3 + $0xf8] sm:$0xff] %vm2930_vm2, %v13552_v1  ;;  %v1021_v19 = vld [vmem:[#allocation2 + $0x82] sm:$0xff] }
  0xdf   : > { %2965 = vst.msk [vmem:[#allocation3 + $0x108] sm:$0xff] %vm2930_vm2, %v13552_v1  ;;  %2966 = vst.msk [vmem:[#allocation3 + $0x110] sm:$0xff] %vm2930_vm2, %v13552_v1  ;;  %9849 = vmatpush3.bf16.msra.mxu1 %v9846_v21 }
  0xe0   : > { %2968 = vst.msk [vmem:[#allocation3 + $0x120] sm:$0xff] %vm2930_vm2, %v13552_v1  ;;  %2969 = vst.msk [vmem:[#allocation3 + $0x128] sm:$0xff] %vm2930_vm2, %v13552_v1 }
  0xe1   : > { %2971 = vst.msk [vmem:[#allocation3 + $0x138] sm:$0xff] %vm2930_vm2, %v13552_v1  ;;  %2972 = vst.msk [vmem:[#allocation3 + $0x140] sm:$0xff] %vm2930_vm2, %v13552_v1 }
  0xe2   : > { %583 = vperm.xlu1 %10462, %v11120_v45   ;;  %598 = vperm.xlu0 %10461, %v499_v46   ;;  %2974 = vst.msk [vmem:[#allocation3 + $0x150] sm:$0xff] %vm2930_vm2, %v13552_v1  ;;  %2975 = vst.msk [vmem:[#allocation3 + $0x158] sm:$0xff] %vm2930_vm2, %v13552_v1  ;;  %v4160_v46 = vld [vmem:[#allocation10 + $0x78] sm:$0xff] }
  0xe3   : > { %2977 = vst.msk [vmem:[#allocation3 + $0x168] sm:$0xff] %vm2930_vm2, %v13552_v1  ;;  %2978 = vst.msk [vmem:[#allocation3 + $0x170] sm:$0xff] %vm2930_vm2, %v13552_v1 }
  0xe4   : > { %2980 = vst.msk [vmem:[#allocation3 + $0x180] sm:$0xff] %vm2930_vm2, %v13552_v1  ;;  %2981 = vst.msk [vmem:[#allocation3 + $0x188] sm:$0xff] %vm2930_vm2, %v13552_v1 }
  0xe5   : > { %2983 = vst.msk [vmem:[#allocation3 + $0x198] sm:$0xff] %vm2930_vm2, %v13552_v1  ;;  %2984 = vst.msk [vmem:[#allocation3 + $0x1a0] sm:$0xff] %vm2930_vm2, %v13552_v1 }
  0xe6   : > { %593 = vperm.xlu1 %10462, %v11123_v47   ;;  %608 = vperm.xlu0 %10461, %v501_v48   ;;  %2937 = vst.msk [vmem:[#allocation3 + $0x28] sm:$0x3] %vm2933_vm3, %v13552_v1  ;;  %2934 = vst.msk [vmem:[#allocation3 + $0x10] sm:$0x3] %vm2933_vm3, %v13552_v1 }
  0xe7   : > { %2940 = vst.msk [vmem:[#allocation3 + $0x40] sm:$0x3] %vm2933_vm3, %v13552_v1  ;;  %2943 = vst.msk [vmem:[#allocation3 + $0x58] sm:$0x3] %vm2933_vm3, %v13552_v1 }
  0xe8   : > { %2946 = vst.msk [vmem:[#allocation3 + $0x70] sm:$0x3] %vm2933_vm3, %v13552_v1  ;;  %2949 = vst.msk [vmem:[#allocation3 + $0x88] sm:$0x3] %vm2933_vm3, %v13552_v1 }
  0xe9   : > { %2952 = vst.msk [vmem:[#allocation3 + $0xa0] sm:$0x3] %vm2933_vm3, %v13552_v1  ;;  %2955 = vst.msk [vmem:[#allocation3 + $0xb8] sm:$0x3] %vm2933_vm3, %v13552_v1 }
  0xea   : > { %603 = vperm.xlu1 %10462, %v500_v49   ;;  %618 = vperm.xlu0 %10461, %v503_v50   ;;  %2958 = vst.msk [vmem:[#allocation3 + $0xd0] sm:$0x3] %vm2933_vm3, %v13552_v1  ;;  %2961 = vst.msk [vmem:[#allocation3 + $0xe8] sm:$0x3] %vm2933_vm3, %v13552_v1  ;;  %v11296_v49 = vpack.c.bf16 %v4160_v46, %v4159_v39  ;;  %v755_v50 = vld [vmem:[#allocation2 + $0x69] sm:$0xff] }
  0xeb   : > { %2964 = vst.msk [vmem:[#allocation3 + $0x100] sm:$0x3] %vm2933_vm3, %v13552_v1  ;;  %2967 = vst.msk [vmem:[#allocation3 + $0x118] sm:$0x3] %vm2933_vm3, %v13552_v1 }
  0xec   : > { %2970 = vst.msk [vmem:[#allocation3 + $0x130] sm:$0x3] %vm2933_vm3, %v13552_v1  ;;  %2973 = vst.msk [vmem:[#allocation3 + $0x148] sm:$0x3] %vm2933_vm3, %v13552_v1 }
  0xed   : > { %2976 = vst.msk [vmem:[#allocation3 + $0x160] sm:$0x3] %vm2933_vm3, %v13552_v1  ;;  %2979 = vst.msk [vmem:[#allocation3 + $0x178] sm:$0x3] %vm2933_vm3, %v13552_v1  ;;  %v3056_v35 = vld [vmem:[#allocation3 + $0x9] sm:$0xff] }
  0xee   : > { %613 = vperm.xlu1 %10462, %v502_v51   ;;  %628 = vperm.xlu0 %10461, %v505_v52   ;;  %2982 = vst.msk [vmem:[#allocation3 + $0x190] sm:$0x3] %vm2933_vm3, %v13552_v1  ;;  %2985 = vst.msk [vmem:[#allocation3 + $0x1a8] sm:$0x3] %vm2933_vm3, %v13552_v1 }
  0xef   : > { %13584 = vst [vmem:[#allocation22_spill] sm:$0xff] %v11296_v49 }
  0xf2   : > { %623 = vperm.xlu1 %10462, %v504_v53   ;;  %638 = vperm.xlu0 %10461, %v507_v54  }
  0xf6   : > { %633 = vperm.xlu1 %10462, %v506_v55   ;;  %648 = vperm.xlu0 %10461, %v509_v56   ;;  %v1018_v55 = vld [vmem:[#allocation2 + $0x62] sm:$0xff] }
  0xfa   : > { %643 = vperm.xlu1 %10462, %v508_v57   ;;  %658 = vperm.xlu0 %10461, %v511_v58  }
  0xfe   : > { %653 = vperm.xlu1 %10462, %v510_v59   ;;  %668 = vperm.xlu0 %10461, %v513_v60   ;;  %v1019_v60 = vld [vmem:[#allocation2 + $0x6a] sm:$0xff] }
 0x102   : > { %663 = vperm.xlu1 %10462, %v512_v61   ;;  %787 = vperm.xlu0 %10461, %v747_v62  }
 0x106   : > { %782 = vperm.xlu1 %10462, %v746_v63   ;;  %1051 = vperm.xlu0 %10461, %v1011_v0  }
 0x10a   : > { %1046 = vperm.xlu1 %10462, %v1010_v2   ;;  %1310 = vperm.xlu0 %10461, %v11067_v26   ;;  %v9850_v26 = vpack.c.bf16 %v3091_v25, %v3090_v24 }
 0x10c   : > { %9851 = vmatprep.subr.bf16.mxu1 %v9850_v26 }
 0x10d   : > { %9853 = vmatpush3.bf16.msra.mxu1 %v9850_v26  ;;  %v758_v26 = vld [vmem:[#allocation2 + $0x91] sm:$0xff] }
 0x10e   : > { %792 = vperm.xlu1 %10462, %v748_v3   ;;  %1315 = vperm.xlu0 %10461, %v11078_v30   ;;  %v3055_v30 = vld [vmem:[#allocation3 + $0x1] sm:$0xff] }
 0x10f   : > { %9098 = vmatprep.mubr.msk.f32.mxu1 %vm2930_vm2, %v3055_v30 }
 0x110   : > { %9099 = vmatmul.mubr.msk.f32.vlgmr.msra.gmra.mrb[0].mxu1 %vm2930_vm2, %v3056_v35 }
 0x112   : > { %797 = vperm.xlu1 %10462, %v749_v4   ;;  %1574 = vperm.xlu0 %10461, %v748_v3  }
 0x116   : > { %1056 = vperm.xlu1 %10462, %v1012_v5   ;;  %1579 = vperm.xlu0 %10461, %v749_v4  }
 0x11a   : > { %1061 = vperm.xlu1 %10462, %v1013_v6   ;;  %1320 = vperm.xlu0 %10461, %v11069_v27  }
 0x11e   : > { %802 = vperm.xlu1 %10462, %v750_v7   ;;  %807 = vperm.xlu0 %10461, %v751_v8  }
 0x122   : > { %1838 = vperm.xlu1 %10462, %v1012_v5   ;;  %1843 = vperm.xlu0 %10461, %v1013_v6   ;;  %v757_v6 = vld [vmem:[#allocation2 + $0x81] sm:$0xff] }
 0x126   : > { %1325 = vperm.xlu1 %10462, %v11086_v32   ;;  %1584 = vperm.xlu0 %10461, %v750_v7  }
 0x12a   : > { %1066 = vperm.xlu1 %10462, %v1014_v9   ;;  %1071 = vperm.xlu0 %10461, %v11130_v10  }
 0x12e   : > { %2103 = vperm.xlu1 %10462, %v11069_v27   ;;  %2108 = vperm.xlu0 %10461, %v11086_v32   ;;  %v11144_v13 = vpop.permute.xlu0 %518  ;;  %v4158_v32 = vld [vmem:[#allocation10 + $0x68] sm:$0xff] }
 0x132   : > { %1589 = vperm.xlu1 %10462, %v751_v8   ;;  %1330 = vperm.xlu0 %10461, %v11082_v31   ;;  %v11150_v15 = vpop.permute.xlu0 %523 }
 0x136   : > { %812 = vperm.xlu1 %10462, %v11136_v11   ;;  %2367 = vperm.xlu0 %10461, %v750_v7  }
 0x13a   : > { %1848 = vperm.xlu1 %10462, %v1014_v9   ;;  %1335 = vperm.xlu0 %10461, %v11099_v38  }
 0x13e   : > { %817 = vperm.xlu1 %10462, %v11140_v12   ;;  %2372 = vperm.xlu0 %10461, %v751_v8  }
 0x142   : > { %1853 = vperm.xlu1 %10462, %v11130_v10   ;;  %1594 = vperm.xlu0 %10461, %v11136_v11  }
 0x146   : > { %1076 = vperm.xlu1 %10462, %v11147_v14   ;;  %2631 = vperm.xlu0 %10461, %v1014_v9  }
 0x149   : > { %v11152_v16 = vpop.permute.xlu1 %528  ;;  %v11227_v17 = vpop.permute.xlu0 %538 }
 0x14a   : > { %2113 = vperm.xlu1 %10462, %v11082_v31   ;;  %1599 = vperm.xlu0 %10461, %v11140_v12   ;;  %v4157_v31 = vld [vmem:[#allocation10 + $0x60] sm:$0xff] }
 0x14b   : > { %v11283_v36 = vpack.c.bf16 %v4158_v32, %v4157_v31  ;;  %v759_v32 = vld [vmem:[#allocation2 + $0x99] sm:$0xff] }
 0x14d   : > { %v11232_v22 = vpop.permute.xlu1 %533  ;;  %v11235_v23 = vpop.permute.xlu0 %548  ;;  %13582 = vst [vmem:[#allocation20_spill] sm:$0xff] %v11283_v36  ;;  %9871 = vmatprep.subr.bf16.mxu0 %v11283_v36 }
 0x14e   : > { %1081 = vperm.xlu1 %10462, %v11230_v18   ;;  %2636 = vperm.xlu0 %10461, %v11130_v10   ;;  %v1020_v10 = vld [vmem:[#allocation2 + $0x7a] sm:$0xff] }
 0x14f   : > { %9873 = vmatpush3.bf16.msra.mxu0 %v11283_v36 }
 0x150   : > { %9875 = vmatprep.subr.bf16.mxu0 %v11296_v49 }
 0x151   : > { %v11274_v27 = vpop.permute.xlu1 %543  ;;  %v11277_v28 = vpop.permute.xlu0 %558 }
 0x152   : > { %2118 = vperm.xlu1 %10462, %v11099_v38   ;;  %1340 = vperm.xlu0 %10461, %v11088_v33  }
 0x153   : > { %9877 = vmatpush3.bf16.msra.mxu0 %v11296_v49 }
 0x155   : > { %v11280_v34 = vpop.permute.xlu1 %553  ;;  %v11285_v37 = vpop.permute.xlu0 %568 }
 0x156   : > { %822 = vperm.xlu1 %10462, %v754_v29   ;;  %2377 = vperm.xlu0 %10461, %v11136_v11  }
 0x159   : > { %v11291_v38 = vpop.permute.xlu1 %563  ;;  %v11294_v48 = vpop.permute.xlu0 %578 }
 0x15a   : > { %1858 = vperm.xlu1 %10462, %v11147_v14   ;;  %13583 = vst [vmem:[#allocation21_spill] sm:$0xff] %v11294_v48  ;;  %1345 = vperm.xlu0 %10461, %v11108_v41  }
 0x15d   : > { %v11300_v51 = vpop.permute.xlu1 %573  ;;  %v11303_v52 = vpop.permute.xlu0 %588 }
 0x15e   : > { %827 = vperm.xlu1 %10462, %v755_v50   ;;  %13585 = vst [vmem:[#allocation23_spill] sm:$0xff] %v11303_v52  ;;  %2382 = vperm.xlu0 %10461, %v11140_v12  }
 0x161   : > { %v11306_v53 = vpop.permute.xlu1 %583  ;;  %v11309_v54 = vpop.permute.xlu0 %598 }
 0x162   : > { %13586 = vst [vmem:[#allocation24_spill] sm:$0xff] %v11306_v53  ;;  %1863 = vperm.xlu1 %10462, %v11230_v18   ;;  %13587 = vst [vmem:[#allocation25_spill] sm:$0xff] %v11309_v54  ;;  %1604 = vperm.xlu0 %10461, %v754_v29  }
 0x165   : > { %v11311_v56 = vpop.permute.xlu1 %593  ;;  %v11313_v57 = vpop.permute.xlu0 %608 }
 0x166   : > { %13588 = vst [vmem:[#allocation26_spill] sm:$0xff] %v11311_v56  ;;  %1086 = vperm.xlu1 %10462, %v1018_v55   ;;  %13589 = vst [vmem:[#allocation27_spill] sm:$0xff] %v11313_v57  ;;  %2641 = vperm.xlu0 %10461, %v11147_v14  }
 0x169   : > { %v11316_v58 = vpop.permute.xlu1 %603  ;;  %v11319_v59 = vpop.permute.xlu0 %618 }
 0x16a   : > { %13590 = vst [vmem:[#allocation28_spill] sm:$0xff] %v11316_v58  ;;  %2123 = vperm.xlu1 %10462, %v11088_v33   ;;  %13591 = vst [vmem:[#allocation29_spill] sm:$0xff] %v11319_v59  ;;  %1609 = vperm.xlu0 %10461, %v755_v50   ;;  %v756_v33 = vld [vmem:[#allocation2 + $0x79] sm:$0xff] }
 0x16d   : > { %v11321_v61 = vpop.permute.xlu1 %613  ;;  %v11323_v62 = vpop.permute.xlu0 %628 }
 0x16e   : > { %13592 = vst [vmem:[#allocation30_spill] sm:$0xff] %v11321_v61  ;;  %1091 = vperm.xlu1 %10462, %v1019_v60   ;;  %13593 = vst [vmem:[#allocation31_spill] sm:$0xff] %v11323_v62  ;;  %2646 = vperm.xlu0 %10461, %v11230_v18   ;;  %v11419_v62 = vld [vmem:[#allocation6 + $0x4] ss:$0 sm:$0xff] }
 0x171   : > { %v11326_v63 = vpop.permute.xlu1 %623  ;;  %v11329_v0 = vpop.permute.xlu0 %638 }
 0x172   : > { %13594 = vst [vmem:[#allocation32_spill] sm:$0xff] %v11326_v63  ;;  %2128 = vperm.xlu1 %10462, %v11108_v41   ;;  %13595 = vst [vmem:[#allocation33_spill] sm:$0xff] %v11329_v0  ;;  %1350 = vperm.xlu0 %10461, %v11103_v40   ;;  %v11409_v63 = vld [vmem:[#allocation6 + $0x2] ss:$0 sm:$0xff] }
 0x175   : > { %v11332_v2 = vpop.permute.xlu1 %633  ;;  %v11334_v3 = vpop.permute.xlu0 %648 }
 0x176   : > { %13596 = vst [vmem:[#allocation34_spill] sm:$0xff] %v11332_v2  ;;  %832 = vperm.xlu1 %10462, %v756_v33   ;;  %13597 = vst [vmem:[#allocation35_spill] sm:$0xff] %v11334_v3  ;;  %2387 = vperm.xlu0 %10461, %v754_v29  }
 0x179   : > { %v11336_v4 = vpop.permute.xlu1 %643  ;;  %v11338_v5 = vpop.permute.xlu0 %658 }
 0x17a   : > { %13598 = vst [vmem:[#allocation36_spill] sm:$0xff] %v11336_v4  ;;  %1868 = vperm.xlu1 %10462, %v1018_v55   ;;  %13599 = vst [vmem:[#allocation37_spill] sm:$0xff] %v11338_v5  ;;  %1355 = vperm.xlu0 %10461, %v11114_v43   ;;  %v11404_v5 = vld [vmem:[#allocation6 + $0x1] ss:$0 sm:$0xff]  ;;  %v11415_v4 = vld [vmem:[#allocation6 + $0x3] ss:$0 sm:$0xff] }
 0x17d   : > { %v11341_v41 = vpop.permute.xlu1 %653  ;;  %v11343_v7 = vpop.permute.xlu0 %668 }
 0x17e   : > { %13600 = vst [vmem:[#allocation38_spill] sm:$0xff] %v11341_v41  ;;  %837 = vperm.xlu1 %10462, %v757_v6   ;;  %13601 = vst [vmem:[#allocation39_spill] sm:$0xff] %v11343_v7  ;;  %2392 = vperm.xlu0 %10461, %v755_v50   ;;  %v11377_v50 = vld [vmem:[#allocation2 + $0x92] sm:$0xff] }
 0x181   : > { %v11345_v8 = vpop.permute.xlu1 %663  ;;  %v11347_v9 = vpop.permute.xlu0 %787 }
 0x182   : > { %13602 = vst [vmem:[#allocation40_spill] sm:$0xff] %v11345_v8  ;;  %1873 = vperm.xlu1 %10462, %v1019_v60   ;;  %1614 = vperm.xlu0 %10461, %v756_v33   ;;  %v11402_v8 = vld [vmem:[#allocation6] ss:$0 sm:$0xff] }
 0x183   : > { %v683_v54 = vmul.f32 %v11402_v8, %v11150_v15  ;;  %v11456_v15 = vld [vmem:[#allocation2 + $0xaa] sm:$0xff] }
 0x185   : > { %v783_v11 = vpop.permute.xlu1 %782  ;;  %v11349_v12 = vpop.permute.xlu0 %1051 }
 0x186   : > { %1096 = vperm.xlu1 %10462, %v1020_v10   ;;  %2651 = vperm.xlu0 %10461, %v1018_v55   ;;  %v946_v41 = vmul.f32 %v11404_v5, %v783_v11 }
 0x189   : > { %v1047_v14 = vpop.permute.xlu1 %1046  ;;  %v11352_v18 = vpop.permute.xlu0 %1310 }
 0x18a   : > { %2133 = vperm.xlu1 %10462, %v11103_v40   ;;  %1619 = vperm.xlu0 %10461, %v757_v6   ;;  %v1210_v59 = vmul.f32 %v11409_v63, %v1047_v14  ;;  %v1474_v61 = vmul.f32 %v11415_v4, %v11352_v18  ;;  %v11429_v14 = vld [vmem:[#allocation6 + $0x5] ss:$0 sm:$0xff] }
 0x18d   : > { %v11354_v20 = vpop.permute.xlu1 %792  ;;  %v11356_v21 = vpop.permute.xlu0 %1315 }
 0x18e   : > { %1101 = vperm.xlu1 %10462, %v1021_v19   ;;  %2656 = vperm.xlu0 %10461, %v1019_v60  }
 0x191   : > { %v11358_v24 = vpop.permute.xlu1 %797  ;;  %v1575_v25 = vpop.permute.xlu0 %1574 }
 0x192   : > { %2138 = vperm.xlu1 %10462, %v11114_v43   ;;  %1360 = vperm.xlu0 %10461, %v11110_v42  }
 0x195   : > { %v11362_v29 = vpop.permute.xlu1 %1056  ;;  %v11364_v40 = vpop.permute.xlu0 %1579 }
 0x196   : > { %842 = vperm.xlu1 %10462, %v758_v26   ;;  %2397 = vperm.xlu0 %10461, %v756_v33  }
 0x199   : > { %v11366_v30 = vpop.permute.xlu1 %1061  ;;  %v11368_v31 = vpop.permute.xlu0 %1320 }
 0x19a   : > { %1878 = vperm.xlu1 %10462, %v1020_v10   ;;  %1365 = vperm.xlu0 %10461, %v11120_v45  }
 0x19d   : > { %v11371_v35 = vpop.permute.xlu1 %802  ;;  %v11373_v43 = vpop.permute.xlu0 %807 }
 0x19e   : > { %847 = vperm.xlu1 %10462, %v759_v32   ;;  %2402 = vperm.xlu0 %10461, %v757_v6   ;;  %v11389_v6 = vld [vmem:[#allocation2 + $0x9a] sm:$0xff] }
 0x1a1   : > { %v1839_v39 = vpop.permute.xlu1 %1838  ;;  %v11375_v46 = vpop.permute.xlu0 %1843 }
 0x1a2   : > { %1883 = vperm.xlu1 %10462, %v1021_v19   ;;  %1624 = vperm.xlu0 %10461, %v758_v26   ;;  %v2002_v18 = vmul.f32 %v11429_v14, %v1839_v39 }
 0x1a5   : > { %v11379_v55 = vpop.permute.xlu1 %1325  ;;  %v11382_v60 = vpop.permute.xlu0 %1584 }
 0x1a6   : > { %1106 = vperm.xlu1 %10462, %v11377_v50   ;;  %2661 = vperm.xlu0 %10461, %v1020_v10  }
 0x1a9   : > { %v11384_v33 = vpop.permute.xlu1 %1066  ;;  %v11387_v1 = vpop.permute.xlu0 %1071 }
 0x1aa   : > { %2143 = vperm.xlu1 %10462, %v11110_v42   ;;  %1629 = vperm.xlu0 %10461, %v759_v32   ;;  %v11400_v42 = vld [vmem:[#allocation2 + $0xa9] sm:$0xff] }
 0x1ad   : > { %v2104_v49 = vpop.permute.xlu1 %2103  ;;  %v11392_v36 = vpop.permute.xlu0 %2108 }
 0x1ae   : > { %1111 = vperm.xlu1 %10462, %v11389_v6   ;;  %2666 = vperm.xlu0 %10461, %v1021_v19  }
 0x1b1   : > { %v11394_v7 = vpop.permute.xlu1 %1589  ;;  %v11397_v10 = vpop.permute.xlu0 %1330 }
 0x1b2   : > { %2148 = vperm.xlu1 %10462, %v11120_v45   ;;  %1370 = vperm.xlu0 %10461, %v11116_v44   ;;  %v682_v45 = vmul.f32 %v11402_v8, %v11144_v13  ;;  %v11427_v13 = vld [vmem:[#allocation2 + $0xb1] sm:$0xff] }
 0x1b4   : > { %v978_v0 = vadd.f32 %v946_v41, %v682_v45  ;;  %v1738_v41 = vmul.f32 %v11419_v62, %v1575_v25  ;;  %v11434_v45 = vld [vmem:[#allocation6 + $0x6] ss:$0 sm:$0xff]  ;;  %v1211_v25 = vmul.f32 %v11409_v63, %v11349_v12  ;;  %v11458_v12 = vld [vmem:[#allocation6 + $0x8] ss:$0 sm:$0xff] }
 0x1b5   : > { %v11407_v3 = vpop.permute.xlu1 %812  ;;  %v2368_v19 = vpop.permute.xlu0 %2367  ;;  %v2267_v52 = vmul.f32 %v11434_v45, %v2104_v49 }
 0x1b6   : > { %852 = vperm.xlu1 %10462, %v11400_v42   ;;  %2407 = vperm.xlu0 %10461, %v758_v26   ;;  %v1242_v57 = vadd.f32 %v1210_v59, %v978_v0  ;;  %v947_v59 = vmul.f32 %v11404_v5, %v11347_v9 }
 0x1b8   : > { %v1506_v0 = vadd.f32 %v1474_v61, %v1242_v57  ;;  %v979_v57 = vadd.f32 %v947_v59, %v683_v54  ;;  %v1475_v61 = vmul.f32 %v11415_v4, %v11356_v21 }
 0x1b9   : > { %v11417_v2 = vpop.permute.xlu1 %1848  ;;  %v11422_v11 = vpop.permute.xlu0 %1335 }
 0x1ba   : > { %1888 = vperm.xlu1 %10462, %v11377_v50   ;;  %1375 = vperm.xlu0 %10461, %v11123_v47   ;;  %v11440_v47 = vld [vmem:[#allocation6 + $0x7] ss:$0 sm:$0xff]  ;;  %v1770_v56 = vadd.f32 %v1738_v41, %v1506_v0  ;;  %v1243_v49 = vadd.f32 %v1211_v25, %v979_v57  ;;  %v1739_v41 = vmul.f32 %v11419_v62, %v11364_v40 }
 0x1bb   : > { %v2531_v39 = vmul.f32 %v11440_v47, %v2368_v19 }
 0x1bc   : > { %v1507_v21 = vadd.f32 %v1475_v61, %v1243_v49 }
 0x1bd   : > { %v11432_v26 = vpop.permute.xlu1 %817  ;;  %v2373_v58 = vpop.permute.xlu0 %2372 }
 0x1be   : > { %857 = vperm.xlu1 %10462, %v11427_v13   ;;  %2412 = vperm.xlu0 %10461, %v759_v32   ;;  %v2034_v32 = vadd.f32 %v2002_v18, %v1770_v56  ;;  %v2003_v56 = vmul.f32 %v11429_v14, %v11375_v46  ;;  %v11469_v18 = vld [vmem:[#allocation8] ss:$0 sm:$0xff]  ;;  %v1771_v25 = vadd.f32 %v1739_v41, %v1507_v21  ;;  %v11489_v21 = vld [vmem:[#allocation2 + $0xc0] sm:$0xff] }
 0x1bf   : > { %v2532_v46 = vmul.f32 %v11440_v47, %v2373_v58  ;;  %v2078_v58 = vld [vmem:[#allocation2 + $0xb0] sm:$0xff] }
 0x1c0   : > { %v2299_v0 = vadd.f32 %v2267_v52, %v2034_v32  ;;  %v2268_v52 = vmul.f32 %v11434_v45, %v11392_v36  ;;  %v2035_v32 = vadd.f32 %v2003_v56, %v1771_v25 }
 0x1c1   : > { %v11447_v53 = vpop.permute.xlu1 %1853  ;;  %v11450_v9 = vpop.permute.xlu0 %1594 }
 0x1c2   : > { %1893 = vperm.xlu1 %10462, %v11389_v6   ;;  %1634 = vperm.xlu0 %10461, %v11400_v42   ;;  %v2563_v19 = vadd.f32 %v2531_v39, %v2299_v0  ;;  %v2300_v49 = vadd.f32 %v2268_v52, %v2035_v32  ;;  %v11497_v52 = vld [vmem:[#allocation2 + $0xc1] sm:$0xff] }
 0x1c5   : > { %v11462_v48 = vpop.permute.xlu1 %1076  ;;  %v2632_v54 = vpop.permute.xlu0 %2631 }
 0x1c6   : > { %1116 = vperm.xlu1 %10462, %v11456_v15   ;;  %v2795_v59 = vmul.f32 %v11458_v12, %v2632_v54  ;;  %2671 = vperm.xlu0 %10461, %v11377_v50   ;;  %v11481_v50 = vld [vmem:[#allocation2 + $0xb2] sm:$0xff]  ;;  %v2564_v54 = vadd.f32 %v2532_v46, %v2300_v49  ;;  %v948_v49 = vmul.f32 %v11404_v5, %v11354_v20 }
 0x1c8   : > { %v2827_v40 = vadd.f32 %v2795_v59, %v2563_v19 }
 0x1c9   : > { %v11473_v57 = vpop.permute.xlu1 %2113  ;;  %v11476_v61 = vpop.permute.xlu0 %1599 }
 0x1ca   : > { %2153 = vperm.xlu1 %10462, %v11116_v44   ;;  %v2866_v39 = vadd.f32 %v11469_v18, %v2827_v40  ;;  %1639 = vperm.xlu0 %10461, %v11427_v13  }
 0x1cc   : > { %v2898_v41 = vmax.f32 %v2866_v39, 0.0 }
 0x1cd   : > { %v11483_v0 = vpop.permute.xlu1 %1081  ;;  %v2637_v36 = vpop.permute.xlu0 %2636 }
 0x1ce   : > { %1121 = vperm.xlu1 %10462, %v11481_v50   ;;  %2987 = vst.msk [vmem:[#allocation3 + $0x19] sm:$0xff] %vm2930_vm2, %v2898_v41  ;;  %v2796_v44 = vmul.f32 %v11458_v12, %v2637_v36  ;;  %2676 = vperm.xlu0 %10461, %v11389_v6   ;;  %v11508_v41 = vld [vmem:[#allocation2 + $0xc8] sm:$0xff]  ;;  %v684_v36 = vmul.f32 %v11402_v8, %v11152_v16 }
 0x1cf   : > { %v1740_v16 = vmul.f32 %v11419_v62, %v11382_v60  ;;  %v685_v60 = vmul.f32 %v11402_v8, %v11232_v22 }
 0x1d0   : > { %v2828_v56 = vadd.f32 %v2796_v44, %v2564_v54  ;;  %v1212_v54 = vmul.f32 %v11409_v63, %v11362_v29 }
 0x1d1   : > { %v11491_v19 = vpop.permute.xlu1 %2118  ;;  %v11493_v59 = vpop.permute.xlu0 %1340 }
 0x1d2   : > { %2158 = vperm.xlu1 %10462, %v2078_v58   ;;  %v2867_v25 = vadd.f32 %v11469_v18, %v2828_v56  ;;  %1380 = vperm.xlu0 %10461, %v11489_v21   ;;  %v980_v58 = vadd.f32 %v948_v49, %v684_v36  ;;  %v11522_v56 = vld [vmem:[#allocation2 + $0xc9] sm:$0xff]  ;;  %v949_v49 = vmul.f32 %v11404_v5, %v11358_v24 }
 0x1d3   : > { %v2269_v24 = vmul.f32 %v11434_v45, %v11473_v57  ;;  %v1741_v57 = vmul.f32 %v11419_v62, %v11394_v7 }
 0x1d4   : > { %v2899_v40 = vmax.f32 %v2867_v25, 0.0  ;;  %v1244_v25 = vadd.f32 %v1212_v54, %v980_v58  ;;  %v1213_v54 = vmul.f32 %v11409_v63, %v11366_v30  ;;  %v11551_v30 = vld [vmem:[#allocation2 + $0xc2] sm:$0xff] }
 0x1d5   : > { %v11499_v32 = vpop.permute.xlu1 %822  ;;  %v2378_v6 = vpop.permute.xlu0 %2377  ;;  %v3057_v46 = vld [vmem:[#allocation3 + $0x19] sm:$0xff] }
 0x1d6   : > { %862 = vperm.xlu1 %10462, %v11497_v52   ;;  %v4124_v39 = vld [vmem:[#allocation3 + $0x18] sm:$0xff]  ;;  %2988 = vst.msk [vmem:[#allocation3 + $0x21] sm:$0xff] %vm2930_vm2, %v2899_v40  ;;  %2417 = vperm.xlu0 %10461, %v11400_v42   ;;  %v1476_v42 = vmul.f32 %v11415_v4, %v11368_v31  ;;  %v2004_v31 = vmul.f32 %v11429_v14, %v11417_v2 }
 0x1d7   : > { %9101 = vmatprep.mubr.msk.f32.mxu1 %vm2930_vm2, %v3057_v46  ;;  %9266 = vmatprep.mubr.msk.f32.mxu0 %vm2930_vm2, %v4124_v39  ;;  %v2533_v22 = vmul.f32 %v11440_v47, %v2378_v6 }
 0x1d8   : > { %v1508_v36 = vadd.f32 %v1476_v42, %v1244_v25  ;;  %v1477_v25 = vmul.f32 %v11415_v4, %v11379_v55  ;;  %v2005_v55 = vmul.f32 %v11429_v14, %v11447_v53 }
 0x1d9   : > { %v11514_v44 = vpop.permute.xlu1 %1858  ;;  %v11517_v20 = vpop.permute.xlu0 %1345 }
 0x1da   : > { %1898 = vperm.xlu1 %10462, %v11456_v15   ;;  %1385 = vperm.xlu0 %10461, %v11508_v41   ;;  %v1772_v58 = vadd.f32 %v1740_v16, %v1508_v36 }
 0x1dd   : > { %v11526_v40 = vpop.permute.xlu1 %827  ;;  %v2383_v29 = vpop.permute.xlu0 %2382  ;;  %v3058_v46 = vld [vmem:[#allocation3 + $0x21] sm:$0xff] }
 0x1de   : > { %867 = vperm.xlu1 %10462, %v11522_v56   ;;  %v4125_v39 = vld [vmem:[#allocation3 + $0x20] sm:$0xff]  ;;  %2422 = vperm.xlu0 %10461, %v11427_v13   ;;  %v981_v13 = vadd.f32 %v949_v49, %v685_v60 }
 0x1df   : > { %9102 = vmatmul.mubr.msk.f32.gmra.mrb[2].mxu1 %vm2930_vm2, %v3058_v46  ;;  %9267 = vmatmul.mubr.msk.f32.vlgmr.msra.gmra.mrb[0].mxu0 %vm2930_vm2, %v4125_v39  ;;  %v2036_v46 = vadd.f32 %v2004_v31, %v1772_v58 }
 0x1e0   : > { %v1245_v16 = vadd.f32 %v1213_v54, %v981_v13  ;;  %v2270_v54 = vmul.f32 %v11434_v45, %v11491_v19 }
 0x1e1   : > { %v11542_v42 = vpop.permute.xlu1 %1863  ;;  %v11545_v2 = vpop.permute.xlu0 %1604  ;;  %v2301_v39 = vadd.f32 %v2269_v24, %v2036_v46 }
 0x1e2   : > { %1903 = vperm.xlu1 %10462, %v11481_v50   ;;  %1644 = vperm.xlu0 %10461, %v11497_v52   ;;  %v1509_v60 = vadd.f32 %v1477_v25, %v1245_v16  ;;  %v2534_v25 = vmul.f32 %v11440_v47, %v2383_v29  ;;  %v11578_v29 = vld [vmem:[#allocation2 + $0xd8] sm:$0xff] }
 0x1e3   : > { %v2565_v31 = vadd.f32 %v2533_v22, %v2301_v39  ;;  %v11570_v22 = vld [vmem:[#allocation2 + $0xca] sm:$0xff] }
 0x1e4   : > { %v1773_v58 = vadd.f32 %v1741_v57, %v1509_v60 }
 0x1e5   : > { %v11555_v36 = vpop.permute.xlu1 %1086  ;;  %v2642_v49 = vpop.permute.xlu0 %2641 }
 0x1e6   : > { %1126 = vperm.xlu1 %10462, %v11551_v30   ;;  %v2797_v6 = vmul.f32 %v11458_v12, %v2642_v49  ;;  %2681 = vperm.xlu0 %10461, %v11456_v15   ;;  %v2037_v46 = vadd.f32 %v2005_v55, %v1773_v58 }
 0x1e8   : > { %v2829_v7 = vadd.f32 %v2797_v6, %v2565_v31  ;;  %v2302_v15 = vadd.f32 %v2270_v54, %v2037_v46  ;;  %v11587_v6 = vld [vmem:[#allocation2 + $0xd9] sm:$0xff] }
 0x1e9   : > { %v2124_v24 = vpop.permute.xlu1 %2123  ;;  %v11565_v13 = vpop.permute.xlu0 %1609 }
 0x1ea   : > { %2163 = vperm.xlu1 %10462, %v11489_v21   ;;  %v2868_v53 = vadd.f32 %v11469_v18, %v2829_v7  ;;  %1649 = vperm.xlu0 %10461, %v11522_v56   ;;  %v2566_v39 = vadd.f32 %v2534_v25, %v2302_v15  ;;  %v950_v25 = vmul.f32 %v11404_v5, %v11371_v35 }
 0x1eb   : > { %v1214_v15 = vmul.f32 %v11409_v63, %v11384_v33 }
 0x1ec   : > { %v2900_v16 = vmax.f32 %v2868_v53, 0.0  ;;  %v686_v53 = vmul.f32 %v11402_v8, %v11227_v17  ;;  %v1742_v17 = vmul.f32 %v11419_v62, %v11450_v9  ;;  %v687_v9 = vmul.f32 %v11402_v8, %v11274_v27  ;;  %v11640_v27 = vld [vmem:[#allocation2 + $0xda] sm:$0xff] }
 0x1ed   : > { %v11572_v57 = vpop.permute.xlu1 %1091  ;;  %v2647_v19 = vpop.permute.xlu0 %2646 }
 0x1ee   : > { %1131 = vperm.xlu1 %10462, %v11570_v22   ;;  %2989 = vst.msk [vmem:[#allocation3 + $0x31] sm:$0xff] %vm2930_vm2, %v2900_v16  ;;  %v2798_v21 = vmul.f32 %v11458_v12, %v2647_v19  ;;  %2686 = vperm.xlu0 %10461, %v11481_v50   ;;  %v982_v19 = vadd.f32 %v950_v25, %v686_v53 }
 0x1ef   : > { %v1215_v25 = vmul.f32 %v11409_v63, %v11387_v1 }
 0x1f0   : > { %v2830_v49 = vadd.f32 %v2798_v21, %v2566_v39  ;;  %v11612_v39 = vld [vmem:[#allocation2 + $0xe1] sm:$0xff]  ;;  %v1246_v21 = vadd.f32 %v1214_v15, %v982_v19  ;;  %v2271_v15 = vmul.f32 %v11434_v45, %v2124_v24  ;;  %v1479_v19 = vmul.f32 %v11415_v4, %v11422_v11 }
 0x1f1   : > { %v11580_v60 = vpop.permute.xlu1 %2128  ;;  %v11583_v55 = vpop.permute.xlu0 %1350  ;;  %v1743_v24 = vmul.f32 %v11419_v62, %v11476_v61  ;;  %v2007_v11 = vmul.f32 %v11429_v14, %v11542_v42 }
 0x1f2   : > { %2168 = vperm.xlu1 %10462, %v11508_v41   ;;  %v2869_v31 = vadd.f32 %v11469_v18, %v2830_v49  ;;  %1390 = vperm.xlu0 %10461, %v11578_v29   ;;  %v11598_v41 = vld [vmem:[#allocation2 + $0xe0] sm:$0xff] }
 0x1f4   : > { %v2901_v58 = vmax.f32 %v2869_v31, 0.0 }
 0x1f5   : > { %v11589_v54 = vpop.permute.xlu1 %832  ;;  %v2388_v50 = vpop.permute.xlu0 %2387  ;;  %v3059_v7 = vld [vmem:[#allocation3 + $0x31] sm:$0xff] }
 0x1f6   : > { %872 = vperm.xlu1 %10462, %v11587_v6   ;;  %v4126_v46 = vld [vmem:[#allocation3 + $0x30] sm:$0xff]  ;;  %2990 = vst.msk [vmem:[#allocation3 + $0x39] sm:$0xff] %vm2930_vm2, %v2901_v58  ;;  %2427 = vperm.xlu0 %10461, %v11497_v52   ;;  %v1478_v52 = vmul.f32 %v11415_v4, %v11397_v10  ;;  %v2006_v10 = vmul.f32 %v11429_v14, %v11514_v44 }
 0x1f7   : > { %9104 = vmatprep.mubr.msk.f32.mxu1 %vm2930_vm2, %v3059_v7  ;;  %9269 = vmatprep.mubr.msk.f32.mxu0 %vm2930_vm2, %v4126_v46  ;;  %v951_v7 = vmul.f32 %v11404_v5, %v11373_v43 }
 0x1f8   : > { %v1510_v46 = vadd.f32 %v1478_v52, %v1246_v21  ;;  %v2535_v21 = vmul.f32 %v11440_v47, %v2388_v50 }
 0x1f9   : > { %v11604_v16 = vpop.permute.xlu1 %1868  ;;  %v11607_v35 = vpop.permute.xlu0 %1355 }
 0x1fa   : > { %1908 = vperm.xlu1 %10462, %v11551_v30   ;;  %1395 = vperm.xlu0 %10461, %v11598_v41   ;;  %v1774_v53 = vadd.f32 %v1742_v17, %v1510_v46 }
 0x1fc   : > { %v2038_v52 = vadd.f32 %v2006_v10, %v1774_v53 }
 0x1fd   : > { %v11616_v49 = vpop.permute.xlu1 %837  ;;  %v2393_v33 = vpop.permute.xlu0 %2392  ;;  %v3060_v31 = vld [vmem:[#allocation3 + $0x39] sm:$0xff] }
 0x1fe   : > { %877 = vperm.xlu1 %10462, %v11612_v39   ;;  %v4127_v58 = vld [vmem:[#allocation3 + $0x38] sm:$0xff]  ;;  %2432 = vperm.xlu0 %10461, %v11522_v56   ;;  %v983_v56 = vadd.f32 %v951_v7, %v687_v9  ;;  %v2303_v17 = vadd.f32 %v2271_v15, %v2038_v52  ;;  %v2272_v9 = vmul.f32 %v11434_v45, %v11580_v60 }
 0x1ff   : > { %9105 = vmatmul.mubr.msk.f32.gmra.mrb[4].mxu1 %vm2930_vm2, %v3060_v31  ;;  %9270 = vmatmul.mubr.msk.f32.gmra.mrb[2].mxu0 %vm2930_vm2, %v4127_v58 }
 0x200   : > { %v1247_v1 = vadd.f32 %v1215_v25, %v983_v56  ;;  %v2567_v46 = vadd.f32 %v2535_v21, %v2303_v17  ;;  %v2536_v56 = vmul.f32 %v11440_v47, %v2393_v33 }
 0x201   : > { %v11631_v43 = vpop.permute.xlu1 %1873  ;;  %v11634_v44 = vpop.permute.xlu0 %1614 }
 0x202   : > { %1913 = vperm.xlu1 %10462, %v11570_v22   ;;  %1654 = vperm.xlu0 %10461, %v11587_v6   ;;  %v1511_v7 = vadd.f32 %v1479_v19, %v1247_v1  ;;  %v11659_v19 = vld [vmem:[#allocation2 + $0xe2] sm:$0xff] }
 0x204   : > { %v1775_v10 = vadd.f32 %v1743_v24, %v1511_v7  ;;  %v1292_v7 = vld [vmem:[#allocation2 + $0xf0] sm:$0xff] }
 0x205   : > { %v11644_v31 = vpop.permute.xlu1 %1096  ;;  %v2652_v58 = vpop.permute.xlu0 %2651 }
 0x206   : > { %1136 = vperm.xlu1 %10462, %v11640_v27   ;;  %v2799_v50 = vmul.f32 %v11458_v12, %v2652_v58  ;;  %2691 = vperm.xlu0 %10461, %v11551_v30   ;;  %v2039_v15 = vadd.f32 %v2007_v11, %v1775_v10  ;;  %v1293_v11 = vld [vmem:[#allocation2 + $0xf8] sm:$0xff] }
 0x208   : > { %v2831_v61 = vadd.f32 %v2799_v50, %v2567_v46  ;;  %v2304_v30 = vadd.f32 %v2272_v9, %v2039_v15  ;;  %v1216_v15 = vmul.f32 %v11409_v63, %v11462_v48 }
 0x209   : > { %v2134_v25 = vpop.permute.xlu1 %2133  ;;  %v11654_v53 = vpop.permute.xlu0 %1619 }
 0x20a   : > { %2173 = vperm.xlu1 %10462, %v11578_v29   ;;  %v2870_v42 = vadd.f32 %v11469_v18, %v2831_v61  ;;  %1659 = vperm.xlu0 %10461, %v11612_v39   ;;  %v2568_v1 = vadd.f32 %v2536_v56, %v2304_v30  ;;  %v952_v61 = vmul.f32 %v11404_v5, %v11407_v3 }
 0x20b   : > { %v1480_v30 = vmul.f32 %v11415_v4, %v11493_v59  ;;  %v2008_v59 = vmul.f32 %v11429_v14, %v11604_v16 }
 0x20c   : > { %v2902_v52 = vmax.f32 %v2870_v42, 0.0 }
 0x20d   : > { %v11661_v21 = vpop.permute.xlu1 %1101  ;;  %v2657_v60 = vpop.permute.xlu0 %2656 }
 0x20e   : > { %1141 = vperm.xlu1 %10462, %v11659_v19   ;;  %2991 = vst.msk [vmem:[#allocation3 + $0x49] sm:$0xff] %vm2930_vm2, %v2902_v52  ;;  %v2800_v29 = vmul.f32 %v11458_v12, %v2657_v60  ;;  %2696 = vperm.xlu0 %10461, %v11570_v22   ;;  %v1744_v60 = vmul.f32 %v11419_v62, %v11545_v2  ;;  %v11706_v2 = vld [vmem:[#allocation2 + $0xf9] sm:$0xff] }
 0x210   : > { %v2832_v33 = vadd.f32 %v2800_v29, %v2568_v1 }
 0x211   : > { %v11667_v24 = vpop.permute.xlu1 %2138  ;;  %v11670_v17 = vpop.permute.xlu0 %1360 }
 0x212   : > { %2178 = vperm.xlu1 %10462, %v11598_v41   ;;  %v2871_v58 = vadd.f32 %v11469_v18, %v2832_v33  ;;  %1918 = vperm.xlu0 %10461, %v11640_v27   ;;  %v688_v41 = vmul.f32 %v11402_v8, %v11235_v23 }
 0x214   : > { %v2903_v46 = vmax.f32 %v2871_v58, 0.0  ;;  %v984_v3 = vadd.f32 %v952_v61, %v688_v41  ;;  %v689_v58 = vmul.f32 %v11402_v8, %v11280_v34  ;;  %v1481_v61 = vmul.f32 %v11415_v4, %v11517_v20 }
 0x215   : > { %v11674_v50 = vpop.permute.xlu1 %842  ;;  %v2398_v10 = vpop.permute.xlu0 %2397  ;;  %v3061_v9 = vld [vmem:[#allocation3 + $0x49] sm:$0xff] }
 0x216   : > { %1400 = vperm.xlu1 %10462, %v1292_v7   ;;  %v4128_v22 = vld [vmem:[#allocation3 + $0x48] sm:$0xff]  ;;  %2992 = vst.msk [vmem:[#allocation3 + $0x51] sm:$0xff] %vm2930_vm2, %v2903_v46  ;;  %1405 = vperm.xlu0 %10461, %v1293_v11   ;;  %v1248_v52 = vadd.f32 %v1216_v15, %v984_v3  ;;  %v1217_v46 = vmul.f32 %v11409_v63, %v11483_v0 }
 0x217   : > { %9107 = vmatprep.mubr.msk.f32.mxu1 %vm2930_vm2, %v3061_v9  ;;  %9272 = vmatprep.mubr.msk.f32.mxu0 %vm2930_vm2, %v4128_v22  ;;  %v2273_v9 = vmul.f32 %v11434_v45, %v2134_v25  ;;  %v2537_v15 = vmul.f32 %v11440_v47, %v2398_v10  ;;  %v1745_v0 = vmul.f32 %v11419_v62, %v11565_v13 }
 0x218   : > { %v1512_v33 = vadd.f32 %v1480_v30, %v1248_v52 }
 0x219   : > { %v11685_v56 = vpop.permute.xlu1 %1878  ;;  %v11688_v42 = vpop.permute.xlu0 %1365 }
 0x21a   : > { %2437 = vperm.xlu1 %10462, %v11587_v6   ;;  %2442 = vperm.xlu0 %10461, %v11612_v39   ;;  %v953_v6 = vmul.f32 %v11404_v5, %v11432_v26  ;;  %v11703_v39 = vld [vmem:[#allocation2 + $0xf1] sm:$0xff]  ;;  %v1776_v26 = vadd.f32 %v1744_v60, %v1512_v33  ;;  %v2009_v60 = vmul.f32 %v11429_v14, %v11631_v43 }
 0x21c   : > { %v2040_v41 = vadd.f32 %v2008_v59, %v1776_v26 }
 0x21d   : > { %v11695_v23 = vpop.permute.xlu1 %847  ;;  %v2403_v48 = vpop.permute.xlu0 %2402  ;;  %v3062_v1 = vld [vmem:[#allocation3 + $0x51] sm:$0xff] }
 0x21e   : > { %1923 = vperm.xlu1 %10462, %v11659_v19   ;;  %v4129_v29 = vld [vmem:[#allocation3 + $0x50] sm:$0xff]  ;;  %2183 = vperm.xlu0 %10461, %v1292_v7   ;;  %v985_v7 = vadd.f32 %v953_v6, %v689_v58  ;;  %v2305_v25 = vadd.f32 %v2273_v9, %v2040_v41  ;;  %v2538_v59 = vmul.f32 %v11440_v47, %v2403_v48  ;;  %v11740_v58 = vld [vmem:[#allocation2 + $0xf2] sm:$0xff] }
 0x21f   : > { %9108 = vmatmul.mubr.msk.f32.gmra.mrb[6].mxu1 %vm2930_vm2, %v3062_v1  ;;  %9273 = vmatmul.mubr.msk.f32.gmra.mrb[4].mxu0 %vm2930_vm2, %v4129_v29  ;;  %v2274_v29 = vmul.f32 %v11434_v45, %v11667_v24  ;;  %v11748_v48 = vld [vmem:[#allocation2 + $0xfa] sm:$0xff] }
 0x220   : > { %v1249_v34 = vadd.f32 %v1217_v46, %v985_v7  ;;  %v2569_v20 = vadd.f32 %v2537_v15, %v2305_v25 }
 0x221   : > { %v11713_v22 = vpop.permute.xlu1 %1883  ;;  %v11716_v16 = vpop.permute.xlu0 %1624 }
 0x222   : > { %1664 = vperm.xlu1 %10462, %v11703_v39   ;;  %1669 = vperm.xlu0 %10461, %v11706_v2   ;;  %v1513_v52 = vadd.f32 %v1481_v61, %v1249_v34  ;;  %v11757_v34 = vld [vmem:[#allocation2 + $0x108] sm:$0xff] }
 0x224   : > { %v1777_v10 = vadd.f32 %v1745_v0, %v1513_v52  ;;  %v447_v0 = vld [vmem:[%s11024_s21 + $0xe8] sm:$0xff] }
 0x225   : > { %v11724_v3 = vpop.permute.xlu1 %1106  ;;  %v2662_v30 = vpop.permute.xlu0 %2661  ;;  %480 = vst.msk [vmem:[#allocation2 + $0x171] sm:$0xff] %vm362_vm0, %v447_v0 }
 0x226   : > { %2701 = vperm.xlu1 %10462, %v11640_v27   ;;  %v2801_v1 = vmul.f32 %v11458_v12, %v2662_v30  ;;  %2706 = vperm.xlu0 %10461, %v11659_v19   ;;  %v2041_v27 = vadd.f32 %v2009_v60, %v1777_v10  ;;  %v11769_v10 = vld [vmem:[#allocation2 + $0x110] sm:$0xff] }
 0x228   : > { %v2833_v13 = vadd.f32 %v2801_v1, %v2569_v20  ;;  %v2306_v19 = vadd.f32 %v2274_v29, %v2041_v27  ;;  %v954_v1 = vmul.f32 %v11404_v5, %v11499_v32  ;;  %v11772_v29 = vld [vmem:[#allocation2 + $0x111] sm:$0xff]  ;;  %v1218_v27 = vmul.f32 %v11409_v63, %v11555_v36 }
 0x229   : > { %v11733_v6 = vpop.permute.xlu1 %2143  ;;  %v11735_v33 = vpop.permute.xlu0 %1629  ;;  %v1746_v36 = vmul.f32 %v11419_v62, %v11634_v44  ;;  %v691_v44 = vmul.f32 %v11402_v8, %v11291_v38 }
 0x22a   : > { %2188 = vperm.xlu1 %10462, %v1293_v11   ;;  %v2872_v43 = vadd.f32 %v11469_v18, %v2833_v13  ;;  %2447 = vperm.xlu0 %10461, %v11703_v39   ;;  %v2570_v11 = vadd.f32 %v2538_v59, %v2306_v19  ;;  %v690_v13 = vmul.f32 %v11402_v8, %v11277_v28 }
 0x22b   : > { %v1482_v19 = vmul.f32 %v11415_v4, %v11583_v55  ;;  %v955_v55 = vmul.f32 %v11404_v5, %v11526_v40  ;;  %v2275_v40 = vmul.f32 %v11434_v45, %v11733_v6 }
 0x22c   : > { %v2904_v46 = vmax.f32 %v2872_v43, 0.0  ;;  %v986_v43 = vadd.f32 %v954_v1, %v690_v13 }
 0x22d   : > { %v11742_v26 = vpop.permute.xlu1 %1111  ;;  %v2667_v24 = vpop.permute.xlu0 %2666 }
 0x22e   : > { %1928 = vperm.xlu1 %10462, %v11740_v58   ;;  %2993 = vst.msk [vmem:[#allocation3 + $0x61] sm:$0xff] %vm2930_vm2, %v2904_v46  ;;  %v2802_v9 = vmul.f32 %v11458_v12, %v2667_v24  ;;  %2452 = vperm.xlu0 %10461, %v11706_v2   ;;  %v11786_v46 = vld [vmem:[#allocation2 + $0x109] sm:$0xff]  ;;  %v11788_v24 = vld [vmem:[#allocation2 + $0x112] sm:$0xff]  ;;  %v1250_v28 = vadd.f32 %v1218_v27, %v986_v43 }
 0x22f   : > { %v987_v27 = vadd.f32 %v955_v55, %v691_v44  ;;  %v1483_v43 = vmul.f32 %v11415_v4, %v11607_v35  ;;  %v2011_v35 = vmul.f32 %v11429_v14, %v11713_v22 }
 0x230   : > { %v2834_v7 = vadd.f32 %v2802_v9, %v2570_v11  ;;  %v1514_v0 = vadd.f32 %v1482_v19, %v1250_v28  ;;  %v1747_v28 = vmul.f32 %v11419_v62, %v11654_v53 }
 0x231   : > { %v11750_v61 = vpop.permute.xlu1 %2148  ;;  %v11753_v41 = vpop.permute.xlu0 %1370 }
 0x232   : > { %1933 = vperm.xlu1 %10462, %v11748_v48   ;;  %v2873_v15 = vadd.f32 %v11469_v18, %v2834_v7  ;;  %2711 = vperm.xlu0 %10461, %v11740_v58   ;;  %v1778_v1 = vadd.f32 %v1746_v36, %v1514_v0  ;;  %v2276_v53 = vmul.f32 %v11434_v45, %v11750_v61 }
 0x234   : > { %v2905_v25 = vmax.f32 %v2873_v15, 0.0 }
 0x235   : > { %v11761_v30 = vpop.permute.xlu1 %852  ;;  %v2408_v52 = vpop.permute.xlu0 %2407  ;;  %v3063_v60 = vld [vmem:[#allocation3 + $0x61] sm:$0xff] }
 0x236   : > { %2193 = vperm.xlu1 %10462, %v11757_v34   ;;  %v4130_v20 = vld [vmem:[#allocation3 + $0x60] sm:$0xff]  ;;  %2994 = vst.msk [vmem:[#allocation3 + $0x69] sm:$0xff] %vm2930_vm2, %v2905_v25  ;;  %2716 = vperm.xlu0 %10461, %v11748_v48   ;;  %v2010_v25 = vmul.f32 %v11429_v14, %v11685_v56  ;;  %v2539_v38 = vmul.f32 %v11440_v47, %v2408_v52 }
 0x237   : > { %9110 = vmatprep.mubr.msk.f32.mxu1 %vm2930_vm2, %v3063_v60  ;;  %9275 = vmatprep.mubr.msk.f32.mxu0 %vm2930_vm2, %v4130_v20  ;;  %v11801_v60 = vld [vmem:[#allocation2 + $0x10a] sm:$0xff]  ;;  %v1219_v20 = vmul.f32 %v11409_v63, %v11572_v57 }
 0x238   : > { %v2042_v19 = vadd.f32 %v2010_v25, %v1778_v1  ;;  %v448_v1 = vld [vmem:[%s11024_s21 + $0xf0] sm:$0xff] }
 0x239   : > { %v11778_v59 = vpop.permute.xlu1 %1888  ;;  %v11781_v32 = vpop.permute.xlu0 %1375  ;;  %v1251_v57 = vadd.f32 %v1219_v20, %v987_v27  ;;  %481 = vst.msk [vmem:[#allocation2 + $0x181] sm:$0xff] %vm362_vm0, %v448_v1  ;;  %v4547_v27 = vld [vmem:[#allocation10 + $0x80] sm:$0xff] }
 0x23a   : > { %2198 = vperm.xlu1 %10462, %v11769_v10   ;;  %2462 = vperm.xlu0 %10461, %v11772_v29   ;;  %v2307_v6 = vadd.f32 %v2275_v40, %v2042_v19 }
 0x23c   : > { %v2571_v55 = vadd.f32 %v2539_v38, %v2307_v6  ;;  %v4550_v6 = vld [vmem:[#allocation10 + $0x98] sm:$0xff] }
 0x23d   : > { %v11792_v11 = vpop.permute.xlu1 %857  ;;  %v2413_v9 = vpop.permute.xlu0 %2412  ;;  %v3064_v7 = vld [vmem:[#allocation3 + $0x69] sm:$0xff] }
 0x23e   : > { %2457 = vperm.xlu1 %10462, %v11786_v46   ;;  %v4131_v15 = vld [vmem:[#allocation3 + $0x68] sm:$0xff]  ;;  %2726 = vperm.xlu0 %10461, %v11788_v24   ;;  %v2540_v20 = vmul.f32 %v11440_v47, %v2413_v9 }
 0x23f   : > { %9111 = vmatmul.mubr.msk.f32.gmra.mrb[8].mxu1 %vm2930_vm2, %v3064_v7  ;;  %9276 = vmatmul.mubr.msk.f32.gmra.mrb[6].mxu0 %vm2930_vm2, %v4131_v15  ;;  %v1515_v15 = vadd.f32 %v1483_v43, %v1251_v57  ;;  %v4548_v43 = vld [vmem:[#allocation10 + $0x88] sm:$0xff] }
 0x240   : > { %v9878_v19 = vpack.c.bf16 %v4548_v43, %v4547_v27  ;;  %v11880_v27 = vld [vmem:[#allocation2 + $0x129] sm:$0xff] }
 0x241   : > { %v11810_v13 = vpop.permute.xlu1 %1893  ;;  %v11813_v56 = vpop.permute.xlu0 %1634 }
 0x242   : > { %2721 = vperm.xlu1 %10462, %v11801_v60   ;;  %887 = vperm.xlu0 %10461, %v11706_v2   ;;  %v1779_v2 = vadd.f32 %v1747_v28, %v1515_v15  ;;  %v4549_v28 = vld [vmem:[#allocation10 + $0x90] sm:$0xff] }
 0x243   : > { %9879 = vmatprep.subr.bf16.mxu0 %v9878_v19  ;;  %v9882_v15 = vpack.c.bf16 %v4550_v6, %v4549_v28  ;;  %v1221_v28 = vmul.f32 %v11409_v63, %v11661_v21  ;;  %v1749_v21 = vmul.f32 %v11419_v62, %v11735_v33 }
 0x244   : > { %v2043_v44 = vadd.f32 %v2011_v35, %v1779_v2  ;;  %9881 = vmatpush3.bf16.msra.mxu0 %v9878_v19 }
 0x245   : > { %v11821_v36 = vpop.permute.xlu1 %1116  ;;  %v2672_v7 = vpop.permute.xlu0 %2671  ;;  %9883 = vmatprep.subr.bf16.mxu0 %v9882_v15 }
 0x246   : > { %882 = vperm.xlu1 %10462, %v11703_v39   ;;  %v2803_v52 = vmul.f32 %v11458_v12, %v2672_v7  ;;  %1151 = vperm.xlu0 %10461, %v11748_v48   ;;  %v2308_v48 = vadd.f32 %v2276_v53, %v2043_v44  ;;  %v956_v44 = vmul.f32 %v11404_v5, %v11589_v54 }
 0x248   : > { %v2835_v0 = vadd.f32 %v2803_v52, %v2571_v55  ;;  %v2572_v38 = vadd.f32 %v2540_v20, %v2308_v48  ;;  %9885 = vmatpush3.bf16.msra.mxu0 %v9882_v15  ;;  %v692_v20 = vmul.f32 %v11402_v8, %v11285_v37  ;;  %v1484_v48 = vmul.f32 %v11415_v4, %v11670_v17 }
 0x249   : > { %v11830_v25 = vpop.permute.xlu1 %2153  ;;  %v11833_v39 = vpop.permute.xlu0 %1639  ;;  %v1748_v37 = vmul.f32 %v11419_v62, %v11716_v16  ;;  %v957_v17 = vmul.f32 %v11404_v5, %v11616_v49  ;;  %v693_v16 = vmul.f32 %v11402_v8, %v11300_v51 }
 0x24a   : > { %1146 = vperm.xlu1 %10462, %v11740_v58   ;;  %v2874_v22 = vadd.f32 %v11469_v18, %v2835_v0  ;;  %1410 = vperm.xlu0 %10461, %v11757_v34   ;;  %v449_v0 = vld [vmem:[%s11024_s21 + $0xf8] sm:$0xff]  ;;  %v2277_v5 = vmul.f32 %v11434_v45, %v11830_v25 }
 0x24b   : > { %482 = vst.msk [vmem:[#allocation2 + $0x189] sm:$0xff] %vm362_vm0, %v449_v0  ;;  %v989_v15 = vadd.f32 %v957_v17, %v693_v16 }
 0x24c   : > { %v2906_v40 = vmax.f32 %v2874_v22, 0.0  ;;  %v1220_v22 = vmul.f32 %v11409_v63, %v11644_v31  ;;  %v1297_v63 = vld [vmem:[#allocation2 + $0x128] sm:$0xff] }
 0x24d   : > { %v11840_v61 = vpop.permute.xlu1 %1121  ;;  %v2677_v58 = vpop.permute.xlu0 %2676  ;;  %v1253_v8 = vadd.f32 %v1221_v28, %v989_v15 }
 0x24e   : > { %892 = vperm.xlu1 %10462, %v11786_v46   ;;  %2995 = vst.msk [vmem:[#allocation3 + $0x79] sm:$0xff] %vm2930_vm2, %v2906_v40  ;;  %v2804_v9 = vmul.f32 %v11458_v12, %v2677_v58  ;;  %1415 = vperm.xlu0 %10461, %v11769_v10   ;;  %v11878_v40 = vld [vmem:[#allocation2 + $0x121] sm:$0xff] }
 0x250   : > { %v2836_v34 = vadd.f32 %v2804_v9, %v2572_v38 }
 0x251   : > { %v11846_v57 = vpop.permute.xlu1 %2158  ;;  %v11849_v7 = vpop.permute.xlu0 %1380 }
 0x252   : > { %897 = vperm.xlu1 %10462, %v11772_v29   ;;  %v2875_v35 = vadd.f32 %v11469_v18, %v2836_v34  ;;  %1674 = vperm.xlu0 %10461, %v11786_v46   ;;  %v1296_v46 = vld [vmem:[#allocation2 + $0x120] sm:$0xff]  ;;  %v2012_v34 = vmul.f32 %v11429_v14, %v11778_v59  ;;  %v2278_v62 = vmul.f32 %v11434_v45, %v11846_v57 }
 0x254   : > { %v2907_v55 = vmax.f32 %v2875_v35, 0.0  ;;  %v1485_v35 = vmul.f32 %v11415_v4, %v11688_v42 }
 0x255   : > { %v11853_v10 = vpop.permute.xlu1 %862  ;;  %v2418_v52 = vpop.permute.xlu0 %2417  ;;  %v11856_v2 = vld [vmem:[#allocation3 + $0x79] sm:$0xff] }
 0x256   : > { %1156 = vperm.xlu1 %10462, %v11801_v60   ;;  %v4132_v53 = vld [vmem:[#allocation3 + $0x78] sm:$0xff]  ;;  %2996 = vst.msk [vmem:[#allocation3 + $0x81] sm:$0xff] %vm2930_vm2, %v2907_v55  ;;  %1679 = vperm.xlu0 %10461, %v11772_v29   ;;  %v988_v29 = vadd.f32 %v956_v44, %v692_v20  ;;  %v2541_v51 = vmul.f32 %v11440_v47, %v2418_v52 }
 0x257   : > { %9113 = vmatprep.mubr.msk.f32.mxu1 %vm2930_vm2, %v11856_v2  ;;  %9278 = vmatprep.mubr.msk.f32.mxu0 %vm2930_vm2, %v4132_v53  ;;  %v1517_v0 = vadd.f32 %v1485_v35, %v1253_v8  ;;  %v2013_v44 = vmul.f32 %v11429_v14, %v11810_v13  ;;  %v11922_v52 = vld [vmem:[#allocation2 + $0x12a] sm:$0xff]  ;;  %v11954_v35 = vld [vmem:[#allocation6 + $0x1] ss:$0 sm:$0xff] }
 0x258   : > { %v1252_v43 = vadd.f32 %v1220_v22, %v988_v29 }
 0x259   : > { %v11871_v1 = vpop.permute.xlu1 %1898  ;;  %v11874_v54 = vpop.permute.xlu0 %1385  ;;  %v1781_v20 = vadd.f32 %v1749_v21, %v1517_v0  ;;  %v11969_v21 = vld [vmem:[#allocation6 + $0x2] ss:$0 sm:$0xff]  ;;  %v11978_v0 = vld [vmem:[#allocation6 + $0x3] ss:$0 sm:$0xff] }
 0x25a   : > { %1161 = vperm.xlu1 %10462, %v11788_v24   ;;  %1420 = vperm.xlu0 %10461, %v1296_v46   ;;  %v1516_v9 = vadd.f32 %v1484_v48, %v1252_v43 }
 0x25b   : > { %v2045_v14 = vadd.f32 %v2013_v44, %v1781_v20  ;;  %v1486_v44 = vmul.f32 %v11978_v0, %v11753_v41  ;;  %v11985_v20 = vld [vmem:[#allocation6 + $0x4] ss:$0 sm:$0xff]  ;;  %v959_v41 = vmul.f32 %v11954_v35, %v11695_v23 }
 0x25c   : > { %v1780_v6 = vadd.f32 %v1748_v37, %v1516_v9  ;;  %v11938_v9 = vld [vmem:[#allocation2 + $0x138] sm:$0xff] }
 0x25d   : > { %v11884_v31 = vpop.permute.xlu1 %867  ;;  %v2423_v58 = vpop.permute.xlu0 %2422  ;;  %v11887_v19 = vld [vmem:[#allocation3 + $0x81] sm:$0xff]  ;;  %v2310_v43 = vadd.f32 %v2278_v62, %v2045_v14 }
 0x25e   : > { %902 = vperm.xlu1 %10462, %v11878_v40   ;;  %v4133_v38 = vld [vmem:[#allocation3 + $0x80] sm:$0xff]  ;;  %907 = vperm.xlu0 %10461, %v11880_v27   ;;  %v2044_v55 = vadd.f32 %v2012_v34, %v1780_v6  ;;  %v2542_v13 = vmul.f32 %v11440_v47, %v2423_v58 }
 0x25f   : > { %9114 = vmatmul.mubr.msk.f32.gmra.mrb[10].mxu1 %vm2930_vm2, %v11887_v19  ;;  %9279 = vmatmul.mubr.msk.f32.gmra.mrb[8].mxu0 %vm2930_vm2, %v4133_v38 }
 0x260   : > { %v2309_v25 = vadd.f32 %v2277_v5, %v2044_v55  ;;  %v2574_v57 = vadd.f32 %v2542_v13, %v2310_v43  ;;  %v958_v55 = vmul.f32 %v11954_v35, %v11674_v50  ;;  %v1222_v50 = vmul.f32 %v11969_v21, %v11724_v3  ;;  %v11996_v43 = vld [vmem:[#allocation6 + $0x5] ss:$0 sm:$0xff] }
 0x261   : > { %v11903_v49 = vpop.permute.xlu1 %1903  ;;  %v11906_v59 = vpop.permute.xlu0 %1644  ;;  %v1750_v3 = vmul.f32 %v11985_v20, %v11813_v56  ;;  %v13604_v56 = vld [vmem:[#allocation24_spill] sm:$0xff] }
 0x262   : > { %1938 = vperm.xlu1 %10462, %v11801_v60   ;;  %1943 = vperm.xlu0 %10461, %v11788_v24   ;;  %v2573_v4 = vadd.f32 %v2541_v51, %v2309_v25  ;;  %v11920_v24 = vld [vmem:[#allocation2 + $0x122] sm:$0xff]  ;;  %v11965_v51 = vld [vmem:[#allocation6] ss:$0 sm:$0xff] }
 0x265   : > { %v11914_v53 = vpop.permute.xlu1 %1126  ;;  %v2682_v60 = vpop.permute.xlu0 %2681 }
 0x266   : > { %1425 = vperm.xlu1 %10462, %v1297_v63   ;;  %v2805_v42 = vmul.f32 %v11458_v12, %v2682_v60  ;;  %1684 = vperm.xlu0 %10461, %v11878_v40  }
 0x268   : > { %v2837_v33 = vadd.f32 %v2805_v42, %v2573_v4  ;;  %v11983_v4 = vld [vmem:[#allocation2 + $0x141] sm:$0xff] }
 0x269   : > { %v11926_v22 = vpop.permute.xlu1 %2163  ;;  %v11929_v29 = vpop.permute.xlu0 %1649 }
 0x26a   : > { %1166 = vperm.xlu1 %10462, %v11920_v24   ;;  %v2876_v48 = vadd.f32 %v11469_v18, %v2837_v33  ;;  %1171 = vperm.xlu0 %10461, %v11922_v52  }
 0x26c   : > { %v2908_v37 = vmax.f32 %v2876_v48, 0.0 }
 0x26d   : > { %v11934_v38 = vpop.permute.xlu1 %1131  ;;  %v2687_v45 = vpop.permute.xlu0 %2686 }
 0x26e   : > { %2203 = vperm.xlu1 %10462, %v1296_v46   ;;  %2997 = vst.msk [vmem:[#allocation3 + $0x91] sm:$0xff] %vm2930_vm2, %v2908_v37  ;;  %v2806_v17 = vmul.f32 %v11458_v12, %v2687_v45  ;;  %2208 = vperm.xlu0 %10461, %v1297_v63   ;;  %v11947_v46 = vld [vmem:[#allocation2 + $0x139] sm:$0xff]  ;;  %v2014_v37 = vmul.f32 %v11996_v43, %v11871_v1 }
 0x26f   : > { %v13603_v63 = vld [vmem:[#allocation21_spill] sm:$0xff]  ;;  %v695_v45 = vmul.f32 %v11965_v51, %v13604_v56 }
 0x270   : > { %v2838_v34 = vadd.f32 %v2806_v17, %v2574_v57  ;;  %v694_v8 = vmul.f32 %v11965_v51, %v13603_v63  ;;  %v1223_v57 = vmul.f32 %v11969_v21, %v11742_v26  ;;  %v12008_v17 = vld [vmem:[#allocation6 + $0x6] ss:$0 sm:$0xff]  ;;  %v12023_v63 = vld [vmem:[#allocation2 + $0x13a] sm:$0xff] }
 0x271   : > { %v11940_v47 = vpop.permute.xlu1 %2168  ;;  %v11943_v58 = vpop.permute.xlu0 %1390 }
 0x272   : > { %1689 = vperm.xlu1 %10462, %v11880_v27   ;;  %v2877_v16 = vadd.f32 %v11469_v18, %v2838_v34  ;;  %1430 = vperm.xlu0 %10461, %v11938_v9   ;;  %v11963_v18 = vld [vmem:[#allocation2 + $0x140] sm:$0xff]  ;;  %v990_v60 = vadd.f32 %v958_v55, %v694_v8  ;;  %v2279_v34 = vmul.f32 %v12008_v17, %v11926_v22 }
 0x273   : > { %v12019_v55 = vld [vmem:[#allocation6 + $0x7] ss:$0 sm:$0xff]  ;;  %v1751_v8 = vmul.f32 %v11985_v20, %v11833_v39  ;;  %v2280_v39 = vmul.f32 %v12008_v17, %v11940_v47 }
 0x274   : > { %v2909_v28 = vmax.f32 %v2877_v16, 0.0  ;;  %v1254_v42 = vadd.f32 %v1222_v50, %v990_v60  ;;  %v991_v16 = vadd.f32 %v959_v41, %v695_v45 }
 0x275   : > { %v11949_v6 = vpop.permute.xlu1 %872  ;;  %v2428_v12 = vpop.permute.xlu0 %2427  ;;  %v11952_v5 = vld [vmem:[#allocation3 + $0x91] sm:$0xff] }
 0x276   : > { %912 = vperm.xlu1 %10462, %v11947_v46   ;;  %v4134_v15 = vld [vmem:[#allocation3 + $0x90] sm:$0xff]  ;;  %2998 = vst.msk [vmem:[#allocation3 + $0x99] sm:$0xff] %vm2930_vm2, %v2909_v28  ;;  %2467 = vperm.xlu0 %10461, %v11878_v40   ;;  %v1518_v48 = vadd.f32 %v1486_v44, %v1254_v42  ;;  %v1487_v28 = vmul.f32 %v11978_v0, %v11781_v32 }
 0x277   : > { %9116 = vmatprep.mubr.msk.f32.mxu1 %vm2930_vm2, %v11952_v5  ;;  %9281 = vmatprep.mubr.msk.f32.mxu0 %vm2930_vm2, %v4134_v15  ;;  %v2543_v26 = vmul.f32 %v12019_v55, %v2428_v12  ;;  %v1255_v22 = vadd.f32 %v1223_v57, %v991_v16  ;;  %v2015_v42 = vmul.f32 %v11996_v43, %v11903_v49  ;;  %v12032_v12 = vld [vmem:[#allocation6 + $0x8] ss:$0 sm:$0xff]  ;;  %v12044_v57 = vld [vmem:[#allocation8] ss:$0 sm:$0xff] }
 0x278   : > { %v1782_v23 = vadd.f32 %v1750_v3, %v1518_v48 }
 0x279   : > { %v11973_v25 = vpop.permute.xlu1 %1908  ;;  %v11976_v40 = vpop.permute.xlu0 %1395  ;;  %v1519_v32 = vadd.f32 %v1487_v28, %v1255_v22 }
 0x27a   : > { %1948 = vperm.xlu1 %10462, %v11920_v24   ;;  %1435 = vperm.xlu0 %10461, %v11963_v18   ;;  %v2046_v15 = vadd.f32 %v2014_v37, %v1782_v23 }
 0x27b   : > { %v1783_v41 = vadd.f32 %v1751_v8, %v1519_v32 }
 0x27c   : > { %v2311_v50 = vadd.f32 %v2279_v34, %v2046_v15  ;;  %v12056_v15 = vld [vmem:[#allocation2 + $0x150] sm:$0xff] }
 0x27d   : > { %v11989_v62 = vpop.permute.xlu1 %877  ;;  %v2433_v33 = vpop.permute.xlu0 %2432  ;;  %v11992_v14 = vld [vmem:[#allocation3 + $0x99] sm:$0xff]  ;;  %v2047_v45 = vadd.f32 %v2015_v42, %v1783_v41  ;;  %v961_v41 = vmul.f32 %v11954_v35, %v11792_v11 }
 0x27e   : > { %917 = vperm.xlu1 %10462, %v11983_v4   ;;  %v4135_v13 = vld [vmem:[#allocation3 + $0x98] sm:$0xff]  ;;  %2472 = vperm.xlu0 %10461, %v11880_v27   ;;  %v2575_v3 = vadd.f32 %v2543_v26, %v2311_v50  ;;  %v2544_v49 = vmul.f32 %v12019_v55, %v2433_v33 }
 0x27f   : > { %9117 = vmatmul.mubr.msk.f32.gmra.mrb[12].mxu1 %vm2930_vm2, %v11992_v14  ;;  %9282 = vmatmul.mubr.msk.f32.gmra.mrb[10].mxu0 %vm2930_vm2, %v4135_v13  ;;  %v2312_v34 = vadd.f32 %v2280_v39, %v2047_v45  ;;  %v13605_v39 = vld [vmem:[#allocation23_spill] sm:$0xff]  ;;  %v12085_v45 = vld [vmem:[#allocation2 + $0x158] sm:$0xff] }
 0x281   : > { %v12012_v1 = vpop.permute.xlu1 %1913  ;;  %v12015_v27 = vpop.permute.xlu0 %1654  ;;  %v2576_v28 = vadd.f32 %v2544_v49, %v2312_v34  ;;  %v13606_v49 = vld [vmem:[#allocation26_spill] sm:$0xff] }
 0x282   : > { %1953 = vperm.xlu1 %10462, %v11922_v52   ;;  %1694 = vperm.xlu0 %10461, %v11947_v46   ;;  %v697_v11 = vmul.f32 %v11965_v51, %v13606_v49 }
 0x285   : > { %v12027_v60 = vpop.permute.xlu1 %1136  ;;  %v2692_v44 = vpop.permute.xlu0 %2691 }
 0x286   : > { %1176 = vperm.xlu1 %10462, %v12023_v63   ;;  %v2807_v13 = vmul.f32 %v12032_v12, %v2692_v44  ;;  %2731 = vperm.xlu0 %10461, %v11920_v24   ;;  %v12048_v24 = vld [vmem:[#allocation2 + $0x142] sm:$0xff]  ;;  %v12063_v44 = vld [vmem:[#allocation2 + $0x151] sm:$0xff] }
 0x288   : > { %v2839_v48 = vadd.f32 %v2807_v13, %v2575_v3 }
 0x289   : > { %v12038_v37 = vpop.permute.xlu1 %2173  ;;  %v12041_v56 = vpop.permute.xlu0 %1659 }
 0x28a   : > { %2213 = vperm.xlu1 %10462, %v11938_v9   ;;  %v2878_v23 = vadd.f32 %v12044_v57, %v2839_v48  ;;  %1699 = vperm.xlu0 %10461, %v11983_v4   ;;  %v1224_v48 = vmul.f32 %v11969_v21, %v11821_v36  ;;  %v1489_v36 = vmul.f32 %v11978_v0, %v11874_v54 }
 0x28c   : > { %v2910_v47 = vmax.f32 %v2878_v23, 0.0  ;;  %v1225_v23 = vmul.f32 %v11969_v21, %v11840_v61  ;;  %v1752_v61 = vmul.f32 %v11985_v20, %v11906_v59  ;;  %v2017_v59 = vmul.f32 %v11996_v43, %v12012_v1 }
 0x28d   : > { %v12050_v16 = vpop.permute.xlu1 %1141  ;;  %v2697_v9 = vpop.permute.xlu0 %2696  ;;  %v962_v1 = vmul.f32 %v11954_v35, %v11853_v10 }
 0x28e   : > { %1181 = vperm.xlu1 %10462, %v12048_v24   ;;  %2999 = vst.msk [vmem:[#allocation3 + $0xa9] sm:$0xff] %vm2930_vm2, %v2910_v47  ;;  %v2808_v33 = vmul.f32 %v12032_v12, %v2697_v9  ;;  %2736 = vperm.xlu0 %10461, %v11922_v52   ;;  %v960_v52 = vmul.f32 %v11954_v35, %v11761_v30 }
 0x28f   : > { %v696_v30 = vmul.f32 %v11965_v51, %v13605_v39  ;;  %v1488_v47 = vmul.f32 %v11978_v0, %v11849_v7 }
 0x290   : > { %v2840_v26 = vadd.f32 %v2808_v33, %v2576_v28  ;;  %v993_v28 = vadd.f32 %v961_v41, %v697_v11  ;;  %v12097_v33 = vld [vmem:[#allocation2 + $0x159] sm:$0xff] }
 0x291   : > { %v2179_v22 = vpop.permute.xlu1 %2178  ;;  %v12059_v8 = vpop.permute.xlu0 %1918  ;;  %v992_v34 = vadd.f32 %v960_v52, %v696_v30 }
 0x292   : > { %2218 = vperm.xlu1 %10462, %v11963_v18   ;;  %v2879_v50 = vadd.f32 %v12044_v57, %v2840_v26  ;;  %1440 = vperm.xlu0 %10461, %v12056_v15   ;;  %v2282_v49 = vmul.f32 %v12008_v17, %v2179_v22 }
 0x293   : > { %v1256_v26 = vadd.f32 %v1224_v48, %v992_v34  ;;  %v2281_v48 = vmul.f32 %v12008_v17, %v12038_v37 }
 0x294   : > { %v2911_v32 = vmax.f32 %v2879_v50, 0.0  ;;  %v1257_v50 = vadd.f32 %v1225_v23, %v993_v28  ;;  %v12129_v28 = vld [vmem:[#allocation2 + $0x152] sm:$0xff] }
 0x295   : > { %v12065_v42 = vpop.permute.xlu1 %1400  ;;  %v12070_v3 = vpop.permute.xlu0 %1405  ;;  %v12072_v13 = vld [vmem:[#allocation3 + $0xa9] sm:$0xff]  ;;  %v1520_v52 = vadd.f32 %v1488_v47, %v1256_v26 }
 0x296   : > { %922 = vperm.xlu1 %10462, %v12063_v44   ;;  %v4136_v18 = vld [vmem:[#allocation3 + $0xa8] sm:$0xff]  ;;  %3000 = vst.msk [vmem:[#allocation3 + $0xb1] sm:$0xff] %vm2930_vm2, %v2911_v32  ;;  %2477 = vperm.xlu0 %10461, %v11947_v46   ;;  %v1753_v32 = vmul.f32 %v11985_v20, %v11929_v29  ;;  %v1521_v30 = vadd.f32 %v1489_v36, %v1257_v50 }
 0x297   : > { %9119 = vmatprep.mubr.msk.f32.mxu1 %vm2930_vm2, %v12072_v13  ;;  %9284 = vmatprep.mubr.msk.f32.mxu0 %vm2930_vm2, %v4136_v18  ;;  %v2016_v18 = vmul.f32 %v11996_v43, %v11973_v25  ;;  %v1784_v29 = vadd.f32 %v1752_v61, %v1520_v52  ;;  %v13607_v36 = vld [vmem:[#allocation25_spill] sm:$0xff] }
 0x298   : > { %v1785_v25 = vadd.f32 %v1753_v32, %v1521_v30  ;;  %v698_v26 = vmul.f32 %v11965_v51, %v13607_v36  ;;  %v963_v32 = vmul.f32 %v11954_v35, %v11884_v31  ;;  %v1227_v31 = vmul.f32 %v11969_v21, %v11934_v38 }
 0x299   : > { %v2438_v46 = vpop.permute.xlu1 %2437  ;;  %v2443_v9 = vpop.permute.xlu0 %2442  ;;  %v2048_v23 = vadd.f32 %v2016_v18, %v1784_v29  ;;  %v2018_v38 = vmul.f32 %v11996_v43, %v12059_v8 }
 0x29a   : > { %1958 = vperm.xlu1 %10462, %v12023_v63   ;;  %1445 = vperm.xlu0 %10461, %v12085_v45   ;;  %v2545_v34 = vmul.f32 %v12019_v55, %v2438_v46  ;;  %v2049_v47 = vadd.f32 %v2017_v59, %v1785_v25  ;;  %v2546_v37 = vmul.f32 %v12019_v55, %v2443_v9 }
 0x29b   : > { %v2313_v22 = vadd.f32 %v2281_v48, %v2048_v23  ;;  %v1226_v46 = vmul.f32 %v11969_v21, %v11914_v53  ;;  %v994_v18 = vadd.f32 %v962_v1, %v698_v26  ;;  %v13608_v53 = vld [vmem:[#allocation28_spill] sm:$0xff] }
 0x29c   : > { %v2314_v61 = vadd.f32 %v2282_v49, %v2049_v47  ;;  %v699_v29 = vmul.f32 %v11965_v51, %v13608_v53  ;;  %v1754_v49 = vmul.f32 %v11985_v20, %v12015_v27  ;;  %v12157_v27 = vld [vmem:[#allocation2 + $0x15a] sm:$0xff] }
 0x29d   : > { %v12103_v7 = vpop.permute.xlu1 %1923  ;;  %v2184_v54 = vpop.permute.xlu0 %2183  ;;  %v12108_v41 = vld [vmem:[#allocation3 + $0xb1] sm:$0xff]  ;;  %v2577_v10 = vadd.f32 %v2545_v34, %v2313_v22  ;;  %v1258_v25 = vadd.f32 %v1226_v46, %v994_v18 }
 0x29e   : > { %927 = vperm.xlu1 %10462, %v12097_v33   ;;  %v4137_v39 = vld [vmem:[#allocation3 + $0xb0] sm:$0xff]  ;;  %2482 = vperm.xlu0 %10461, %v11983_v4   ;;  %v2578_v30 = vadd.f32 %v2546_v37, %v2314_v61  ;;  %v995_v1 = vadd.f32 %v963_v32, %v699_v29  ;;  %v1491_v37 = vmul.f32 %v11978_v0, %v11976_v40 }
 0x29f   : > { %9120 = vmatmul.mubr.msk.f32.gmra.mrb[14].mxu1 %vm2930_vm2, %v12108_v41  ;;  %9285 = vmatmul.mubr.msk.f32.gmra.mrb[12].mxu0 %vm2930_vm2, %v4137_v39  ;;  %v1490_v39 = vmul.f32 %v11978_v0, %v11943_v58  ;;  %v2283_v61 = vmul.f32 %v12008_v17, %v2184_v54  ;;  %v965_v40 = vmul.f32 %v11954_v35, %v11989_v62  ;;  %v13609_v54 = vld [vmem:[#allocation30_spill] sm:$0xff] }
 0x2a0   : > { %v1259_v36 = vadd.f32 %v1227_v31, %v995_v1  ;;  %v701_v18 = vmul.f32 %v11965_v51, %v13609_v54  ;;  %v1229_v62 = vmul.f32 %v11969_v21, %v12050_v16  ;;  %v13610_v31 = vld [vmem:[#allocation27_spill] sm:$0xff] }
 0x2a1   : > { %v12119_v11 = vpop.permute.xlu1 %1664  ;;  %v12123_v4 = vpop.permute.xlu0 %1669 }
 0x2a2   : > { %1963 = vperm.xlu1 %10462, %v12048_v24   ;;  %1704 = vperm.xlu0 %10461, %v12063_v44  }
 0x2a5   : > { %v2702_v50 = vpop.permute.xlu1 %2701  ;;  %v2707_v9 = vpop.permute.xlu0 %2706 }
 0x2a6   : > { %v2809_v52 = vmul.f32 %v12032_v12, %v2702_v50  ;;  %1186 = vperm.xlu1 %10462, %v12129_v28   ;;  %v2810_v59 = vmul.f32 %v12032_v12, %v2707_v9  ;;  %2741 = vperm.xlu0 %10461, %v12023_v63   ;;  %v1522_v63 = vadd.f32 %v1490_v39, %v1258_v25  ;;  %v12175_v39 = vld [vmem:[#allocation2 + $0x168] sm:$0xff] }
 0x2a7   : > { %v2019_v9 = vmul.f32 %v11996_v43, %v12103_v7  ;;  %v1493_v25 = vmul.f32 %v11978_v0, %v12070_v3  ;;  %v1757_v3 = vmul.f32 %v11985_v20, %v12123_v4 }
 0x2a8   : > { %v2841_v48 = vadd.f32 %v2809_v52, %v2577_v10  ;;  %v2842_v23 = vadd.f32 %v2810_v59, %v2578_v30  ;;  %v1786_v46 = vadd.f32 %v1754_v49, %v1522_v63  ;;  %v1523_v10 = vadd.f32 %v1491_v37, %v1259_v36 }
 0x2a9   : > { %v2189_v34 = vpop.permute.xlu1 %2188  ;;  %v2448_v47 = vpop.permute.xlu0 %2447  ;;  %v964_v30 = vmul.f32 %v11954_v35, %v11949_v6 }
 0x2aa   : > { %v2880_v58 = vadd.f32 %v12044_v57, %v2841_v48  ;;  %2223 = vperm.xlu1 %10462, %v12056_v15   ;;  %v2881_v22 = vadd.f32 %v12044_v57, %v2842_v23  ;;  %1709 = vperm.xlu0 %10461, %v12097_v33   ;;  %v1755_v15 = vmul.f32 %v11985_v20, %v12041_v56 }
 0x2ab   : > { %v2050_v52 = vadd.f32 %v2018_v38, %v1786_v46  ;;  %v2547_v56 = vmul.f32 %v12019_v55, %v2448_v47  ;;  %v2284_v7 = vmul.f32 %v12008_v17, %v2189_v34  ;;  %v700_v48 = vmul.f32 %v11965_v51, %v13610_v31  ;;  %v12188_v34 = vld [vmem:[#allocation2 + $0x169] sm:$0xff] }
 0x2ac   : > { %v2912_v26 = vmax.f32 %v2880_v58, 0.0  ;;  %v2913_v50 = vmax.f32 %v2881_v22, 0.0  ;;  %v1787_v59 = vadd.f32 %v1755_v15, %v1523_v10  ;;  %v1228_v58 = vmul.f32 %v11969_v21, %v12027_v60 }
 0x2ad   : > { %v1929_v32 = vpop.permute.xlu1 %1928  ;;  %v2453_v8 = vpop.permute.xlu0 %2452  ;;  %v2315_v53 = vadd.f32 %v2283_v61, %v2050_v52  ;;  %v996_v63 = vadd.f32 %v964_v30, %v700_v48  ;;  %v1756_v10 = vmul.f32 %v11985_v20, %v12119_v11 }
 0x2ae   : > { %3001 = vst.msk [vmem:[#allocation3 + $0xc1] sm:$0xff] %vm2930_vm2, %v2912_v26  ;;  %1191 = vperm.xlu1 %10462, %v12157_v27   ;;  %3002 = vst.msk [vmem:[#allocation3 + $0xc9] sm:$0xff] %vm2930_vm2, %v2913_v50  ;;  %2746 = vperm.xlu0 %10461, %v12048_v24   ;;  %v997_v24 = vadd.f32 %v965_v40, %v701_v18  ;;  %v2051_v49 = vadd.f32 %v2019_v9, %v1787_v59  ;;  %v12213_v9 = vld [vmem:[#allocation2 + $0x171] sm:$0xff] }
 0x2af   : > { %v2579_v23 = vadd.f32 %v2547_v56, %v2315_v53  ;;  %v2548_v1 = vmul.f32 %v12019_v55, %v2453_v8  ;;  %v1492_v26 = vmul.f32 %v11978_v0, %v12065_v42  ;;  %v1260_v42 = vadd.f32 %v1228_v58, %v996_v63 }
 0x2b0   : > { %v1261_v47 = vadd.f32 %v1229_v62, %v997_v24  ;;  %v2020_v30 = vmul.f32 %v11996_v43, %v1929_v32 }
 0x2b1   : > { %v1934_v29 = vpop.permute.xlu1 %1933  ;;  %v2712_v16 = vpop.permute.xlu0 %2711  ;;  %v1524_v62 = vadd.f32 %v1492_v26, %v1260_v42 }
 0x2b2   : > { %2228 = vperm.xlu1 %10462, %v12085_v45   ;;  %v2811_v6 = vmul.f32 %v12032_v12, %v2712_v16  ;;  %1450 = vperm.xlu0 %10461, %v12175_v39   ;;  %v2316_v45 = vadd.f32 %v2284_v7, %v2051_v49  ;;  %v1525_v46 = vadd.f32 %v1493_v25, %v1261_v47  ;;  %v12227_v47 = vld [vmem:[#allocation2 + $0x16a] sm:$0xff] }
 0x2b3   : > { %v2021_v15 = vmul.f32 %v11996_v43, %v1934_v29  ;;  %v514_v29 = vld [vmem:[#allocation2 + $0x170] sm:$0xff]  ;;  %v1788_v31 = vadd.f32 %v1756_v10, %v1524_v62 }
 0x2b4   : > { %v2843_v37 = vadd.f32 %v2811_v6, %v2579_v23  ;;  %v2580_v50 = vadd.f32 %v2548_v1, %v2316_v45  ;;  %v1789_v52 = vadd.f32 %v1757_v3, %v1525_v46 }
 0x2b5   : > { %v2194_v38 = vpop.permute.xlu1 %2193  ;;  %v12194_v22 = vld [vmem:[#allocation3 + $0xc1] sm:$0xff]  ;;  %v2717_v60 = vpop.permute.xlu0 %2716  ;;  %v12202_v4 = vld [vmem:[#allocation3 + $0xc9] sm:$0xff]  ;;  %v2052_v16 = vadd.f32 %v2020_v30, %v1788_v31  ;;  %v4514_v31 = vld [vmem:[#allocation3 + $0x19] sm:$0xff] }
 0x2b6   : > { %v4138_v36 = vld [vmem:[#allocation3 + $0xc0] sm:$0xff]  ;;  %932 = vperm.xlu1 %10462, %v12188_v34   ;;  %9122 = vmatprep.mubr.msk.f32.mxu1 %vm2930_vm2, %v12194_v22  ;;  %v4139_v61 = vld [vmem:[#allocation3 + $0xc8] sm:$0xff]  ;;  %v2882_v40 = vadd.f32 %v12044_v57, %v2843_v37  ;;  %v2812_v8 = vmul.f32 %v12032_v12, %v2717_v60  ;;  %v2053_v59 = vadd.f32 %v2021_v15, %v1789_v52 }
 0x2b7   : > { %9287 = vmatprep.mubr.msk.f32.mxu0 %vm2930_vm2, %v4138_v36  ;;  %2487 = vperm.xlu0 %10461, %v12063_v44   ;;  %v2285_v48 = vmul.f32 %v12008_v17, %v2194_v38  ;;  %v12252_v52 = vld [vmem:[#allocation2 + $0x172] sm:$0xff] }
 0x2b8   : > { %9123 = vmatmul.mubr.msk.f32.gmra.mrb[16].mxu1 %vm2930_vm2, %v12202_v4  ;;  %9288 = vmatmul.mubr.msk.f32.gmra.mrb[14].mxu0 %vm2930_vm2, %v4139_v61  ;;  %v2914_v56 = vmax.f32 %v2882_v40, 0.0  ;;  %v2844_v54 = vadd.f32 %v2812_v8, %v2580_v50 }
 0x2b9   : > { %v2199_v18 = vpop.permute.xlu1 %2198  ;;  %v2463_v11 = vpop.permute.xlu0 %2462  ;;  %v2317_v58 = vadd.f32 %v2285_v48, %v2052_v16 }
 0x2ba   : > { %v2286_v44 = vmul.f32 %v12008_v17, %v2199_v18  ;;  %1968 = vperm.xlu1 %10462, %v12129_v28   ;;  %3003 = vst.msk [vmem:[#allocation3 + $0xd9] sm:$0xff] %vm2930_vm2, %v2914_v56  ;;  %v2883_v53 = vadd.f32 %v12044_v57, %v2844_v54  ;;  %v2550_v7 = vmul.f32 %v12019_v55, %v2463_v11  ;;  %v12264_v18 = vld [vmem:[#allocation2 + $0x180] sm:$0xff] }
 0x2bb   : > { %937 = vperm.xlu0 %10461, %v12213_v9  }
 0x2bc   : > { %v2318_v24 = vadd.f32 %v2286_v44, %v2053_v59  ;;  %v2915_v32 = vmax.f32 %v2883_v53, 0.0 }
 0x2bd   : > { %v2458_v25 = vpop.permute.xlu1 %2457  ;;  %v2727_v1 = vpop.permute.xlu0 %2726 }
 0x2be   : > { %v2582_v49 = vadd.f32 %v2550_v7, %v2318_v24  ;;  %v2549_v23 = vmul.f32 %v12019_v55, %v2458_v25  ;;  %673 = vperm.xlu1 %10462, %v514_v29   ;;  %3004 = vst.msk [vmem:[#allocation3 + $0xe1] sm:$0xff] %vm2930_vm2, %v2915_v32  ;;  %v2814_v6 = vmul.f32 %v12032_v12, %v2727_v1  ;;  %v13611_v7 = vld [vmem:[#allocation31_spill] sm:$0xff] }
 0x2bf   : > { %1973 = vperm.xlu0 %10461, %v12157_v27  }
 0x2c0   : > { %v2846_v3 = vadd.f32 %v2814_v6, %v2582_v49  ;;  %v2581_v45 = vadd.f32 %v2549_v23, %v2317_v58  ;;  %v4515_v49 = vld [vmem:[#allocation3 + $0x21] sm:$0xff]  ;;  %v13612_v23 = vld [vmem:[#allocation34_spill] sm:$0xff] }
 0x2c1   : > { %v2722_v63 = vpop.permute.xlu1 %2721  ;;  %v12230_v38 = vpop.permute.xlu0 %887  ;;  %v12232_v36 = vld [vmem:[#allocation3 + $0xd9] sm:$0xff]  ;;  %v705_v1 = vmul.f32 %v11965_v51, %v13612_v23  ;;  %v4516_v58 = vld [vmem:[#allocation3 + $0x31] sm:$0xff] }
 0x2c2   : > { %v2813_v37 = vmul.f32 %v12032_v12, %v2722_v63  ;;  %1455 = vperm.xlu1 %10462, %v514_v29   ;;  %v4140_v26 = vld [vmem:[#allocation3 + $0xd8] sm:$0xff]  ;;  %v2885_v46 = vadd.f32 %v12044_v57, %v2846_v3  ;;  %9125 = vmatprep.mubr.msk.f32.mxu1 %vm2930_vm2, %v12232_v36 }
 0x2c3   : > { %1196 = vperm.xlu0 %10461, %v12227_v47   ;;  %9290 = vmatprep.mubr.msk.f32.mxu0 %vm2930_vm2, %v4140_v26  ;;  %v1305_v26 = vld [vmem:[#allocation2 + $0x188] sm:$0xff] }
 0x2c4   : > { %v2845_v15 = vadd.f32 %v2813_v37, %v2581_v45  ;;  %v2917_v60 = vmax.f32 %v2885_v46, 0.0  ;;  %v1832_v23 = vld [vmem:[#allocation2 + $0x182] sm:$0xff] }
 0x2c5   : > { %v12239_v61 = vpop.permute.xlu1 %882  ;;  %v12243_v40 = vpop.permute.xlu0 %1151  ;;  %v12245_v8 = vld [vmem:[#allocation3 + $0xe1] sm:$0xff] }
 0x2c6   : > { %v2884_v50 = vadd.f32 %v12044_v57, %v2845_v15  ;;  %2492 = vperm.xlu1 %10462, %v12097_v33   ;;  %v4141_v42 = vld [vmem:[#allocation3 + $0xe0] sm:$0xff]  ;;  %3006 = vst.msk [vmem:[#allocation3 + $0xf9] sm:$0xff] %vm2930_vm2, %v2917_v60  ;;  %9126 = vmatmul.mubr.msk.f32.gmra.mrb[18].mxu1 %vm2930_vm2, %v12245_v8  ;;  %v4518_v15 = vld [vmem:[#allocation3 + $0x49] sm:$0xff]  ;;  %v1568_v60 = vld [vmem:[#allocation2 + $0x181] sm:$0xff] }
 0x2c7   : > { %2233 = vperm.xlu0 %10461, %v12175_v39   ;;  %9291 = vmatmul.mubr.msk.f32.gmra.mrb[16].mxu0 %vm2930_vm2, %v4141_v42 }
 0x2c8   : > { %v2916_v10 = vmax.f32 %v2884_v50, 0.0 }
 0x2c9   : > { %v12254_v56 = vpop.permute.xlu1 %1146  ;;  %v12258_v33 = vpop.permute.xlu0 %1410 }
 0x2ca   : > { %3005 = vst.msk [vmem:[#allocation3 + $0xf1] sm:$0xff] %vm2930_vm2, %v2916_v10  ;;  %1714 = vperm.xlu1 %10462, %v12188_v34  }
 0x2cb   : > { %1201 = vperm.xlu0 %10461, %v12252_v52  }
 0x2cd   : > { %v893_v54 = vpop.permute.xlu1 %892  ;;  %v12262_v39 = vpop.permute.xlu0 %1415 }
 0x2ce   : > { %2751 = vperm.xlu1 %10462, %v12129_v28   ;;  %v968_v11 = vmul.f32 %v11954_v35, %v893_v54  ;;  %v12276_v28 = vld [vmem:[#allocation3 + $0xf9] sm:$0xff] }
 0x2cf   : > { %2238 = vperm.xlu0 %10461, %v514_v29   ;;  %v704_v29 = vmul.f32 %v11965_v51, %v13611_v7  ;;  %v4937_v54 = vld [vmem:[#allocation10 + $0xa0] sm:$0xff] }
 0x2d1   : > { %v898_v62 = vpop.permute.xlu1 %897  ;;  %v12266_v30 = vld [vmem:[#allocation3 + $0xf1] sm:$0xff]  ;;  %v12272_v53 = vpop.permute.xlu0 %1674  ;;  %v1000_v24 = vadd.f32 %v968_v11, %v704_v29  ;;  %v4520_v11 = vld [vmem:[#allocation3 + $0x61] sm:$0xff] }
 0x2d2   : > { %v4142_v59 = vld [vmem:[#allocation3 + $0xf0] sm:$0xff]  ;;  %v4143_v44 = vld [vmem:[#allocation3 + $0xf8] sm:$0xff]  ;;  %1719 = vperm.xlu1 %10462, %v12213_v9   ;;  %9128 = vmatprep.mubr.msk.f32.mxu1 %vm2930_vm2, %v12266_v30  ;;  %v969_v32 = vmul.f32 %v11954_v35, %v898_v62  ;;  %v4938_v62 = vld [vmem:[#allocation10 + $0xa8] sm:$0xff] }
 0x2d3   : > { %9293 = vmatprep.mubr.msk.f32.mxu0 %vm2930_vm2, %v4142_v59  ;;  %1460 = vperm.xlu0 %10461, %v12264_v18   ;;  %v4519_v59 = vld [vmem:[#allocation3 + $0x51] sm:$0xff] }
 0x2d4   : > { %9129 = vmatmul.mubr.msk.f32.gmra.mrb[20].mxu1 %vm2930_vm2, %v12276_v28  ;;  %9294 = vmatmul.mubr.msk.f32.gmra.mrb[18].mxu0 %vm2930_vm2, %v4143_v44  ;;  %v1001_v63 = vadd.f32 %v969_v32, %v705_v1  ;;  %v9886_v44 = vpack.c.bf16 %v4938_v62, %v4937_v54  ;;  %v13615_v54 = vld [vmem:[#allocation29_spill] sm:$0xff]  ;;  %v1230_v62 = vmul.f32 %v11969_v21, %v12254_v56 }
 0x2d5   : > { %9322 = vmatprep.mubr.msk.f32.mxu0 %vm2930_vm2, %v4514_v31  ;;  %v1157_v48 = vpop.permute.xlu1 %1156  ;;  %v12287_v16 = vpop.permute.xlu0 %1679  ;;  %v4521_v31 = vld [vmem:[#allocation3 + $0x69] sm:$0xff]  ;;  %v1758_v56 = vmul.f32 %v11985_v20, %v12272_v53  ;;  %v1231_v53 = vmul.f32 %v11969_v21, %v12243_v40 }
 0x2d6   : > { %v1232_v25 = vmul.f32 %v11969_v21, %v1157_v48  ;;  %2756 = vperm.xlu1 %10462, %v12157_v27   ;;  %9887 = vmatprep.subr.bf16.mxu0 %v9886_v44 }
 0x2d7   : > { %2497 = vperm.xlu0 %10461, %v12188_v34   ;;  %v4517_v34 = vld [vmem:[#allocation3 + $0x39] sm:$0xff] }
 0x2d8   : > { %v1264_v6 = vadd.f32 %v1232_v25, %v1000_v24  ;;  %9323 = vmatmul.mubr.msk.f32.vlgmr.msra.gmra.mrb[0].mxu0 %vm2930_vm2, %v4515_v49  ;;  %v1569_v25 = vld [vmem:[#allocation2 + $0x189] sm:$0xff]  ;;  %v13613_v49 = vld [vmem:[#allocation33_spill] sm:$0xff] }
 0x2d9   : > { %9325 = vmatprep.mubr.msk.f32.mxu0 %vm2930_vm2, %v4516_v58  ;;  %v1162_v3 = vpop.permute.xlu1 %1161  ;;  %v1421_v27 = vpop.permute.xlu0 %1420  ;;  %9889 = vmatpush3.bf16.msra.mxu0 %v9886_v44 }
 0x2da   : > { %v1233_v45 = vmul.f32 %v11969_v21, %v1162_v3  ;;  %1978 = vperm.xlu1 %10462, %v12227_v47   ;;  %v1496_v37 = vmul.f32 %v11978_v0, %v1421_v27 }
 0x2db   : > { %1983 = vperm.xlu0 %10461, %v12252_v52  }
 0x2dc   : > { %v12298_v46 = vadd.f32 %v1233_v45, %v1001_v63  ;;  %9326 = vmatmul.mubr.msk.f32.gmra.mrb[2].mxu0 %vm2930_vm2, %v4517_v34  ;;  %v12301_v50 = vadd.f32 %v1496_v37, %v1264_v6 }
 0x2dd   : > { %9328 = vmatprep.mubr.msk.f32.mxu0 %vm2930_vm2, %v4518_v15  ;;  %v903_v42 = vpop.permute.xlu1 %902  ;;  %v908_v10 = vpop.permute.xlu0 %907 }
 0x2de   : > { %1465 = vperm.xlu1 %10462, %v1305_v26   ;;  %v970_v24 = vmul.f32 %v11954_v35, %v903_v42 }
 0x2df   : > { %1724 = vperm.xlu0 %10461, %v1568_v60  }
 0x2e0   : > { %9329 = vmatmul.mubr.msk.f32.gmra.mrb[4].mxu0 %vm2930_vm2, %v4519_v59 }
 0x2e1   : > { %9331 = vmatprep.mubr.msk.f32.mxu0 %vm2930_vm2, %v4520_v11  ;;  %v12306_v7 = vpop.permute.xlu1 %1938  ;;  %v12309_v29 = vpop.permute.xlu0 %1943  ;;  %v1494_v11 = vmul.f32 %v11978_v0, %v12258_v33 }
 0x2e2   : > { %2502 = vperm.xlu1 %10462, %v12213_v9   ;;  %v971_v9 = vmul.f32 %v11954_v35, %v908_v10  ;;  %v2022_v33 = vmul.f32 %v11996_v43, %v12306_v7 }
 0x2e3   : > { %2761 = vperm.xlu0 %10461, %v12227_v47   ;;  %v706_v47 = vmul.f32 %v11965_v51, %v13613_v49 }
 0x2e4   : > { %9332 = vmatmul.mubr.msk.f32.gmra.mrb[6].mxu0 %vm2930_vm2, %v4521_v31 }
 0x2e5   : > { %9334 = vmatprep.mubr.msk.f32.mxu0 %vm2930_vm2, %v11856_v2  ;;  %v12315_v48 = vpop.permute.xlu1 %1425  ;;  %v12319_v32 = vpop.permute.xlu0 %1684  ;;  %v13614_v2 = vld [vmem:[#allocation36_spill] sm:$0xff]  ;;  %v1002_v6 = vadd.f32 %v970_v24, %v706_v47  ;;  %v2362_v47 = vld [vmem:[#allocation2 + $0x1a1] sm:$0xff] }
 0x2e6   : > { %2243 = vperm.xlu1 %10462, %v12264_v18   ;;  %v707_v1 = vmul.f32 %v11965_v51, %v13614_v2 }
 0x2e7   : > { %2248 = vperm.xlu0 %10461, %v1305_v26   ;;  %v2097_v26 = vld [vmem:[#allocation2 + $0x198] sm:$0xff] }
 0x2e8   : > { %9335 = vmatmul.mubr.msk.f32.gmra.mrb[8].mxu0 %vm2930_vm2, %v11887_v19  ;;  %v1003_v63 = vadd.f32 %v971_v9, %v707_v1  ;;  %v1833_v19 = vld [vmem:[#allocation2 + $0x18a] sm:$0xff]  ;;  %v967_v9 = vmul.f32 %v11954_v35, %v12230_v38 }
 0x2e9   : > { %9337 = vmatprep.mubr.msk.f32.mxu0 %vm2930_vm2, %v11952_v5  ;;  %v1167_v18 = vpop.permute.xlu1 %1166  ;;  %v1172_v3 = vpop.permute.xlu0 %1171 }
 0x2ea   : > { %v1234_v58 = vmul.f32 %v11969_v21, %v1167_v18  ;;  %1729 = vperm.xlu1 %10462, %v1569_v25   ;;  %v1235_v45 = vmul.f32 %v11969_v21, %v1172_v3  ;;  %v4939_v3 = vld [vmem:[#allocation10 + $0xb0] sm:$0xff] }
 0x2eb   : > { %1988 = vperm.xlu0 %10461, %v1832_v23  }
 0x2ec   : > { %v1266_v27 = vadd.f32 %v1234_v58, %v1002_v6  ;;  %9338 = vmatmul.mubr.msk.f32.gmra.mrb[10].mxu0 %vm2930_vm2, %v11992_v14  ;;  %v1267_v37 = vadd.f32 %v1235_v45, %v1003_v63  ;;  %v1495_v6 = vmul.f32 %v11978_v0, %v12262_v39  ;;  %v4940_v63 = vld [vmem:[#allocation10 + $0xb8] sm:$0xff]  ;;  %v1759_v39 = vmul.f32 %v11985_v20, %v12287_v16  ;;  %v3051_v16 = vld [vmem:[#allocation10] sm:$0xff] }
 0x2ed   : > { %9340 = vmatprep.mubr.msk.f32.mxu0 %vm2930_vm2, %v12072_v13  ;;  %v2204_v5 = vpop.permute.xlu1 %2203  ;;  %v12337_v34 = vpop.permute.xlu0 %2208  ;;  %v2098_v13 = vld [vmem:[#allocation2 + $0x1a0] sm:$0xff] }
 0x2ee   : > { %2766 = vperm.xlu1 %10462, %v12252_v52   ;;  %v966_v52 = vmul.f32 %v11954_v35, %v12239_v61  ;;  %v2287_v1 = vmul.f32 %v12008_v17, %v2204_v5  ;;  %v13617_v5 = vld [vmem:[#allocation35_spill] sm:$0xff] }
 0x2ef   : > { %1993 = vperm.xlu0 %10461, %v1833_v19  }
 0x2f0   : > { %9341 = vmatmul.mubr.msk.f32.gmra.mrb[12].mxu0 %vm2930_vm2, %v12108_v41 }
 0x2f1   : > { %9343 = vmatprep.mubr.msk.f32.mxu0 %vm2930_vm2, %v12194_v22  ;;  %v12343_v15 = vpop.permute.xlu1 %1689  ;;  %v1431_v14 = vpop.permute.xlu0 %1430 }
 0x2f2   : > { %2507 = vperm.xlu1 %10462, %v1568_v60   ;;  %v1498_v42 = vmul.f32 %v11978_v0, %v1431_v14  ;;  %v702_v60 = vmul.f32 %v11965_v51, %v13615_v54 }
 0x2f3   : > { %2253 = vperm.xlu0 %10461, %v2097_v26   ;;  %v708_v26 = vmul.f32 %v11965_v51, %v13617_v5 }
 0x2f4   : > { %9344 = vmatmul.mubr.msk.f32.gmra.mrb[14].mxu0 %vm2930_vm2, %v12202_v4  ;;  %v1530_v10 = vadd.f32 %v1498_v42, %v1266_v27  ;;  %v2361_v4 = vld [vmem:[#allocation2 + $0x199] sm:$0xff]  ;;  %v998_v59 = vadd.f32 %v966_v52, %v702_v60 }
 0x2f5   : > { %9346 = vmatprep.mubr.msk.f32.mxu0 %vm2930_vm2, %v12232_v36  ;;  %v913_v41 = vpop.permute.xlu1 %912  ;;  %v2468_v22 = vpop.permute.xlu0 %2467 }
 0x2f6   : > { %2512 = vperm.xlu1 %10462, %v1569_v25   ;;  %v1262_v44 = vadd.f32 %v1230_v62, %v998_v59  ;;  %v972_v58 = vmul.f32 %v11954_v35, %v913_v41  ;;  %v2551_v27 = vmul.f32 %v12019_v55, %v2468_v22  ;;  %v2023_v62 = vmul.f32 %v11996_v43, %v12309_v29 }
 0x2f7   : > { %2258 = vperm.xlu0 %10461, %v2098_v13  }
 0x2f8   : > { %9347 = vmatmul.mubr.msk.f32.gmra.mrb[16].mxu0 %vm2930_vm2, %v12245_v8  ;;  %v2625_v8 = vld [vmem:[#allocation2 + $0x19a] sm:$0xff]  ;;  %v1526_v49 = vadd.f32 %v1494_v11, %v1262_v44  ;;  %v1004_v41 = vadd.f32 %v972_v58, %v708_v26  ;;  %v2288_v11 = vmul.f32 %v12008_v17, %v12337_v34  ;;  %v3054_v34 = vld [vmem:[#allocation10 + $0x18] sm:$0xff] }
 0x2f9   : > { %9349 = vmatprep.mubr.msk.f32.mxu0 %vm2930_vm2, %v12266_v30  ;;  %v12360_v61 = vpop.permute.xlu1 %1948  ;;  %v1436_v36 = vpop.permute.xlu0 %1435  ;;  %v3052_v44 = vld [vmem:[#allocation10 + $0x8] sm:$0xff] }
 0x2fa   : > { %2771 = vperm.xlu1 %10462, %v1832_v23   ;;  %v1499_v31 = vmul.f32 %v11978_v0, %v1436_v36  ;;  %v13616_v23 = vld [vmem:[#allocation32_spill] sm:$0xff]  ;;  %v1790_v2 = vadd.f32 %v1758_v56, %v1526_v49  ;;  %v9854_v56 = vpack.c.bf16 %v3052_v44, %v3051_v16  ;;  %v2024_v16 = vmul.f32 %v11996_v43, %v12360_v61 }
 0x2fb   : > { %2517 = vperm.xlu0 %10461, %v2361_v4  }
 0x2fc   : > { %9350 = vmatmul.mubr.msk.f32.gmra.mrb[18].mxu0 %vm2930_vm2, %v12276_v28  ;;  %v12369_v24 = vadd.f32 %v1499_v31, %v1267_v37  ;;  %v703_v28 = vmul.f32 %v11965_v51, %v13616_v23  ;;  %v2054_v45 = vadd.f32 %v2022_v33, %v1790_v2  ;;  %v9890_v37 = vpack.c.bf16 %v4940_v63, %v4939_v3  ;;  %v3053_v2 = vld [vmem:[#allocation10 + $0x10] sm:$0xff] }
 0x2fd   : > { %v918_v30 = vpop.permute.xlu1 %917  ;;  %v2473_v25 = vpop.permute.xlu0 %2472  ;;  %9855 = vmatprep.subr.bf16.mxu1 %v9854_v56 }
 0x2fe   : > { %2776 = vperm.xlu1 %10462, %v1833_v19   ;;  %v999_v38 = vadd.f32 %v967_v9, %v703_v28  ;;  %v2626_v19 = vld [vmem:[#allocation2 + $0x1a2] sm:$0xff]  ;;  %v2319_v42 = vadd.f32 %v2287_v1, %v2054_v45  ;;  %9891 = vmatprep.subr.bf16.mxu0 %v9890_v37  ;;  %v973_v9 = vmul.f32 %v11954_v35, %v918_v30 }
 0x2ff   : > { %2781 = vperm.xlu0 %10461, %v2625_v8   ;;  %9893 = vmatpush3.bf16.msra.mxu0 %v9890_v37  ;;  %v13618_v28 = vld [vmem:[#allocation38_spill] sm:$0xff]  ;;  %v9858_v30 = vpack.c.bf16 %v3054_v34, %v3053_v2 }
 0x300   : > { %v1263_v14 = vadd.f32 %v1231_v53, %v999_v38  ;;  %v2583_v4 = vadd.f32 %v2551_v27, %v2319_v42  ;;  %v709_v53 = vmul.f32 %v11965_v51, %v13618_v28  ;;  %9857 = vmatpush3.bf16.msra.mxu1 %v9854_v56  ;;  %v5329_v42 = vld [vmem:[#allocation10 + $0xc8] sm:$0xff] }
 0x301   : > { %v12380_v18 = vpop.permute.xlu1 %1953  ;;  %v1695_v7 = vpop.permute.xlu0 %1694  ;;  %9859 = vmatprep.subr.bf16.mxu1 %v9858_v30 }
 0x302   : > { %2522 = vperm.xlu1 %10462, %v2362_v47   ;;  %v1762_v40 = vmul.f32 %v11985_v20, %v1695_v7  ;;  %v1527_v60 = vadd.f32 %v1495_v6, %v1263_v14  ;;  %v2552_v47 = vmul.f32 %v12019_v55, %v2473_v25  ;;  %v1005_v58 = vadd.f32 %v973_v9, %v709_v53  ;;  %v12446_v9 = vld [vmem:[#allocation6] ss:$0 sm:$0xff]  ;;  %v12458_v53 = vld [vmem:[#allocation6 + $0x5] ss:$0 sm:$0xff] }
 0x303   : > { %v2025_v2 = vmul.f32 %v12458_v53, %v12380_v18 }
 0x304   : > { %v12391_v13 = vadd.f32 %v1762_v40, %v1530_v10  ;;  %v1791_v10 = vadd.f32 %v1759_v39, %v1527_v60  ;;  %9861 = vmatpush3.bf16.msra.mxu1 %v9858_v30  ;;  %v5328_v39 = vld [vmem:[#allocation10 + $0xc0] sm:$0xff]  ;;  %v1760_v60 = vmul.f32 %v11985_v20, %v12319_v32 }
 0x305   : > { %v1177_v52 = vpop.permute.xlu1 %1176  ;;  %v2732_v22 = vpop.permute.xlu0 %2731 }
 0x306   : > { %v1236_v54 = vmul.f32 %v11969_v21, %v1177_v52  ;;  %2786 = vperm.xlu1 %10462, %v2626_v19   ;;  %v2815_v59 = vmul.f32 %v12032_v12, %v2732_v22  ;;  %v2055_v33 = vadd.f32 %v2023_v62, %v1791_v10  ;;  %v12418_v52 = vpack.c.bf16 %v5329_v42, %v5328_v39 }
 0x307   : > { %v1792_v44 = vadd.f32 %v1760_v60, %v12301_v50  ;;  %v13619_v50 = vld [vmem:[#allocation37_spill] sm:$0xff] }
 0x308   : > { %v1268_v36 = vadd.f32 %v1236_v54, %v1004_v41  ;;  %v2847_v31 = vadd.f32 %v2815_v59, %v2583_v4  ;;  %v2320_v1 = vadd.f32 %v2288_v11, %v2055_v33  ;;  %9895 = vmatprep.subr.bf16.mxu0 %v12418_v52  ;;  %v12436_v11 = vld [vmem:[#allocation6 + $0x1] ss:$0 sm:$0xff] }
 0x309   : > { %v2214_v8 = vpop.permute.xlu1 %2213  ;;  %v1700_v49 = vpop.permute.xlu0 %1699  ;;  %v2056_v61 = vadd.f32 %v2024_v16, %v1792_v44 }
 0x30a   : > { %v2886_v29 = vadd.f32 %v12044_v57, %v2847_v31  ;;  %v1763_v23 = vmul.f32 %v11985_v20, %v1700_v49  ;;  %v2584_v3 = vadd.f32 %v2552_v47, %v2320_v1  ;;  %v2289_v10 = vmul.f32 %v12008_v17, %v2214_v8  ;;  %v12441_v31 = vld [vmem:[#allocation6 + $0x3] ss:$0 sm:$0xff]  ;;  %v12450_v8 = vld [vmem:[#allocation6 + $0x4] ss:$0 sm:$0xff] }
 0x30b   : > { %v1497_v43 = vmul.f32 %v12441_v31, %v12315_v48  ;;  %v710_v17 = vmul.f32 %v12446_v9, %v13619_v50  ;;  %v1761_v49 = vmul.f32 %v12450_v8, %v12343_v15 }
 0x30c   : > { %v2918_v38 = vmax.f32 %v2886_v29, 0.0  ;;  %v12406_v6 = vadd.f32 %v1763_v23, %v12369_v24  ;;  %v2321_v33 = vadd.f32 %v2289_v10, %v2056_v61  ;;  %v12454_v23 = vld [vmem:[#allocation6 + $0x2] ss:$0 sm:$0xff] }
 0x30d   : > { %v1182_v35 = vpop.permute.xlu1 %1181  ;;  %v2737_v7 = vpop.permute.xlu0 %2736 }
 0x30e   : > { %v1237_v25 = vmul.f32 %v11969_v21, %v1182_v35  ;;  %3007 = vst.msk [vmem:[#allocation3 + $0x109] sm:$0xff] %vm2930_vm2, %v2918_v38  ;;  %v2816_v63 = vmul.f32 %v12032_v12, %v2737_v7  ;;  %v12465_v35 = vld [vmem:[#allocation6 + $0x6] ss:$0 sm:$0xff] }
 0x310   : > { %v1269_v51 = vadd.f32 %v1237_v25, %v1005_v58  ;;  %v2848_v45 = vadd.f32 %v2816_v63, %v2584_v3  ;;  %v12471_v63 = vld [vmem:[#allocation6 + $0x7] ss:$0 sm:$0xff] }
 0x311   : > { %v2219_v27 = vpop.permute.xlu1 %2218  ;;  %v1441_v40 = vpop.permute.xlu0 %1440 }
 0x312   : > { %v2887_v24 = vadd.f32 %v12044_v57, %v2848_v45  ;;  %v1500_v19 = vmul.f32 %v11978_v0, %v1441_v40  ;;  %v2290_v30 = vmul.f32 %v12465_v35, %v2219_v27 }
 0x314   : > { %v2919_v37 = vmax.f32 %v2887_v24, 0.0  ;;  %v12413_v5 = vadd.f32 %v1500_v19, %v1268_v36 }
 0x315   : > { %v923_v21 = vpop.permute.xlu1 %922  ;;  %v2478_v26 = vpop.permute.xlu0 %2477  ;;  %v3077_v14 = vld [vmem:[#allocation3 + $0x109] sm:$0xff] }
 0x316   : > { %3008 = vst.msk [vmem:[#allocation3 + $0x111] sm:$0xff] %vm2930_vm2, %v2919_v37  ;;  %9131 = vmatprep.mubr.msk.f32.mxu1 %vm2930_vm2, %v3077_v14  ;;  %9352 = vmatprep.mubr.msk.f32.mxu0 %vm2930_vm2, %v3077_v14  ;;  %v974_v20 = vmul.f32 %v12436_v11, %v923_v21  ;;  %v2553_v56 = vmul.f32 %v12019_v55, %v2478_v26  ;;  %v12479_v14 = vld [vmem:[#allocation6 + $0x8] ss:$0 sm:$0xff] }
 0x317   : > { %v1529_v55 = vadd.f32 %v1497_v43, %v12298_v46 }
 0x318   : > { %v1006_v29 = vadd.f32 %v974_v20, %v710_v17  ;;  %v2585_v34 = vadd.f32 %v2553_v56, %v2321_v33 }
 0x319   : > { %v12420_v41 = vpop.permute.xlu1 %1958  ;;  %v1446_v54 = vpop.permute.xlu0 %1445  ;;  %v1793_v15 = vadd.f32 %v1761_v49, %v1529_v55 }
 0x31a   : > { %v1501_v22 = vmul.f32 %v11978_v0, %v1446_v54  ;;  %v2026_v49 = vmul.f32 %v12458_v53, %v12420_v41 }
 0x31b   : > { %v2057_v3 = vadd.f32 %v2025_v2, %v1793_v15 }
 0x31c   : > { %v12426_v62 = vadd.f32 %v1501_v22, %v1269_v51  ;;  %v13620_v51 = vld [vmem:[#allocation40_spill] sm:$0xff]  ;;  %v2058_v55 = vadd.f32 %v2026_v49, %v12391_v13 }
 0x31d   : > { %v928_v4 = vpop.permute.xlu1 %927  ;;  %v2483_v59 = vpop.permute.xlu0 %2482  ;;  %v3078_v36 = vld [vmem:[#allocation3 + $0x111] sm:$0xff]  ;;  %v711_v45 = vmul.f32 %v12446_v9, %v13620_v51  ;;  %v2322_v40 = vadd.f32 %v2290_v30, %v2057_v3 }
 0x31e   : > { %9132 = vmatmul.mubr.msk.f32.gmra.mrb[22].mxu1 %vm2930_vm2, %v3078_v36  ;;  %9353 = vmatmul.mubr.msk.f32.gmra.mrb[20].mxu0 %vm2930_vm2, %v3078_v36  ;;  %v975_v7 = vmul.f32 %v12436_v11, %v928_v4  ;;  %v2554_v18 = vmul.f32 %v12471_v63, %v2483_v59 }
 0x320   : > { %v1007_v27 = vadd.f32 %v975_v7, %v711_v45  ;;  %v2586_v26 = vadd.f32 %v2554_v18, %v2322_v40  ;;  %v12524_v45 = vld [vmem:[#allocation8] ss:$0 sm:$0xff] }
 0x321   : > { %v12434_v0 = vpop.permute.xlu1 %1963  ;;  %v12439_v32 = vpop.permute.xlu0 %1704 }
 0x322   : > { %v2027_v41 = vmul.f32 %v12458_v53, %v12434_v0 }
 0x325   : > { %v1187_v47 = vpop.permute.xlu1 %1186  ;;  %v2742_v28 = vpop.permute.xlu0 %2741 }
 0x326   : > { %v1238_v48 = vmul.f32 %v12454_v23, %v1187_v47  ;;  %v2817_v1 = vmul.f32 %v12032_v12, %v2742_v28  ;;  %v3768_v28 = vld [vmem:[#allocation10 + $0x48] sm:$0xff] }
 0x328   : > { %v12463_v38 = vadd.f32 %v1238_v48, %v1006_v29  ;;  %v2849_v58 = vadd.f32 %v2817_v1, %v2585_v34  ;;  %v3767_v48 = vld [vmem:[#allocation10 + $0x40] sm:$0xff] }
 0x329   : > { %v2224_v25 = vpop.permute.xlu1 %2223  ;;  %v12469_v46 = vpop.permute.xlu0 %1709  ;;  %v12513_v1 = vpack.c.bf16 %v3768_v28, %v3767_v48 }
 0x32a   : > { %v2888_v12 = vadd.f32 %v12044_v57, %v2849_v58  ;;  %v2291_v47 = vmul.f32 %v12465_v35, %v2224_v25 }
 0x32b   : > { %9863 = vmatprep.subr.bf16.mxu1 %v12513_v1 }
 0x32c   : > { %v2920_v24 = vmax.f32 %v2888_v12, 0.0  ;;  %v2323_v15 = vadd.f32 %v2291_v47, %v2058_v55  ;;  %v2059_v12 = vadd.f32 %v2027_v41, %v12406_v6  ;;  %v1764_v6 = vmul.f32 %v12450_v8, %v12439_v32 }
 0x32d   : > { %v1192_v19 = vpop.permute.xlu1 %1191  ;;  %v2747_v21 = vpop.permute.xlu0 %2746 }
 0x32e   : > { %v1239_v37 = vmul.f32 %v12454_v23, %v1192_v19  ;;  %3009 = vst.msk [vmem:[#allocation3 + $0x121] sm:$0xff] %vm2930_vm2, %v2920_v24  ;;  %v2818_v39 = vmul.f32 %v12479_v14, %v2747_v21 }
 0x330   : > { %v12482_v42 = vadd.f32 %v1239_v37, %v1007_v27  ;;  %v2850_v54 = vadd.f32 %v2818_v39, %v2586_v26 }
 0x331   : > { %v2229_v22 = vpop.permute.xlu1 %2228  ;;  %v12484_v60 = vpop.permute.xlu0 %1450 }
 0x332   : > { %v2889_v4 = vadd.f32 %v12044_v57, %v2850_v54  ;;  %v2292_v3 = vmul.f32 %v12465_v35, %v2229_v22 }
 0x334   : > { %v2921_v59 = vmax.f32 %v2889_v4, 0.0  ;;  %v2324_v0 = vadd.f32 %v2292_v3, %v2059_v12 }
 0x335   : > { %v12487_v36 = vpop.permute.xlu1 %932  ;;  %v3079_v44 = vld [vmem:[#allocation3 + $0x121] sm:$0xff] }
 0x336   : > { %v2488_v16 = vpop.permute.xlu0 %2487  ;;  %3010 = vst.msk [vmem:[#allocation3 + $0x129] sm:$0xff] %vm2930_vm2, %v2921_v59  ;;  %9134 = vmatprep.mubr.msk.f32.mxu1 %vm2930_vm2, %v3079_v44  ;;  %9355 = vmatprep.mubr.msk.f32.mxu0 %vm2930_vm2, %v3079_v44  ;;  %v1796_v44 = vadd.f32 %v1764_v6, %v12413_v5 }
 0x337   : > { %v2555_v2 = vmul.f32 %v12471_v63, %v2488_v16 }
 0x339   : > { %v1969_v10 = vpop.permute.xlu1 %1968  ;;  %v2587_v58 = vadd.f32 %v2555_v2, %v2323_v15  ;;  %v1765_v2 = vmul.f32 %v12450_v8, %v12469_v46 }
 0x33a   : > { %v12492_v20 = vpop.permute.xlu0 %937  ;;  %v2028_v59 = vmul.f32 %v12458_v53, %v1969_v10 }
 0x33c   : > { %v2060_v47 = vadd.f32 %v2028_v59, %v1796_v44 }
 0x33d   : > { %v12494_v43 = vpop.permute.xlu1 %673  ;;  %v3080_v56 = vld [vmem:[#allocation3 + $0x129] sm:$0xff] }
 0x33e   : > { %v12496_v61 = vpop.permute.xlu0 %1973  ;;  %9135 = vmatmul.mubr.msk.f32.gmra.mrb[24].mxu1 %vm2930_vm2, %v3080_v56  ;;  %9356 = vmatmul.mubr.msk.f32.gmra.mrb[22].mxu0 %vm2930_vm2, %v3080_v56 }
 0x341   : > { %v12500_v57 = vpop.permute.xlu1 %1455 }
 0x342   : > { %v12502_v50 = vpop.permute.xlu0 %1196 }
 0x345   : > { %v2493_v17 = vpop.permute.xlu1 %2492 }
 0x346   : > { %v2234_v33 = vpop.permute.xlu0 %2233  ;;  %v2556_v51 = vmul.f32 %v12471_v63, %v2493_v17 }
 0x347   : > { %v2293_v56 = vmul.f32 %v12465_v35, %v2234_v33 }
 0x348   : > { %v2588_v37 = vadd.f32 %v2556_v51, %v2324_v0 }
 0x349   : > { %v12507_v29 = vpop.permute.xlu1 %1714  ;;  %v2325_v48 = vadd.f32 %v2293_v56, %v2060_v47  ;;  %v1503_v56 = vmul.f32 %v12441_v31, %v12500_v57 }
 0x34a   : > { %v12511_v34 = vpop.permute.xlu0 %1201 }
 0x34d   : > { %v2752_v30 = vpop.permute.xlu1 %2751 }
 0x34e   : > { %v2819_v25 = vmul.f32 %v12479_v14, %v2752_v30  ;;  %v2239_v7 = vpop.permute.xlu0 %2238 }
 0x34f   : > { %v2294_v46 = vmul.f32 %v12465_v35, %v2239_v7  ;;  %v1766_v7 = vmul.f32 %v12450_v8, %v12507_v29 }
 0x350   : > { %v2851_v13 = vadd.f32 %v2819_v25, %v2587_v58  ;;  %v2029_v58 = vmul.f32 %v12458_v53, %v12496_v61 }
 0x351   : > { %v12520_v18 = vpop.permute.xlu1 %1719 }
 0x352   : > { %v2890_v40 = vadd.f32 %v12524_v45, %v2851_v13  ;;  %v12527_v24 = vpop.permute.xlu0 %1460  ;;  %v1797_v13 = vadd.f32 %v1765_v2, %v12426_v62  ;;  %v976_v62 = vmul.f32 %v12436_v11, %v12487_v36  ;;  %v1767_v57 = vmul.f32 %v12450_v8, %v12520_v18 }
 0x353   : > { %v1535_v2 = vadd.f32 %v1503_v56, %v12482_v42 }
 0x354   : > { %v2922_v19 = vmax.f32 %v2890_v40, 0.0  ;;  %v2061_v40 = vadd.f32 %v2029_v58, %v1797_v13 }
 0x355   : > { %v2757_v27 = vpop.permute.xlu1 %2756  ;;  %v1799_v13 = vadd.f32 %v1767_v57, %v1535_v2 }
 0x356   : > { %3011 = vst.msk [vmem:[#allocation3 + $0x139] sm:$0xff] %vm2930_vm2, %v2922_v19  ;;  %v2820_v21 = vmul.f32 %v12479_v14, %v2757_v27  ;;  %v2498_v26 = vpop.permute.xlu0 %2497  ;;  %v2326_v61 = vadd.f32 %v2294_v46, %v2061_v40 }
 0x357   : > { %v2557_v10 = vmul.f32 %v12471_v63, %v2498_v26 }
 0x358   : > { %v2852_v39 = vadd.f32 %v2820_v21, %v2588_v37  ;;  %v1502_v37 = vmul.f32 %v12441_v31, %v12484_v60 }
 0x359   : > { %v1979_v54 = vpop.permute.xlu1 %1978  ;;  %v2589_v33 = vadd.f32 %v2557_v10, %v2325_v48 }
 0x35a   : > { %v2891_v22 = vadd.f32 %v12524_v45, %v2852_v39  ;;  %v12534_v4 = vpop.permute.xlu0 %1983  ;;  %v1534_v60 = vadd.f32 %v1502_v37, %v12463_v38  ;;  %v2030_v47 = vmul.f32 %v12458_v53, %v1979_v54 }
 0x35b   : > { %v2031_v58 = vmul.f32 %v12458_v53, %v12534_v4 }
 0x35c   : > { %v2923_v16 = vmax.f32 %v2891_v22, 0.0  ;;  %v13623_v22 = vld [vmem:[#allocation39_spill] sm:$0xff]  ;;  %v1798_v38 = vadd.f32 %v1766_v7, %v1534_v60 }
 0x35d   : > { %v12539_v17 = vpop.permute.xlu1 %1465  ;;  %v12541_v49 = vld [vmem:[#allocation3 + $0x139] sm:$0xff]  ;;  %v712_v59 = vmul.f32 %v12446_v9, %v13623_v22 }
 0x35e   : > { %13621 = vst [vmem:[#allocation21_spill] sm:$0xff] %v12541_v49  ;;  %3012 = vst.msk [vmem:[#allocation3 + $0x141] sm:$0xff] %vm2930_vm2, %v2923_v16  ;;  %9137 = vmatprep.mubr.msk.f32.mxu1 %vm2930_vm2, %v12541_v49  ;;  %9358 = vmatprep.mubr.msk.f32.mxu0 %vm2930_vm2, %v12541_v49  ;;  %v1725_v32 = vpop.permute.xlu0 %1724  ;;  %v1240_v16 = vmul.f32 %v12454_v23, %v12502_v50  ;;  %v1505_v4 = vmul.f32 %v12441_v31, %v12539_v17 }
 0x35f   : > { %v1008_v29 = vadd.f32 %v976_v62, %v712_v59 }
 0x361   : > { %v2503_v5 = vpop.permute.xlu1 %2502 }
 0x362   : > { %v2762_v28 = vpop.permute.xlu0 %2761  ;;  %v2558_v0 = vmul.f32 %v12471_v63, %v2503_v5  ;;  %v1504_v5 = vmul.f32 %v12441_v31, %v12527_v24 }
 0x363   : > { %v2821_v55 = vmul.f32 %v12479_v14, %v2762_v28  ;;  %v713_v28 = vmul.f32 %v12446_v9, %v12494_v43  ;;  %v1241_v9 = vmul.f32 %v12454_v23, %v12511_v34 }
 0x364   : > { %v2590_v21 = vadd.f32 %v2558_v0, %v2326_v61 }
 0x365   : > { %v2853_v15 = vadd.f32 %v2821_v55, %v2589_v33  ;;  %v2244_v30 = vpop.permute.xlu1 %2243  ;;  %v12552_v41 = vld [vmem:[#allocation3 + $0x141] sm:$0xff]  ;;  %v1272_v33 = vadd.f32 %v1240_v16, %v1008_v29  ;;  %v1768_v55 = vmul.f32 %v12450_v8, %v1725_v32 }
 0x366   : > { %13622 = vst [vmem:[#allocation24_spill] sm:$0xff] %v12552_v41  ;;  %9138 = vmatmul.mubr.msk.f32.gmra.mrb[26].mxu1 %vm2930_vm2, %v12552_v41  ;;  %9359 = vmatmul.mubr.msk.f32.gmra.mrb[24].mxu0 %vm2930_vm2, %v12552_v41  ;;  %v2249_v25 = vpop.permute.xlu0 %2248  ;;  %v2295_v50 = vmul.f32 %v12465_v35, %v2244_v30  ;;  %v977_v30 = vmul.f32 %v12436_v11, %v12492_v20 }
 0x367   : > { %v2892_v3 = vadd.f32 %v12524_v45, %v2853_v15  ;;  %v2062_v15 = vadd.f32 %v2030_v47, %v1798_v38  ;;  %v1536_v43 = vadd.f32 %v1504_v5, %v1272_v33  ;;  %v2296_v46 = vmul.f32 %v12465_v35, %v2249_v25 }
 0x369   : > { %v2924_v12 = vmax.f32 %v2892_v3, 0.0  ;;  %v1730_v51 = vpop.permute.xlu1 %1729  ;;  %v2327_v42 = vadd.f32 %v2295_v50, %v2062_v15  ;;  %v1800_v40 = vadd.f32 %v1768_v55, %v1536_v43  ;;  %v3021_v43 = vld [vmem:[#allocation3 + $0x18] sm:$0xff] }
 0x36a   : > { %v1989_v19 = vpop.permute.xlu0 %1988 }
 0x36b   : > { %3013 = vst.msk [vmem:[#allocation3 + $0x151] sm:$0xff] %vm2930_vm2, %v2924_v12  ;;  %v2032_v32 = vmul.f32 %v12458_v53, %v1989_v19  ;;  %v1009_v12 = vadd.f32 %v977_v30, %v713_v28  ;;  %v3770_v30 = vld [vmem:[#allocation10 + $0x58] sm:$0xff] }
 0x36d   : > { %v2767_v27 = vpop.permute.xlu1 %2766  ;;  %v1273_v19 = vadd.f32 %v1241_v9, %v1009_v12  ;;  %v2064_v37 = vadd.f32 %v2032_v32, %v1800_v40  ;;  %v3022_v32 = vld [vmem:[#allocation3 + $0x20] sm:$0xff]  ;;  %v12658_v12 = vld [vmem:[#allocation3 + $0x30] sm:$0xff]  ;;  %v12666_v40 = vld [vmem:[#allocation3 + $0x38] sm:$0xff] }
 0x36e   : > { %v2822_v26 = vmul.f32 %v12479_v14, %v2767_v27  ;;  %v1994_v39 = vpop.permute.xlu0 %1993  ;;  %v2063_v27 = vadd.f32 %v2031_v58, %v1799_v13  ;;  %v3019_v58 = vld [vmem:[#allocation3] sm:$0xff] }
 0x36f   : > { %v1537_v31 = vadd.f32 %v1505_v4, %v1273_v19  ;;  %v2033_v17 = vmul.f32 %v12458_v53, %v1994_v39  ;;  %v12660_v4 = vld [vmem:[#allocation3 + $0x1a] sm:$0xff] }
 0x370   : > { %v2854_v6 = vadd.f32 %v2822_v26, %v2590_v21  ;;  %v2328_v25 = vadd.f32 %v2296_v46, %v2063_v27  ;;  %v1769_v26 = vmul.f32 %v12450_v8, %v1730_v51  ;;  %v5331_v46 = vld [vmem:[#allocation10 + $0xd8] sm:$0xff]  ;;  %v12675_v27 = vld [vmem:[#allocation3 + $0x48] sm:$0xff] }
 0x371   : > { %v2508_v44 = vpop.permute.xlu1 %2507  ;;  %v12686_v19 = vld [vmem:[#allocation3 + $0x3a] sm:$0xff] }
 0x372   : > { %v2893_v36 = vadd.f32 %v12524_v45, %v2854_v6  ;;  %v2254_v10 = vpop.permute.xlu0 %2253  ;;  %v12581_v48 = vld [vmem:[#allocation3 + $0x151] sm:$0xff]  ;;  %v2559_v18 = vmul.f32 %v12471_v63, %v2508_v44  ;;  %v1801_v53 = vadd.f32 %v1769_v26, %v1537_v31  ;;  %v12713_v31 = vld [vmem:[#allocation3 + $0x62] sm:$0xff] }
 0x373   : > { %13624 = vst [vmem:[#allocation23_spill] sm:$0xff] %v12581_v48  ;;  %9140 = vmatprep.mubr.msk.f32.mxu1 %vm2930_vm2, %v12581_v48  ;;  %9361 = vmatprep.mubr.msk.f32.mxu0 %vm2930_vm2, %v12581_v48  ;;  %v2297_v0 = vmul.f32 %v12465_v35, %v2254_v10  ;;  %v12704_v26 = vld [vmem:[#allocation3 + $0x52] sm:$0xff] }
 0x374   : > { %v2925_v54 = vmax.f32 %v2893_v36, 0.0  ;;  %v2591_v11 = vadd.f32 %v2559_v18, %v2327_v42  ;;  %v2065_v29 = vadd.f32 %v2033_v17, %v1801_v53  ;;  %v5330_v42 = vld [vmem:[#allocation10 + $0xd0] sm:$0xff]  ;;  %v12719_v17 = vld [vmem:[#allocation3 + $0x80] sm:$0xff] }
 0x375   : > { %v2513_v24 = vpop.permute.xlu1 %2512  ;;  %v2329_v7 = vadd.f32 %v2297_v0, %v2064_v37  ;;  %v12668_v0 = vld [vmem:[#allocation3 + $0x22] sm:$0xff]  ;;  %v12753_v53 = vld [vmem:[#allocation3 + $0x9a] sm:$0xff] }
 0x376   : > { %3014 = vst.msk [vmem:[#allocation3 + $0x159] sm:$0xff] %vm2930_vm2, %v2925_v54  ;;  %v2259_v3 = vpop.permute.xlu0 %2258  ;;  %v2560_v20 = vmul.f32 %v12471_v63, %v2513_v24 }
 0x377   : > { %v2298_v39 = vmul.f32 %v12465_v35, %v2259_v3  ;;  %v3769_v3 = vld [vmem:[#allocation10 + $0x50] sm:$0xff] }
 0x378   : > { %v2592_v59 = vadd.f32 %v2560_v20, %v2328_v25  ;;  %v9866_v9 = vpack.c.bf16 %v3770_v30, %v3769_v3  ;;  %v5719_v20 = vld [vmem:[#allocation10 + $0xe8] sm:$0xff]  ;;  %v12833_v3 = vld [vmem:[#allocation3 + $0x112] sm:$0xff] }
 0x379   : > { %v2772_v61 = vpop.permute.xlu1 %2771  ;;  %v2330_v50 = vadd.f32 %v2298_v39, %v2065_v29  ;;  %v12702_v25 = vld [vmem:[#allocation3 + $0x68] sm:$0xff]  ;;  %v12759_v39 = vld [vmem:[#allocation3 + $0xc0] sm:$0xff]  ;;  %v12839_v30 = vld [vmem:[#allocation3 + $0x138] sm:$0xff] }
 0x37a   : > { %v2823_v23 = vmul.f32 %v12479_v14, %v2772_v61  ;;  %v2518_v34 = vpop.permute.xlu0 %2517  ;;  %v13630_v61 = vld [vmem:[#allocation20_spill] sm:$0xff] }
 0x37b   : > { %v2561_v21 = vmul.f32 %v12471_v63, %v2518_v34  ;;  %v12684_v34 = vld [vmem:[#allocation3 + $0x50] sm:$0xff]  ;;  %v12777_v29 = vld [vmem:[#allocation3 + $0xc2] sm:$0xff] }
 0x37c   : > { %v2855_v62 = vadd.f32 %v2823_v23, %v2591_v11  ;;  %v5718_v11 = vld [vmem:[#allocation10 + $0xe0] sm:$0xff]  ;;  %v12680_v23 = vld [vmem:[#allocation3 + $0x32] sm:$0xff] }
 0x37d   : > { %v2777_v6 = vpop.permute.xlu1 %2776  ;;  %v12614_v22 = vld [vmem:[#allocation3 + $0x159] sm:$0xff]  ;;  %v2593_v51 = vadd.f32 %v2561_v21, %v2329_v7  ;;  %v12688_v37 = vpack.c.bf16 %v5719_v20, %v5718_v11  ;;  %v12696_v21 = vld [vmem:[#allocation3 + $0x4a] sm:$0xff] }
 0x37e   : > { %13625 = vst [vmem:[#allocation26_spill] sm:$0xff] %v12614_v22  ;;  %v2894_v16 = vadd.f32 %v12524_v45, %v2855_v62  ;;  %v2824_v44 = vmul.f32 %v12479_v14, %v2777_v6  ;;  %9141 = vmatmul.mubr.msk.f32.gmra.mrb[28].mxu1 %vm2930_vm2, %v12614_v22  ;;  %9362 = vmatmul.mubr.msk.f32.gmra.mrb[26].mxu0 %vm2930_vm2, %v12614_v22  ;;  %v2782_v8 = vpop.permute.xlu0 %2781  ;;  %v12711_v62 = vld [vmem:[#allocation3 + $0x78] sm:$0xff]  ;;  %v12721_v7 = vld [vmem:[#allocation3 + $0x6a] sm:$0xff] }
 0x37f   : > { %v2825_v60 = vmul.f32 %v12479_v14, %v2782_v8  ;;  %v12727_v6 = vld [vmem:[#allocation3 + $0x90] sm:$0xff]  ;;  %v12743_v8 = vld [vmem:[#allocation3 + $0xa8] sm:$0xff] }
 0x380   : > { %v2926_v56 = vmax.f32 %v2894_v16, 0.0  ;;  %v2856_v47 = vadd.f32 %v2824_v44, %v2592_v59  ;;  %v12729_v59 = vld [vmem:[#allocation3 + $0x7a] sm:$0xff]  ;;  %v12737_v44 = vld [vmem:[#allocation3 + $0x82] sm:$0xff]  ;;  %v12873_v20 = vld [vmem:[#allocation3 + $0x152] sm:$0xff] }
 0x381   : > { %v2857_v36 = vadd.f32 %v2825_v60, %v2593_v51  ;;  %v2523_v10 = vpop.permute.xlu1 %2522  ;;  %v12735_v16 = vld [vmem:[#allocation3 + $0x98] sm:$0xff]  ;;  %v12751_v60 = vld [vmem:[#allocation3 + $0xb0] sm:$0xff] }
 0x382   : > { %3015 = vst.msk [vmem:[#allocation3 + $0x169] sm:$0xff] %vm2930_vm2, %v2926_v56  ;;  %v2895_v5 = vadd.f32 %v12524_v45, %v2856_v47  ;;  %v2562_v38 = vmul.f32 %v12471_v63, %v2523_v10  ;;  %v12745_v51 = vld [vmem:[#allocation3 + $0x92] sm:$0xff]  ;;  %v12761_v56 = vld [vmem:[#allocation3 + $0xaa] sm:$0xff] }
 0x383   : > { %v2896_v57 = vadd.f32 %v12524_v45, %v2857_v36  ;;  %v12767_v47 = vld [vmem:[#allocation3 + $0xc8] sm:$0xff]  ;;  %v12769_v36 = vld [vmem:[#allocation3 + $0xb2] sm:$0xff] }
 0x384   : > { %v2927_v54 = vmax.f32 %v2895_v5, 0.0  ;;  %v2594_v35 = vadd.f32 %v2562_v38, %v2330_v50  ;;  %v12775_v10 = vld [vmem:[#allocation3 + $0xd8] sm:$0xff]  ;;  %v12783_v5 = vld [vmem:[#allocation3 + $0xe0] sm:$0xff]  ;;  %v12785_v38 = vld [vmem:[#allocation3 + $0xca] sm:$0xff] }
 0x385   : > { %v2928_v28 = vmax.f32 %v2896_v57, 0.0  ;;  %v2787_v33 = vpop.permute.xlu1 %2786  ;;  %v12791_v57 = vld [vmem:[#allocation3 + $0xf0] sm:$0xff]  ;;  %v12793_v50 = vld [vmem:[#allocation3 + $0xda] sm:$0xff] }
 0x386   : > { %3016 = vst.msk [vmem:[#allocation3 + $0x171] sm:$0xff] %vm2930_vm2, %v2927_v54  ;;  %v2826_v55 = vmul.f32 %v12479_v14, %v2787_v33  ;;  %v12799_v54 = vld [vmem:[#allocation3 + $0xf8] sm:$0xff]  ;;  %v12807_v33 = vld [vmem:[#allocation3 + $0x108] sm:$0xff] }
 0x387   : > { %3017 = vst.msk [vmem:[#allocation3 + $0x181] sm:$0xff] %vm2930_vm2, %v2928_v28  ;;  %v12801_v28 = vld [vmem:[#allocation3 + $0xe2] sm:$0xff]  ;;  %v3735_v22 = vld [vmem:[#allocation3 + $0xa] sm:$0xff] }
 0x388   : > { %v2858_v24 = vadd.f32 %v2826_v55, %v2594_v35  ;;  %v12809_v35 = vld [vmem:[#allocation3 + $0xf2] sm:$0xff] }
 0x389   : > { %v12631_v2 = vld [vmem:[#allocation3 + $0x169] sm:$0xff] }
 0x38a   : > { %13626 = vst [vmem:[#allocation25_spill] sm:$0xff] %v12631_v2  ;;  %v2897_v15 = vadd.f32 %v12524_v45, %v2858_v24  ;;  %9143 = vmatprep.mubr.msk.f32.mxu1 %vm2930_vm2, %v12631_v2  ;;  %9364 = vmatprep.mubr.msk.f32.mxu0 %vm2930_vm2, %v12631_v2  ;;  %v3020_v45 = vld [vmem:[#allocation3 + $0x8] sm:$0xff]  ;;  %v12815_v55 = vld [vmem:[#allocation3 + $0x110] sm:$0xff]  ;;  %v12817_v24 = vld [vmem:[#allocation3 + $0xfa] sm:$0xff] }
 0x38b   : > { %v12871_v11 = vld [vmem:[#allocation3 + $0x168] sm:$0xff] }
 0x38c   : > { %v2929_v63 = vmax.f32 %v2897_v15, 0.0  ;;  %v12823_v15 = vld [vmem:[#allocation3 + $0x120] sm:$0xff]  ;;  %13631 = vst [vmem:[#allocation31_spill] sm:$0xff] %v12871_v11 }
 0x38d   : > { %v12638_v18 = vld [vmem:[#allocation3 + $0x171] sm:$0xff] }
 0x38e   : > { %13627 = vst [vmem:[#allocation28_spill] sm:$0xff] %v12638_v18  ;;  %3018 = vst.msk [vmem:[#allocation3 + $0x189] sm:$0xff] %vm2930_vm2, %v2929_v63  ;;  %9144 = vmatmul.mubr.msk.f32.gmra.mrb[30].mxu1 %vm2930_vm2, %v12638_v18  ;;  %9365 = vmatmul.mubr.msk.f32.gmra.mrb[28].mxu0 %vm2930_vm2, %v12638_v18  ;;  %v12645_v14 = vld [vmem:[#allocation3 + $0x181] sm:$0xff]  ;;  %v12825_v63 = vld [vmem:[#allocation3 + $0x10a] sm:$0xff] }
 0x38f   : > { %13628 = vst [vmem:[#allocation30_spill] sm:$0xff] %v12645_v14  ;;  %9367 = vmatprep.mubr.msk.f32.mxu0 %vm2930_vm2, %v12645_v14  ;;  %9154 = vmatprep.mubr.msk.f32.mxu1 %vm2930_vm2, %v3019_v58  ;;  %v12831_v58 = vld [vmem:[#allocation3 + $0x128] sm:$0xff]  ;;  %v12879_v14 = vld [vmem:[#allocation3 + $0x170] sm:$0xff]  ;;  %v12881_v18 = vld [vmem:[#allocation3 + $0x15a] sm:$0xff] }
 0x390   : > { %13632 = vst [vmem:[#allocation34_spill] sm:$0xff] %v12879_v14  ;;  %v12887_v2 = vld [vmem:[#allocation3 + $0x16a] sm:$0xff]  ;;  %v12892_v48 = vld [vmem:[#allocation3 + $0x172] sm:$0xff] }
 0x392   : > { %9155 = vmatmul.mubr.msk.f32.vlgmr.msra.gmra.mrb[0].mxu1 %vm2930_vm2, %v3020_v45  ;;  %v12841_v45 = vld [vmem:[#allocation3 + $0x122] sm:$0xff] }
 0x393   : > { %9157 = vmatprep.mubr.msk.f32.mxu1 %vm2930_vm2, %v3021_v43  ;;  %9865 = vmatpush3.bf16.msra.mxu1 %v12513_v1  ;;  %v9898_v1 = vpack.c.bf16 %v5331_v46, %v5330_v42  ;;  %v12849_v43 = vld [vmem:[#allocation3 + $0x12a] sm:$0xff]  ;;  %v12857_v42 = vld [vmem:[#allocation3 + $0x13a] sm:$0xff] }
 0x394   : > { %9867 = vmatprep.subr.bf16.mxu1 %v9866_v9  ;;  %v12863_v46 = vld [vmem:[#allocation3 + $0x158] sm:$0xff] }
 0x395   : > { %v12653_v13 = vld [vmem:[#allocation3 + $0x189] sm:$0xff] }
 0x396   : > { %13629 = vst [vmem:[#allocation27_spill] sm:$0xff] %v12653_v13  ;;  %9158 = vmatmul.mubr.msk.f32.gmra.mrb[2].mxu1 %vm2930_vm2, %v3022_v32  ;;  %9368 = vmatmul.mubr.msk.f32.gmra.mrb[30].mxu0 %vm2930_vm2, %v12653_v13  ;;  %v12855_v32 = vld [vmem:[#allocation3 + $0x150] sm:$0xff]  ;;  %v3734_v13 = vld [vmem:[#allocation3 + $0x2] sm:$0xff] }
 0x397   : > { %9160 = vmatprep.mubr.msk.f32.mxu1 %vm2930_vm2, %v12658_v12  ;;  %9378 = vmatprep.mubr.msk.f32.mxu0 %vm2930_vm2, %v12660_v4  ;;  %v12897_v41 = vld [vmem:[#allocation3 + $0x182] sm:$0xff]  ;;  %v12904_v49 = vld [vmem:[#allocation3 + $0x18a] sm:$0xff] }
 0x398   : > { %9869 = vmatpush3.bf16.msra.mxu1 %v9866_v9  ;;  %v12847_v9 = vld [vmem:[#allocation3 + $0x140] sm:$0xff] }
 0x399   : > { %10062 = vmatprep.subr.bf16.mxu1 %v13630_v61 }
 0x39a   : > { %9161 = vmatmul.mubr.msk.f32.gmra.mrb[4].mxu1 %vm2930_vm2, %v12666_v40  ;;  %9379 = vmatmul.mubr.msk.f32.vlgmr.msra.gmra.mrb[0].mxu0 %vm2930_vm2, %v12668_v0 }
 0x39b   : > { %9897 = vmatpush3.bf16.msra.mxu0 %v12418_v52  ;;  %9163 = vmatprep.mubr.msk.f32.mxu1 %vm2930_vm2, %v12675_v27  ;;  %v12694_v52 = vld [vmem:[#allocation3 + $0x60] sm:$0xff] }
 0x39c   : > { %9381 = vmatprep.mubr.msk.f32.mxu0 %vm2930_vm2, %v12680_v23  ;;  %9899 = vmatprep.subr.bf16.mxu0 %v9898_v1 }
 0x39e   : > { %9164 = vmatmul.mubr.msk.f32.gmra.mrb[6].mxu1 %vm2930_vm2, %v12684_v34  ;;  %9382 = vmatmul.mubr.msk.f32.gmra.mrb[2].mxu0 %vm2930_vm2, %v12686_v19 }
 0x39f   : > { %9166 = vmatprep.mubr.msk.f32.mxu1 %vm2930_vm2, %v12694_v52  ;;  %9384 = vmatprep.mubr.msk.f32.mxu0 %vm2930_vm2, %v12696_v21 }
 0x3a0   : > { %9901 = vmatpush3.bf16.msra.mxu0 %v9898_v1  ;;  %v12865_v1 = vld [vmem:[#allocation3 + $0x142] sm:$0xff] }
 0x3a1   : > { %9903 = vmatprep.subr.bf16.mxu0 %v12688_v37 }
 0x3a2   : > { %9167 = vmatmul.mubr.msk.f32.gmra.mrb[8].mxu1 %vm2930_vm2, %v12702_v25  ;;  %9385 = vmatmul.mubr.msk.f32.gmra.mrb[4].mxu0 %vm2930_vm2, %v12704_v26 }
 0x3a3   : > { %9169 = vmatprep.mubr.msk.f32.mxu1 %vm2930_vm2, %v12711_v62  ;;  %9387 = vmatprep.mubr.msk.f32.mxu0 %vm2930_vm2, %v12713_v31 }
 0x3a6   : > { %9170 = vmatmul.mubr.msk.f32.gmra.mrb[10].mxu1 %vm2930_vm2, %v12719_v17  ;;  %9388 = vmatmul.mubr.msk.f32.gmra.mrb[6].mxu0 %vm2930_vm2, %v12721_v7 }
 0x3a7   : > { %9172 = vmatprep.mubr.msk.f32.mxu1 %vm2930_vm2, %v12727_v6  ;;  %9390 = vmatprep.mubr.msk.f32.mxu0 %vm2930_vm2, %v12729_v59 }
 0x3aa   : > { %9173 = vmatmul.mubr.msk.f32.gmra.mrb[12].mxu1 %vm2930_vm2, %v12735_v16  ;;  %9391 = vmatmul.mubr.msk.f32.gmra.mrb[8].mxu0 %vm2930_vm2, %v12737_v44 }
 0x3ab   : > { %9175 = vmatprep.mubr.msk.f32.mxu1 %vm2930_vm2, %v12743_v8  ;;  %9393 = vmatprep.mubr.msk.f32.mxu0 %vm2930_vm2, %v12745_v51 }
 0x3ae   : > { %9176 = vmatmul.mubr.msk.f32.gmra.mrb[14].mxu1 %vm2930_vm2, %v12751_v60  ;;  %9394 = vmatmul.mubr.msk.f32.gmra.mrb[10].mxu0 %vm2930_vm2, %v12753_v53 }
 0x3af   : > { %9178 = vmatprep.mubr.msk.f32.mxu1 %vm2930_vm2, %v12759_v39  ;;  %9396 = vmatprep.mubr.msk.f32.mxu0 %vm2930_vm2, %v12761_v56 }
 0x3b2   : > { %9179 = vmatmul.mubr.msk.f32.gmra.mrb[16].mxu1 %vm2930_vm2, %v12767_v47  ;;  %9397 = vmatmul.mubr.msk.f32.gmra.mrb[12].mxu0 %vm2930_vm2, %v12769_v36 }
 0x3b3   : > { %9181 = vmatprep.mubr.msk.f32.mxu1 %vm2930_vm2, %v12775_v10  ;;  %9399 = vmatprep.mubr.msk.f32.mxu0 %vm2930_vm2, %v12777_v29 }
 0x3b6   : > { %9182 = vmatmul.mubr.msk.f32.gmra.mrb[18].mxu1 %vm2930_vm2, %v12783_v5  ;;  %9400 = vmatmul.mubr.msk.f32.gmra.mrb[14].mxu0 %vm2930_vm2, %v12785_v38 }
 0x3b7   : > { %9184 = vmatprep.mubr.msk.f32.mxu1 %vm2930_vm2, %v12791_v57  ;;  %9402 = vmatprep.mubr.msk.f32.mxu0 %vm2930_vm2, %v12793_v50 }
 0x3ba   : > { %9185 = vmatmul.mubr.msk.f32.gmra.mrb[20].mxu1 %vm2930_vm2, %v12799_v54  ;;  %9403 = vmatmul.mubr.msk.f32.gmra.mrb[16].mxu0 %vm2930_vm2, %v12801_v28 }
 0x3bb   : > { %9187 = vmatprep.mubr.msk.f32.mxu1 %vm2930_vm2, %v12807_v33  ;;  %9405 = vmatprep.mubr.msk.f32.mxu0 %vm2930_vm2, %v12809_v35 }
 0x3be   : > { %9188 = vmatmul.mubr.msk.f32.gmra.mrb[22].mxu1 %vm2930_vm2, %v12815_v55  ;;  %9406 = vmatmul.mubr.msk.f32.gmra.mrb[18].mxu0 %vm2930_vm2, %v12817_v24 }
 0x3bf   : > { %9190 = vmatprep.mubr.msk.f32.mxu1 %vm2930_vm2, %v12823_v15  ;;  %9408 = vmatprep.mubr.msk.f32.mxu0 %vm2930_vm2, %v12825_v63 }
 0x3c2   : > { %9191 = vmatmul.mubr.msk.f32.gmra.mrb[24].mxu1 %vm2930_vm2, %v12831_v58  ;;  %9409 = vmatmul.mubr.msk.f32.gmra.mrb[20].mxu0 %vm2930_vm2, %v12833_v3 }
 0x3c3   : > { %9193 = vmatprep.mubr.msk.f32.mxu1 %vm2930_vm2, %v12839_v30  ;;  %9411 = vmatprep.mubr.msk.f32.mxu0 %vm2930_vm2, %v12841_v45 }
 0x3c6   : > { %9194 = vmatmul.mubr.msk.f32.gmra.mrb[26].mxu1 %vm2930_vm2, %v12847_v9  ;;  %9412 = vmatmul.mubr.msk.f32.gmra.mrb[22].mxu0 %vm2930_vm2, %v12849_v43 }
 0x3c7   : > { %9196 = vmatprep.mubr.msk.f32.mxu1 %vm2930_vm2, %v12855_v32  ;;  %9414 = vmatprep.mubr.msk.f32.mxu0 %vm2930_vm2, %v12857_v42 }
 0x3ca   : > { %9197 = vmatmul.mubr.msk.f32.gmra.mrb[28].mxu1 %vm2930_vm2, %v12863_v46  ;;  %9415 = vmatmul.mubr.msk.f32.gmra.mrb[24].mxu0 %vm2930_vm2, %v12865_v1 }
 0x3cb   : > { %9199 = vmatprep.mubr.msk.f32.mxu1 %vm2930_vm2, %v12871_v11  ;;  %9417 = vmatprep.mubr.msk.f32.mxu0 %vm2930_vm2, %v12873_v20  ;;  %v13633_v11 = vld [vmem:[#allocation22_spill] sm:$0xff] }
 0x3ce   : > { %9200 = vmatmul.mubr.msk.f32.gmra.mrb[30].mxu1 %vm2930_vm2, %v12879_v14  ;;  %9418 = vmatmul.mubr.msk.f32.gmra.mrb[26].mxu0 %vm2930_vm2, %v12881_v18  ;;  %v5721_v14 = vld [vmem:[#allocation10 + $0xf8] sm:$0xff] }
 0x3cf   : > { %9420 = vmatprep.mubr.msk.f32.mxu0 %vm2930_vm2, %v12887_v2  ;;  %9210 = vmatprep.mubr.msk.f32.mxu1 %vm2930_vm2, %v3734_v13  ;;  %v5720_v13 = vld [vmem:[#allocation10 + $0xf0] sm:$0xff] }
 0x3d2   : > { %9211 = vmatmul.mubr.msk.f32.vlgmr.msra.gmra.mrb[0].mxu1 %vm2930_vm2, %v3735_v22  ;;  %9421 = vmatmul.mubr.msk.f32.gmra.mrb[28].mxu0 %vm2930_vm2, %v12892_v48  ;;  %v9906_v22 = vpack.c.bf16 %v5721_v14, %v5720_v13  ;;  %v5705_v13 = vld [vmem:[#allocation3 + $0x121] sm:$0xff] }
 0x3d3   : > { %9213 = vmatprep.mubr.msk.f32.mxu1 %vm2930_vm2, %v12660_v4  ;;  %9423 = vmatprep.mubr.msk.f32.mxu0 %vm2930_vm2, %v12897_v41  ;;  %v6108_v4 = vld [vmem:[#allocation10 + $0x100] sm:$0xff] }
 0x3d4   : > { %10064 = vmatpush3.bf16.msra.mxu1 %v13630_v61  ;;  %v5323_v61 = vld [vmem:[#allocation3 + $0x180] sm:$0xff] }
 0x3d5   : > { %10063 = vmatprep.subr.bf16.mxu1 %v13633_v11 }
 0x3d6   : > { %9214 = vmatmul.mubr.msk.f32.gmra.mrb[2].mxu1 %vm2930_vm2, %v12668_v0  ;;  %9424 = vmatmul.mubr.msk.f32.gmra.mrb[30].mxu0 %vm2930_vm2, %v12904_v49  ;;  %v6109_v0 = vld [vmem:[#allocation10 + $0x108] sm:$0xff] }
 0x3d7   : > { %9216 = vmatprep.mubr.msk.f32.mxu1 %vm2930_vm2, %v12680_v23  ;;  %9434 = vmatprep.mubr.msk.f32.mxu0 %vm2930_vm2, %v12658_v12  ;;  %v12925_v14 = vpack.c.bf16 %v6109_v0, %v6108_v4  ;;  %v13634_v12 = vld [vmem:[#allocation31_spill] sm:$0xff]  ;;  %v13636_v4 = vld [vmem:[#allocation21_spill] sm:$0xff]  ;;  %v13637_v0 = vld [vmem:[#allocation24_spill] sm:$0xff] }
 0x3d8   : > { %10065 = vmatpush3.bf16.msra.mxu1 %v13633_v11  ;;  %v5704_v11 = vld [vmem:[#allocation3 + $0x111] sm:$0xff] }
 0x3da   : > { %9217 = vmatmul.mubr.msk.f32.gmra.mrb[4].mxu1 %vm2930_vm2, %v12686_v19  ;;  %9435 = vmatmul.mubr.msk.f32.vlgmr.msra.gmra.mrb[0].mxu0 %vm2930_vm2, %v12666_v40  ;;  %v13635_v40 = vld [vmem:[#allocation34_spill] sm:$0xff] }
 0x3db   : > { %9905 = vmatpush3.bf16.msra.mxu0 %v12688_v37  ;;  %9219 = vmatprep.mubr.msk.f32.mxu1 %vm2930_vm2, %v12696_v21  ;;  %v5326_v37 = vld [vmem:[#allocation3 + $0x1a0] sm:$0xff] }
 0x3dc   : > { %9437 = vmatprep.mubr.msk.f32.mxu0 %vm2930_vm2, %v12675_v27  ;;  %9907 = vmatprep.subr.bf16.mxu0 %v9906_v22  ;;  %v5325_v27 = vld [vmem:[#allocation3 + $0x198] sm:$0xff] }
 0x3de   : > { %9220 = vmatmul.mubr.msk.f32.gmra.mrb[6].mxu1 %vm2930_vm2, %v12704_v26  ;;  %9438 = vmatmul.mubr.msk.f32.gmra.mrb[2].mxu0 %vm2930_vm2, %v12684_v34  ;;  %v5324_v34 = vld [vmem:[#allocation3 + $0x188] sm:$0xff] }
 0x3df   : > { %9222 = vmatprep.mubr.msk.f32.mxu1 %vm2930_vm2, %v12713_v31  ;;  %9440 = vmatprep.mubr.msk.f32.mxu0 %vm2930_vm2, %v12694_v52  ;;  %v6110_v52 = vld [vmem:[#allocation10 + $0x110] sm:$0xff] }
 0x3e0   : > { %9909 = vmatpush3.bf16.msra.mxu0 %v9906_v22  ;;  %v5706_v22 = vld [vmem:[#allocation3 + $0x129] sm:$0xff] }
 0x3e1   : > { %9911 = vmatprep.subr.bf16.mxu0 %v12925_v14 }
 0x3e2   : > { %9223 = vmatmul.mubr.msk.f32.gmra.mrb[8].mxu1 %vm2930_vm2, %v12721_v7  ;;  %9441 = vmatmul.mubr.msk.f32.gmra.mrb[4].mxu0 %vm2930_vm2, %v12702_v25  ;;  %v6111_v25 = vld [vmem:[#allocation10 + $0x118] sm:$0xff] }
 0x3e3   : > { %9225 = vmatprep.mubr.msk.f32.mxu1 %vm2930_vm2, %v12729_v59  ;;  %9443 = vmatprep.mubr.msk.f32.mxu0 %vm2930_vm2, %v12711_v62  ;;  %v5685_v62 = vld [vmem:[#allocation3 + $0x31] sm:$0xff] }
 0x3e6   : > { %9226 = vmatmul.mubr.msk.f32.gmra.mrb[10].mxu1 %vm2930_vm2, %v12737_v44  ;;  %9444 = vmatmul.mubr.msk.f32.gmra.mrb[6].mxu0 %vm2930_vm2, %v12719_v17  ;;  %v9914_v17 = vpack.c.bf16 %v6111_v25, %v6110_v52  ;;  %v5716_v52 = vld [vmem:[#allocation3 + $0x1a1] sm:$0xff]  ;;  %v6669_v25 = vld [vmem:[#allocation13 + $0x70] sm:$0xff] }
 0x3e7   : > { %9228 = vmatprep.mubr.msk.f32.mxu1 %vm2930_vm2, %v12745_v51  ;;  %9446 = vmatprep.mubr.msk.f32.mxu0 %vm2930_vm2, %v12727_v6  ;;  %v5686_v6 = vld [vmem:[#allocation3 + $0x39] sm:$0xff] }
 0x3ea   : > { %9229 = vmatmul.mubr.msk.f32.gmra.mrb[12].mxu1 %vm2930_vm2, %v12753_v53  ;;  %9447 = vmatmul.mubr.msk.f32.gmra.mrb[8].mxu0 %vm2930_vm2, %v12735_v16  ;;  %v5687_v16 = vld [vmem:[#allocation3 + $0x49] sm:$0xff] }
 0x3eb   : > { %9231 = vmatprep.mubr.msk.f32.mxu1 %vm2930_vm2, %v12761_v56  ;;  %9449 = vmatprep.mubr.msk.f32.mxu0 %vm2930_vm2, %v12743_v8  ;;  %v5688_v8 = vld [vmem:[#allocation3 + $0x51] sm:$0xff] }
 0x3ee   : > { %9232 = vmatmul.mubr.msk.f32.gmra.mrb[14].mxu1 %vm2930_vm2, %v12769_v36  ;;  %9450 = vmatmul.mubr.msk.f32.gmra.mrb[10].mxu0 %vm2930_vm2, %v12751_v60  ;;  %v5689_v60 = vld [vmem:[#allocation3 + $0x61] sm:$0xff] }
 0x3ef   : > { %9234 = vmatprep.mubr.msk.f32.mxu1 %vm2930_vm2, %v12777_v29  ;;  %9452 = vmatprep.mubr.msk.f32.mxu0 %vm2930_vm2, %v12759_v39  ;;  %v5690_v39 = vld [vmem:[#allocation3 + $0x69] sm:$0xff] }
 0x3f2   : > { %9235 = vmatmul.mubr.msk.f32.gmra.mrb[16].mxu1 %vm2930_vm2, %v12785_v38  ;;  %9453 = vmatmul.mubr.msk.f32.gmra.mrb[12].mxu0 %vm2930_vm2, %v12767_v47  ;;  %v5691_v47 = vld [vmem:[#allocation3 + $0x79] sm:$0xff] }
 0x3f3   : > { %9237 = vmatprep.mubr.msk.f32.mxu1 %vm2930_vm2, %v12793_v50  ;;  %9455 = vmatprep.mubr.msk.f32.mxu0 %vm2930_vm2, %v12775_v10  ;;  %v5692_v10 = vld [vmem:[#allocation3 + $0x81] sm:$0xff] }
 0x3f6   : > { %9238 = vmatmul.mubr.msk.f32.gmra.mrb[18].mxu1 %vm2930_vm2, %v12801_v28  ;;  %9456 = vmatmul.mubr.msk.f32.gmra.mrb[14].mxu0 %vm2930_vm2, %v12783_v5  ;;  %v5693_v5 = vld [vmem:[#allocation3 + $0x91] sm:$0xff] }
 0x3f7   : > { %9240 = vmatprep.mubr.msk.f32.mxu1 %vm2930_vm2, %v12809_v35  ;;  %9458 = vmatprep.mubr.msk.f32.mxu0 %vm2930_vm2, %v12791_v57  ;;  %v5694_v57 = vld [vmem:[#allocation3 + $0x99] sm:$0xff] }
 0x3fa   : > { %9241 = vmatmul.mubr.msk.f32.gmra.mrb[20].mxu1 %vm2930_vm2, %v12817_v24  ;;  %9459 = vmatmul.mubr.msk.f32.gmra.mrb[16].mxu0 %vm2930_vm2, %v12799_v54  ;;  %v5695_v54 = vld [vmem:[#allocation3 + $0xa9] sm:$0xff] }
 0x3fb   : > { %9243 = vmatprep.mubr.msk.f32.mxu1 %vm2930_vm2, %v12825_v63  ;;  %9461 = vmatprep.mubr.msk.f32.mxu0 %vm2930_vm2, %v12807_v33 }
 0x3fe   : > { %9244 = vmatmul.mubr.msk.f32.gmra.mrb[22].mxu1 %vm2930_vm2, %v12833_v3  ;;  %9462 = vmatmul.mubr.msk.f32.gmra.mrb[18].mxu0 %vm2930_vm2, %v12815_v55 }
 0x3ff   : > { %9246 = vmatprep.mubr.msk.f32.mxu1 %vm2930_vm2, %v12841_v45  ;;  %9464 = vmatprep.mubr.msk.f32.mxu0 %vm2930_vm2, %v12823_v15 }
 0x402   : > { %9247 = vmatmul.mubr.msk.f32.gmra.mrb[24].mxu1 %vm2930_vm2, %v12849_v43  ;;  %9465 = vmatmul.mubr.msk.f32.gmra.mrb[20].mxu0 %vm2930_vm2, %v12831_v58 }
 0x403   : > { %9249 = vmatprep.mubr.msk.f32.mxu1 %vm2930_vm2, %v12857_v42  ;;  %9467 = vmatprep.mubr.msk.f32.mxu0 %vm2930_vm2, %v12839_v30 }
 0x406   : > { %9250 = vmatmul.mubr.msk.f32.gmra.mrb[26].mxu1 %vm2930_vm2, %v12865_v1  ;;  %9468 = vmatmul.mubr.msk.f32.gmra.mrb[22].mxu0 %vm2930_vm2, %v12847_v9 }
 0x407   : > { %9252 = vmatprep.mubr.msk.f32.mxu1 %vm2930_vm2, %v12873_v20  ;;  %9470 = vmatprep.mubr.msk.f32.mxu0 %vm2930_vm2, %v12855_v32 }
 0x40a   : > { %9253 = vmatmul.mubr.msk.f32.gmra.mrb[28].mxu1 %vm2930_vm2, %v12881_v18  ;;  %9471 = vmatmul.mubr.msk.f32.gmra.mrb[24].mxu0 %vm2930_vm2, %v12863_v46 }
 0x40b   : > { %9255 = vmatprep.mubr.msk.f32.mxu1 %vm2930_vm2, %v12887_v2  ;;  %9473 = vmatprep.mubr.msk.f32.mxu0 %vm2930_vm2, %v13634_v12 }
 0x40e   : > { %9256 = vmatmul.mubr.msk.f32.gmra.mrb[30].mxu1 %vm2930_vm2, %v12892_v48  ;;  %9474 = vmatmul.mubr.msk.f32.gmra.mrb[26].mxu0 %vm2930_vm2, %v13635_v40 }
 0x40f   : > { %9296 = vmatprep.mubr.msk.f32.mxu1 %vm2930_vm2, %v12807_v33  ;;  %9476 = vmatprep.mubr.msk.f32.mxu0 %vm2930_vm2, %v5323_v61  ;;  %v5696_v33 = vld [vmem:[#allocation3 + $0xb1] sm:$0xff] }
 0x412   : > { %9297 = vmatmul.mubr.msk.f32.vlgmr.msra.gmra.mrb[20].mxu1 %vm2930_vm2, %v12815_v55  ;;  %9477 = vmatmul.mubr.msk.f32.gmra.mrb[28].mxu0 %vm2930_vm2, %v5324_v34  ;;  %v5697_v55 = vld [vmem:[#allocation3 + $0xc1] sm:$0xff] }
 0x413   : > { %9299 = vmatprep.mubr.msk.f32.mxu1 %vm2930_vm2, %v12823_v15  ;;  %9479 = vmatprep.mubr.msk.f32.mxu0 %vm2930_vm2, %v5325_v27  ;;  %v5698_v15 = vld [vmem:[#allocation3 + $0xc9] sm:$0xff] }
 0x414   : > { %v13642_v27 = vld [vmem:[#allocation30_spill] sm:$0xff] }
 0x416   : > { %9300 = vmatmul.mubr.msk.f32.gmra.mrb[22].mxu1 %vm2930_vm2, %v12831_v58  ;;  %9480 = vmatmul.mubr.msk.f32.gmra.mrb[30].mxu0 %vm2930_vm2, %v5326_v37  ;;  %v5699_v58 = vld [vmem:[#allocation3 + $0xd9] sm:$0xff] }
 0x417   : > { %9302 = vmatprep.mubr.msk.f32.mxu1 %vm2930_vm2, %v12839_v30  ;;  %9490 = vmatprep.mubr.msk.f32.mxu0 %vm2930_vm2, %v5685_v62  ;;  %v5700_v30 = vld [vmem:[#allocation3 + $0xe1] sm:$0xff]  ;;  %v13643_v37 = vld [vmem:[#allocation27_spill] sm:$0xff] }
 0x418   : > { %v6670_v62 = vld [vmem:[#allocation13 + $0x78] sm:$0xff] }
 0x41a   : > { %9303 = vmatmul.mubr.msk.f32.gmra.mrb[24].mxu1 %vm2930_vm2, %v12847_v9  ;;  %9491 = vmatmul.mubr.msk.f32.vlgmr.msra.gmra.mrb[0].mxu0 %vm2930_vm2, %v5686_v6  ;;  %v5701_v9 = vld [vmem:[#allocation3 + $0xf1] sm:$0xff]  ;;  %v9930_v6 = vpack.c.bf16 %v6670_v62, %v6669_v25 }
 0x41b   : > { %9913 = vmatpush3.bf16.msra.mxu0 %v12925_v14  ;;  %9305 = vmatprep.mubr.msk.f32.mxu1 %vm2930_vm2, %v12855_v32  ;;  %v5702_v32 = vld [vmem:[#allocation3 + $0xf9] sm:$0xff] }
 0x41c   : > { %9493 = vmatprep.mubr.msk.f32.mxu0 %vm2930_vm2, %v5687_v16  ;;  %9915 = vmatprep.subr.bf16.mxu0 %v9914_v17  ;;  %v13638_v14 = vld [vmem:[#allocation23_spill] sm:$0xff] }
 0x41e   : > { %9306 = vmatmul.mubr.msk.f32.gmra.mrb[26].mxu1 %vm2930_vm2, %v12863_v46  ;;  %9494 = vmatmul.mubr.msk.f32.gmra.mrb[2].mxu0 %vm2930_vm2, %v5688_v8  ;;  %v5703_v46 = vld [vmem:[#allocation3 + $0x109] sm:$0xff] }
 0x41f   : > { %9308 = vmatprep.mubr.msk.f32.mxu1 %vm2930_vm2, %v13634_v12  ;;  %9496 = vmatprep.mubr.msk.f32.mxu0 %vm2930_vm2, %v5689_v60  ;;  %v13639_v12 = vld [vmem:[#allocation26_spill] sm:$0xff] }
 0x420   : > { %9917 = vmatpush3.bf16.msra.mxu0 %v9914_v17 }
 0x422   : > { %9309 = vmatmul.mubr.msk.f32.gmra.mrb[28].mxu1 %vm2930_vm2, %v13635_v40  ;;  %9497 = vmatmul.mubr.msk.f32.gmra.mrb[4].mxu0 %vm2930_vm2, %v5690_v39  ;;  %v13640_v40 = vld [vmem:[#allocation25_spill] sm:$0xff] }
 0x423   : > { %9311 = vmatprep.mubr.msk.f32.mxu1 %vm2930_vm2, %v5323_v61  ;;  %9499 = vmatprep.mubr.msk.f32.mxu0 %vm2930_vm2, %v5691_v47  ;;  %v13641_v61 = vld [vmem:[#allocation28_spill] sm:$0xff] }
 0x426   : > { %9312 = vmatmul.mubr.msk.f32.gmra.mrb[30].mxu1 %vm2930_vm2, %v5324_v34  ;;  %9500 = vmatmul.mubr.msk.f32.gmra.mrb[6].mxu0 %vm2930_vm2, %v5692_v10  ;;  %v5715_v34 = vld [vmem:[#allocation3 + $0x199] sm:$0xff] }
 0x427   : > { %9502 = vmatprep.mubr.msk.f32.mxu0 %vm2930_vm2, %v5693_v5 }
 0x42a   : > { %9503 = vmatmul.mubr.msk.f32.gmra.mrb[8].mxu0 %vm2930_vm2, %v5694_v57 }
 0x42b   : > { %9505 = vmatprep.mubr.msk.f32.mxu0 %vm2930_vm2, %v5695_v54  ;;  %v6646_v54 = vld [vmem:[#allocation13] sm:$0xff] }
 0x42e   : > { %9506 = vmatmul.mubr.msk.f32.gmra.mrb[10].mxu0 %vm2930_vm2, %v5696_v33  ;;  %v6647_v33 = vld [vmem:[#allocation13 + $0x8] sm:$0xff] }
 0x42f   : > { %9508 = vmatprep.mubr.msk.f32.mxu0 %vm2930_vm2, %v5697_v55 }
 0x432   : > { %9509 = vmatmul.mubr.msk.f32.gmra.mrb[12].mxu0 %vm2930_vm2, %v5698_v15  ;;  %v13242_v15 = vpack.c.bf16 %v6647_v33, %v6646_v54 }
 0x433   : > { %9511 = vmatprep.mubr.msk.f32.mxu0 %vm2930_vm2, %v5699_v58 }
 0x436   : > { %9512 = vmatmul.mubr.msk.f32.gmra.mrb[14].mxu0 %vm2930_vm2, %v5700_v30 }
 0x437   : > { %9514 = vmatprep.mubr.msk.f32.mxu0 %vm2930_vm2, %v5701_v9 }
 0x43a   : > { %9515 = vmatmul.mubr.msk.f32.gmra.mrb[16].mxu0 %vm2930_vm2, %v5702_v32 }
 0x43b   : > { %9517 = vmatprep.mubr.msk.f32.mxu0 %vm2930_vm2, %v5703_v46 }
 0x43e   : > { %9518 = vmatmul.mubr.msk.f32.gmra.mrb[18].mxu0 %vm2930_vm2, %v5704_v11 }
 0x43f   : > { %9520 = vmatprep.mubr.msk.f32.mxu0 %vm2930_vm2, %v5705_v13 }
 0x442   : > { %9521 = vmatmul.mubr.msk.f32.gmra.mrb[20].mxu0 %vm2930_vm2, %v5706_v22 }
 0x443   : > { %9523 = vmatprep.mubr.msk.f32.mxu0 %vm2930_vm2, %v13636_v4  ;;  %v13256_v4 = vld [vmem:[#allocation11] ss:$0 sm:$0xff] }
 0x446   : > { %9524 = vmatmul.mubr.msk.f32.gmra.mrb[22].mxu0 %vm2930_vm2, %v13637_v0 }
 0x447   : > { %9526 = vmatprep.mubr.msk.f32.mxu0 %vm2930_vm2, %v13638_v14 }
 0x44a   : > { %9527 = vmatmul.mubr.msk.f32.gmra.mrb[24].mxu0 %vm2930_vm2, %v13639_v12 }
 0x44b   : > { %9529 = vmatprep.mubr.msk.f32.mxu0 %vm2930_vm2, %v13640_v40 }
 0x44e   : > { %9530 = vmatmul.mubr.msk.f32.gmra.mrb[26].mxu0 %vm2930_vm2, %v13641_v61 }
 0x44f   : > { %9532 = vmatprep.mubr.msk.f32.mxu0 %vm2930_vm2, %v13642_v27 }
 0x452   : > { %9533 = vmatmul.mubr.msk.f32.gmra.mrb[28].mxu0 %vm2930_vm2, %v13643_v37 }
 0x453   : > { %9535 = vmatprep.mubr.msk.f32.mxu0 %vm2930_vm2, %v5715_v34 }
 0x456   : > { %9536 = vmatmul.mubr.msk.f32.gmra.mrb[30].mxu0 %vm2930_vm2, %v5716_v52 }
 0x457   : > { %9546 = vmatprep.mubr.msk.f32.mxu0 %vm2930_vm2, %v12680_v23  ;;  %v6105_v23 = vld [vmem:[#allocation3 + $0x19a] sm:$0xff] }
 0x45a   : > { %9547 = vmatmul.mubr.msk.f32.vlgmr.msra.gmra.mrb[0].mxu0 %vm2930_vm2, %v12686_v19  ;;  %v6106_v19 = vld [vmem:[#allocation3 + $0x1a2] sm:$0xff] }
 0x45b   : > { %9549 = vmatprep.mubr.msk.f32.mxu0 %vm2930_vm2, %v12696_v21 }
 0x45e   : > { %9550 = vmatmul.mubr.msk.f32.gmra.mrb[2].mxu0 %vm2930_vm2, %v12704_v26 }
 0x45f   : > { %9552 = vmatprep.mubr.msk.f32.mxu0 %vm2930_vm2, %v12713_v31 }
 0x462   : > { %9553 = vmatmul.mubr.msk.f32.gmra.mrb[4].mxu0 %vm2930_vm2, %v12721_v7 }
 0x463   : > { %9555 = vmatprep.mubr.msk.f32.mxu0 %vm2930_vm2, %v12729_v59 }
 0x466   : > { %9556 = vmatmul.mubr.msk.f32.gmra.mrb[6].mxu0 %vm2930_vm2, %v12737_v44 }
 0x467   : > { %9558 = vmatprep.mubr.msk.f32.mxu0 %vm2930_vm2, %v12745_v51  ;;  %v13644_v51 = vmov 0.0  }
 0x468   : > { %6608 = vst.msk [vmem:[#allocation5] sm:$0xff] %vm6552_vm4, %v13644_v51  ;;  %6611 = vst.msk [vmem:[#allocation5 + $0x10] sm:$0xff] %vm6552_vm4, %v13644_v51 }
 0x469   : > { %6613 = vst.msk [vmem:[#allocation5 + $0x20] sm:$0xff] %vm6552_vm4, %v13644_v51  ;;  %6615 = vst.msk [vmem:[#allocation5 + $0x30] sm:$0xff] %vm6552_vm4, %v13644_v51 }
 0x46a   : > { %9559 = vmatmul.mubr.msk.f32.gmra.mrb[8].mxu0 %vm2930_vm2, %v12753_v53  ;;  %6617 = vst.msk [vmem:[#allocation5 + $0x40] sm:$0xff] %vm6552_vm4, %v13644_v51  ;;  %6619 = vst.msk [vmem:[#allocation5 + $0x50] sm:$0xff] %vm6552_vm4, %v13644_v51 }
 0x46b   : > { %9561 = vmatprep.mubr.msk.f32.mxu0 %vm2930_vm2, %v12761_v56  ;;  %6621 = vst.msk [vmem:[#allocation5 + $0x60] sm:$0xff] %vm6552_vm4, %v13644_v51  ;;  %6623 = vst.msk [vmem:[#allocation5 + $0x70] sm:$0xff] %vm6552_vm4, %v13644_v51  ;;  %v6663_v56 = vld [vmem:[#allocation13 + $0x40] sm:$0xff] }
 0x46c   : > { %6625 = vst.msk [vmem:[#allocation5 + $0x80] sm:$0xff] %vm6552_vm4, %v13644_v51  ;;  %6627 = vst.msk [vmem:[#allocation5 + $0x90] sm:$0xff] %vm6552_vm4, %v13644_v51 }
 0x46d   : > { %6610 = vst.msk [vmem:[#allocation5 + $0x8] sm:$0x3] %vm6609_vm5, %v13644_v51  ;;  %6612 = vst.msk [vmem:[#allocation5 + $0x18] sm:$0x3] %vm6609_vm5, %v13644_v51 }
 0x46e   : > { %9562 = vmatmul.mubr.msk.f32.gmra.mrb[10].mxu0 %vm2930_vm2, %v12769_v36  ;;  %v6664_v36 = vld [vmem:[#allocation13 + $0x48] sm:$0xff]  ;;  %6614 = vst.msk [vmem:[#allocation5 + $0x28] sm:$0x3] %vm6609_vm5, %v13644_v51  ;;  %6616 = vst.msk [vmem:[#allocation5 + $0x38] sm:$0x3] %vm6609_vm5, %v13644_v51 }
 0x46f   : > { %9564 = vmatprep.mubr.msk.f32.mxu0 %vm2930_vm2, %v12777_v29  ;;  %6618 = vst.msk [vmem:[#allocation5 + $0x48] sm:$0x3] %vm6609_vm5, %v13644_v51  ;;  %6620 = vst.msk [vmem:[#allocation5 + $0x58] sm:$0x3] %vm6609_vm5, %v13644_v51 }
 0x470   : > { %6622 = vst.msk [vmem:[#allocation5 + $0x68] sm:$0x3] %vm6609_vm5, %v13644_v51  ;;  %6624 = vst.msk [vmem:[#allocation5 + $0x78] sm:$0x3] %vm6609_vm5, %v13644_v51 }
 0x471   : > { %6626 = vst.msk [vmem:[#allocation5 + $0x88] sm:$0x3] %vm6609_vm5, %v13644_v51  ;;  %6628 = vst.msk [vmem:[#allocation5 + $0x98] sm:$0x3] %vm6609_vm5, %v13644_v51 }
 0x472   : > { %9565 = vmatmul.mubr.msk.f32.gmra.mrb[12].mxu0 %vm2930_vm2, %v12785_v38  ;;  %v9918_v38 = vpack.c.bf16 %v6664_v36, %v6663_v56 }
 0x473   : > { %9567 = vmatprep.mubr.msk.f32.mxu0 %vm2930_vm2, %v12793_v50 }
 0x474   : > { %9919 = vmatprep.subr.bf16.mxu1 %v9918_v38  ;;  %v6654_v8 = vld [vmem:[#allocation5 + $0x1] sm:$0xff] }
 0x475   : > { %9921 = vmatpush3.bf16.msra.mxu1 %v9918_v38  ;;  %9610 = vmatprep.mubr.msk.f32.mxu1 %vm6552_vm4, %v6654_v8 }
 0x476   : > { %9568 = vmatmul.mubr.msk.f32.gmra.mrb[14].mxu0 %vm2930_vm2, %v12801_v28  ;;  %v6665_v28 = vld [vmem:[#allocation13 + $0x50] sm:$0xff] }
 0x477   : > { %9570 = vmatprep.mubr.msk.f32.mxu0 %vm2930_vm2, %v12809_v35  ;;  %v6666_v35 = vld [vmem:[#allocation13 + $0x58] sm:$0xff] }
 0x47a   : > { %9571 = vmatmul.mubr.msk.f32.gmra.mrb[16].mxu0 %vm2930_vm2, %v12817_v24 }
 0x47b   : > { %9573 = vmatprep.mubr.msk.f32.mxu0 %vm2930_vm2, %v12825_v63  ;;  %v9922_v63 = vpack.c.bf16 %v6666_v35, %v6665_v28 }
 0x47d   : > { %9923 = vmatprep.subr.bf16.mxu1 %v9922_v63 }
 0x47e   : > { %9574 = vmatmul.mubr.msk.f32.gmra.mrb[18].mxu0 %vm2930_vm2, %v12833_v3  ;;  %9925 = vmatpush3.bf16.msra.mxu1 %v9922_v63 }
 0x47f   : > { %9576 = vmatprep.mubr.msk.f32.mxu0 %vm2930_vm2, %v12841_v45  ;;  %v6667_v45 = vld [vmem:[#allocation13 + $0x60] sm:$0xff] }
 0x482   : > { %9577 = vmatmul.mubr.msk.f32.gmra.mrb[20].mxu0 %vm2930_vm2, %v12849_v43  ;;  %v6668_v43 = vld [vmem:[#allocation13 + $0x68] sm:$0xff] }
 0x483   : > { %9579 = vmatprep.mubr.msk.f32.mxu0 %vm2930_vm2, %v12857_v42 }
 0x486   : > { %9580 = vmatmul.mubr.msk.f32.gmra.mrb[22].mxu0 %vm2930_vm2, %v12865_v1  ;;  %v9926_v1 = vpack.c.bf16 %v6668_v43, %v6667_v45 }
 0x487   : > { %9582 = vmatprep.mubr.msk.f32.mxu0 %vm2930_vm2, %v12873_v20 }
 0x488   : > { %9927 = vmatprep.subr.bf16.mxu1 %v9926_v1 }
 0x489   : > { %9929 = vmatpush3.bf16.msra.mxu1 %v9926_v1 }
 0x48a   : > { %9583 = vmatmul.mubr.msk.f32.gmra.mrb[24].mxu0 %vm2930_vm2, %v12881_v18  ;;  %9931 = vmatprep.subr.bf16.mxu1 %v9930_v6 }
 0x48b   : > { %9585 = vmatprep.mubr.msk.f32.mxu0 %vm2930_vm2, %v12887_v2 }
 0x48d   : > { %9933 = vmatpush3.bf16.msra.mxu1 %v9930_v6 }
 0x48e   : > { %9586 = vmatmul.mubr.msk.f32.gmra.mrb[26].mxu0 %vm2930_vm2, %v12892_v48  ;;  %9935 = vmatprep.subr.bf16.mxu1 %v13242_v15 }
 0x48f   : > { %9588 = vmatprep.mubr.msk.f32.mxu0 %vm2930_vm2, %v12897_v41 }
 0x492   : > { %9589 = vmatmul.mubr.msk.f32.gmra.mrb[28].mxu0 %vm2930_vm2, %v12904_v49 }
 0x493   : > { %9591 = vmatprep.mubr.msk.f32.mxu0 %vm2930_vm2, %v6105_v23 }
 0x496   : > { %9592 = vmatmul.mubr.msk.f32.gmra.mrb[30].mxu0 %vm2930_vm2, %v6106_v19 }
 0x4a5   : > { %v13157_v21 = vpop.f32.mrb[0].mxu1 }
 0x4a6   : > { %v13159_v18 = vpop.f32.mrb[1].mxu1 }
 0x4a9   : > { %v13161_v2 = vpop.f32.mrb[2].mxu1 }
 0x4aa   : > { %v13163_v26 = vpop.f32.mrb[3].mxu1 }
 0x4ad   : > { %v13165_v48 = vpop.f32.mrb[4].mxu1 }
 0x4ae   : > { %v13167_v41 = vpop.f32.mrb[5].mxu1 }
 0x4b1   : > { %v13169_v31 = vpop.f32.mrb[6].mxu1 }
 0x4b2   : > { %v13171_v49 = vpop.f32.mrb[7].mxu1 }
 0x4b5   : > { %v13173_v7 = vpop.f32.mrb[8].mxu1 }
 0x4b6   : > { %v13175_v59 = vpop.f32.mrb[9].mxu1 }
 0x4b9   : > { %v13177_v44 = vpop.f32.mrb[10].mxu1 }
 0x4ba   : > { %v13199_v53 = vpop.f32.mrb[11].mxu1 }
 0x4bd   : > { %v13201_v29 = vpop.f32.mrb[12].mxu1 }
 0x4be   : > { %v13203_v50 = vpop.f32.mrb[13].mxu1 }
 0x4c1   : > { %v13205_v24 = vpop.f32.mrb[14].mxu1 }
 0x4c2   : > { %v13207_v3 = vpop.f32.mrb[15].mxu1 }
 0x4c5   : > { %v13209_v42 = vpop.f32.mrb[16].mxu1 }
 0x4c6   : > { %v13211_v20 = vpop.f32.mrb[17].mxu1 }
 0x4c9   : > { %v13223_v17 = vpop.f32.mrb[18].mxu1 }
 0x4ca   : > { %v13225_v16 = vpop.f32.mrb[19].mxu1 }
 0x4e5   : > { %v13228_v60 = vpop.f32.mrb[20].mxu1 }
 0x4e6   : > { %v13230_v39 = vpop.f32.mrb[21].mxu1 }
 0x4e9   : > { %v13232_v47 = vpop.f32.mrb[22].mxu1 }
 0x4ea   : > { %v13234_v10 = vpop.f32.mrb[23].mxu1 }
 0x4ed   : > { %v13236_v5 = vpop.f32.mrb[24].mxu1 }
 0x4ee   : > { %v13238_v57 = vpop.f32.mrb[25].mxu1 }
 0x4f1   : > { %v13240_v55 = vpop.f32.mrb[26].mxu1 }
 0x4f2   : > { %v13244_v58 = vpop.f32.mrb[27].mxu1 }
 0x4f5   : > { %v13247_v30 = vpop.f32.mrb[28].mxu1 }
 0x4f6   : > { %v13249_v9 = vpop.f32.mrb[29].mxu1 }
 0x4f9   : > { %v13251_v32 = vpop.f32.mrb[30].mxu1 }
 0x4fa   : > { %v13253_v46 = vpop.f32.mrb[31].mxu1 }
 0x52d   : > { %v9548_v11 = vpop.f32.mrb[0].mxu0 }
 0x52e   : > { %v10066_v13 = vadd.f32 %v9548_v11, %v13157_v21  ;;  %v6274_v22 = vpop.f32.mrb[1].mxu0 }
 0x52f   : > { %v10067_v0 = vadd.f32 %v6274_v22, %v13159_v18 }
 0x530   : > { %v6473_v12 = vadd.f32 %v10066_v13, %v13256_v4 }
 0x531   : > { %v9551_v14 = vpop.f32.mrb[2].mxu0  ;;  %v6472_v27 = vadd.f32 %v10067_v0, %v13256_v4 }
 0x532   : > { %v10068_v40 = vadd.f32 %v9551_v14, %v13161_v2  ;;  %v6284_v61 = vpop.f32.mrb[3].mxu0  ;;  %v6505_v19 = vmax.f32 %v6473_v12, 0.0 }
 0x533   : > { %v10069_v34 = vadd.f32 %v6284_v61, %v13163_v26  ;;  %v6504_v56 = vmax.f32 %v6472_v27, 0.0 }
 0x534   : > { %v6475_v37 = vadd.f32 %v10068_v40, %v13256_v4 }
 0x535   : > { %v6474_v52 = vadd.f32 %v10069_v34, %v13256_v4  ;;  %v9554_v23 = vpop.f32.mrb[4].mxu0 }
 0x536   : > { %v6507_v21 = vmax.f32 %v6475_v37, 0.0  ;;  %v10070_v51 = vadd.f32 %v9554_v23, %v13165_v48  ;;  %v6294_v18 = vpop.f32.mrb[5].mxu0 }
 0x537   : > { %v6506_v36 = vmax.f32 %v6474_v52, 0.0  ;;  %v10071_v38 = vadd.f32 %v6294_v18, %v13167_v41 }
 0x538   : > { %v6537_v2 = vmax.f32 %v6505_v19, %v6507_v21  ;;  %v6477_v26 = vadd.f32 %v10070_v51, %v13256_v4 }
 0x539   : > { %v6536_v28 = vmax.f32 %v6504_v56, %v6506_v36  ;;  %v9557_v35 = vpop.f32.mrb[6].mxu0  ;;  %v6476_v43 = vadd.f32 %v10071_v38, %v13256_v4  ;;  %v6648_v38 = vld [vmem:[#allocation13 + $0x10] sm:$0xff] }
 0x53a   : > { %6554 = vst.msk [vmem:[#allocation4 + $0x8] sm:$0xff] %vm6552_vm4, %v6537_v2  ;;  %v10072_v63 = vadd.f32 %v9557_v35, %v13169_v31  ;;  %v6304_v45 = vpop.f32.mrb[7].mxu0  ;;  %v6509_v62 = vmax.f32 %v6477_v26, 0.0  ;;  %v6649_v2 = vld [vmem:[#allocation13 + $0x18] sm:$0xff] }
 0x53b   : > { %6553 = vst.msk [vmem:[#allocation4] sm:$0xff] %vm6552_vm4, %v6536_v28  ;;  %v10073_v48 = vadd.f32 %v6304_v45, %v13171_v49  ;;  %v6508_v33 = vmax.f32 %v6476_v43, 0.0 }
 0x53c   : > { %v6479_v1 = vadd.f32 %v10072_v63, %v13256_v4 }
 0x53d   : > { %v6478_v41 = vadd.f32 %v10073_v48, %v13256_v4  ;;  %v9560_v25 = vpop.f32.mrb[8].mxu0 }
 0x53e   : > { %v6511_v6 = vmax.f32 %v6479_v1, 0.0  ;;  %v10074_v8 = vadd.f32 %v9560_v25, %v13173_v7  ;;  %v6314_v54 = vpop.f32.mrb[9].mxu0  ;;  %v9938_v1 = vpack.c.bf16 %v6649_v2, %v6648_v38 }
 0x53f   : > { %v6510_v11 = vmax.f32 %v6478_v41, 0.0  ;;  %v10075_v31 = vadd.f32 %v6314_v54, %v13175_v59 }
 0x540   : > { %v6539_v13 = vmax.f32 %v6509_v62, %v6511_v6  ;;  %v6481_v49 = vadd.f32 %v10074_v8, %v13256_v4  ;;  %v6650_v62 = vld [vmem:[#allocation13 + $0x20] sm:$0xff]  ;;  %v6651_v6 = vld [vmem:[#allocation13 + $0x28] sm:$0xff] }
 0x541   : > { %v6538_v22 = vmax.f32 %v6508_v33, %v6510_v11  ;;  %v9563_v0 = vpop.f32.mrb[10].mxu0  ;;  %v6480_v7 = vadd.f32 %v10075_v31, %v13256_v4 }
 0x542   : > { %v6569_v14 = vld [vmem:[#allocation4] ss:$2 sm:$0xff]  ;;  %v6585_v12 = vld [vmem:[#allocation4 + $0x1] ss:$2 sm:$0xff]  ;;  %6556 = vst.msk [vmem:[#allocation4 + $0x18] sm:$0xff] %vm6552_vm4, %v6539_v13  ;;  %v10076_v40 = vadd.f32 %v9563_v0, %v13177_v44  ;;  %v6324_v61 = vpop.f32.mrb[11].mxu0  ;;  %v9942_v0 = vpack.c.bf16 %v6651_v6, %v6650_v62 }
 0x543   : > { %v6600_v27 = vmax.f32 %v6569_v14, %v6585_v12  ;;  %6555 = vst.msk [vmem:[#allocation4 + $0x10] sm:$0xff] %vm6552_vm4, %v6538_v22  ;;  %v10077_v34 = vadd.f32 %v6324_v61, %v13199_v53  ;;  %v6513_v23 = vmax.f32 %v6481_v49, 0.0  ;;  %v6512_v51 = vmax.f32 %v6480_v7, 0.0  ;;  %v6652_v12 = vld [vmem:[#allocation13 + $0x30] sm:$0xff]  ;;  %v6653_v49 = vld [vmem:[#allocation13 + $0x38] sm:$0xff] }
 0x544   : > { %v6483_v59 = vadd.f32 %v10076_v40, %v13256_v4 }
 0x545   : > { %v6482_v37 = vadd.f32 %v10077_v34, %v13256_v4  ;;  %v9566_v52 = vpop.f32.mrb[12].mxu0  ;;  %6630 = vst.msk [vmem:[#allocation5 + $0x11] sm:$0xff] %vm6552_vm4, %v6600_v27 }
 0x546   : > { %v6515_v19 = vmax.f32 %v6483_v59, 0.0  ;;  %v10078_v21 = vadd.f32 %v9566_v52, %v13201_v29  ;;  %v6334_v44 = vpop.f32.mrb[13].mxu0  ;;  %v9946_v52 = vpack.c.bf16 %v6653_v49, %v6652_v12 }
 0x547   : > { %v6514_v18 = vmax.f32 %v6482_v37, 0.0  ;;  %v10079_v56 = vadd.f32 %v6334_v44, %v13203_v50  ;;  %v6939_v44 = vld [vmem:[#allocation13 + $0x88] sm:$0xff] }
 0x548   : > { %v6541_v36 = vmax.f32 %v6513_v23, %v6515_v19  ;;  %v6485_v63 = vadd.f32 %v10078_v21, %v13256_v4  ;;  %v6938_v21 = vld [vmem:[#allocation13 + $0x80] sm:$0xff] }
 0x549   : > { %v6540_v53 = vmax.f32 %v6512_v51, %v6514_v18  ;;  %v9569_v28 = vpop.f32.mrb[14].mxu0  ;;  %v6484_v48 = vadd.f32 %v10079_v56, %v13256_v4 }
 0x54a   : > { %v6571_v35 = vld [vmem:[#allocation4 + $0x10] ss:$2 sm:$0xff]  ;;  %v6587_v26 = vld [vmem:[#allocation4 + $0x11] ss:$2 sm:$0xff]  ;;  %6558 = vst.msk [vmem:[#allocation4 + $0x28] sm:$0xff] %vm6552_vm4, %v6541_v36  ;;  %v10080_v45 = vadd.f32 %v9569_v28, %v13205_v24  ;;  %v6344_v43 = vpop.f32.mrb[15].mxu0  ;;  %v13319_v28 = vpack.c.bf16 %v6939_v44, %v6938_v21 }
 0x54b   : > { %v6601_v29 = vmax.f32 %v6571_v35, %v6587_v26  ;;  %6557 = vst.msk [vmem:[#allocation4 + $0x20] sm:$0xff] %vm6552_vm4, %v6540_v53  ;;  %v10081_v50 = vadd.f32 %v6344_v43, %v13207_v3  ;;  %v6517_v24 = vmax.f32 %v6485_v63, 0.0  ;;  %v6516_v31 = vmax.f32 %v6484_v48, 0.0 }
 0x54c   : > { %v6487_v41 = vadd.f32 %v10080_v45, %v13256_v4  ;;  %v13295_v25 = vld [vmem:[#allocation5 + $0x11] sm:$0xff] }
 0x54d   : > { %v6486_v8 = vadd.f32 %v10081_v50, %v13256_v4  ;;  %v9572_v54 = vpop.f32.mrb[16].mxu0  ;;  %6631 = vst.msk [vmem:[#allocation5 + $0x21] sm:$0xff] %vm6552_vm4, %v6601_v29  ;;  %9611 = vmatmul.mubr.msk.f32.vlgmr.msra.gmra.mrb[32].mxu1 %vm6552_vm4, %v13295_v25 }
 0x54e   : > { %v6519_v33 = vmax.f32 %v6487_v41, 0.0  ;;  %v10082_v11 = vadd.f32 %v9572_v54, %v13209_v42  ;;  %v6354_v3 = vpop.f32.mrb[17].mxu0  ;;  %9937 = vmatpush3.bf16.msra.mxu1 %v13242_v15 }
 0x54f   : > { %v6518_v13 = vmax.f32 %v6486_v8, 0.0  ;;  %v10083_v22 = vadd.f32 %v6354_v3, %v13211_v20  ;;  %9939 = vmatprep.subr.bf16.mxu1 %v9938_v1 }
 0x550   : > { %v6543_v14 = vmax.f32 %v6517_v24, %v6519_v33  ;;  %v6489_v42 = vadd.f32 %v10082_v11, %v13256_v4 }
 0x551   : > { %v6542_v40 = vmax.f32 %v6516_v31, %v6518_v13  ;;  %v9575_v61 = vpop.f32.mrb[18].mxu0  ;;  %v6488_v20 = vadd.f32 %v10083_v22, %v13256_v4 }
 0x552   : > { %v6573_v27 = vld [vmem:[#allocation4 + $0x20] ss:$2 sm:$0xff]  ;;  %v6589_v7 = vld [vmem:[#allocation4 + $0x21] ss:$2 sm:$0xff]  ;;  %6560 = vst.msk [vmem:[#allocation4 + $0x38] sm:$0xff] %vm6552_vm4, %v6543_v14  ;;  %v10084_v34 = vadd.f32 %v9575_v61, %v13223_v17  ;;  %v6364_v15 = vpop.f32.mrb[19].mxu0  ;;  %9941 = vmatpush3.bf16.msra.mxu1 %v9938_v1 }
 0x553   : > { %v6602_v59 = vmax.f32 %v6573_v27, %v6589_v7  ;;  %6559 = vst.msk [vmem:[#allocation4 + $0x30] sm:$0xff] %vm6552_vm4, %v6542_v40  ;;  %v10085_v37 = vadd.f32 %v6364_v15, %v13225_v16  ;;  %9943 = vmatprep.subr.bf16.mxu1 %v9942_v0  ;;  %v6521_v18 = vmax.f32 %v6489_v42, 0.0  ;;  %v6520_v38 = vmax.f32 %v6488_v20, 0.0 }
 0x554   : > { %v6491_v23 = vadd.f32 %v10084_v34, %v13256_v4  ;;  %v13311_v19 = vld [vmem:[#allocation5 + $0x21] sm:$0xff] }
 0x555   : > { %6632 = vst.msk [vmem:[#allocation5 + $0x31] sm:$0xff] %vm6552_vm4, %v6602_v59  ;;  %v6490_v17 = vadd.f32 %v10085_v37, %v13256_v4  ;;  %v9578_v51 = vpop.f32.mrb[20].mxu0  ;;  %9613 = vmatprep.mubr.msk.f32.mxu1 %vm6552_vm4, %v13311_v19 }
 0x556   : > { %v6523_v56 = vmax.f32 %v6491_v23, 0.0  ;;  %v10086_v16 = vadd.f32 %v9578_v51, %v13228_v60  ;;  %v6374_v36 = vpop.f32.mrb[21].mxu0  ;;  %9945 = vmatpush3.bf16.msra.mxu1 %v9942_v0 }
 0x557   : > { %v6522_v2 = vmax.f32 %v6490_v17, 0.0  ;;  %v10087_v53 = vadd.f32 %v6374_v36, %v13230_v39  ;;  %9947 = vmatprep.subr.bf16.mxu1 %v9946_v52 }
 0x558   : > { %v6545_v35 = vmax.f32 %v6521_v18, %v6523_v56  ;;  %v6493_v29 = vadd.f32 %v10086_v16, %v13256_v4 }
 0x559   : > { %v6544_v26 = vmax.f32 %v6520_v38, %v6522_v2  ;;  %v9581_v63 = vpop.f32.mrb[22].mxu0  ;;  %v6492_v39 = vadd.f32 %v10087_v53, %v13256_v4 }
 0x55a   : > { %v6575_v45 = vld [vmem:[#allocation4 + $0x30] ss:$2 sm:$0xff]  ;;  %v6591_v43 = vld [vmem:[#allocation4 + $0x31] ss:$2 sm:$0xff]  ;;  %6562 = vst.msk [vmem:[#allocation4 + $0x48] sm:$0xff] %vm6552_vm4, %v6545_v35  ;;  %v10088_v60 = vadd.f32 %v9581_v63, %v13232_v47  ;;  %v6384_v48 = vpop.f32.mrb[23].mxu0  ;;  %9949 = vmatpush3.bf16.msra.mxu1 %v9946_v52 }
 0x55b   : > { %v6603_v50 = vmax.f32 %v6575_v45, %v6591_v43  ;;  %6561 = vst.msk [vmem:[#allocation4 + $0x40] sm:$0xff] %vm6552_vm4, %v6544_v26  ;;  %v10089_v1 = vadd.f32 %v6384_v48, %v13234_v10  ;;  %9951 = vmatprep.subr.bf16.mxu1 %v13319_v28  ;;  %v6525_v8 = vmax.f32 %v6493_v29, 0.0  ;;  %v6524_v10 = vmax.f32 %v6492_v39, 0.0 }
 0x55c   : > { %v6495_v41 = vadd.f32 %v10088_v60, %v13256_v4  ;;  %v13329_v62 = vld [vmem:[#allocation5 + $0x31] sm:$0xff] }
 0x55d   : > { %6633 = vst.msk [vmem:[#allocation5 + $0x41] sm:$0xff] %vm6552_vm4, %v6603_v50  ;;  %v6494_v6 = vadd.f32 %v10089_v1, %v13256_v4  ;;  %v9584_v47 = vpop.f32.mrb[24].mxu0  ;;  %9614 = vmatmul.mubr.msk.f32.gmra.mrb[34].mxu1 %vm6552_vm4, %v13329_v62  ;;  %v6638_v1 = vld [vmem:[#allocation5] sm:$0xff] }
 0x55e   : > { %v6527_v54 = vmax.f32 %v6495_v41, 0.0  ;;  %v10090_v24 = vadd.f32 %v9584_v47, %v13236_v5  ;;  %v6394_v33 = vpop.f32.mrb[25].mxu0  ;;  %v6941_v47 = vld [vmem:[#allocation13 + $0x98] sm:$0xff] }
 0x55f   : > { %v6526_v11 = vmax.f32 %v6494_v6, 0.0  ;;  %v10091_v3 = vadd.f32 %v6394_v33, %v13238_v57  ;;  %v6940_v6 = vld [vmem:[#allocation13 + $0x90] sm:$0xff]  ;;  %v6943_v33 = vld [vmem:[#allocation13 + $0xa8] sm:$0xff] }
 0x560   : > { %v6547_v31 = vmax.f32 %v6525_v8, %v6527_v54  ;;  %v6497_v12 = vadd.f32 %v10090_v24, %v13256_v4  ;;  %v9954_v8 = vpack.c.bf16 %v6941_v47, %v6940_v6  ;;  %v13378_v54 = vld [vmem:[#allocation5 + $0x10] sm:$0xff]  ;;  %v7406_v47 = vld [vmem:[#allocation13 + $0x170] sm:$0xff] }
 0x561   : > { %v6546_v13 = vmax.f32 %v6524_v10, %v6526_v11  ;;  %v9587_v22 = vpop.f32.mrb[26].mxu0  ;;  %v6496_v5 = vadd.f32 %v10091_v3, %v13256_v4  ;;  %v6942_v24 = vld [vmem:[#allocation13 + $0xa0] sm:$0xff]  ;;  %v13382_v10 = vld [vmem:[#allocation5 + $0x20] sm:$0xff] }
 0x562   : > { %v6577_v0 = vld [vmem:[#allocation4 + $0x40] ss:$2 sm:$0xff]  ;;  %v6593_v14 = vld [vmem:[#allocation4 + $0x41] ss:$2 sm:$0xff]  ;;  %6564 = vst.msk [vmem:[#allocation4 + $0x58] sm:$0xff] %vm6552_vm4, %v6547_v31  ;;  %v10092_v49 = vadd.f32 %v9587_v22, %v13240_v55  ;;  %v6404_v40 = vpop.f32.mrb[27].mxu0  ;;  %v9958_v11 = vpack.c.bf16 %v6943_v33, %v6942_v24 }
 0x563   : > { %v6604_v61 = vmax.f32 %v6577_v0, %v6593_v14  ;;  %6563 = vst.msk [vmem:[#allocation4 + $0x50] sm:$0xff] %vm6552_vm4, %v6546_v13  ;;  %v10093_v27 = vadd.f32 %v6404_v40, %v13244_v58  ;;  %v6529_v55 = vmax.f32 %v6497_v12, 0.0  ;;  %v6528_v37 = vmax.f32 %v6496_v5, 0.0  ;;  %v13387_v3 = vld [vmem:[#allocation5 + $0x30] sm:$0xff]  ;;  %v6944_v31 = vld [vmem:[#allocation13 + $0xb0] sm:$0xff]  ;;  %v6945_v13 = vld [vmem:[#allocation13 + $0xb8] sm:$0xff] }
 0x564   : > { %v6499_v57 = vadd.f32 %v10092_v49, %v13256_v4  ;;  %v13344_v7 = vld [vmem:[#allocation5 + $0x41] sm:$0xff]  ;;  %v7092_v14 = vld [vmem:[#allocation13 + $0xc0] sm:$0xff]  ;;  %v7093_v12 = vld [vmem:[#allocation13 + $0xc8] sm:$0xff] }
 0x565   : > { %6634 = vst.msk [vmem:[#allocation5 + $0x51] sm:$0xff] %vm6552_vm4, %v6604_v61  ;;  %v6498_v42 = vadd.f32 %v10093_v27, %v13256_v4  ;;  %v9590_v34 = vpop.f32.mrb[28].mxu0  ;;  %9616 = vmatprep.mubr.msk.f32.mxu1 %vm6552_vm4, %v13344_v7  ;;  %v13391_v22 = vld [vmem:[#allocation5 + $0x40] sm:$0xff]  ;;  %v9966_v61 = vpack.c.bf16 %v7093_v12, %v7092_v14  ;;  %v7556_v24 = vld [vmem:[#allocation13 + $0x188] sm:$0xff]  ;;  %v7559_v14 = vld [vmem:[#allocation13 + $0x1a0] sm:$0xff] }
 0x566   : > { %v6531_v15 = vmax.f32 %v6499_v57, 0.0  ;;  %v10094_v59 = vadd.f32 %v9590_v34, %v13247_v30  ;;  %v6414_v20 = vpop.f32.mrb[29].mxu0  ;;  %v6929_v40 = vld [vmem:[#allocation5 + $0x2] sm:$0xff]  ;;  %v13408_v34 = vld [vmem:[#allocation5 + $0x12] sm:$0xff] }
 0x567   : > { %v6530_v52 = vmax.f32 %v6498_v42, 0.0  ;;  %v10095_v58 = vadd.f32 %v6414_v20, %v13249_v9  ;;  %v7094_v27 = vld [vmem:[#allocation13 + $0xd0] sm:$0xff]  ;;  %v7095_v57 = vld [vmem:[#allocation13 + $0xd8] sm:$0xff]  ;;  %v7560_v12 = vld [vmem:[#allocation13 + $0x1a8] sm:$0xff] }
 0x568   : > { %v6549_v23 = vmax.f32 %v6529_v55, %v6531_v15  ;;  %v6501_v18 = vadd.f32 %v10094_v59, %v13256_v4  ;;  %v9970_v42 = vpack.c.bf16 %v7095_v57, %v7094_v27  ;;  %v7096_v55 = vld [vmem:[#allocation13 + $0xe0] sm:$0xff]  ;;  %v7097_v15 = vld [vmem:[#allocation13 + $0xe8] sm:$0xff]  ;;  %v13412_v59 = vld [vmem:[#allocation5 + $0x22] sm:$0xff] }
 0x569   : > { %v6548_v21 = vmax.f32 %v6528_v37, %v6530_v52  ;;  %v9593_v44 = vpop.f32.mrb[30].mxu0  ;;  %v6500_v30 = vadd.f32 %v10095_v58, %v13256_v4  ;;  %v9974_v20 = vpack.c.bf16 %v7097_v15, %v7096_v55  ;;  %v13416_v37 = vld [vmem:[#allocation5 + $0x32] sm:$0xff]  ;;  %v7098_v52 = vld [vmem:[#allocation13 + $0xf0] sm:$0xff]  ;;  %v7099_v58 = vld [vmem:[#allocation13 + $0xf8] sm:$0xff] }
 0x56a   : > { %v6579_v17 = vld [vmem:[#allocation4 + $0x50] ss:$2 sm:$0xff]  ;;  %v6595_v51 = vld [vmem:[#allocation4 + $0x51] ss:$2 sm:$0xff]  ;;  %6566 = vst.msk [vmem:[#allocation4 + $0x68] sm:$0xff] %vm6552_vm4, %v6549_v23  ;;  %v10096_v56 = vadd.f32 %v9593_v44, %v13251_v32  ;;  %v6424_v16 = vpop.f32.mrb[31].mxu0 }
 0x56b   : > { %v6605_v36 = vmax.f32 %v6579_v17, %v6595_v51  ;;  %6565 = vst.msk [vmem:[#allocation4 + $0x60] sm:$0xff] %vm6552_vm4, %v6548_v21  ;;  %v10097_v38 = vadd.f32 %v6424_v16, %v13253_v46  ;;  %v6533_v32 = vmax.f32 %v6501_v18, 0.0  ;;  %v6532_v26 = vmax.f32 %v6500_v30, 0.0  ;;  %v13420_v23 = vld [vmem:[#allocation5 + $0x42] sm:$0xff]  ;;  %v7246_v17 = vld [vmem:[#allocation13 + $0x100] sm:$0xff]  ;;  %v7247_v51 = vld [vmem:[#allocation13 + $0x108] sm:$0xff] }
 0x56c   : > { %v6503_v9 = vadd.f32 %v10096_v56, %v13256_v4  ;;  %v13359_v2 = vld [vmem:[#allocation5 + $0x51] sm:$0xff]  ;;  %v9978_v21 = vpack.c.bf16 %v7099_v58, %v7098_v52  ;;  %v9982_v56 = vpack.c.bf16 %v7247_v51, %v7246_v17  ;;  %v7249_v30 = vld [vmem:[#allocation13 + $0x118] sm:$0xff] }
 0x56d   : > { %6635 = vst.msk [vmem:[#allocation5 + $0x61] sm:$0xff] %vm6552_vm4, %v6605_v36  ;;  %v6502_v53 = vadd.f32 %v10097_v38, %v13256_v4  ;;  %9617 = vmatmul.mubr.msk.f32.gmra.mrb[36].mxu1 %vm6552_vm4, %v13359_v2  ;;  %v13395_v0 = vld [vmem:[#allocation5 + $0x50] sm:$0xff]  ;;  %v7248_v36 = vld [vmem:[#allocation13 + $0x110] sm:$0xff]  ;;  %v7562_v27 = vld [vmem:[#allocation13 + $0x1b8] sm:$0xff] }
 0x56e   : > { %v6535_v35 = vmax.f32 %v6503_v9, 0.0  ;;  %v13424_v44 = vld [vmem:[#allocation5 + $0x52] sm:$0xff]  ;;  %v9986_v38 = vpack.c.bf16 %v7249_v30, %v7248_v36  ;;  %v7712_v52 = vld [vmem:[#allocation13 + $0x1d8] sm:$0xff] }
 0x56f   : > { %v6534_v63 = vmax.f32 %v6502_v53, 0.0  ;;  %v7250_v9 = vld [vmem:[#allocation13 + $0x120] sm:$0xff]  ;;  %v7251_v53 = vld [vmem:[#allocation13 + $0x128] sm:$0xff]  ;;  %v7716_v36 = vld [vmem:[#allocation13 + $0x1f8] sm:$0xff] }
 0x570   : > { %v6551_v45 = vmax.f32 %v6533_v32, %v6535_v35  ;;  %v9990_v32 = vpack.c.bf16 %v7251_v53, %v7250_v9  ;;  %v7252_v35 = vld [vmem:[#allocation13 + $0x130] sm:$0xff]  ;;  %v7714_v17 = vld [vmem:[#allocation13 + $0x1e8] sm:$0xff]  ;;  %v7863_v30 = vld [vmem:[#allocation13 + $0x200] sm:$0xff] }
 0x571   : > { %v6550_v43 = vmax.f32 %v6532_v26, %v6534_v63  ;;  %v7253_v26 = vld [vmem:[#allocation13 + $0x138] sm:$0xff]  ;;  %v7865_v9 = vld [vmem:[#allocation13 + $0x210] sm:$0xff]  ;;  %v7867_v53 = vld [vmem:[#allocation13 + $0x220] sm:$0xff] }
 0x572   : > { %v6581_v29 = vld [vmem:[#allocation4 + $0x60] ss:$2 sm:$0xff]  ;;  %v6597_v60 = vld [vmem:[#allocation4 + $0x61] ss:$2 sm:$0xff]  ;;  %6568 = vst.msk [vmem:[#allocation4 + $0x78] sm:$0xff] %vm6552_vm4, %v6551_v45  ;;  %v9994_v63 = vpack.c.bf16 %v7253_v26, %v7252_v35 }
 0x573   : > { %v6606_v46 = vmax.f32 %v6581_v29, %v6597_v60  ;;  %6567 = vst.msk [vmem:[#allocation4 + $0x70] sm:$0xff] %vm6552_vm4, %v6550_v43  ;;  %v7400_v45 = vld [vmem:[#allocation13 + $0x140] sm:$0xff]  ;;  %v7401_v43 = vld [vmem:[#allocation13 + $0x148] sm:$0xff]  ;;  %v7869_v35 = vld [vmem:[#allocation13 + $0x230] sm:$0xff] }
 0x574   : > { %v13367_v48 = vld [vmem:[#allocation5 + $0x61] sm:$0xff]  ;;  %v9998_v29 = vpack.c.bf16 %v7401_v43, %v7400_v45 }
 0x575   : > { %6636 = vst.msk [vmem:[#allocation5 + $0x71] sm:$0xff] %vm6552_vm4, %v6606_v46  ;;  %9619 = vmatprep.mubr.msk.f32.mxu1 %vm6552_vm4, %v13367_v48  ;;  %v13399_v49 = vld [vmem:[#allocation5 + $0x60] sm:$0xff] }
 0x576   : > { %v13428_v18 = vld [vmem:[#allocation5 + $0x62] sm:$0xff] }
 0x577   : > { %v7402_v46 = vld [vmem:[#allocation13 + $0x150] sm:$0xff]  ;;  %v7870_v26 = vld [vmem:[#allocation13 + $0x238] sm:$0xff] }
 0x57a   : > { %v6583_v4 = vld [vmem:[#allocation4 + $0x70] ss:$2 sm:$0xff]  ;;  %v6599_v50 = vld [vmem:[#allocation4 + $0x71] ss:$2 sm:$0xff] }
 0x57b   : > { %v6607_v39 = vmax.f32 %v6583_v4, %v6599_v50  ;;  %v7403_v4 = vld [vmem:[#allocation13 + $0x158] sm:$0xff] }
 0x57c   : > { %v13372_v41 = vld [vmem:[#allocation5 + $0x71] sm:$0xff]  ;;  %v10002_v50 = vpack.c.bf16 %v7403_v4, %v7402_v46 }
 0x57d   : > { %6637 = vst.msk [vmem:[#allocation5 + $0x81] sm:$0xff] %vm6552_vm4, %v6607_v39  ;;  %9620 = vmatmul.mubr.msk.f32.gmra.mrb[38].mxu1 %vm6552_vm4, %v13372_v41  ;;  %v13403_v5 = vld [vmem:[#allocation5 + $0x70] sm:$0xff] }
 0x57e   : > { %9638 = vmatprep.mubr.msk.f32.mxu1 %vm6552_vm4, %v6638_v1  ;;  %v13432_v16 = vld [vmem:[#allocation5 + $0x72] sm:$0xff] }
 0x57f   : > { %v7404_v39 = vld [vmem:[#allocation13 + $0x160] sm:$0xff]  ;;  %v7405_v1 = vld [vmem:[#allocation13 + $0x168] sm:$0xff] }
 0x580   : > { %v10006_v6 = vpack.c.bf16 %v7405_v1, %v7404_v39 }
 0x581   : > { %9639 = vmatmul.mubr.msk.f32.vlgmr.msra.gmra.mrb[32].mxu1 %vm6552_vm4, %v13378_v54 }
 0x582   : > { %9953 = vmatpush3.bf16.msra.mxu1 %v13319_v28  ;;  %9641 = vmatprep.mubr.msk.f32.mxu1 %vm6552_vm4, %v13382_v10  ;;  %v9962_v28 = vpack.c.bf16 %v6945_v13, %v6944_v31  ;;  %v7557_v31 = vld [vmem:[#allocation13 + $0x190] sm:$0xff]  ;;  %v7558_v13 = vld [vmem:[#allocation13 + $0x198] sm:$0xff] }
 0x583   : > { %9955 = vmatprep.subr.bf16.mxu1 %v9954_v8 }
 0x584   : > { %v13450_v60 = vld [vmem:[#allocation5 + $0x80] sm:$0xff] }
 0x585   : > { %9642 = vmatmul.mubr.msk.f32.gmra.mrb[34].mxu1 %vm6552_vm4, %v13387_v3  ;;  %v13486_v15 = vld [vmem:[#allocation5 + $0x82] sm:$0xff] }
 0x586   : > { %9957 = vmatpush3.bf16.msra.mxu1 %v9954_v8  ;;  %9644 = vmatprep.mubr.msk.f32.mxu1 %vm6552_vm4, %v13391_v22  ;;  %v7407_v8 = vld [vmem:[#allocation13 + $0x178] sm:$0xff] }
 0x587   : > { %9959 = vmatprep.subr.bf16.mxu1 %v9958_v11 }
 0x589   : > { %9645 = vmatmul.mubr.msk.f32.gmra.mrb[36].mxu1 %vm6552_vm4, %v13395_v0 }
 0x58a   : > { %9961 = vmatpush3.bf16.msra.mxu1 %v9958_v11  ;;  %9647 = vmatprep.mubr.msk.f32.mxu1 %vm6552_vm4, %v13399_v49  ;;  %v13468_v11 = vld [vmem:[#allocation5 + $0x81] sm:$0xff] }
 0x58b   : > { %9963 = vmatprep.subr.bf16.mxu1 %v9962_v28 }
 0x58d   : > { %9648 = vmatmul.mubr.msk.f32.gmra.mrb[38].mxu1 %vm6552_vm4, %v13403_v5 }
 0x58e   : > { %9965 = vmatpush3.bf16.msra.mxu1 %v9962_v28  ;;  %9666 = vmatprep.mubr.msk.f32.mxu1 %vm6552_vm4, %v6929_v40  ;;  %v10018_v28 = vpack.c.bf16 %v7558_v13, %v7557_v31  ;;  %v10022_v40 = vpack.c.bf16 %v7560_v12, %v7559_v14 }
 0x58f   : > { %9967 = vmatprep.subr.bf16.mxu1 %v9966_v61 }
 0x591   : > { %9667 = vmatmul.mubr.msk.f32.vlgmr.msra.gmra.mrb[32].mxu1 %vm6552_vm4, %v13408_v34 }
 0x592   : > { %9969 = vmatpush3.bf16.msra.mxu1 %v9966_v61  ;;  %9669 = vmatprep.mubr.msk.f32.mxu1 %vm6552_vm4, %v13412_v59  ;;  %v7561_v61 = vld [vmem:[#allocation13 + $0x1b0] sm:$0xff] }
 0x593   : > { %9971 = vmatprep.subr.bf16.mxu1 %v9970_v42  ;;  %v10026_v57 = vpack.c.bf16 %v7562_v27, %v7561_v61 }
 0x595   : > { %9670 = vmatmul.mubr.msk.f32.gmra.mrb[34].mxu1 %vm6552_vm4, %v13416_v37 }
 0x596   : > { %9973 = vmatpush3.bf16.msra.mxu1 %v9970_v42  ;;  %9672 = vmatprep.mubr.msk.f32.mxu1 %vm6552_vm4, %v13420_v23  ;;  %v7709_v42 = vld [vmem:[#allocation13 + $0x1c0] sm:$0xff] }
 0x597   : > { %9975 = vmatprep.subr.bf16.mxu1 %v9974_v20 }
 0x599   : > { %9673 = vmatmul.mubr.msk.f32.gmra.mrb[36].mxu1 %vm6552_vm4, %v13424_v44 }
 0x59a   : > { %9977 = vmatpush3.bf16.msra.mxu1 %v9974_v20  ;;  %9675 = vmatprep.mubr.msk.f32.mxu1 %vm6552_vm4, %v13428_v18  ;;  %v7711_v20 = vld [vmem:[#allocation13 + $0x1d0] sm:$0xff] }
 0x59b   : > { %9979 = vmatprep.subr.bf16.mxu1 %v9978_v21  ;;  %v10034_v58 = vpack.c.bf16 %v7712_v52, %v7711_v20 }
 0x59d   : > { %9676 = vmatmul.mubr.msk.f32.gmra.mrb[38].mxu1 %vm6552_vm4, %v13432_v16 }
 0x59e   : > { %9981 = vmatpush3.bf16.msra.mxu1 %v9978_v21  ;;  %9694 = vmatprep.mubr.msk.f32.mxu1 %vm6552_vm4, %v13378_v54  ;;  %v7555_v54 = vld [vmem:[#allocation13 + $0x180] sm:$0xff] }
 0x59f   : > { %9983 = vmatprep.subr.bf16.mxu1 %v9982_v56  ;;  %v10014_v33 = vpack.c.bf16 %v7556_v24, %v7555_v54  ;;  %v7713_v21 = vld [vmem:[#allocation13 + $0x1e0] sm:$0xff] }
 0x5a0   : > { %v10038_v51 = vpack.c.bf16 %v7714_v17, %v7713_v21 }
 0x5a1   : > { %9695 = vmatmul.mubr.msk.f32.vlgmr.msra.gmra.mrb[32].mxu1 %vm6552_vm4, %v13382_v10 }
 0x5a2   : > { %9985 = vmatpush3.bf16.msra.mxu1 %v9982_v56  ;;  %9697 = vmatprep.mubr.msk.f32.mxu1 %vm6552_vm4, %v13387_v3  ;;  %v7715_v56 = vld [vmem:[#allocation13 + $0x1f0] sm:$0xff] }
 0x5a3   : > { %9987 = vmatprep.subr.bf16.mxu1 %v9986_v38 }
 0x5a5   : > { %9698 = vmatmul.mubr.msk.f32.gmra.mrb[34].mxu1 %vm6552_vm4, %v13391_v22 }
 0x5a6   : > { %9989 = vmatpush3.bf16.msra.mxu1 %v9986_v38  ;;  %9700 = vmatprep.mubr.msk.f32.mxu1 %vm6552_vm4, %v13395_v0  ;;  %v7864_v38 = vld [vmem:[#allocation13 + $0x208] sm:$0xff] }
 0x5a7   : > { %9991 = vmatprep.subr.bf16.mxu1 %v9990_v32 }
 0x5a9   : > { %9701 = vmatmul.mubr.msk.f32.gmra.mrb[36].mxu1 %vm6552_vm4, %v13399_v49 }
 0x5aa   : > { %9993 = vmatpush3.bf16.msra.mxu1 %v9990_v32  ;;  %9703 = vmatprep.mubr.msk.f32.mxu1 %vm6552_vm4, %v13403_v5  ;;  %v7868_v32 = vld [vmem:[#allocation13 + $0x228] sm:$0xff] }
 0x5ab   : > { %9995 = vmatprep.subr.bf16.mxu1 %v9994_v63 }
 0x5ad   : > { %9704 = vmatmul.mubr.msk.f32.gmra.mrb[38].mxu1 %vm6552_vm4, %v13450_v60 }
 0x5ae   : > { %9997 = vmatpush3.bf16.msra.mxu1 %v9994_v63  ;;  %9722 = vmatprep.mubr.msk.f32.mxu1 %vm6552_vm4, %v13295_v25  ;;  %v10010_v25 = vpack.c.bf16 %v7407_v8, %v7406_v47 }
 0x5af   : > { %9999 = vmatprep.subr.bf16.mxu1 %v9998_v29 }
 0x5b1   : > { %9723 = vmatmul.mubr.msk.f32.vlgmr.msra.gmra.mrb[32].mxu1 %vm6552_vm4, %v13311_v19 }
 0x5b2   : > { %10001 = vmatpush3.bf16.msra.mxu1 %v9998_v29  ;;  %9725 = vmatprep.mubr.msk.f32.mxu1 %vm6552_vm4, %v13329_v62 }
 0x5b3   : > { %10003 = vmatprep.subr.bf16.mxu1 %v10002_v50 }
 0x5b5   : > { %9726 = vmatmul.mubr.msk.f32.gmra.mrb[34].mxu1 %vm6552_vm4, %v13344_v7 }
 0x5b6   : > { %10005 = vmatpush3.bf16.msra.mxu1 %v10002_v50  ;;  %9728 = vmatprep.mubr.msk.f32.mxu1 %vm6552_vm4, %v13359_v2 }
 0x5b7   : > { %10007 = vmatprep.subr.bf16.mxu1 %v10006_v6 }
 0x5b9   : > { %9729 = vmatmul.mubr.msk.f32.gmra.mrb[36].mxu1 %vm6552_vm4, %v13367_v48 }
 0x5ba   : > { %10009 = vmatpush3.bf16.msra.mxu1 %v10006_v6  ;;  %9731 = vmatprep.mubr.msk.f32.mxu1 %vm6552_vm4, %v13372_v41 }
 0x5bb   : > { %10011 = vmatprep.subr.bf16.mxu1 %v10010_v25 }
 0x5bd   : > { %9732 = vmatmul.mubr.msk.f32.gmra.mrb[38].mxu1 %vm6552_vm4, %v13468_v11 }
 0x5be   : > { %10013 = vmatpush3.bf16.msra.mxu1 %v10010_v25  ;;  %9750 = vmatprep.mubr.msk.f32.mxu1 %vm6552_vm4, %v13408_v34  ;;  %v7710_v34 = vld [vmem:[#allocation13 + $0x1c8] sm:$0xff] }
 0x5bf   : > { %10015 = vmatprep.subr.bf16.mxu1 %v10014_v33  ;;  %v10030_v55 = vpack.c.bf16 %v7710_v34, %v7709_v42 }
 0x5c1   : > { %9751 = vmatmul.mubr.msk.f32.vlgmr.msra.gmra.mrb[32].mxu1 %vm6552_vm4, %v13412_v59 }
 0x5c2   : > { %10017 = vmatpush3.bf16.msra.mxu1 %v10014_v33  ;;  %9753 = vmatprep.mubr.msk.f32.mxu1 %vm6552_vm4, %v13416_v37 }
 0x5c3   : > { %10019 = vmatprep.subr.bf16.mxu1 %v10018_v28 }
 0x5c5   : > { %9754 = vmatmul.mubr.msk.f32.gmra.mrb[34].mxu1 %vm6552_vm4, %v13420_v23 }
 0x5c6   : > { %10021 = vmatpush3.bf16.msra.mxu1 %v10018_v28  ;;  %9756 = vmatprep.mubr.msk.f32.mxu1 %vm6552_vm4, %v13424_v44 }
 0x5c7   : > { %10023 = vmatprep.subr.bf16.mxu1 %v10022_v40 }
 0x5c9   : > { %9757 = vmatmul.mubr.msk.f32.gmra.mrb[36].mxu1 %vm6552_vm4, %v13428_v18 }
 0x5ca   : > { %10025 = vmatpush3.bf16.msra.mxu1 %v10022_v40  ;;  %9759 = vmatprep.mubr.msk.f32.mxu1 %vm6552_vm4, %v13432_v16 }
 0x5cb   : > { %10027 = vmatprep.subr.bf16.mxu1 %v10026_v57 }
 0x5cd   : > { %9760 = vmatmul.mubr.msk.f32.gmra.mrb[38].mxu1 %vm6552_vm4, %v13486_v15 }
 0x5ce   : > { %10029 = vmatpush3.bf16.msra.mxu1 %v10026_v57  ;;  %9778 = vmatprep.mubr.msk.f32.mxu1 %vm6552_vm4, %v13382_v10  ;;  %v10042_v10 = vpack.c.bf16 %v7716_v36, %v7715_v56 }
 0x5cf   : > { %10031 = vmatprep.subr.bf16.mxu1 %v10030_v55 }
 0x5d1   : > { %9779 = vmatmul.mubr.msk.f32.vlgmr.msra.gmra.mrb[32].mxu1 %vm6552_vm4, %v13387_v3  ;;  %v7553_v3 = vld [vmem:[#allocation5 + $0x90] sm:$0xff] }
 0x5d2   : > { %10033 = vmatpush3.bf16.msra.mxu1 %v10030_v55  ;;  %9781 = vmatprep.mubr.msk.f32.mxu1 %vm6552_vm4, %v13391_v22  ;;  %v10046_v22 = vpack.c.bf16 %v7864_v38, %v7863_v30 }
 0x5d3   : > { %10035 = vmatprep.subr.bf16.mxu1 %v10034_v58 }
 0x5d5   : > { %9782 = vmatmul.mubr.msk.f32.gmra.mrb[34].mxu1 %vm6552_vm4, %v13395_v0  ;;  %v7866_v0 = vld [vmem:[#allocation13 + $0x218] sm:$0xff] }
 0x5d6   : > { %10037 = vmatpush3.bf16.msra.mxu1 %v10034_v58  ;;  %9784 = vmatprep.mubr.msk.f32.mxu1 %vm6552_vm4, %v13399_v49  ;;  %v10050_v49 = vpack.c.bf16 %v7866_v0, %v7865_v9 }
 0x5d7   : > { %10039 = vmatprep.subr.bf16.mxu1 %v10038_v51 }
 0x5d9   : > { %9785 = vmatmul.mubr.msk.f32.gmra.mrb[36].mxu1 %vm6552_vm4, %v13403_v5  ;;  %v10054_v5 = vpack.c.bf16 %v7868_v32, %v7867_v53 }
 0x5da   : > { %10041 = vmatpush3.bf16.msra.mxu1 %v10038_v51  ;;  %9787 = vmatprep.mubr.msk.f32.mxu1 %vm6552_vm4, %v13450_v60 }
 0x5db   : > { %10043 = vmatprep.subr.bf16.mxu1 %v10042_v10 }
 0x5dd   : > { %9788 = vmatmul.mubr.msk.f32.gmra.mrb[38].mxu1 %vm6552_vm4, %v7553_v3 }
 0x5de   : > { %10045 = vmatpush3.bf16.msra.mxu1 %v10042_v10  ;;  %9806 = vmatprep.mubr.msk.f32.mxu1 %vm6552_vm4, %v13311_v19  ;;  %v10058_v19 = vpack.c.bf16 %v7870_v26, %v7869_v35 }
 0x5df   : > { %10047 = vmatprep.subr.bf16.mxu1 %v10046_v22 }
 0x5e1   : > { %9807 = vmatmul.mubr.msk.f32.vlgmr.msra.gmra.mrb[32].mxu1 %vm6552_vm4, %v13329_v62  ;;  %v7707_v62 = vld [vmem:[#allocation5 + $0x91] sm:$0xff] }
 0x5e2   : > { %10049 = vmatpush3.bf16.msra.mxu1 %v10046_v22  ;;  %9809 = vmatprep.mubr.msk.f32.mxu1 %vm6552_vm4, %v13344_v7  ;;  %v7861_v7 = vld [vmem:[#allocation5 + $0x92] sm:$0xff] }
 0x5e3   : > { %10051 = vmatprep.subr.bf16.mxu1 %v10050_v49 }
 0x5e5   : > { %9810 = vmatmul.mubr.msk.f32.gmra.mrb[34].mxu1 %vm6552_vm4, %v13359_v2  ;;  %v8579_v2 = vld [vmem:[#allocation14] ss:$0 sm:$0xff] }
 0x5e6   : > { %10053 = vmatpush3.bf16.msra.mxu1 %v10050_v49  ;;  %9812 = vmatprep.mubr.msk.f32.mxu1 %vm6552_vm4, %v13367_v48 }
 0x5e7   : > { %10055 = vmatprep.subr.bf16.mxu1 %v10054_v5 }
 0x5e9   : > { %9813 = vmatmul.mubr.msk.f32.gmra.mrb[36].mxu1 %vm6552_vm4, %v13372_v41 }
 0x5ea   : > { %10057 = vmatpush3.bf16.msra.mxu1 %v10054_v5  ;;  %9815 = vmatprep.mubr.msk.f32.mxu1 %vm6552_vm4, %v13468_v11 }
 0x5eb   : > { %10059 = vmatprep.subr.bf16.mxu1 %v10058_v19 }
 0x5ed   : > { %9816 = vmatmul.mubr.msk.f32.gmra.mrb[38].mxu1 %vm6552_vm4, %v7707_v62 }
 0x5ee   : > { %10061 = vmatpush3.bf16.msra.mxu1 %v10058_v19  ;;  %9834 = vmatprep.mubr.msk.f32.mxu1 %vm6552_vm4, %v13412_v59 }
 0x5f1   : > { %9835 = vmatmul.mubr.msk.f32.vlgmr.msra.gmra.mrb[32].mxu1 %vm6552_vm4, %v13416_v37 }
 0x5f2   : > { %9837 = vmatprep.mubr.msk.f32.mxu1 %vm6552_vm4, %v13420_v23 }
 0x5f5   : > { %9838 = vmatmul.mubr.msk.f32.gmra.mrb[34].mxu1 %vm6552_vm4, %v13424_v44 }
 0x5f6   : > { %9840 = vmatprep.mubr.msk.f32.mxu1 %vm6552_vm4, %v13428_v18 }
 0x5f9   : > { %9841 = vmatmul.mubr.msk.f32.gmra.mrb[36].mxu1 %vm6552_vm4, %v13432_v16 }
 0x5fa   : > { %9843 = vmatprep.mubr.msk.f32.mxu1 %vm6552_vm4, %v13486_v15 }
 0x5fd   : > { %9844 = vmatmul.mubr.msk.f32.gmra.mrb[38].mxu1 %vm6552_vm4, %v7861_v7 }
 0x6c4   : > { %v9836_v48 = vpop.f32.mrb[32].mxu1 }
 0x6c5   : > { %v8016_v41 = vadd.f32 %v9836_v48, %v8579_v2  ;;  %v7961_v59 = vpop.f32.mrb[33].mxu1 }
 0x6c6   : > { %v8015_v37 = vadd.f32 %v8579_v2, %v7961_v59 }
 0x6c7   : > { %v8024_v23 = vmax.f32 %v8016_v41, 0.0 }
 0x6c8   : > { %v8023_v44 = vmax.f32 %v8015_v37, 0.0  ;;  %v9839_v18 = vpop.f32.mrb[34].mxu1 }
 0x6c9   : > { %v8018_v16 = vadd.f32 %v9839_v18, %v8579_v2  ;;  %v7971_v63 = vpop.f32.mrb[35].mxu1 }
 0x6ca   : > { %v8602_v45 = vpack.c.bf16 %v8024_v23, %v8023_v44  ;;  %v8017_v43 = vadd.f32 %v8579_v2, %v7971_v63 }
 0x6cb   : > { %v8026_v29 = vmax.f32 %v8018_v16, 0.0 }
 0x6cc   : > { %8603 = vst [vmem:[%s360_s29] sm:$0xff] %v8602_v45   ;;  %v8025_v60 = vmax.f32 %v8017_v43, 0.0  ;;  %v9842_v46 = vpop.f32.mrb[36].mxu1 }
 0x6cd   : > { %v8020_v4 = vadd.f32 %v9842_v46, %v8579_v2  ;;  %v7981_v50 = vpop.f32.mrb[37].mxu1 }
 0x6ce   : > { %v8607_v39 = vpack.c.bf16 %v8026_v29, %v8025_v60  ;;  %v8019_v1 = vadd.f32 %v8579_v2, %v7981_v50 }
 0x6cf   : > { %v8028_v6 = vmax.f32 %v8020_v4, 0.0 }
 0x6d0   : > { %8619 = vst [vmem:[%s360_s29 + $0x8] sm:$0xff] %v8607_v39   ;;  %v8027_v47 = vmax.f32 %v8019_v1, 0.0  ;;  %v9845_v8 = vpop.f32.mrb[38].mxu1 }
 0x6d1   : > { %v8022_v25 = vadd.f32 %v9845_v8, %v8579_v2  ;;  %v7991_v54 = vpop.f32.mrb[39].mxu1 }
 0x6d2   : > { %v8612_v24 = vpack.c.bf16 %v8028_v6, %v8027_v47  ;;  %v8021_v33 = vadd.f32 %v8579_v2, %v7991_v54 }
 0x6d3   : > { %v8030_v11 = vmax.f32 %v8022_v25, 0.0 }
 0x6d4   : > { %8620 = vst [vmem:[%s360_s29 + $0x10] sm:$0xff] %v8612_v24   ;;  %v8029_v31 = vmax.f32 %v8021_v33, 0.0 }
 0x6d6   : > { %v8617_v13 = vpack.c.bf16 %v8030_v11, %v8029_v31 }
 0x6d8   : > { %8621 = vst [vmem:[%s360_s29 + $0x18] sm:$0xff] %v8617_v13  }
 0x6d9 PF: > { %s21_s24 = sadd.s32 1, %s10673_s24  }
 0x6da   : > { %p18_p10 = scmp.ge.s32.totalorder %s21_s24, 4  }
 0x6dc   :  { %20 = sbr.rel (!%p18_p10) target bundleno = 4 (0x4), region = 148 }
 0x6e3   :  { %8093 = vsyncpa [#allocation7], 1 }
 0x6e4   :  { %8095 = vsyncpa [#allocation7 + $0x1], 1 }
 0x6e5   :  { %8096 = vsyncpa [#allocation9], 1 }
 0x6e6   :  { %8097 = vsyncpa [#allocation12], 1 }
 0x6e7   :  { %8098 = vsyncpa [#allocation15], 1 }

</bundles_post_ra>
